<compile_context>
chip_gen: v7x
topology: tpu7x:2x2x1
jax: 0.10.0
libtpu: 0.0.40
codegen_flags: <defaults>
</compile_context>

<pallas_src>
import functools

import jax
import jax.numpy as jnp
from jax.experimental import pallas as pl
from jax.experimental.pallas import tpu as pltpu


# ----------------------------------------------------------------------------
# helpers
# ----------------------------------------------------------------------------
def _round_up(n, m):
    return ((n + m - 1) // m) * m


def _pick_tb(b):
    """Batch-tile size: multiple of 128, capped at 512 (v7x VMEM-safe)."""
    b = max(int(b), 1)
    if b >= 512:
        return 512
    return _round_up(b, 128)


def _pad_transpose(x2d, b_pad):
    """[B, D] float -> [D, B_pad] bf16 (batch on the lane axis, zero-padded)."""
    B, D = x2d.shape
    xt = jnp.zeros((D, b_pad), jnp.bfloat16)
    return xt.at[:, :B].set(x2d.astype(jnp.bfloat16).T)


def _nbytes(*arrays):
    return int(sum(int(a.size) * a.dtype.itemsize for a in arrays))


# ----------------------------------------------------------------------------
# kernels
# ----------------------------------------------------------------------------
def _mlp3_kernel(x_ref, w0_ref, b0_ref, w1_ref, b1_ref, w2_ref, b2_ref, o_ref,
                 *, apply_sigmoid):
    """3-layer MLP in feature-major layout.

    x_ref : [D_in, TB]  bf16        w0 : [H0, D_in] bf16   b0 : [H0, 1] f32
    w1    : [H1, H0]    bf16        b1 : [H1, 1]    f32
    w2    : [H1, 1]     f32 (col)   b2 : (1,1) f32 scalar in SMEM
    o_ref : [1, TB]     f32  (lane-dense scores)
    """
    h0 = jnp.dot(w0_ref[...], x_ref[...],
                 preferred_element_type=jnp.float32) + b0_ref[...]
    h0 = jnp.maximum(h0, 0.0).astype(jnp.bfloat16)

    h1 = jnp.dot(w1_ref[...], h0,
                 preferred_element_type=jnp.float32) + b1_ref[...]
    h1 = jnp.maximum(h1, 0.0)

    # Final 1-wide layer: VPU multiply + sublane reduce (keeps the MXU free).
    z = jnp.sum(h1 * w2_ref[...], axis=0, keepdims=True) + b2_ref[0, 0]
    if apply_sigmoid:
        z = jax.nn.sigmoid(z)
    o_ref[...] = z


def _global_kernel(y_ref, m_ref, wc0_ref, bc0_ref, wc1_ref, bc1_ref,
                   wl0y_ref, wl0h_ref, bl0_ref, wl1_ref, bl1_ref,
                   wl2_ref, bl2_ref, o_ref):
    """GlobalDiscriminator: conv head on M, concat with y (via split l0
    weights -> no in-kernel concat), then 3-layer MLP. Feature-major layout.
    """
    # c0 (relu) / c1 (no relu) -- 1x1 convs == per-sample linears
    h = jnp.dot(wc0_ref[...], m_ref[...],
                preferred_element_type=jnp.float32) + bc0_ref[...]
    h = jnp.maximum(h, 0.0).astype(jnp.bfloat16)
    h = jnp.dot(wc1_ref[...], h,
                preferred_element_type=jnp.float32) + bc1_ref[...]
    h = h.astype(jnp.bfloat16)

    # l0 over cat(y, conv_features): split-weight formulation
    h0 = (jnp.dot(wl0y_ref[...], y_ref[...],
                  preferred_element_type=jnp.float32)
          + jnp.dot(wl0h_ref[...], h, preferred_element_type=jnp.float32)
          + bl0_ref[...])
    h0 = jnp.maximum(h0, 0.0).astype(jnp.bfloat16)

    h1 = jnp.dot(wl1_ref[...], h0,
                 preferred_element_type=jnp.float32) + bl1_ref[...]
    h1 = jnp.maximum(h1, 0.0)

    z = jnp.sum(h1 * wl2_ref[...], axis=0, keepdims=True) + bl2_ref[0, 0]
    o_ref[...] = z


# ----------------------------------------------------------------------------
# pallas_call wrappers
# ----------------------------------------------------------------------------
def _run_mlp3(x2d, p, *, apply_sigmoid):
    """x2d: [B, D_in] float -> [B] f32 scores (sigmoid-ed if requested)."""
    B, D = x2d.shape
    TB = _pick_tb(B)
    B_pad = _round_up(B, TB)
    xt = _pad_transpose(x2d, B_pad)

    flops = 2 * B_pad * (int(p["w0"].size) + int(p["w1"].size)
                         + int(p["w2"].size))
    cost = pl.CostEstimate(
        flops=int(flops),
        transcendentals=int(B_pad if apply_sigmoid else 0),
        bytes_accessed=_nbytes(xt, p["w0"], p["b0"], p["w1"], p["b1"],
                               p["w2"], p["b2"]) + 4 * B_pad)

    out = pl.pallas_call(
        functools.partial(_mlp3_kernel, apply_sigmoid=apply_sigmoid),
        out_shape=jax.ShapeDtypeStruct((1, B_pad), jnp.float32),
        grid=(B_pad // TB,),
        in_specs=[
            pl.BlockSpec((D, TB), lambda i: (0, i)),          # batch-tiled x
            pl.BlockSpec(p["w0"].shape, lambda i: (0, 0)),    # VMEM-resident
            pl.BlockSpec(p["b0"].shape, lambda i: (0, 0)),
            pl.BlockSpec(p["w1"].shape, lambda i: (0, 0)),
            pl.BlockSpec(p["b1"].shape, lambda i: (0, 0)),
            pl.BlockSpec(p["w2"].shape, lambda i: (0, 0)),
            pl.BlockSpec(memory_space=pltpu.MemorySpace.SMEM),  # scalar b2
        ],
        out_specs=pl.BlockSpec((1, TB), lambda i: (0, i)),    # lane-dense
        compiler_params=pltpu.CompilerParams(
            dimension_semantics=("parallel",)),
        cost_estimate=cost,
    )(xt, p["w0"], p["b0"], p["w1"], p["b1"], p["w2"], p["b2"])
    return out[0, :B]


def _run_global(y2d, m2d, p):
    """y2d: [B,128], m2d: [B,2048] -> [B] f32 scores."""
    B = y2d.shape[0]
    TB = _pick_tb(B)
    B_pad = _round_up(B, TB)
    yt = _pad_transpose(y2d, B_pad)
    mt = _pad_transpose(m2d, B_pad)

    flops = 2 * B_pad * (int(p["wc0"].size) + int(p["wc1"].size)
                         + int(p["wl0y"].size) + int(p["wl0h"].size)
                         + int(p["wl1"].size) + int(p["wl2"].size))
    cost = pl.CostEstimate(
        flops=int(flops), transcendentals=0,
        bytes_accessed=_nbytes(yt, mt, *[p[k] for k in
                                         ("wc0", "bc0", "wc1", "bc1", "wl0y",
                                          "wl0h", "bl0", "wl1", "bl1", "wl2",
                                          "bl2")]) + 4 * B_pad)

    out = pl.pallas_call(
        _global_kernel,
        out_shape=jax.ShapeDtypeStruct((1, B_pad), jnp.float32),
        grid=(B_pad // TB,),
        in_specs=[
            pl.BlockSpec((128, TB), lambda i: (0, i)),
            pl.BlockSpec((2048, TB), lambda i: (0, i)),
            pl.BlockSpec(p["wc0"].shape, lambda i: (0, 0)),
            pl.BlockSpec(p["bc0"].shape, lambda i: (0, 0)),
            pl.BlockSpec(p["wc1"].shape, lambda i: (0, 0)),
            pl.BlockSpec(p["bc1"].shape, lambda i: (0, 0)),
            pl.BlockSpec(p["wl0y"].shape, lambda i: (0, 0)),
            pl.BlockSpec(p["wl0h"].shape, lambda i: (0, 0)),
            pl.BlockSpec(p["bl0"].shape, lambda i: (0, 0)),
            pl.BlockSpec(p["wl1"].shape, lambda i: (0, 0)),
            pl.BlockSpec(p["bl1"].shape, lambda i: (0, 0)),
            pl.BlockSpec(p["wl2"].shape, lambda i: (0, 0)),
            pl.BlockSpec(memory_space=pltpu.MemorySpace.SMEM),  # scalar bl2
        ],
        out_specs=pl.BlockSpec((1, TB), lambda i: (0, i)),
        compiler_params=pltpu.CompilerParams(
            dimension_semantics=("parallel",)),
        cost_estimate=cost,
    )(yt, mt, p["wc0"], p["bc0"], p["wc1"], p["bc1"], p["wl0y"], p["wl0h"],
      p["bl0"], p["wl1"], p["bl1"], p["wl2"], p["bl2"])
    return out[0, :B]


# ----------------------------------------------------------------------------
# DeepInfoMaxLoss forward
# ----------------------------------------------------------------------------
def deep_infomax_loss(y, M, M_prime, params, rng_key,
                      alpha=0.5, beta=1.0, gamma=0.1):
    B = y.shape[0]
    m_flat = M.reshape(B, -1)          # [B, 2048] (1x1 spatial)
    mp_flat = M_prime.reshape(B, -1)

    # ---- local discriminator on cat(M, y) / cat(M', y), batched together ----
    x_local = jnp.concatenate(
        [jnp.concatenate([m_flat, y], axis=1),
         jnp.concatenate([mp_flat, y], axis=1)], axis=0)       # [2B, 2176]
    l_scores = _run_mlp3(x_local, params["local_d"], apply_sigmoid=False)
    lj, lm = l_scores[:B], l_scores[B:]
    Ej = -jax.nn.softplus(-lj).mean()
    Em = jax.nn.softplus(lm).mean()
    LOCAL = (Em - Ej) * beta

    # ---- global discriminator (both M and M' in one call) ----
    y2 = jnp.concatenate([y, y], axis=0)
    m2 = jnp.concatenate([m_flat, mp_flat], axis=0)
    g_scores = _run_global(y2, m2, params["global_d"])
    gj, gm = g_scores[:B], g_scores[B:]
    Ej = -jax.nn.softplus(-gj).mean()
    Em = jax.nn.softplus(gm).mean()
    GLOBAL = (Em - Ej) * alpha

    # ---- prior discriminator ----
    prior = jax.random.uniform(rng_key, y.shape, jnp.float32)
    p_out = _run_mlp3(jnp.concatenate([prior, y], axis=0),
                      params["prior_d"], apply_sigmoid=True)   # [2B]
    term_a = jnp.log(p_out[:B]).mean()
    term_b = jnp.log(1.0 - p_out[B:]).mean()
    PRIOR = -(term_a + term_b) * gamma

    return LOCAL + GLOBAL + PRIOR


# ----------------------------------------------------------------------------
# parameter init (PyTorch default: uniform +-1/sqrt(fan_in); weights [out,in])
# ----------------------------------------------------------------------------
def init_params(key):
    def lin(k, fan_in, fan_out, dtype=jnp.bfloat16):
        kw, kb = jax.random.split(k)
        bound = 1.0 / float(fan_in) ** 0.5
        w = jax.random.uniform(kw, (fan_out, fan_in), jnp.float32, -bound, bound)
        b = jax.random.uniform(kb, (fan_out, 1), jnp.float32, -bound, bound)
        return w.astype(dtype), b

    (kl0, kl1, kl2, kg0, kg1, kg2, kg3, kg4,
     kp0, kp1, kp2) = jax.random.split(key, 11)

    # LocalDiscriminator (1x1 convs; input channel order = cat(M, y))
    wc0, bc0 = lin(kl0, 2176, 512)
    wc1, bc1 = lin(kl1, 512, 512)
    wc2, bc2 = lin(kl2, 512, 1, dtype=jnp.float32)
    local_d = dict(w0=wc0, b0=bc0, w1=wc1, b1=bc1, w2=wc2.T, b2=bc2)

    # GlobalDiscriminator (conv head + linears; l0 split into y / conv parts)
    gc0, gbc0 = lin(kg0, 2048, 64)
    gc1, gbc1 = lin(kg1, 64, 32)
    gl0, gbl0 = lin(kg2, 160, 512)        # cat(y[128], conv[32])
    gl1, gbl1 = lin(kg3, 512, 512)
    gl2, gbl2 = lin(kg4, 512, 1, dtype=jnp.float32)
    global_d = dict(wc0=gc0, bc0=gbc0, wc1=gc1, bc1=gbc1,
                    wl0y=gl0[:, :128], wl0h=gl0[:, 128:], bl0=gbl0,
                    wl1=gl1, bl1=gbl1, wl2=gl2.T, bl2=gbl2)

    # PriorDiscriminator, zero-padded 1000->1024 and 200->256 (exact)
    pw0, pb0 = lin(kp0, 128, 1000)
    pw1, pb1 = lin(kp1, 1000, 200)
    pw2, pb2 = lin(kp2, 200, 1, dtype=jnp.float32)
    w0p = jnp.zeros((1024, 128), jnp.bfloat16).at[:1000, :].set(pw0)
    b0p = jnp.zeros((1024, 1), jnp.float32).at[:1000, :].set(pb0)
    w1p = jnp.zeros((256, 1024), jnp.bfloat16).at[:200, :1000].set(pw1)
    b1p = jnp.zeros((256, 1), jnp.float32).at[:200, :].set(pb1)
    w2p = jnp.zeros((256, 1), jnp.float32).at[:200, :].set(pw2.T)
    prior_d = dict(w0=w0p, b0=b0p, w1=w1p, b1=b1p, w2=w2p, b2=pb2)

    return dict(local_d=local_d, global_d=global_d, prior_d=prior_d)


# ----------------------------------------------------------------------------
# pure-JAX reference (mirrors the kernels' bf16 rounding points exactly)
# ----------------------------------------------------------------------------
def _ref_mlp3(x2d, p, *, apply_sigmoid):
    f32 = jnp.float32
    x = x2d.astype(jnp.bfloat16).astype(f32)
    h0 = jax.nn.relu(x @ p["w0"].astype(f32).T + p["b0"][:, 0])
    h0 = h0.astype(jnp.bfloat16).astype(f32)
    h1 = jax.nn.relu(h0 @ p["w1"].astype(f32).T + p["b1"][:, 0])
    z = jnp.sum(h1 * p["w2"][:, 0][None, :], axis=1) + p["b2"][0, 0]
    return jax.nn.sigmoid(z) if apply_sigmoid else z


def _ref_global(y2d, m2d, p):
    f32 = jnp.float32
    yv = y2d.astype(jnp.bfloat16).astype(f32)
    mv = m2d.astype(jnp.bfloat16).astype(f32)
    h = jax.nn.relu(mv @ p["wc0"].astype(f32).T + p["bc0"][:, 0])
    h = h.astype(jnp.bfloat16).astype(f32)
    h = h @ p["wc1"].astype(f32).T + p["bc1"][:, 0]
    h = h.astype(jnp.bfloat16).astype(f32)
    h0 = jax.nn.relu(yv @ p["wl0y"].astype(f32).T
                     + h @ p["wl0h"].astype(f32).T + p["bl0"][:, 0])
    h0 = h0.astype(jnp.bfloat16).astype(f32)
    h1 = jax.nn.relu(h0 @ p["wl1"].astype(f32).T + p["bl1"][:, 0])
    return jnp.sum(h1 * p["wl2"][:, 0][None, :], axis=1) + p["bl2"][0, 0]


def reference_loss(y, M, M_prime, params, rng_key,
                   alpha=0.5, beta=1.0, gamma=0.1):
    B = y.shape[0]
    m_flat = M.reshape(B, -1)
    mp_flat = M_prime.reshape(B, -1)

    lj = _ref_mlp3(jnp.concatenate([m_flat, y], axis=1),
                   params["local_d"], apply_sigmoid=False)
    lm = _ref_mlp3(jnp.concatenate([mp_flat, y], axis=1),
                   params["local_d"], apply_sigmoid=False)
    LOCAL = (jax.nn.softplus(lm).mean()
             - (-jax.nn.softplus(-lj).mean())) * beta

    gj = _ref_global(y, m_flat, params["global_d"])
    gm = _ref_global(y, mp_flat, params["global_d"])
    GLOBAL = (jax.nn.softplus(gm).mean()
              - (-jax.nn.softplus(-gj).mean())) * alpha

    prior = jax.random.uniform(rng_key, y.shape, jnp.float32)
    pa = _ref_mlp3(prior, params["prior_d"], apply_sigmoid=True)
    pb = _ref_mlp3(y, params["prior_d"], apply_sigmoid=True)
    PRIOR = -(jnp.log(pa).mean() + jnp.log(1.0 - pb).mean()) * gamma
    return LOCAL + GLOBAL + PRIOR


# ----------------------------------------------------------------------------
if __name__ == "__main__":
    key = jax.random.PRNGKey(0)
    kp, ky, km, kmp, kprior = jax.random.split(key, 5)

    params = init_params(kp)

    B = 4  # shapes below are forced by the module: y dim 128, M = [B,2048,1,1]
    y = jax.random.normal(ky, (B, 128), jnp.float32)
    M = jax.random.normal(km, (B, 2048, 1, 1), jnp.float32)
    M_prime = jax.random.normal(kmp, (B, 2048, 1, 1), jnp.float32)

    loss = deep_infomax_loss(y, M, M_prime, params, kprior)
    loss = jax.block_until_ready(loss)

    ref = reference_loss(y, M, M_prime, params, kprior)
    ref = jax.block_until_ready(ref)

    assert jnp.isfinite(loss), loss
    assert jnp.allclose(loss, ref, atol=2e-3, rtol=2e-3), (loss, ref)

    print("KERNEL_OK")
</pallas_src>

<mosaic_0001>
module attributes {stable_mosaic.version = 11 : i64} {
  func.func @_mlp3_kernel(%arg0: i32, %arg1: memref<2176x128xbf16, #tpu.memory_space<vmem>>, %arg2: memref<512x2176xbf16, #tpu.memory_space<vmem>>, %arg3: memref<512x1xf32, #tpu.memory_space<vmem>>, %arg4: memref<512x512xbf16, #tpu.memory_space<vmem>>, %arg5: memref<512x1xf32, #tpu.memory_space<vmem>>, %arg6: memref<512x1xf32, #tpu.memory_space<vmem>>, %arg7: memref<1x1xf32, #tpu.memory_space<smem>>, %arg8: memref<1x128xf32, #tpu.memory_space<vmem>>) attributes {dimension_semantics = [#tpu.dimension_semantics<parallel>], iteration_bounds = array<i64: 1>, scalar_prefetch = 0 : i64, scratch_operands = 0 : i64, tpu.core_type = #tpu.core_type<tc>, window_params = [{transform_indices = @transform_0, window_bounds = array<i64: 2176, 128>}, {pipeline_mode = #tpu.pipeline_mode<synchronous>, transform_indices = @transform_1, window_bounds = array<i64: 512, 2176>}, {pipeline_mode = #tpu.pipeline_mode<synchronous>, transform_indices = @transform_2, window_bounds = array<i64: 512, 1>}, {pipeline_mode = #tpu.pipeline_mode<synchronous>, transform_indices = @transform_3, window_bounds = array<i64: 512, 512>}, {pipeline_mode = #tpu.pipeline_mode<synchronous>, transform_indices = @transform_4, window_bounds = array<i64: 512, 1>}, {pipeline_mode = #tpu.pipeline_mode<synchronous>, transform_indices = @transform_5, window_bounds = array<i64: 512, 1>}, {transform_indices = @transform_6, window_bounds = array<i64: 1, 1>}, {transform_indices = @transform_7, window_bounds = array<i64: 1, 128>}]} {
    %c0 = arith.constant 0 : index
    %c0_0 = arith.constant 0 : index
    %0 = vector.load %arg2[%c0, %c0_0] : memref<512x2176xbf16, #tpu.memory_space<vmem>>, vector<512x2176xbf16>
    %c0_1 = arith.constant 0 : index
    %c0_2 = arith.constant 0 : index
    %1 = vector.load %arg1[%c0_1, %c0_2] : memref<2176x128xbf16, #tpu.memory_space<vmem>>, vector<2176x128xbf16>
    %cst = arith.constant dense<0.000000e+00> : vector<512x128xf32>
    %2 = tpu.matmul %0, %1, %cst {dimension_numbers = #tpu.dot_dimension_numbers<[1], [0], [0], [1], [0, 0, 1, 1], [], []>} : vector<512x2176xbf16>, vector<2176x128xbf16>, vector<512x128xf32> -> vector<512x128xf32>
    %c0_3 = arith.constant 0 : index
    %c0_4 = arith.constant 0 : index
    %3 = vector.load %arg3[%c0_3, %c0_4] : memref<512x1xf32, #tpu.memory_space<vmem>>, vector<512x1xf32>
    %4 = vector.broadcast %3 : vector<512x1xf32> to vector<512x128xf32>
    %5 = arith.addf %2, %4 : vector<512x128xf32>
    %cst_5 = arith.constant 0.000000e+00 : f32
    %6 = vector.broadcast %cst_5 : f32 to vector<512x128xf32>
    %7 = arith.maximumf %5, %6 : vector<512x128xf32>
    %8 = arith.truncf %7 : vector<512x128xf32> to vector<512x128xbf16>
    %c0_6 = arith.constant 0 : index
    %c0_7 = arith.constant 0 : index
    %9 = vector.load %arg4[%c0_6, %c0_7] : memref<512x512xbf16, #tpu.memory_space<vmem>>, vector<512x512xbf16>
    %cst_8 = arith.constant dense<0.000000e+00> : vector<512x128xf32>
    %10 = tpu.matmul %9, %8, %cst_8 {dimension_numbers = #tpu.dot_dimension_numbers<[1], [0], [0], [1], [0, 0, 1, 1], [], []>} : vector<512x512xbf16>, vector<512x128xbf16>, vector<512x128xf32> -> vector<512x128xf32>
    %c0_9 = arith.constant 0 : index
    %c0_10 = arith.constant 0 : index
    %11 = vector.load %arg5[%c0_9, %c0_10] : memref<512x1xf32, #tpu.memory_space<vmem>>, vector<512x1xf32>
    %12 = vector.broadcast %11 : vector<512x1xf32> to vector<512x128xf32>
    %13 = arith.addf %10, %12 : vector<512x128xf32>
    %cst_11 = arith.constant 0.000000e+00 : f32
    %14 = vector.broadcast %cst_11 : f32 to vector<512x128xf32>
    %15 = arith.maximumf %13, %14 : vector<512x128xf32>
    %c0_12 = arith.constant 0 : index
    %c0_13 = arith.constant 0 : index
    %16 = vector.load %arg6[%c0_12, %c0_13] : memref<512x1xf32, #tpu.memory_space<vmem>>, vector<512x1xf32>
    %17 = vector.broadcast %16 : vector<512x1xf32> to vector<512x128xf32>
    %18 = arith.mulf %15, %17 : vector<512x128xf32>
    %cst_14 = arith.constant dense<0.000000e+00> : vector<128xf32>
    %19 = vector.multi_reduction <add>, %18, %cst_14 [0] : vector<512x128xf32> to vector<128xf32>
    %20 = vector.shape_cast %19 : vector<128xf32> to vector<1x128xf32>
    %c0_15 = arith.constant 0 : index
    %c0_16 = arith.constant 0 : index
    %21 = memref.load %arg7[%c0_15, %c0_16] : memref<1x1xf32, #tpu.memory_space<smem>>
    %22 = vector.broadcast %21 : f32 to vector<1x128xf32>
    %23 = arith.addf %20, %22 : vector<1x128xf32>
    %c0_17 = arith.constant 0 : index
    %c0_18 = arith.constant 0 : index
    %24 = vector.load %arg8[%c0_17, %c0_18] : memref<1x128xf32, #tpu.memory_space<vmem>>, vector<1x128xf32>
    tpu.vector_store %arg8[%c0_17, %c0_18], %23 {strides = array<i32>} : memref<1x128xf32, #tpu.memory_space<vmem>>, vector<1x128xf32>,
    return
  }
  func.func @transform_0(%arg0: i32) -> (i32, i32) {
    %c0_i32 = arith.constant 0 : i32
    %c0_i32_0 = arith.constant 0 : i32
    return %c0_i32, %arg0 : i32, i32
  }
  func.func @transform_1(%arg0: i32) -> (i32, i32) {
    %c0_i32 = arith.constant 0 : i32
    %c0_i32_0 = arith.constant 0 : i32
    %c0_i32_1 = arith.constant 0 : i32
    return %c0_i32, %c0_i32_0 : i32, i32
  }
  func.func @transform_2(%arg0: i32) -> (i32, i32) {
    %c0_i32 = arith.constant 0 : i32
    %c0_i32_0 = arith.constant 0 : i32
    %c0_i32_1 = arith.constant 0 : i32
    return %c0_i32, %c0_i32_0 : i32, i32
  }
  func.func @transform_3(%arg0: i32) -> (i32, i32) {
    %c0_i32 = arith.constant 0 : i32
    %c0_i32_0 = arith.constant 0 : i32
    %c0_i32_1 = arith.constant 0 : i32
    return %c0_i32, %c0_i32_0 : i32, i32
  }
  func.func @transform_4(%arg0: i32) -> (i32, i32) {
    %c0_i32 = arith.constant 0 : i32
    %c0_i32_0 = arith.constant 0 : i32
    %c0_i32_1 = arith.constant 0 : i32
    return %c0_i32, %c0_i32_0 : i32, i32
  }
  func.func @transform_5(%arg0: i32) -> (i32, i32) {
    %c0_i32 = arith.constant 0 : i32
    %c0_i32_0 = arith.constant 0 : i32
    %c0_i32_1 = arith.constant 0 : i32
    return %c0_i32, %c0_i32_0 : i32, i32
  }
  func.func @transform_6(%arg0: i32) -> (i32, i32) {
    %c0_i32 = arith.constant 0 : i32
    %c0_i32_0 = arith.constant 0 : i32
    %c0_i32_1 = arith.constant 0 : i32
    return %c0_i32, %c0_i32_0 : i32, i32
  }
  func.func @transform_7(%arg0: i32) -> (i32, i32) {
    %c0_i32 = arith.constant 0 : i32
    %c0_i32_0 = arith.constant 0 : i32
    return %c0_i32, %arg0 : i32, i32
  }
}

</mosaic_0001>

<bundles_post_ra>
// kernel: tpu_custom_call.1
= control target key start
LH: loop header
LB: loop body
LE: loop exit
PB: predicated region body
PF: predicated region fallthrough
CT: control target
= control target key end

     0   :  { %13 = vsyncpa [#allocation4], 0  ;;  %s14821_s0 = inlined_call_operand.hbm [shape: bf16[2176,128], index: 0, kind: input, shape index: {}]   ;;  %s14822_s1 = inlined_call_operand.hbm [shape: bf16[512,2176], index: 1, kind: input, shape index: {}]   ;;  %s14823_s2 = inlined_call_operand.vmem [shape: f32[512,1], index: 2, kind: input, shape index: {}]   ;;  %s14824_s3 = inlined_call_operand.hbm [shape: bf16[512,512], index: 3, kind: input, shape index: {}]   ;;  %s14825_s4 = inlined_call_operand.vmem [shape: f32[512,1], index: 4, kind: input, shape index: {}]   ;;  %s14826_s5 = inlined_call_operand.vmem [shape: f32[512,1], index: 5, kind: input, shape index: {}]   ;;  %s14827_s6 = inlined_call_operand.<no memory space> [shape: f32[1,1], index: 6, kind: input, shape index: {}]   ;;  %s14828_s7 = inlined_call_operand.hbm [shape: f32[1,128], index: 7, kind: output, shape index: {}]  }
   0x1   :  { %14 = vsyncpa [#allocation7], 0 }
   0x2   :  { %15 = vsyncpa [#allocation5], 0  ;;  %s13197_s24 = smov [#allocation6]   ;;  %s13103_s28 = scalar_lea.hbm %s14822_s1, 69632 }
   0x3   :  { %s33_s25 = sshll.u32 %s13197_s24, 4  ;;  %p13104_p0 = scmp.ne.s32.totalorder %s14822_s1, %s13103_s28  ;;  %s34_s25 = int_to_ptr.vmem [resolvable:$true] %s33_s25 }
   0x4   :  { %p13107_p1 = scmp.lt.u32.totalorder %s13103_s28, %s14822_s1 }
   0x6   :  { %p13109_p2 = pnand %p13107_p1, %p13104_p0 }
   0x8   :  { %13112 = shalt.err (!%p13109_p2)
}
   0x9   :  { %s13113_s10 = scalar_lea.vmem %s34_s25, 69632  ;;  %p13118_p4 = scmp.lt.s32.totalorder %s34_s25, %s34_s25 }
   0xa   :  { %p13114_p3 = scmp.ne.s32.totalorder %s34_s25, %s13113_s10  ;;  %p13119_p5 = scmp.lt.s32.totalorder %s13113_s10, %s13113_s10 }
   0xc   :  { %p13120_p6 = por %p13119_p5, %p13118_p4 }
   0xe   :  { %p13121_p7 = pnand %p13120_p6, %p13114_p3 }
  0x10   :  { %13124 = shalt.err (!%p13121_p7)
}
  0x11   :  { %s13198_s11 = smov 1088   ;;  %s13199_s12 = smov 68  }
  0x12   :  { %39 = dma.hbm_to_vmem [thread:$0]  %s14822_s1, 69632, %s34_s25, [#allocation7], %s13198_s11, %s13198_s11, %s13199_s12  }
  0x13   :  { %s13200_s15 = smov [#allocation3]   ;;  %s13125_s19 = scalar_lea.hbm %s14821_s0, 17408 }
  0x14   :  { %s21_s16 = sshll.u32 %s13200_s15, 4  ;;  %p13126_p8 = scmp.ne.s32.totalorder %s14821_s0, %s13125_s19  ;;  %s22_s16 = int_to_ptr.vmem [resolvable:$true] %s21_s16 }
  0x15   :  { %p13129_p9 = scmp.lt.u32.totalorder %s13125_s19, %s14821_s0 }
  0x17   :  { %p13131_p10 = pnand %p13129_p9, %p13126_p8 }
  0x19   :  { %13134 = shalt.err (!%p13131_p10)
}
  0x1a   :  { %s13135_s24 = scalar_lea.vmem %s22_s16, 17408  ;;  %p13140_p12 = scmp.lt.s32.totalorder %s22_s16, %s22_s16 }
  0x1b   :  { %p13136_p11 = scmp.ne.s32.totalorder %s22_s16, %s13135_s24  ;;  %p13141_p13 = scmp.lt.s32.totalorder %s13135_s24, %s13135_s24 }
  0x1d   :  { %p13142_p0 = por %p13141_p13, %p13140_p12 }
  0x1f   :  { %p13143_p1 = pnand %p13142_p0, %p13136_p11 }
  0x21   :  { %13146 = shalt.err (!%p13143_p1)
}
  0x22   :  { %s13201_s1 = smov 64   ;;  %s13202_s25 = smov 4  }
  0x23   :  { %27 = dma.hbm_to_vmem [thread:$0]  %s14821_s0, 17408, %s22_s16, [#allocation4], %s13201_s1, %s13201_s1, %s13202_s25  }
  0x24   :  { %s13203_s28 = smov [#allocation8]   ;;  %s13147_s9 = scalar_lea.hbm %s14824_s3, 16384 }
  0x25   :  { %s47_s29 = sshll.u32 %s13203_s28, 4  ;;  %p13148_p2 = scmp.ne.s32.totalorder %s14824_s3, %s13147_s9  ;;  %s48_s29 = int_to_ptr.vmem [resolvable:$true] %s47_s29 }
  0x26   :  { %p13151_p3 = scmp.lt.u32.totalorder %s13147_s9, %s14824_s3 }
  0x28   :  { %p13153_p4 = pnand %p13151_p3, %p13148_p2 }
  0x2a   :  { %13156 = shalt.err (!%p13153_p4)
}
  0x2b   :  { %s13157_s14 = scalar_lea.vmem %s48_s29, 16384  ;;  %p13162_p6 = scmp.lt.s32.totalorder %s48_s29, %s48_s29 }
  0x2c   :  { %p13158_p5 = scmp.ne.s32.totalorder %s48_s29, %s13157_s14  ;;  %p13163_p7 = scmp.lt.s32.totalorder %s13157_s14, %s13157_s14 }
  0x2e   :  { %p13164_p8 = por %p13163_p7, %p13162_p6 }
  0x30   :  { %p13165_p9 = pnand %p13164_p8, %p13158_p5 }
  0x32   :  { %13168 = shalt.err (!%p13165_p9)
}
  0x33   :  { %s13204_s0 = smov 256   ;;  %s13205_s15 = smov 16  }
  0x34   :  { %53 = dma.hbm_to_vmem [thread:$0]  %s14824_s3, 16384, %s48_s29, [#allocation7], %s13204_s0, %s13204_s0, %s13205_s15  }
  0x35   :  { %13191 = dma.done.wait [#allocation4], 17408  }
  0x36   :  { %13192 = vsyncadd [#allocation4], 4294949888 }
  0x37   :  { %13193 = dma.done.wait [#allocation7], 86016  }
  0x38   :  { %13194 = vsyncadd [#allocation7], 4294881280  ;;  %v14829_v0 = vmov 0   ;;  %v11959_v1 = vld [vmem:[#allocation3] sm:$0xff]   ;;  %v11961_v3 = vld [vmem:[#allocation3 + $0x8] sm:$0xff]   ;;  %s13207_s23 = smov [#allocation9]  }
  0x39   :  { %4870 = vmatprep.subr.bf16.mxu1 %v14829_v0  ;;  %5448 = vmatprep.subr.bf16.mxu0 %v14829_v0  ;;  %v11960_v2 = vld [vmem:[#allocation3 + $0x100] sm:$0xff]   ;;  %v11962_v4 = vld [vmem:[#allocation3 + $0x108] sm:$0xff]   ;;  %v11963_v5 = vld [vmem:[#allocation3 + $0x10] sm:$0xff]   ;;  %s9888_s24 = sshll.u32 %s13207_s23, 4  ;;  %s9889_s24 = int_to_ptr.vmem [resolvable:$true] %s9888_s24 }
  0x3a   :  { %11957 = vset.pattern.permute.xlu0 %v14829_v0  ;;  %11958 = vset.pattern.permute.xlu1 %v14829_v0  ;;  %v11964_v6 = vld [vmem:[#allocation3 + $0x110] sm:$0xff]   ;;  %v11965_v7 = vld [vmem:[#allocation3 + $0x18] sm:$0xff]   ;;  %v11967_v9 = vld [vmem:[#allocation3 + $0x20] sm:$0xff]   ;;  %s13169_s1 = scalar_lea.vmem %s9889_s24, 16  ;;  %s13173_s25 = scalar_lea.vmem %s9889_s24, 32 }
  0x3b   :  { %4871 = vmatpush1.bf16.msra.mxu1 %v11959_v1  ;;  %5449 = vmatpush1.bf16.msra.mxu0 %v11960_v2  ;;  %v11966_v8 = vld [vmem:[#allocation3 + $0x118] sm:$0xff]   ;;  %v11968_v10 = vld [vmem:[#allocation3 + $0x120] sm:$0xff]   ;;  %v11969_v11 = vld [vmem:[#allocation3 + $0x28] sm:$0xff]   ;;  %p13170_p10 = scmp.ne.s32.totalorder %s9889_s24, %s13169_s1  ;;  %p13174_p11 = scmp.lt.s32.totalorder %s9889_s24, %s9889_s24 }
  0x3c   :  { %4872 = vmatprep.subr.bf16.mxu1 %v14829_v0  ;;  %5450 = vmatprep.subr.bf16.mxu0 %v14829_v0  ;;  %v11970_v12 = vld [vmem:[#allocation3 + $0x128] sm:$0xff]   ;;  %v11971_v13 = vld [vmem:[#allocation3 + $0x30] sm:$0xff]   ;;  %v11973_v15 = vld [vmem:[#allocation3 + $0x38] sm:$0xff]   ;;  %p13175_p12 = scmp.lt.s32.totalorder %s13173_s25, %s13169_s1 }
  0x3d   :  { %v11972_v14 = vld [vmem:[#allocation3 + $0x130] sm:$0xff]   ;;  %v11974_v16 = vld [vmem:[#allocation3 + $0x138] sm:$0xff]   ;;  %v11975_v17 = vld [vmem:[#allocation3 + $0x40] sm:$0xff]  }
  0x3e   :  { %v11976_v18 = vld [vmem:[#allocation3 + $0x140] sm:$0xff]   ;;  %v11977_v20 = vld [vmem:[#allocation3 + $0x48] sm:$0xff]   ;;  %v11996_v21 = vld [vmem:[#allocation6 + $0x14] ss:$68 sps:$4 sm:$0xff]   ;;  %p13176_p13 = por %p13175_p12, %p13174_p11 }
  0x3f   :  { %4873 = vmatpush1.bf16.msra.mxu1 %v11961_v3  ;;  %5451 = vmatpush1.bf16.msra.mxu0 %v11962_v4  ;;  %v11993_v19 = vld [vmem:[#allocation6 + $0x4] ss:$68 sps:$4 sm:$0xff]   ;;  %v11979_v23 = vld [vmem:[#allocation3 + $0x50] sm:$0xff]   ;;  %v11981_v25 = vld [vmem:[#allocation3 + $0x58] sm:$0xff]  }
  0x40   :  { %4874 = vmatprep.subr.bf16.mxu1 %v14829_v0  ;;  %5452 = vmatprep.subr.bf16.mxu0 %v14829_v0  ;;  %v11978_v22 = vld [vmem:[#allocation3 + $0x148] sm:$0xff]   ;;  %v11980_v24 = vld [vmem:[#allocation3 + $0x150] sm:$0xff]   ;;  %v11982_v26 = vld [vmem:[#allocation3 + $0x158] sm:$0xff]   ;;  %p13177_p0 = pnand %p13176_p13, %p13170_p10 }
  0x41   :  { %4902 = vmatprep.mubr.bf16.mxu1 %v11993_v19  ;;  %5480 = vmatprep.mubr.bf16.mxu0 %v11996_v21  ;;  %v11983_v27 = vld [vmem:[#allocation3 + $0x60] sm:$0xff]   ;;  %v11985_v29 = vld [vmem:[#allocation3 + $0x68] sm:$0xff]   ;;  %v11987_v31 = vld [vmem:[#allocation3 + $0x70] sm:$0xff]  }
  0x42   :  { %v11984_v28 = vld [vmem:[#allocation3 + $0x160] sm:$0xff]   ;;  %v11986_v30 = vld [vmem:[#allocation3 + $0x168] sm:$0xff]   ;;  %v11988_v32 = vld [vmem:[#allocation3 + $0x170] sm:$0xff]  }
  0x43   :  { %4875 = vmatpush1.bf16.msra.mxu1 %v11963_v5  ;;  %5453 = vmatpush1.bf16.msra.mxu0 %v11964_v6  ;;  %v11989_v33 = vld [vmem:[#allocation3 + $0x78] sm:$0xff]   ;;  %v11991_v35 = vld [vmem:[#allocation6] ss:$68 sps:$4 sm:$0xff]   ;;  %v11994_v36 = vld [vmem:[#allocation6 + $0x10] ss:$68 sps:$4 sm:$0xff]  }
  0x44   :  { %4876 = vmatprep.subr.bf16.mxu1 %v14829_v0  ;;  %5454 = vmatprep.subr.bf16.mxu0 %v14829_v0  ;;  %v11990_v34 = vld [vmem:[#allocation3 + $0x178] sm:$0xff]   ;;  %v11997_v37 = vld [vmem:[#allocation3 + $0x180] sm:$0xff]   ;;  %v11999_v38 = vld [vmem:[#allocation6 + $0x8c] ss:$68 sps:$4 sm:$0xff]  }
  0x45   :  { %v12001_v39 = vld [vmem:[#allocation6 + $0x9c] ss:$68 sps:$4 sm:$0xff]   ;;  %v11998_v40 = vld [vmem:[#allocation3 + $0x188] sm:$0xff]   ;;  %v12007_v43 = vld [vmem:[#allocation6 + $0x114] ss:$68 sps:$4 sm:$0xff]  }
  0x46   :  { %v12003_v41 = vld [vmem:[#allocation6 + $0x88] ss:$68 sps:$4 sm:$0xff]   ;;  %v12004_v42 = vld [vmem:[#allocation6 + $0x98] ss:$68 sps:$4 sm:$0xff]   ;;  %v12005_v44 = vld [vmem:[#allocation3 + $0x190] sm:$0xff]  }
  0x47   :  { %4877 = vmatpush1.bf16.msra.mxu1 %v11965_v7  ;;  %5455 = vmatpush1.bf16.msra.mxu0 %v11966_v8  ;;  %v12009_v45 = vld [vmem:[#allocation6 + $0x124] ss:$68 sps:$4 sm:$0xff]   ;;  %v12006_v46 = vld [vmem:[#allocation3 + $0x198] sm:$0xff]   ;;  %v12011_v47 = vld [vmem:[#allocation6 + $0x110] ss:$68 sps:$4 sm:$0xff]  }
  0x48   :  { %4878 = vmatprep.subr.bf16.mxu1 %v14829_v0  ;;  %5456 = vmatprep.subr.bf16.mxu0 %v14829_v0  ;;  %v12012_v48 = vld [vmem:[#allocation6 + $0x120] ss:$68 sps:$4 sm:$0xff]   ;;  %v12017_v51 = vld [vmem:[#allocation6 + $0x1ac] ss:$68 sps:$4 sm:$0xff]   ;;  %v12019_v53 = vld [vmem:[#allocation6 + $0x198] ss:$68 sps:$4 sm:$0xff]  }
  0x49   :  { %v12013_v49 = vld [vmem:[#allocation3 + $0x1a0] sm:$0xff]   ;;  %v12014_v52 = vld [vmem:[#allocation3 + $0x1a8] sm:$0xff]   ;;  %v12021_v56 = vld [vmem:[#allocation3 + $0x1b0] sm:$0xff]  }
  0x4a   :  { %v12015_v50 = vld [vmem:[#allocation6 + $0x19c] ss:$68 sps:$4 sm:$0xff]   ;;  %v12020_v54 = vld [vmem:[#allocation6 + $0x1a8] ss:$68 sps:$4 sm:$0xff]   ;;  %v12025_v57 = vld [vmem:[#allocation6 + $0x234] ss:$68 sps:$4 sm:$0xff]  }
  0x4b   :  { %4879 = vmatpush1.bf16.msra.mxu1 %v11967_v9  ;;  %5457 = vmatpush1.bf16.msra.mxu0 %v11968_v10  ;;  %v12023_v55 = vld [vmem:[#allocation6 + $0x224] ss:$68 sps:$4 sm:$0xff]   ;;  %v12022_v58 = vld [vmem:[#allocation3 + $0x1b8] sm:$0xff]   ;;  %v12028_v60 = vld [vmem:[#allocation6 + $0x230] ss:$68 sps:$4 sm:$0xff]  }
  0x4c   :  { %4880 = vmatprep.subr.bf16.mxu1 %v14829_v0  ;;  %5458 = vmatprep.subr.bf16.mxu0 %v14829_v0  ;;  %v12027_v59 = vld [vmem:[#allocation6 + $0x220] ss:$68 sps:$4 sm:$0xff]   ;;  %v12031_v62 = vld [vmem:[#allocation6 + $0x2ac] ss:$68 sps:$4 sm:$0xff]   ;;  %v12036_v3 = vld [vmem:[#allocation6 + $0x2b8] ss:$68 sps:$4 sm:$0xff]  }
  0x4d   :  { %v12029_v61 = vld [vmem:[#allocation3 + $0x1c0] sm:$0xff]   ;;  %v12030_v1 = vld [vmem:[#allocation3 + $0x1c8] sm:$0xff]   ;;  %v12039_v4 = vld [vmem:[#allocation6 + $0x334] ss:$68 sps:$4 sm:$0xff]  }
  0x4e   :  { %v12033_v63 = vld [vmem:[#allocation6 + $0x2bc] ss:$68 sps:$4 sm:$0xff]   ;;  %v12035_v2 = vld [vmem:[#allocation6 + $0x2a8] ss:$68 sps:$4 sm:$0xff]   ;;  %v12037_v5 = vld [vmem:[#allocation3 + $0x1d0] sm:$0xff]  }
  0x4f   :  { %4881 = vmatpush1.bf16.msra.mxu1 %v11969_v11  ;;  %5459 = vmatpush1.bf16.msra.mxu0 %v11970_v12  ;;  %v12041_v6 = vld [vmem:[#allocation6 + $0x344] ss:$68 sps:$4 sm:$0xff]   ;;  %v12038_v7 = vld [vmem:[#allocation3 + $0x1d8] sm:$0xff]   ;;  %v12043_v8 = vld [vmem:[#allocation6 + $0x330] ss:$68 sps:$4 sm:$0xff]  }
  0x50   :  { %4882 = vmatprep.subr.bf16.mxu1 %v14829_v0  ;;  %5460 = vmatprep.subr.bf16.mxu0 %v14829_v0  ;;  %v12044_v9 = vld [vmem:[#allocation6 + $0x340] ss:$68 sps:$4 sm:$0xff]   ;;  %v12049_v12 = vld [vmem:[#allocation6 + $0x3cc] ss:$68 sps:$4 sm:$0xff]   ;;  %v12054_v19 = vld [vmem:[#allocation3 + $0x1f8] sm:$0xff]  }
  0x51   :  { %v12045_v10 = vld [vmem:[#allocation3 + $0x1e0] sm:$0xff]   ;;  %v12057_v21 = vld [vmem:[#allocation6 + $0x18] ss:$68 sps:$4 sm:$0xff]  }
  0x52   :  { %v12047_v11 = vld [vmem:[#allocation6 + $0x3bc] ss:$68 sps:$4 sm:$0xff]  }
  0x53   :  { %4883 = vmatpush1.bf16.msra.mxu1 %v11971_v13  ;;  %5461 = vmatpush1.bf16.msra.mxu0 %v11972_v14  ;;  %v12046_v13 = vld [vmem:[#allocation3 + $0x1e8] sm:$0xff]   ;;  %v12051_v14 = vld [vmem:[#allocation6 + $0x3b8] ss:$68 sps:$4 sm:$0xff]  }
  0x54   :  { %4884 = vmatprep.subr.bf16.mxu1 %v14829_v0  ;;  %5462 = vmatprep.subr.bf16.mxu0 %v14829_v0 }
  0x57   :  { %4885 = vmatpush1.bf16.msra.mxu1 %v11973_v15  ;;  %5463 = vmatpush1.bf16.msra.mxu0 %v11974_v16  ;;  %v12052_v15 = vld [vmem:[#allocation6 + $0x3c8] ss:$68 sps:$4 sm:$0xff]  }
  0x58   :  { %4886 = vmatprep.subr.bf16.mxu1 %v14829_v0  ;;  %5464 = vmatprep.subr.bf16.mxu0 %v14829_v0  ;;  %v12055_v16 = vld [vmem:[#allocation6 + $0x444] ss:$68 sps:$4 sm:$0xff]  }
  0x5b   :  { %4887 = vmatpush1.bf16.msra.mxu1 %v11975_v17  ;;  %5465 = vmatpush1.bf16.msra.mxu0 %v11976_v18  ;;  %v12053_v17 = vld [vmem:[#allocation3 + $0x1f0] sm:$0xff]   ;;  %v12059_v18 = vld [vmem:[#allocation6 + $0x1c] ss:$68 sps:$4 sm:$0xff]  }
  0x5c   :  { %4888 = vmatprep.subr.bf16.mxu1 %v14829_v0  ;;  %5466 = vmatprep.subr.bf16.mxu0 %v14829_v0 }
  0x5f   :  { %4889 = vmatpush1.bf16.msra.mxu1 %v11977_v20  ;;  %5467 = vmatpush1.bf16.msra.mxu0 %v11978_v22  ;;  %v12060_v20 = vld [vmem:[#allocation6 + $0x440] ss:$68 sps:$4 sm:$0xff]   ;;  %v12062_v22 = vld [vmem:[#allocation6 + $0x4cc] ss:$68 sps:$4 sm:$0xff]  }
  0x60   :  { %4890 = vmatprep.subr.bf16.mxu1 %v14829_v0  ;;  %5468 = vmatprep.subr.bf16.mxu0 %v14829_v0 }
  0x63   :  { %4891 = vmatpush1.bf16.msra.mxu1 %v11979_v23  ;;  %5469 = vmatpush1.bf16.msra.mxu0 %v11980_v24  ;;  %v12061_v23 = vld [vmem:[#allocation3 + $0x200] sm:$0xff]  }
  0x64   :  { %4892 = vmatprep.subr.bf16.mxu1 %v14829_v0  ;;  %5470 = vmatprep.subr.bf16.mxu0 %v14829_v0  ;;  %v12064_v24 = vld [vmem:[#allocation6 + $0xa4] ss:$68 sps:$4 sm:$0xff]  }
  0x67   :  { %4893 = vmatpush1.bf16.msra.mxu1 %v11981_v25  ;;  %5471 = vmatpush1.bf16.msra.mxu0 %v11982_v26  ;;  %v12165_v25 = vld [vmem:[#allocation3 + $0x80] sm:$0xff]   ;;  %v12066_v26 = vld [vmem:[#allocation6 + $0x4c8] ss:$68 sps:$4 sm:$0xff]  }
  0x68   :  { %4894 = vmatprep.subr.bf16.mxu1 %v14829_v0  ;;  %5472 = vmatprep.subr.bf16.mxu0 %v14829_v0 }
  0x6b   :  { %4895 = vmatpush1.bf16.msra.mxu1 %v11983_v27  ;;  %5473 = vmatpush1.bf16.msra.mxu0 %v11984_v28  ;;  %v12074_v27 = vld [vmem:[#allocation3 + $0x208] sm:$0xff]  }
  0x6c   :  { %4896 = vmatprep.subr.bf16.mxu1 %v14829_v0  ;;  %5474 = vmatprep.subr.bf16.mxu0 %v14829_v0  ;;  %v12166_v28 = vld [vmem:[#allocation3 + $0x88] sm:$0xff]  }
  0x6f   :  { %4897 = vmatpush1.bf16.msra.mxu1 %v11985_v29  ;;  %5475 = vmatpush1.bf16.msra.mxu0 %v11986_v30  ;;  %v12067_v29 = vld [vmem:[#allocation6 + $0xa0] ss:$68 sps:$4 sm:$0xff]   ;;  %v12068_v30 = vld [vmem:[#allocation6 + $0x554] ss:$68 sps:$4 sm:$0xff]  }
  0x70   :  { %4898 = vmatprep.subr.bf16.mxu1 %v14829_v0  ;;  %5476 = vmatprep.subr.bf16.mxu0 %v14829_v0 }
  0x73   :  { %4899 = vmatpush1.bf16.msra.mxu1 %v11987_v31  ;;  %5477 = vmatpush1.bf16.msra.mxu0 %v11988_v32  ;;  %v12070_v31 = vld [vmem:[#allocation6 + $0x12c] ss:$68 sps:$4 sm:$0xff]  }
  0x74   :  { %4900 = vmatprep.subr.bf16.mxu1 %v14829_v0  ;;  %5478 = vmatprep.subr.bf16.mxu0 %v14829_v0  ;;  %v12087_v32 = vld [vmem:[#allocation3 + $0x210] sm:$0xff]  }
  0x77   :  { %4901 = vmatpush1.bf16.msra.mxu1 %v11989_v33  ;;  %5479 = vmatpush1.bf16.msra.mxu0 %v11990_v34  ;;  %v12174_v33 = vld [vmem:[#allocation3 + $0x90] sm:$0xff]   ;;  %v12100_v34 = vld [vmem:[#allocation3 + $0x218] sm:$0xff]  }
  0x78   :  { %5159 = vmatprep.subr.bf16.mxu1 %v14829_v0  ;;  %5737 = vmatprep.subr.bf16.mxu0 %v14829_v0 }
  0x7a   :  { %4903 = vmatmul.mubr.bf16.vlgmr.msra.gmra.mrb[0].mxu1 %v11991_v35  ;;  %5481 = vmatmul.mubr.bf16.vlgmr.msra.gmra.mrb[0].mxu0 %v11994_v36  ;;  %v12072_v35 = vld [vmem:[#allocation6 + $0x550] ss:$68 sps:$4 sm:$0xff]   ;;  %v12175_v36 = vld [vmem:[#allocation3 + $0x98] sm:$0xff]  }
  0x7b   :  { %4910 = vmatprep.mubr.bf16.mxu1 %v11999_v38  ;;  %5738 = vmatpush1.bf16.msra.mxu0 %v11997_v37  ;;  %v12073_v37 = vld [vmem:[#allocation6 + $0x128] ss:$68 sps:$4 sm:$0xff]   ;;  %v12075_v38 = vld [vmem:[#allocation6 + $0x5dc] ss:$68 sps:$4 sm:$0xff]  }
  0x7c   :  { %5488 = vmatprep.mubr.bf16.mxu0 %v12001_v39  ;;  %5739 = vmatprep.subr.bf16.mxu0 %v14829_v0  ;;  %v12077_v39 = vld [vmem:[#allocation6 + $0x1b4] ss:$68 sps:$4 sm:$0xff]  }
  0x7d   :  { %5160 = vmatpush1.bf16.msra.mxu1 %v12165_v25  ;;  %v12122_v25 = vld [vmem:[#allocation6 + $0x56c] ss:$68 sps:$4 sm:$0xff]  }
  0x7e   :  { %5161 = vmatprep.subr.bf16.mxu1 %v14829_v0 }
  0x7f   :  { %5740 = vmatpush1.bf16.msra.mxu0 %v11998_v40  ;;  %v12113_v40 = vld [vmem:[#allocation3 + $0x220] sm:$0xff]  }
  0x80   :  { %5741 = vmatprep.subr.bf16.mxu0 %v14829_v0 }
  0x81   :  { %5162 = vmatpush1.bf16.msra.mxu1 %v12166_v28  ;;  %v12127_v28 = vld [vmem:[#allocation6 + $0xa1c] ss:$68 sps:$4 sm:$0xff]  }
  0x82   :  { %4911 = vmatmul.mubr.bf16.gmra.mrb[4].mxu1 %v12003_v41  ;;  %5489 = vmatmul.mubr.bf16.gmra.mrb[4].mxu0 %v12004_v42  ;;  %v12182_v41 = vld [vmem:[#allocation3 + $0xa0] sm:$0xff]   ;;  %v12079_v42 = vld [vmem:[#allocation6 + $0x5d8] ss:$68 sps:$4 sm:$0xff]  }
  0x83   :  { %4918 = vmatprep.mubr.bf16.mxu1 %v12007_v43  ;;  %5742 = vmatpush1.bf16.msra.mxu0 %v12005_v44  ;;  %v12126_v43 = vld [vmem:[#allocation3 + $0x228] sm:$0xff]  }
  0x84   :  { %5496 = vmatprep.mubr.bf16.mxu0 %v12009_v45  ;;  %5743 = vmatprep.subr.bf16.mxu0 %v14829_v0  ;;  %v12183_v44 = vld [vmem:[#allocation3 + $0xa8] sm:$0xff]   ;;  %v12080_v45 = vld [vmem:[#allocation6 + $0x1b0] ss:$68 sps:$4 sm:$0xff]  }
  0x85   :  { %5163 = vmatprep.subr.bf16.mxu1 %v14829_v0 }
  0x86   :  { %5164 = vmatpush1.bf16.msra.mxu1 %v12174_v33  ;;  %v12133_v33 = vld [vmem:[#allocation6 + $0xaa4] ss:$68 sps:$4 sm:$0xff]  }
  0x87   :  { %5744 = vmatpush1.bf16.msra.mxu0 %v12006_v46  ;;  %5165 = vmatprep.subr.bf16.mxu1 %v14829_v0  ;;  %v12081_v46 = vld [vmem:[#allocation6 + $0x664] ss:$68 sps:$4 sm:$0xff]  }
  0x88   :  { %5745 = vmatprep.subr.bf16.mxu0 %v14829_v0 }
  0x8a   :  { %4919 = vmatmul.mubr.bf16.gmra.mrb[8].mxu1 %v12011_v47  ;;  %5497 = vmatmul.mubr.bf16.gmra.mrb[8].mxu0 %v12012_v48  ;;  %v12083_v47 = vld [vmem:[#allocation6 + $0x23c] ss:$68 sps:$4 sm:$0xff]   ;;  %v12139_v48 = vld [vmem:[#allocation3 + $0x230] sm:$0xff]  }
  0x8b   :  { %4926 = vmatprep.mubr.bf16.mxu1 %v12015_v50  ;;  %5746 = vmatpush1.bf16.msra.mxu0 %v12013_v49  ;;  %v12191_v49 = vld [vmem:[#allocation3 + $0xb0] sm:$0xff]   ;;  %v12152_v50 = vld [vmem:[#allocation3 + $0x238] sm:$0xff]  }
  0x8c   :  { %5504 = vmatprep.mubr.bf16.mxu0 %v12017_v51  ;;  %5747 = vmatprep.subr.bf16.mxu0 %v14829_v0  ;;  %v12085_v51 = vld [vmem:[#allocation6 + $0x660] ss:$68 sps:$4 sm:$0xff]  }
  0x8d   :  { %5166 = vmatpush1.bf16.msra.mxu1 %v12175_v36  ;;  %v12138_v36 = vld [vmem:[#allocation6 + $0x678] ss:$68 sps:$4 sm:$0xff]  }
  0x8e   :  { %5167 = vmatprep.subr.bf16.mxu1 %v14829_v0 }
  0x8f   :  { %5748 = vmatpush1.bf16.msra.mxu0 %v12014_v52  ;;  %v12192_v52 = vld [vmem:[#allocation3 + $0xb8] sm:$0xff]  }
  0x90   :  { %5749 = vmatprep.subr.bf16.mxu0 %v14829_v0 }
  0x91   :  { %5168 = vmatpush1.bf16.msra.mxu1 %v12182_v41  ;;  %v12145_v41 = vld [vmem:[#allocation6 + $0x700] ss:$68 sps:$4 sm:$0xff]  }
  0x92   :  { %4927 = vmatmul.mubr.bf16.gmra.mrb[12].mxu1 %v12019_v53  ;;  %5505 = vmatmul.mubr.bf16.gmra.mrb[12].mxu0 %v12020_v54  ;;  %v12086_v53 = vld [vmem:[#allocation6 + $0x238] ss:$68 sps:$4 sm:$0xff]   ;;  %v12088_v54 = vld [vmem:[#allocation6 + $0x6ec] ss:$68 sps:$4 sm:$0xff]  }
  0x93   :  { %4934 = vmatprep.mubr.bf16.mxu1 %v12023_v55  ;;  %5750 = vmatpush1.bf16.msra.mxu0 %v12021_v56  ;;  %v12090_v55 = vld [vmem:[#allocation6 + $0x2c4] ss:$68 sps:$4 sm:$0xff]  }
  0x94   :  { %5512 = vmatprep.mubr.bf16.mxu0 %v12025_v57  ;;  %5751 = vmatprep.subr.bf16.mxu0 %v14829_v0  ;;  %v12167_v56 = vld [vmem:[#allocation3 + $0x240] sm:$0xff]  }
  0x95   :  { %5169 = vmatprep.subr.bf16.mxu1 %v14829_v0  ;;  %v12199_v57 = vld [vmem:[#allocation3 + $0xc0] sm:$0xff]  }
  0x96   :  { %5170 = vmatpush1.bf16.msra.mxu1 %v12183_v44  ;;  %v12150_v44 = vld [vmem:[#allocation6 + $0xbb0] ss:$68 sps:$4 sm:$0xff]  }
  0x97   :  { %5752 = vmatpush1.bf16.msra.mxu0 %v12022_v58  ;;  %5171 = vmatprep.subr.bf16.mxu1 %v14829_v0  ;;  %v12092_v58 = vld [vmem:[#allocation6 + $0x6e8] ss:$68 sps:$4 sm:$0xff]  }
  0x98   :  { %5753 = vmatprep.subr.bf16.mxu0 %v14829_v0 }
  0x9a   :  { %4935 = vmatmul.mubr.bf16.gmra.mrb[16].mxu1 %v12027_v59  ;;  %5513 = vmatmul.mubr.bf16.gmra.mrb[16].mxu0 %v12028_v60  ;;  %v12184_v59 = vld [vmem:[#allocation3 + $0x248] sm:$0xff]  }
  0x9b   :  { %4942 = vmatprep.mubr.bf16.mxu1 %v12031_v62  ;;  %5754 = vmatpush1.bf16.msra.mxu0 %v12029_v61  ;;  %v12200_v60 = vld [vmem:[#allocation3 + $0xc8] sm:$0xff]   ;;  %v12093_v61 = vld [vmem:[#allocation6 + $0x2c0] ss:$68 sps:$4 sm:$0xff]   ;;  %v12094_v62 = vld [vmem:[#allocation6 + $0x774] ss:$68 sps:$4 sm:$0xff]  }
  0x9c   :  { %5520 = vmatprep.mubr.bf16.mxu0 %v12033_v63  ;;  %5755 = vmatprep.subr.bf16.mxu0 %v14829_v0  ;;  %v12096_v63 = vld [vmem:[#allocation6 + $0x34c] ss:$68 sps:$4 sm:$0xff]  }
  0x9d   :  { %5172 = vmatpush1.bf16.msra.mxu1 %v12191_v49  ;;  %v12157_v49 = vld [vmem:[#allocation6 + $0xc38] ss:$68 sps:$4 sm:$0xff]  }
  0x9e   :  { %5173 = vmatprep.subr.bf16.mxu1 %v14829_v0 }
  0x9f   :  { %5756 = vmatpush1.bf16.msra.mxu0 %v12030_v1  ;;  %v12201_v1 = vld [vmem:[#allocation3 + $0x250] sm:$0xff]  }
  0xa0   :  { %5757 = vmatprep.subr.bf16.mxu0 %v14829_v0 }
  0xa1   :  { %5174 = vmatpush1.bf16.msra.mxu1 %v12192_v52  ;;  %v12161_v52 = vld [vmem:[#allocation6 + $0x89c] ss:$68 sps:$4 sm:$0xff]  }
  0xa2   :  { %4943 = vmatmul.mubr.bf16.gmra.mrb[20].mxu1 %v12035_v2  ;;  %5521 = vmatmul.mubr.bf16.gmra.mrb[20].mxu0 %v12036_v3  ;;  %v12208_v2 = vld [vmem:[#allocation3 + $0xd0] sm:$0xff]  }
  0xa3   :  { %4950 = vmatprep.mubr.bf16.mxu1 %v12039_v4  ;;  %5758 = vmatpush1.bf16.msra.mxu0 %v12037_v5  ;;  %v12098_v3 = vld [vmem:[#allocation6 + $0x770] ss:$68 sps:$4 sm:$0xff]   ;;  %v12209_v4 = vld [vmem:[#allocation3 + $0xd8] sm:$0xff]   ;;  %v12099_v5 = vld [vmem:[#allocation6 + $0x348] ss:$68 sps:$4 sm:$0xff]  }
  0xa4   :  { %5528 = vmatprep.mubr.bf16.mxu0 %v12041_v6  ;;  %5759 = vmatprep.subr.bf16.mxu0 %v14829_v0  ;;  %v12101_v6 = vld [vmem:[#allocation6 + $0x7fc] ss:$68 sps:$4 sm:$0xff]  }
  0xa5   :  { %5175 = vmatprep.subr.bf16.mxu1 %v14829_v0 }
  0xa6   :  { %5176 = vmatpush1.bf16.msra.mxu1 %v12199_v57  ;;  %v12172_v57 = vld [vmem:[#allocation6 + $0xd48] ss:$68 sps:$4 sm:$0xff]  }
  0xa7   :  { %5760 = vmatpush1.bf16.msra.mxu0 %v12038_v7  ;;  %5177 = vmatprep.subr.bf16.mxu1 %v14829_v0  ;;  %v12103_v7 = vld [vmem:[#allocation6 + $0x3d4] ss:$68 sps:$4 sm:$0xff]  }
  0xa8   :  { %5761 = vmatprep.subr.bf16.mxu0 %v14829_v0 }
  0xaa   :  { %4951 = vmatmul.mubr.bf16.gmra.mrb[24].mxu1 %v12043_v8  ;;  %5529 = vmatmul.mubr.bf16.gmra.mrb[24].mxu0 %v12044_v9  ;;  %v12216_v8 = vld [vmem:[#allocation3 + $0xe0] sm:$0xff]   ;;  %v12218_v9 = vld [vmem:[#allocation3 + $0x258] sm:$0xff]  }
  0xab   :  { %4958 = vmatprep.mubr.bf16.mxu1 %v12047_v11  ;;  %5762 = vmatpush1.bf16.msra.mxu0 %v12045_v10  ;;  %v12105_v10 = vld [vmem:[#allocation6 + $0x7f8] ss:$68 sps:$4 sm:$0xff]   ;;  %v12217_v11 = vld [vmem:[#allocation3 + $0xe8] sm:$0xff]  }
  0xac   :  { %5536 = vmatprep.mubr.bf16.mxu0 %v12049_v12  ;;  %5763 = vmatprep.subr.bf16.mxu0 %v14829_v0  ;;  %v12106_v12 = vld [vmem:[#allocation6 + $0x3d0] ss:$68 sps:$4 sm:$0xff]  }
  0xad   :  { %5178 = vmatpush1.bf16.msra.mxu1 %v12200_v60  ;;  %v12178_v60 = vld [vmem:[#allocation6 + $0x9ac] ss:$68 sps:$4 sm:$0xff]  }
  0xae   :  { %5179 = vmatprep.subr.bf16.mxu1 %v14829_v0 }
  0xaf   :  { %5764 = vmatpush1.bf16.msra.mxu0 %v12046_v13  ;;  %v12107_v13 = vld [vmem:[#allocation6 + $0x884] ss:$68 sps:$4 sm:$0xff]  }
  0xb0   :  { %5765 = vmatprep.subr.bf16.mxu0 %v14829_v0 }
  0xb1   :  { %5180 = vmatpush1.bf16.msra.mxu1 %v12208_v2  ;;  %v12189_v2 = vld [vmem:[#allocation6 + $0xe58] ss:$68 sps:$4 sm:$0xff]  }
  0xb2   :  { %4959 = vmatmul.mubr.bf16.gmra.mrb[28].mxu1 %v12051_v14  ;;  %5537 = vmatmul.mubr.bf16.gmra.mrb[28].mxu0 %v12052_v15  ;;  %v12109_v14 = vld [vmem:[#allocation6 + $0x45c] ss:$68 sps:$4 sm:$0xff]   ;;  %v12225_v15 = vld [vmem:[#allocation3 + $0xf0] sm:$0xff]  }
  0xb3   :  { %4966 = vmatprep.mubr.bf16.mxu1 %v12055_v16  ;;  %5766 = vmatpush1.bf16.msra.mxu0 %v12053_v17  ;;  %v12111_v16 = vld [vmem:[#allocation6 + $0x880] ss:$68 sps:$4 sm:$0xff]   ;;  %v12226_v17 = vld [vmem:[#allocation3 + $0xf8] sm:$0xff]  }
  0xb4   :  { %5769 = vmatprep.mubr.bf16.mxu0 %v12059_v18  ;;  %5767 = vmatprep.subr.bf16.mxu0 %v14829_v0  ;;  %v12112_v18 = vld [vmem:[#allocation6 + $0x458] ss:$68 sps:$4 sm:$0xff]  }
  0xb5   :  { %5181 = vmatprep.subr.bf16.mxu1 %v14829_v0 }
  0xb6   :  { %5182 = vmatpush1.bf16.msra.mxu1 %v12209_v4  ;;  %v12193_v4 = vld [vmem:[#allocation6 + $0xee4] ss:$68 sps:$4 sm:$0xff]  }
  0xb7   :  { %5768 = vmatpush1.bf16.msra.mxu0 %v12054_v19  ;;  %5183 = vmatprep.subr.bf16.mxu1 %v14829_v0  ;;  %v12114_v19 = vld [vmem:[#allocation6 + $0x90c] ss:$68 sps:$4 sm:$0xff]  }
  0xb8   :  { %6026 = vmatprep.subr.bf16.mxu0 %v14829_v0 }
  0xba   :  { %4967 = vmatmul.mubr.bf16.gmra.mrb[32].mxu1 %v12060_v20  ;;  %5770 = vmatmul.mubr.bf16.vlgmr.msra.gmra.mrb[0].mxu0 %v12057_v21  ;;  %v12116_v20 = vld [vmem:[#allocation6 + $0x4e4] ss:$68 sps:$4 sm:$0xff]  }
  0xbb   :  { %4974 = vmatprep.mubr.bf16.mxu1 %v12062_v22  ;;  %6027 = vmatpush1.bf16.msra.mxu0 %v12061_v23  ;;  %v12233_v21 = vld [vmem:[#allocation3 + $0x260] sm:$0xff]   ;;  %v12118_v22 = vld [vmem:[#allocation6 + $0x908] ss:$68 sps:$4 sm:$0xff]  }
  0xbc   :  { %5777 = vmatprep.mubr.bf16.mxu0 %v12064_v24  ;;  %6028 = vmatprep.subr.bf16.mxu0 %v14829_v0  ;;  %v12119_v23 = vld [vmem:[#allocation6 + $0x4e0] ss:$68 sps:$4 sm:$0xff]   ;;  %v12120_v24 = vld [vmem:[#allocation6 + $0x994] ss:$68 sps:$4 sm:$0xff]  }
  0xbd   :  { %5184 = vmatpush1.bf16.msra.mxu1 %v12216_v8  ;;  %v12202_v8 = vld [vmem:[#allocation6 + $0xf6c] ss:$68 sps:$4 sm:$0xff]  }
  0xbe   :  { %5185 = vmatprep.subr.bf16.mxu1 %v14829_v0 }
  0xbf   :  { %6029 = vmatpush1.bf16.msra.mxu0 %v12074_v27  ;;  %v12125_v27 = vld [vmem:[#allocation6 + $0x568] ss:$68 sps:$4 sm:$0xff]  }
  0xc0   :  { %6030 = vmatprep.subr.bf16.mxu0 %v14829_v0 }
  0xc1   :  { %5186 = vmatpush1.bf16.msra.mxu1 %v12217_v11  ;;  %v12207_v11 = vld [vmem:[#allocation6 + $0xb40] ss:$68 sps:$4 sm:$0xff]  }
  0xc2   :  { %4975 = vmatmul.mubr.bf16.gmra.mrb[36].mxu1 %v12066_v26  ;;  %5778 = vmatmul.mubr.bf16.gmra.mrb[4].mxu0 %v12067_v29  ;;  %v12124_v26 = vld [vmem:[#allocation6 + $0x990] ss:$68 sps:$4 sm:$0xff]  }
  0xc3   :  { %4982 = vmatprep.mubr.bf16.mxu1 %v12068_v30  ;;  %5785 = vmatprep.mubr.bf16.mxu0 %v12070_v31  ;;  %v12129_v29 = vld [vmem:[#allocation6 + $0x5f4] ss:$68 sps:$4 sm:$0xff]   ;;  %v12246_v30 = vld [vmem:[#allocation3 + $0x268] sm:$0xff]  }
  0xc4   :  { %6031 = vmatpush1.bf16.msra.mxu0 %v12087_v32  ;;  %5187 = vmatprep.subr.bf16.mxu1 %v14829_v0  ;;  %v12131_v31 = vld [vmem:[#allocation6 + $0xa18] ss:$68 sps:$4 sm:$0xff]   ;;  %v12132_v32 = vld [vmem:[#allocation6 + $0x5f0] ss:$68 sps:$4 sm:$0xff]  }
  0xc5   :  { %6032 = vmatprep.subr.bf16.mxu0 %v14829_v0  ;;  %5188 = vmatpush1.bf16.msra.mxu1 %v12225_v15  ;;  %v12215_v15 = vld [vmem:[#allocation6 + $0xbc8] ss:$68 sps:$4 sm:$0xff]  }
  0xc6   :  { %5189 = vmatprep.subr.bf16.mxu1 %v14829_v0 }
  0xc8   :  { %6033 = vmatpush1.bf16.msra.mxu0 %v12100_v34  ;;  %v12135_v34 = vld [vmem:[#allocation6 + $0x67c] ss:$68 sps:$4 sm:$0xff]  }
  0xc9   :  { %6034 = vmatprep.subr.bf16.mxu0 %v14829_v0  ;;  %5190 = vmatpush1.bf16.msra.mxu1 %v12226_v17  ;;  %v12221_v17 = vld [vmem:[#allocation6 + $0xc54] ss:$68 sps:$4 sm:$0xff]  }
  0xca   :  { %4983 = vmatmul.mubr.bf16.gmra.mrb[40].mxu1 %v12072_v35  ;;  %5786 = vmatmul.mubr.bf16.gmra.mrb[8].mxu0 %v12073_v37  ;;  %v12137_v35 = vld [vmem:[#allocation6 + $0xaa0] ss:$68 sps:$4 sm:$0xff]   ;;  %v12140_v37 = vld [vmem:[#allocation6 + $0xb2c] ss:$68 sps:$4 sm:$0xff]  }
  0xcb   :  { %4990 = vmatprep.mubr.bf16.mxu1 %v12075_v38  ;;  %5793 = vmatprep.mubr.bf16.mxu0 %v12077_v39  ;;  %v12142_v38 = vld [vmem:[#allocation6 + $0x704] ss:$68 sps:$4 sm:$0xff]   ;;  %v12259_v39 = vld [vmem:[#allocation3 + $0x270] sm:$0xff]  }
  0xcc   :  { %6035 = vmatpush1.bf16.msra.mxu0 %v12113_v40  ;;  %10826 = vmatprep.subr.bf16.mxu1 %v14829_v0  ;;  %v12144_v40 = vld [vmem:[#allocation6 + $0xb28] ss:$68 sps:$4 sm:$0xff]  }
  0xcd   :  { %6036 = vmatprep.subr.bf16.mxu0 %v14829_v0 }
  0xd0   :  { %6037 = vmatpush1.bf16.msra.mxu0 %v12126_v43  ;;  %v12148_v43 = vld [vmem:[#allocation6 + $0x78c] ss:$68 sps:$4 sm:$0xff]  }
  0xd1   :  { %6038 = vmatprep.subr.bf16.mxu0 %v14829_v0 }
  0xd2   :  { %4991 = vmatmul.mubr.bf16.gmra.mrb[44].mxu1 %v12079_v42  ;;  %5794 = vmatmul.mubr.bf16.gmra.mrb[12].mxu0 %v12080_v45  ;;  %v12146_v42 = vld [vmem:[#allocation6 + $0xbb4] ss:$68 sps:$4 sm:$0xff]   ;;  %v12151_v45 = vld [vmem:[#allocation6 + $0x788] ss:$68 sps:$4 sm:$0xff]  }
  0xd3   :  { %4998 = vmatprep.mubr.bf16.mxu1 %v12081_v46  ;;  %5801 = vmatprep.mubr.bf16.mxu0 %v12083_v47  ;;  %v12153_v46 = vld [vmem:[#allocation6 + $0xc3c] ss:$68 sps:$4 sm:$0xff]   ;;  %v12155_v47 = vld [vmem:[#allocation6 + $0x814] ss:$68 sps:$4 sm:$0xff]  }
  0xd4   :  { %6039 = vmatpush1.bf16.msra.mxu0 %v12139_v48  ;;  %v12272_v48 = vld [vmem:[#allocation3 + $0x278] sm:$0xff]  }
  0xd5   :  { %6040 = vmatprep.subr.bf16.mxu0 %v14829_v0 }
  0xd8   :  { %6041 = vmatpush1.bf16.msra.mxu0 %v12152_v50  ;;  %v12158_v50 = vld [vmem:[#allocation6 + $0x810] ss:$68 sps:$4 sm:$0xff]  }
  0xd9   :  { %6042 = vmatprep.subr.bf16.mxu0 %v14829_v0 }
  0xda   :  { %4999 = vmatmul.mubr.bf16.gmra.mrb[48].mxu1 %v12085_v51  ;;  %5802 = vmatmul.mubr.bf16.gmra.mrb[16].mxu0 %v12086_v53  ;;  %v12159_v51 = vld [vmem:[#allocation6 + $0xcc4] ss:$68 sps:$4 sm:$0xff]  }
  0xdb   :  { %5006 = vmatprep.mubr.bf16.mxu1 %v12088_v54  ;;  %5809 = vmatprep.mubr.bf16.mxu0 %v12090_v55  ;;  %v12163_v53 = vld [vmem:[#allocation6 + $0xcc0] ss:$68 sps:$4 sm:$0xff]   ;;  %v12164_v54 = vld [vmem:[#allocation6 + $0x898] ss:$68 sps:$4 sm:$0xff]   ;;  %v12168_v55 = vld [vmem:[#allocation6 + $0xd4c] ss:$68 sps:$4 sm:$0xff]  }
  0xdc   :  { %6043 = vmatpush1.bf16.msra.mxu0 %v12167_v56  ;;  %v12170_v56 = vld [vmem:[#allocation6 + $0x924] ss:$68 sps:$4 sm:$0xff]  }
  0xdd   :  { %6044 = vmatprep.subr.bf16.mxu0 %v14829_v0 }
  0xe0   :  { %6045 = vmatpush1.bf16.msra.mxu0 %v12184_v59  ;;  %v12176_v59 = vld [vmem:[#allocation6 + $0xdd4] ss:$68 sps:$4 sm:$0xff]  }
  0xe1   :  { %6046 = vmatprep.subr.bf16.mxu0 %v14829_v0 }
  0xe2   :  { %5007 = vmatmul.mubr.bf16.gmra.mrb[52].mxu1 %v12092_v58  ;;  %5810 = vmatmul.mubr.bf16.gmra.mrb[20].mxu0 %v12093_v61  ;;  %v12173_v58 = vld [vmem:[#allocation6 + $0x920] ss:$68 sps:$4 sm:$0xff]   ;;  %v12180_v61 = vld [vmem:[#allocation6 + $0xdd0] ss:$68 sps:$4 sm:$0xff]  }
  0xe3   :  { %5014 = vmatprep.mubr.bf16.mxu1 %v12094_v62  ;;  %5817 = vmatprep.mubr.bf16.mxu0 %v12096_v63  ;;  %v12181_v62 = vld [vmem:[#allocation6 + $0x9a8] ss:$68 sps:$4 sm:$0xff]   ;;  %v12185_v63 = vld [vmem:[#allocation6 + $0xe5c] ss:$68 sps:$4 sm:$0xff]  }
  0xe4   :  { %6047 = vmatpush1.bf16.msra.mxu0 %v12201_v1  ;;  %v12187_v1 = vld [vmem:[#allocation6 + $0xa34] ss:$68 sps:$4 sm:$0xff]  }
  0xe5   :  { %6048 = vmatprep.subr.bf16.mxu0 %v14829_v0 }
  0xe8   :  { %6049 = vmatpush1.bf16.msra.mxu0 %v12218_v9  ;;  %v12204_v9 = vld [vmem:[#allocation6 + $0xb44] ss:$68 sps:$4 sm:$0xff]  }
  0xe9   :  { %6050 = vmatprep.subr.bf16.mxu0 %v14829_v0 }
  0xea   :  { %5015 = vmatmul.mubr.bf16.gmra.mrb[56].mxu1 %v12098_v3  ;;  %5818 = vmatmul.mubr.bf16.gmra.mrb[24].mxu0 %v12099_v5  ;;  %v12190_v3 = vld [vmem:[#allocation6 + $0xa30] ss:$68 sps:$4 sm:$0xff]   ;;  %v12195_v5 = vld [vmem:[#allocation6 + $0xabc] ss:$68 sps:$4 sm:$0xff]  }
  0xeb   :  { %5022 = vmatprep.mubr.bf16.mxu1 %v12101_v6  ;;  %5825 = vmatprep.mubr.bf16.mxu0 %v12103_v7  ;;  %v12197_v6 = vld [vmem:[#allocation6 + $0xee0] ss:$68 sps:$4 sm:$0xff]   ;;  %v12198_v7 = vld [vmem:[#allocation6 + $0xab8] ss:$68 sps:$4 sm:$0xff]  }
  0xec   :  { %6051 = vmatpush1.bf16.msra.mxu0 %v12233_v21  ;;  %v12230_v21 = vld [vmem:[#allocation6 + $0xcdc] ss:$68 sps:$4 sm:$0xff]  }
  0xed   :  { %6052 = vmatprep.subr.bf16.mxu0 %v14829_v0 }
  0xf0   :  { %6053 = vmatpush1.bf16.msra.mxu0 %v12246_v30  ;;  %v12242_v30 = vld [vmem:[#allocation6 + $0xdec] ss:$68 sps:$4 sm:$0xff]  }
  0xf1   :  { %6054 = vmatprep.subr.bf16.mxu0 %v14829_v0 }
  0xf2   :  { %5023 = vmatmul.mubr.bf16.gmra.mrb[60].mxu1 %v12105_v10  ;;  %5826 = vmatmul.mubr.bf16.gmra.mrb[28].mxu0 %v12106_v12  ;;  %v12206_v10 = vld [vmem:[#allocation6 + $0xf68] ss:$68 sps:$4 sm:$0xff]   ;;  %v12210_v12 = vld [vmem:[#allocation6 + $0xff4] ss:$68 sps:$4 sm:$0xff]  }
  0xf3   :  { %5030 = vmatprep.mubr.bf16.mxu1 %v12107_v13  ;;  %5833 = vmatprep.mubr.bf16.mxu0 %v12109_v14  ;;  %v12212_v13 = vld [vmem:[#allocation6 + $0xbcc] ss:$68 sps:$4 sm:$0xff]  }
  0xf4   :  { %6055 = vmatpush1.bf16.msra.mxu0 %v12259_v39  ;;  %v12214_v14 = vld [vmem:[#allocation6 + $0xff0] ss:$68 sps:$4 sm:$0xff]   ;;  %v13091_v39 = vld [vmem:[#allocation3 + $0x120] sm:$0xff]  }
  0xf5   :  { %6056 = vmatprep.subr.bf16.mxu0 %v14829_v0 }
  0xf8   :  { %6057 = vmatpush1.bf16.msra.mxu0 %v12272_v48  ;;  %v12262_v48 = vld [vmem:[#allocation6 + $0xf84] ss:$68 sps:$4 sm:$0xff]  }
  0xf9   :  { %6315 = vmatprep.subr.bf16.mxu0 %v14829_v0 }
  0xfa   :  { %5031 = vmatmul.mubr.bf16.gmra.mrb[64].mxu1 %v12111_v16  ;;  %5834 = vmatmul.mubr.bf16.gmra.mrb[32].mxu0 %v12112_v18  ;;  %v12219_v16 = vld [vmem:[#allocation6 + $0x107c] ss:$68 sps:$4 sm:$0xff]  }
  0xfb   :  { %5038 = vmatprep.mubr.bf16.mxu1 %v12114_v19  ;;  %5841 = vmatprep.mubr.bf16.mxu0 %v12116_v20  ;;  %v12223_v18 = vld [vmem:[#allocation6 + $0x1078] ss:$68 sps:$4 sm:$0xff]   ;;  %v12224_v19 = vld [vmem:[#allocation6 + $0xc50] ss:$68 sps:$4 sm:$0xff]  }
  0xfc   :  { %v12229_v20 = vld [vmem:[#allocation6 + $0xc] ss:$68 sps:$4 sm:$0xff]  }
 0x102   :  { %5039 = vmatmul.mubr.bf16.gmra.mrb[68].mxu1 %v12118_v22  ;;  %5842 = vmatmul.mubr.bf16.gmra.mrb[36].mxu0 %v12119_v23  ;;  %v12227_v22 = vld [vmem:[#allocation6 + $0x8] ss:$68 sps:$4 sm:$0xff]   ;;  %v12232_v23 = vld [vmem:[#allocation6 + $0xcd8] ss:$68 sps:$4 sm:$0xff]  }
 0x103   :  { %5046 = vmatprep.mubr.bf16.mxu1 %v12120_v24  ;;  %5849 = vmatprep.mubr.bf16.mxu0 %v12122_v25  ;;  %v12234_v24 = vld [vmem:[#allocation6 + $0x94] ss:$68 sps:$4 sm:$0xff]   ;;  %v12236_v25 = vld [vmem:[#allocation6 + $0xd64] ss:$68 sps:$4 sm:$0xff]  }
 0x10a   :  { %5047 = vmatmul.mubr.bf16.gmra.mrb[72].mxu1 %v12124_v26  ;;  %5850 = vmatmul.mubr.bf16.gmra.mrb[40].mxu0 %v12125_v27  ;;  %v12238_v26 = vld [vmem:[#allocation6 + $0x90] ss:$68 sps:$4 sm:$0xff]   ;;  %v13087_v27 = vld [vmem:[#allocation3 + $0x100] sm:$0xff]  }
 0x10b   :  { %5054 = vmatprep.mubr.bf16.mxu1 %v12127_v28  ;;  %5857 = vmatprep.mubr.bf16.mxu0 %v12129_v29  ;;  %v12239_v28 = vld [vmem:[#allocation6 + $0xd60] ss:$68 sps:$4 sm:$0xff]  }
 0x10c   :  { %v12240_v29 = vld [vmem:[#allocation6 + $0x11c] ss:$68 sps:$4 sm:$0xff]  }
 0x112   :  { %5055 = vmatmul.mubr.bf16.gmra.mrb[76].mxu1 %v12131_v31  ;;  %5858 = vmatmul.mubr.bf16.gmra.mrb[44].mxu0 %v12132_v32  ;;  %v13088_v31 = vld [vmem:[#allocation3 + $0x108] sm:$0xff]   ;;  %v12244_v32 = vld [vmem:[#allocation6 + $0x118] ss:$68 sps:$4 sm:$0xff]  }
 0x113   :  { %5062 = vmatprep.mubr.bf16.mxu1 %v12133_v33  ;;  %5865 = vmatprep.mubr.bf16.mxu0 %v12135_v34  ;;  %v13089_v33 = vld [vmem:[#allocation3 + $0x110] sm:$0xff]   ;;  %v12245_v34 = vld [vmem:[#allocation6 + $0xde8] ss:$68 sps:$4 sm:$0xff]  }
 0x11a   :  { %5063 = vmatmul.mubr.bf16.gmra.mrb[80].mxu1 %v12137_v35  ;;  %5866 = vmatmul.mubr.bf16.gmra.mrb[48].mxu0 %v12138_v36  ;;  %v12247_v35 = vld [vmem:[#allocation6 + $0x1a4] ss:$68 sps:$4 sm:$0xff]   ;;  %v12249_v36 = vld [vmem:[#allocation6 + $0xe74] ss:$68 sps:$4 sm:$0xff]  }
 0x11b   :  { %5070 = vmatprep.mubr.bf16.mxu1 %v12140_v37  ;;  %5873 = vmatprep.mubr.bf16.mxu0 %v12142_v38  ;;  %v13090_v37 = vld [vmem:[#allocation3 + $0x118] sm:$0xff]   ;;  %v12251_v38 = vld [vmem:[#allocation6 + $0x1a0] ss:$68 sps:$4 sm:$0xff]  }
 0x122   :  { %5071 = vmatmul.mubr.bf16.gmra.mrb[84].mxu1 %v12144_v40  ;;  %5874 = vmatmul.mubr.bf16.gmra.mrb[52].mxu0 %v12145_v41  ;;  %v12252_v40 = vld [vmem:[#allocation6 + $0xe70] ss:$68 sps:$4 sm:$0xff]  }
 0x123   :  { %5078 = vmatprep.mubr.bf16.mxu1 %v12146_v42  ;;  %5881 = vmatprep.mubr.bf16.mxu0 %v12148_v43  ;;  %v12253_v41 = vld [vmem:[#allocation6 + $0x22c] ss:$68 sps:$4 sm:$0xff]   ;;  %v12255_v42 = vld [vmem:[#allocation6 + $0xefc] ss:$68 sps:$4 sm:$0xff]  }
 0x124   :  { %v13092_v43 = vld [vmem:[#allocation3 + $0x128] sm:$0xff]  }
 0x12a   :  { %5079 = vmatmul.mubr.bf16.gmra.mrb[88].mxu1 %v12150_v44  ;;  %5882 = vmatmul.mubr.bf16.gmra.mrb[56].mxu0 %v12151_v45  ;;  %v12257_v44 = vld [vmem:[#allocation6 + $0x228] ss:$68 sps:$4 sm:$0xff]   ;;  %v13093_v45 = vld [vmem:[#allocation3 + $0x130] sm:$0xff]  }
 0x12b   :  { %5086 = vmatprep.mubr.bf16.mxu1 %v12153_v46  ;;  %5889 = vmatprep.mubr.bf16.mxu0 %v12155_v47  ;;  %v12258_v46 = vld [vmem:[#allocation6 + $0xef8] ss:$68 sps:$4 sm:$0xff]  }
 0x12c   :  { %v12260_v47 = vld [vmem:[#allocation6 + $0x2b4] ss:$68 sps:$4 sm:$0xff]  }
 0x132   :  { %5087 = vmatmul.mubr.bf16.gmra.mrb[92].mxu1 %v12157_v49  ;;  %5890 = vmatmul.mubr.bf16.gmra.mrb[60].mxu0 %v12158_v50  ;;  %v13094_v49 = vld [vmem:[#allocation3 + $0x138] sm:$0xff]   ;;  %v12264_v50 = vld [vmem:[#allocation6 + $0x2b0] ss:$68 sps:$4 sm:$0xff]  }
 0x133   :  { %5094 = vmatprep.mubr.bf16.mxu1 %v12159_v51  ;;  %5897 = vmatprep.mubr.bf16.mxu0 %v12161_v52  ;;  %v13095_v51 = vld [vmem:[#allocation3 + $0x140] sm:$0xff]  }
 0x134   :  { %v12265_v52 = vld [vmem:[#allocation6 + $0xf80] ss:$68 sps:$4 sm:$0xff]  }
 0x13a   :  { %5095 = vmatmul.mubr.bf16.gmra.mrb[96].mxu1 %v12163_v53  ;;  %5898 = vmatmul.mubr.bf16.gmra.mrb[64].mxu0 %v12164_v54  ;;  %v12266_v53 = vld [vmem:[#allocation6 + $0x33c] ss:$68 sps:$4 sm:$0xff]   ;;  %v12268_v54 = vld [vmem:[#allocation6 + $0x100c] ss:$68 sps:$4 sm:$0xff]  }
 0x13b   :  { %5102 = vmatprep.mubr.bf16.mxu1 %v12168_v55  ;;  %5905 = vmatprep.mubr.bf16.mxu0 %v12170_v56  ;;  %v13096_v55 = vld [vmem:[#allocation3 + $0x148] sm:$0xff]   ;;  %v12270_v56 = vld [vmem:[#allocation6 + $0x338] ss:$68 sps:$4 sm:$0xff]  }
 0x142   :  { %5103 = vmatmul.mubr.bf16.gmra.mrb[100].mxu1 %v12172_v57  ;;  %5906 = vmatmul.mubr.bf16.gmra.mrb[68].mxu0 %v12173_v58  ;;  %v13097_v57 = vld [vmem:[#allocation3 + $0x150] sm:$0xff]   ;;  %v12271_v58 = vld [vmem:[#allocation6 + $0x1008] ss:$68 sps:$4 sm:$0xff]  }
 0x143   :  { %5110 = vmatprep.mubr.bf16.mxu1 %v12176_v59  ;;  %5913 = vmatprep.mubr.bf16.mxu0 %v12178_v60  ;;  %v12273_v59 = vld [vmem:[#allocation6 + $0x3c4] ss:$68 sps:$4 sm:$0xff]   ;;  %v12275_v60 = vld [vmem:[#allocation6 + $0x1094] ss:$68 sps:$4 sm:$0xff]  }
 0x14a   :  { %5111 = vmatmul.mubr.bf16.gmra.mrb[104].mxu1 %v12180_v61  ;;  %5914 = vmatmul.mubr.bf16.gmra.mrb[72].mxu0 %v12181_v62  ;;  %v13098_v61 = vld [vmem:[#allocation3 + $0x158] sm:$0xff]   ;;  %v12277_v62 = vld [vmem:[#allocation6 + $0x3c0] ss:$68 sps:$4 sm:$0xff]  }
 0x14b   :  { %5118 = vmatprep.mubr.bf16.mxu1 %v12185_v63  ;;  %5921 = vmatprep.mubr.bf16.mxu0 %v12187_v1  ;;  %v13099_v63 = vld [vmem:[#allocation3 + $0x160] sm:$0xff]   ;;  %v12278_v1 = vld [vmem:[#allocation6 + $0x1090] ss:$68 sps:$4 sm:$0xff]  }
 0x152   :  { %5119 = vmatmul.mubr.bf16.gmra.mrb[108].mxu1 %v12189_v2  ;;  %5922 = vmatmul.mubr.bf16.gmra.mrb[76].mxu0 %v12190_v3  ;;  %v12279_v2 = vld [vmem:[#allocation6 + $0x44c] ss:$68 sps:$4 sm:$0xff]   ;;  %v12283_v3 = vld [vmem:[#allocation6 + $0x24] ss:$68 sps:$4 sm:$0xff]  }
 0x153   :  { %5126 = vmatprep.mubr.bf16.mxu1 %v12193_v4  ;;  %5929 = vmatprep.mubr.bf16.mxu0 %v12195_v5  ;;  %v13100_v4 = vld [vmem:[#allocation3 + $0x168] sm:$0xff]  }
 0x154   :  { %v12284_v5 = vld [vmem:[#allocation6 + $0x448] ss:$68 sps:$4 sm:$0xff]  }
 0x15a   :  { %5127 = vmatmul.mubr.bf16.gmra.mrb[112].mxu1 %v12197_v6  ;;  %5930 = vmatmul.mubr.bf16.gmra.mrb[80].mxu0 %v12198_v7  ;;  %v13101_v6 = vld [vmem:[#allocation3 + $0x170] sm:$0xff]   ;;  %v12281_v7 = vld [vmem:[#allocation6 + $0x20] ss:$68 sps:$4 sm:$0xff]  }
 0x15b   :  { %5134 = vmatprep.mubr.bf16.mxu1 %v12202_v8  ;;  %5937 = vmatprep.mubr.bf16.mxu0 %v12204_v9  ;;  %v12286_v8 = vld [vmem:[#allocation6 + $0x4d4] ss:$68 sps:$4 sm:$0xff]   ;;  %v12285_v9 = vld [vmem:[#allocation3 + $0x280] sm:$0xff]  }
 0x162   :  { %5135 = vmatmul.mubr.bf16.gmra.mrb[116].mxu1 %v12206_v10  ;;  %5938 = vmatmul.mubr.bf16.gmra.mrb[84].mxu0 %v12207_v11  ;;  %v12288_v10 = vld [vmem:[#allocation6 + $0xac] ss:$68 sps:$4 sm:$0xff]   ;;  %v13102_v11 = vld [vmem:[#allocation3 + $0x178] sm:$0xff]  }
 0x163   :  { %5142 = vmatprep.mubr.bf16.mxu1 %v12210_v12  ;;  %5945 = vmatprep.mubr.bf16.mxu0 %v12212_v13  ;;  %v12290_v12 = vld [vmem:[#allocation6 + $0x4d0] ss:$68 sps:$4 sm:$0xff]   ;;  %v12298_v13 = vld [vmem:[#allocation3 + $0x288] sm:$0xff]  }
 0x16a   :  { %5143 = vmatmul.mubr.bf16.gmra.mrb[120].mxu1 %v12214_v14  ;;  %5946 = vmatmul.mubr.bf16.gmra.mrb[88].mxu0 %v12215_v15  ;;  %v12291_v14 = vld [vmem:[#allocation6 + $0xa8] ss:$68 sps:$4 sm:$0xff]   ;;  %v12292_v15 = vld [vmem:[#allocation6 + $0x55c] ss:$68 sps:$4 sm:$0xff]  }
 0x16b   :  { %5150 = vmatprep.mubr.bf16.mxu1 %v12219_v16  ;;  %5953 = vmatprep.mubr.bf16.mxu0 %v12221_v17  ;;  %v12294_v16 = vld [vmem:[#allocation6 + $0x134] ss:$68 sps:$4 sm:$0xff]  }
 0x16c   :  { %v12311_v17 = vld [vmem:[#allocation3 + $0x290] sm:$0xff]  }
 0x172   :  { %5151 = vmatmul.mubr.bf16.gmra.mrb[124].mxu1 %v12223_v18  ;;  %5954 = vmatmul.mubr.bf16.gmra.mrb[92].mxu0 %v12224_v19  ;;  %v12296_v18 = vld [vmem:[#allocation6 + $0x558] ss:$68 sps:$4 sm:$0xff]  }
 0x173   :  { %5191 = vmatprep.mubr.bf16.mxu1 %v12229_v20  ;;  %5961 = vmatprep.mubr.bf16.mxu0 %v12230_v21  ;;  %v12324_v19 = vld [vmem:[#allocation3 + $0x298] sm:$0xff]   ;;  %v12297_v20 = vld [vmem:[#allocation6 + $0x130] ss:$68 sps:$4 sm:$0xff]   ;;  %v12299_v21 = vld [vmem:[#allocation6 + $0x5e4] ss:$68 sps:$4 sm:$0xff]  }
 0x17a   :  { %5192 = vmatmul.mubr.bf16.vlgmr.msra.gmra.mrb[0].mxu1 %v12227_v22  ;;  %5962 = vmatmul.mubr.bf16.gmra.mrb[96].mxu0 %v12232_v23  ;;  %v12301_v22 = vld [vmem:[#allocation6 + $0x1bc] ss:$68 sps:$4 sm:$0xff]  }
 0x17b   :  { %5199 = vmatprep.mubr.bf16.mxu1 %v12234_v24  ;;  %5969 = vmatprep.mubr.bf16.mxu0 %v12236_v25  ;;  %v12337_v23 = vld [vmem:[#allocation3 + $0x2a0] sm:$0xff]  }
 0x17c   :  { %10842 = vmatpush1.bf16.msra.mxu1 %v13087_v27  ;;  %v918_v24 = vld [vmem:[%s14823_s2] sm:$0xff]  ;;  %v919_v27 = vld [vmem:[%s14823_s2 + $0x8] sm:$0xff] }
 0x17d   :  { %10827 = vmatprep.subr.bf16.mxu1 %v14829_v0  ;;  %v12303_v25 = vld [vmem:[#allocation6 + $0x5e0] ss:$68 sps:$4 sm:$0xff]   ;;  %984 = vperm.xlu0 %11957, %v918_v24   ;;  %v12364_v24 = vld [vmem:[#allocation6 + $0xb34] ss:$68 sps:$4 sm:$0xff]  }
 0x180   :  { %10843 = vmatpush1.bf16.msra.mxu1 %v13088_v31  ;;  %v12363_v31 = vld [vmem:[#allocation3 + $0x2b0] sm:$0xff]  }
 0x181   :  { %10828 = vmatprep.subr.bf16.mxu1 %v14829_v0  ;;  %989 = vperm.xlu0 %11957, %v919_v27   ;;  %v12368_v27 = vld [vmem:[#allocation6 + $0xb30] ss:$68 sps:$4 sm:$0xff]  }
 0x182   :  { %5200 = vmatmul.mubr.bf16.gmra.mrb[4].mxu1 %v12238_v26  ;;  %5970 = vmatmul.mubr.bf16.gmra.mrb[100].mxu0 %v12239_v28  ;;  %v12350_v26 = vld [vmem:[#allocation3 + $0x2a8] sm:$0xff]   ;;  %v12304_v28 = vld [vmem:[#allocation6 + $0x1b8] ss:$68 sps:$4 sm:$0xff]  }
 0x183   :  { %5207 = vmatprep.mubr.bf16.mxu1 %v12240_v29  ;;  %5977 = vmatprep.mubr.bf16.mxu0 %v12242_v30  ;;  %v12305_v29 = vld [vmem:[#allocation6 + $0x66c] ss:$68 sps:$4 sm:$0xff]   ;;  %v12307_v30 = vld [vmem:[#allocation6 + $0x244] ss:$68 sps:$4 sm:$0xff]  }
 0x184   :  { %10844 = vmatpush1.bf16.msra.mxu1 %v13089_v33  ;;  %v12309_v33 = vld [vmem:[#allocation6 + $0x668] ss:$68 sps:$4 sm:$0xff]  }
 0x185   :  { %10829 = vmatprep.subr.bf16.mxu1 %v14829_v0 }
 0x188   :  { %10845 = vmatpush1.bf16.msra.mxu1 %v13090_v37  ;;  %v12312_v37 = vld [vmem:[#allocation6 + $0x6f4] ss:$68 sps:$4 sm:$0xff]  }
 0x189   :  { %10830 = vmatprep.subr.bf16.mxu1 %v14829_v0 }
 0x18a   :  { %5208 = vmatmul.mubr.bf16.gmra.mrb[8].mxu1 %v12244_v32  ;;  %5978 = vmatmul.mubr.bf16.gmra.mrb[104].mxu0 %v12245_v34  ;;  %v920_v32 = vld [vmem:[%s14823_s2 + $0x10] sm:$0xff]  ;;  %v12376_v34 = vld [vmem:[#allocation3 + $0x2b8] sm:$0xff]  }
 0x18b   :  { %5215 = vmatprep.mubr.bf16.mxu1 %v12247_v35  ;;  %5985 = vmatprep.mubr.bf16.mxu0 %v12249_v36  ;;  %v921_v35 = vld [vmem:[%s14823_s2 + $0x18] sm:$0xff]  ;;  %v12310_v36 = vld [vmem:[#allocation6 + $0x240] ss:$68 sps:$4 sm:$0xff]  }
 0x18c   :  { %10846 = vmatpush1.bf16.msra.mxu1 %v13091_v39  ;;  %994 = vperm.xlu1 %11958, %v920_v32   ;;  %v12389_v39 = vld [vmem:[#allocation3 + $0x2c0] sm:$0xff]   ;;  %v12375_v32 = vld [vmem:[#allocation6 + $0x790] ss:$68 sps:$4 sm:$0xff]  }
 0x18d   :  { %10831 = vmatprep.subr.bf16.mxu1 %v14829_v0 }
 0x190   :  { %10847 = vmatpush1.bf16.msra.mxu1 %v13092_v43  ;;  %999 = vperm.xlu1 %11958, %v921_v35   ;;  %v12402_v43 = vld [vmem:[#allocation3 + $0x2c8] sm:$0xff]   ;;  %v12480_v35 = vld [vmem:[#allocation3 + $0x2f8] sm:$0xff]  }
 0x191   :  { %10832 = vmatprep.subr.bf16.mxu1 %v14829_v0 }
 0x192   :  { %5216 = vmatmul.mubr.bf16.gmra.mrb[12].mxu1 %v12251_v38  ;;  %5986 = vmatmul.mubr.bf16.gmra.mrb[108].mxu0 %v12252_v40  ;;  %v12314_v38 = vld [vmem:[#allocation6 + $0x2cc] ss:$68 sps:$4 sm:$0xff]  }
 0x193   :  { %5223 = vmatprep.mubr.bf16.mxu1 %v12253_v41  ;;  %5993 = vmatprep.mubr.bf16.mxu0 %v12255_v42  ;;  %v923_v40 = vld [vmem:[%s14823_s2 + $0x28] sm:$0xff]  ;;  %v922_v41 = vld [vmem:[%s14823_s2 + $0x20] sm:$0xff]  ;;  %v12316_v42 = vld [vmem:[#allocation6 + $0x6f0] ss:$68 sps:$4 sm:$0xff]  }
 0x194   :  { %10848 = vmatpush1.bf16.msra.mxu1 %v13093_v45  ;;  %v12318_v45 = vld [vmem:[#allocation6 + $0x77c] ss:$68 sps:$4 sm:$0xff]   ;;  %1009 = vperm.xlu1 %11958, %v923_v40   ;;  %v12387_v40 = vld [vmem:[#allocation6 + $0xcc8] ss:$68 sps:$4 sm:$0xff]  }
 0x195   :  { %10833 = vmatprep.subr.bf16.mxu1 %v14829_v0  ;;  %1004 = vperm.xlu0 %11957, %v922_v41   ;;  %v12388_v41 = vld [vmem:[#allocation6 + $0x8a0] ss:$68 sps:$4 sm:$0xff]  }
 0x198   :  { %10849 = vmatpush1.bf16.msra.mxu1 %v13094_v49  ;;  %v924_v49 = vld [vmem:[%s14823_s2 + $0x30] sm:$0xff] }
 0x199   :  { %10834 = vmatprep.subr.bf16.mxu1 %v14829_v0  ;;  %1014 = vperm.xlu0 %11957, %v924_v49   ;;  %v12401_v49 = vld [vmem:[#allocation6 + $0x9b0] ss:$68 sps:$4 sm:$0xff]  }
 0x19a   :  { %5224 = vmatmul.mubr.bf16.gmra.mrb[16].mxu1 %v12257_v44  ;;  %5994 = vmatmul.mubr.bf16.gmra.mrb[112].mxu0 %v12258_v46  ;;  %v12317_v44 = vld [vmem:[#allocation6 + $0x2c8] ss:$68 sps:$4 sm:$0xff]   ;;  %v12320_v46 = vld [vmem:[#allocation6 + $0x354] ss:$68 sps:$4 sm:$0xff]  }
 0x19b   :  { %5231 = vmatprep.mubr.bf16.mxu1 %v12260_v47  ;;  %6001 = vmatprep.mubr.bf16.mxu0 %v12262_v48  ;;  %v12415_v47 = vld [vmem:[#allocation3 + $0x2d0] sm:$0xff]   ;;  %v925_v48 = vld [vmem:[%s14823_s2 + $0x38] sm:$0xff] }
 0x19c   :  { %10850 = vmatpush1.bf16.msra.mxu1 %v13095_v51  ;;  %v12323_v51 = vld [vmem:[#allocation6 + $0x350] ss:$68 sps:$4 sm:$0xff]   ;;  %1019 = vperm.xlu1 %11958, %v925_v48   ;;  %v12400_v48 = vld [vmem:[#allocation6 + $0xdd8] ss:$68 sps:$4 sm:$0xff]  }
 0x19d   :  { %10835 = vmatprep.subr.bf16.mxu1 %v14829_v0 }
 0x1a0   :  { %10851 = vmatpush1.bf16.msra.mxu1 %v13096_v55  ;;  %v926_v55 = vld [vmem:[%s14823_s2 + $0x40] sm:$0xff] }
 0x1a1   :  { %10836 = vmatprep.subr.bf16.mxu1 %v14829_v0  ;;  %1024 = vperm.xlu0 %11957, %v926_v55   ;;  %v12407_v55 = vld [vmem:[#allocation6 + $0xe60] ss:$68 sps:$4 sm:$0xff]  }
 0x1a2   :  { %5232 = vmatmul.mubr.bf16.gmra.mrb[20].mxu1 %v12264_v50  ;;  %6002 = vmatmul.mubr.bf16.gmra.mrb[116].mxu0 %v12265_v52  ;;  %v12322_v50 = vld [vmem:[#allocation6 + $0x778] ss:$68 sps:$4 sm:$0xff]   ;;  %v12325_v52 = vld [vmem:[#allocation6 + $0x804] ss:$68 sps:$4 sm:$0xff]  }
 0x1a3   :  { %5239 = vmatprep.mubr.bf16.mxu1 %v12266_v53  ;;  %6009 = vmatprep.mubr.bf16.mxu0 %v12268_v54  ;;  %v12327_v53 = vld [vmem:[#allocation6 + $0x3dc] ss:$68 sps:$4 sm:$0xff]   ;;  %v927_v54 = vld [vmem:[%s14823_s2 + $0x48] sm:$0xff] }
 0x1a4   :  { %10852 = vmatpush1.bf16.msra.mxu1 %v13097_v57  ;;  %v12329_v57 = vld [vmem:[#allocation6 + $0x800] ss:$68 sps:$4 sm:$0xff]   ;;  %1029 = vperm.xlu1 %11958, %v927_v54  }
 0x1a5   :  { %10837 = vmatprep.subr.bf16.mxu1 %v14829_v0 }
 0x1a8   :  { %10853 = vmatpush1.bf16.msra.mxu1 %v13098_v61  ;;  %v929_v61 = vld [vmem:[%s14823_s2 + $0x58] sm:$0xff] }
 0x1a9   :  { %10838 = vmatprep.subr.bf16.mxu1 %v14829_v0  ;;  %1039 = vperm.xlu1 %11958, %v929_v61  }
 0x1aa   :  { %5240 = vmatmul.mubr.bf16.gmra.mrb[24].mxu1 %v12270_v56  ;;  %6010 = vmatmul.mubr.bf16.gmra.mrb[120].mxu0 %v12271_v58  ;;  %v12428_v56 = vld [vmem:[#allocation3 + $0x2d8] sm:$0xff]  }
 0x1ab   :  { %5247 = vmatprep.mubr.bf16.mxu1 %v12273_v59  ;;  %6017 = vmatprep.mubr.bf16.mxu0 %v12275_v60  ;;  %v12330_v58 = vld [vmem:[#allocation6 + $0x3d8] ss:$68 sps:$4 sm:$0xff]   ;;  %v12331_v59 = vld [vmem:[#allocation6 + $0x88c] ss:$68 sps:$4 sm:$0xff]   ;;  %v12333_v60 = vld [vmem:[#allocation6 + $0x464] ss:$68 sps:$4 sm:$0xff]  }
 0x1ac   :  { %10854 = vmatpush1.bf16.msra.mxu1 %v13099_v63  ;;  %v12335_v63 = vld [vmem:[#allocation6 + $0x888] ss:$68 sps:$4 sm:$0xff]  }
 0x1ad   :  { %10839 = vmatprep.subr.bf16.mxu1 %v14829_v0 }
 0x1b0   :  { %10855 = vmatpush1.bf16.msra.mxu1 %v13100_v4  ;;  %v931_v4 = vld [vmem:[%s14823_s2 + $0x68] sm:$0xff] }
 0x1b1   :  { %10840 = vmatprep.subr.bf16.mxu1 %v14829_v0  ;;  %1049 = vperm.xlu1 %11958, %v931_v4   ;;  %v12414_v4 = vld [vmem:[#allocation6 + $0xac0] ss:$68 sps:$4 sm:$0xff]  }
 0x1b2   :  { %5248 = vmatmul.mubr.bf16.gmra.mrb[28].mxu1 %v12277_v62  ;;  %6018 = vmatmul.mubr.bf16.gmra.mrb[124].mxu0 %v12278_v1  ;;  %v928_v62 = vld [vmem:[%s14823_s2 + $0x50] sm:$0xff]  ;;  %v12336_v1 = vld [vmem:[#allocation6 + $0x460] ss:$68 sps:$4 sm:$0xff]  }
 0x1b3   :  { %5255 = vmatprep.mubr.bf16.mxu1 %v12279_v2  ;;  %6058 = vmatprep.mubr.bf16.mxu0 %v12283_v3  ;;  %v12338_v2 = vld [vmem:[#allocation6 + $0x914] ss:$68 sps:$4 sm:$0xff]   ;;  %v12340_v3 = vld [vmem:[#allocation6 + $0x4ec] ss:$68 sps:$4 sm:$0xff]  }
 0x1b4   :  { %10856 = vmatpush1.bf16.msra.mxu1 %v13101_v6  ;;  %1034 = vperm.xlu0 %11957, %v928_v62   ;;  %v12441_v6 = vld [vmem:[#allocation3 + $0x2e0] sm:$0xff]   ;;  %v936_v62 = vld [vmem:[%s14823_s2 + $0x90] sm:$0xff] }
 0x1b5   :  { %10841 = vmatprep.subr.bf16.mxu1 %v14829_v0 }
 0x1b8   :  { %10857 = vmatpush1.bf16.msra.mxu1 %v13102_v11  ;;  %v933_v11 = vld [vmem:[%s14823_s2 + $0x78] sm:$0xff] }
 0x1b9   :  { %1059 = vperm.xlu1 %11958, %v933_v11  }
 0x1ba   :  { %5256 = vmatmul.mubr.bf16.gmra.mrb[32].mxu1 %v12284_v5  ;;  %6059 = vmatmul.mubr.bf16.vlgmr.msra.gmra.mrb[0].mxu0 %v12281_v7  ;;  %v930_v5 = vld [vmem:[%s14823_s2 + $0x60] sm:$0xff]  ;;  %v12342_v7 = vld [vmem:[#allocation6 + $0x910] ss:$68 sps:$4 sm:$0xff]  }
 0x1bb   :  { %5263 = vmatprep.mubr.bf16.mxu1 %v12286_v8  ;;  %6316 = vmatpush1.bf16.msra.mxu0 %v12285_v9  ;;  %v12343_v8 = vld [vmem:[#allocation6 + $0x4e8] ss:$68 sps:$4 sm:$0xff]   ;;  %v12344_v9 = vld [vmem:[#allocation6 + $0x99c] ss:$68 sps:$4 sm:$0xff]  }
 0x1bc   :  { %6066 = vmatprep.mubr.bf16.mxu0 %v12288_v10  ;;  %6317 = vmatprep.subr.bf16.mxu0 %v14829_v0  ;;  %v12346_v10 = vld [vmem:[#allocation6 + $0x574] ss:$68 sps:$4 sm:$0xff]  }
 0x1bd   :  { %1044 = vperm.xlu0 %11957, %v930_v5   ;;  %v12416_v5 = vld [vmem:[#allocation6 + $0xf74] ss:$68 sps:$4 sm:$0xff]  }
 0x1bf   :  { %6318 = vmatpush1.bf16.msra.mxu0 %v12298_v13  ;;  %v12348_v13 = vld [vmem:[#allocation6 + $0x998] ss:$68 sps:$4 sm:$0xff]  }
 0x1c0   :  { %6319 = vmatprep.subr.bf16.mxu0 %v14829_v0 }
 0x1c2   :  { %5264 = vmatmul.mubr.bf16.gmra.mrb[36].mxu1 %v12290_v12  ;;  %6067 = vmatmul.mubr.bf16.gmra.mrb[4].mxu0 %v12291_v14  ;;  %v932_v12 = vld [vmem:[%s14823_s2 + $0x70] sm:$0xff] }
 0x1c3   :  { %5271 = vmatprep.mubr.bf16.mxu1 %v12292_v15  ;;  %6074 = vmatprep.mubr.bf16.mxu0 %v12294_v16  ;;  %v12349_v14 = vld [vmem:[#allocation6 + $0x570] ss:$68 sps:$4 sm:$0xff]   ;;  %v12351_v15 = vld [vmem:[#allocation6 + $0xa24] ss:$68 sps:$4 sm:$0xff]   ;;  %v12353_v16 = vld [vmem:[#allocation6 + $0x5fc] ss:$68 sps:$4 sm:$0xff]  }
 0x1c4   :  { %6320 = vmatpush1.bf16.msra.mxu0 %v12311_v17  ;;  %1054 = vperm.xlu0 %11957, %v932_v12   ;;  %v12454_v17 = vld [vmem:[#allocation3 + $0x2e8] sm:$0xff]   ;;  %v12420_v12 = vld [vmem:[#allocation6 + $0xf70] ss:$68 sps:$4 sm:$0xff]  }
 0x1c5   :  { %6321 = vmatprep.subr.bf16.mxu0 %v14829_v0 }
 0x1c8   :  { %6322 = vmatpush1.bf16.msra.mxu0 %v12324_v19  ;;  %v12356_v19 = vld [vmem:[#allocation6 + $0x5f8] ss:$68 sps:$4 sm:$0xff]  }
 0x1c9   :  { %6323 = vmatprep.subr.bf16.mxu0 %v14829_v0 }
 0x1ca   :  { %5272 = vmatmul.mubr.bf16.gmra.mrb[40].mxu1 %v12296_v18  ;;  %6075 = vmatmul.mubr.bf16.gmra.mrb[8].mxu0 %v12297_v20  ;;  %v12355_v18 = vld [vmem:[#allocation6 + $0xa20] ss:$68 sps:$4 sm:$0xff]   ;;  %v12357_v20 = vld [vmem:[#allocation6 + $0xaac] ss:$68 sps:$4 sm:$0xff]  }
 0x1cb   :  { %5279 = vmatprep.mubr.bf16.mxu1 %v12299_v21  ;;  %6082 = vmatprep.mubr.bf16.mxu0 %v12301_v22  ;;  %v12359_v21 = vld [vmem:[#allocation6 + $0x684] ss:$68 sps:$4 sm:$0xff]  }
 0x1cc   :  { %6324 = vmatpush1.bf16.msra.mxu0 %v12337_v23  ;;  %v12361_v22 = vld [vmem:[#allocation6 + $0xaa8] ss:$68 sps:$4 sm:$0xff]   ;;  %v12362_v23 = vld [vmem:[#allocation6 + $0x680] ss:$68 sps:$4 sm:$0xff]  }
 0x1cd   :  { %6325 = vmatprep.subr.bf16.mxu0 %v14829_v0 }
 0x1d0   :  { %6326 = vmatpush1.bf16.msra.mxu0 %v12350_v26  ;;  %v12467_v26 = vld [vmem:[#allocation3 + $0x2f0] sm:$0xff]  }
 0x1d1   :  { %6327 = vmatprep.subr.bf16.mxu0 %v14829_v0 }
 0x1d2   :  { %5280 = vmatmul.mubr.bf16.gmra.mrb[44].mxu1 %v12303_v25  ;;  %6083 = vmatmul.mubr.bf16.gmra.mrb[12].mxu0 %v12304_v28  ;;  %v12366_v25 = vld [vmem:[#allocation6 + $0x70c] ss:$68 sps:$4 sm:$0xff]  }
 0x1d3   :  { %5287 = vmatprep.mubr.bf16.mxu1 %v12305_v29  ;;  %6090 = vmatprep.mubr.bf16.mxu0 %v12307_v30  ;;  %v12369_v28 = vld [vmem:[#allocation6 + $0x708] ss:$68 sps:$4 sm:$0xff]   ;;  %v12370_v29 = vld [vmem:[#allocation6 + $0xbbc] ss:$68 sps:$4 sm:$0xff]   ;;  %v12372_v30 = vld [vmem:[#allocation6 + $0x794] ss:$68 sps:$4 sm:$0xff]  }
 0x1d4   :  { %6328 = vmatpush1.bf16.msra.mxu0 %v12363_v31  ;;  %v12374_v31 = vld [vmem:[#allocation6 + $0xbb8] ss:$68 sps:$4 sm:$0xff]  }
 0x1d5   :  { %6329 = vmatprep.subr.bf16.mxu0 %v14829_v0 }
 0x1d8   :  { %6330 = vmatpush1.bf16.msra.mxu0 %v12376_v34  ;;  %v12379_v34 = vld [vmem:[#allocation6 + $0x81c] ss:$68 sps:$4 sm:$0xff]  }
 0x1d9   :  { %6331 = vmatprep.subr.bf16.mxu0 %v14829_v0 }
 0x1da   :  { %5288 = vmatmul.mubr.bf16.gmra.mrb[48].mxu1 %v12309_v33  ;;  %6091 = vmatmul.mubr.bf16.gmra.mrb[16].mxu0 %v12310_v36  ;;  %v12377_v33 = vld [vmem:[#allocation6 + $0xc44] ss:$68 sps:$4 sm:$0xff]  }
 0x1db   :  { %5295 = vmatprep.mubr.bf16.mxu1 %v12312_v37  ;;  %6098 = vmatprep.mubr.bf16.mxu0 %v12314_v38  ;;  %v12381_v36 = vld [vmem:[#allocation6 + $0xc40] ss:$68 sps:$4 sm:$0xff]   ;;  %v12382_v37 = vld [vmem:[#allocation6 + $0x818] ss:$68 sps:$4 sm:$0xff]   ;;  %v12383_v38 = vld [vmem:[#allocation6 + $0xccc] ss:$68 sps:$4 sm:$0xff]  }
 0x1dc   :  { %6332 = vmatpush1.bf16.msra.mxu0 %v12389_v39  ;;  %v12385_v39 = vld [vmem:[#allocation6 + $0x8a4] ss:$68 sps:$4 sm:$0xff]  }
 0x1dd   :  { %6333 = vmatprep.subr.bf16.mxu0 %v14829_v0 }
 0x1e0   :  { %6334 = vmatpush1.bf16.msra.mxu0 %v12402_v43  ;;  %v12392_v43 = vld [vmem:[#allocation6 + $0x92c] ss:$68 sps:$4 sm:$0xff]  }
 0x1e1   :  { %6335 = vmatprep.subr.bf16.mxu0 %v14829_v0 }
 0x1e2   :  { %5296 = vmatmul.mubr.bf16.gmra.mrb[52].mxu1 %v12316_v42  ;;  %6099 = vmatmul.mubr.bf16.gmra.mrb[20].mxu0 %v12317_v44  ;;  %v12390_v42 = vld [vmem:[#allocation6 + $0xd54] ss:$68 sps:$4 sm:$0xff]  }
 0x1e3   :  { %5303 = vmatprep.mubr.bf16.mxu1 %v12318_v45  ;;  %6106 = vmatprep.mubr.bf16.mxu0 %v12320_v46  ;;  %v12394_v44 = vld [vmem:[#allocation6 + $0xd50] ss:$68 sps:$4 sm:$0xff]   ;;  %v12395_v45 = vld [vmem:[#allocation6 + $0x928] ss:$68 sps:$4 sm:$0xff]   ;;  %v12396_v46 = vld [vmem:[#allocation6 + $0xddc] ss:$68 sps:$4 sm:$0xff]  }
 0x1e4   :  { %6336 = vmatpush1.bf16.msra.mxu0 %v12415_v47  ;;  %v12398_v47 = vld [vmem:[#allocation6 + $0x9b4] ss:$68 sps:$4 sm:$0xff]  }
 0x1e5   :  { %6337 = vmatprep.subr.bf16.mxu0 %v14829_v0 }
 0x1e8   :  { %6338 = vmatpush1.bf16.msra.mxu0 %v12428_v56 }
 0x1e9   :  { %6339 = vmatprep.subr.bf16.mxu0 %v14829_v0 }
 0x1ea   :  { %5304 = vmatmul.mubr.bf16.gmra.mrb[56].mxu1 %v12322_v50  ;;  %6107 = vmatmul.mubr.bf16.gmra.mrb[24].mxu0 %v12323_v51  ;;  %v12403_v50 = vld [vmem:[#allocation6 + $0xe64] ss:$68 sps:$4 sm:$0xff]   ;;  %v12405_v51 = vld [vmem:[#allocation6 + $0xa3c] ss:$68 sps:$4 sm:$0xff]  }
 0x1eb   :  { %5311 = vmatprep.mubr.bf16.mxu1 %v12325_v52  ;;  %6114 = vmatprep.mubr.bf16.mxu0 %v12327_v53  ;;  %v934_v52 = vld [vmem:[%s14823_s2 + $0x80] sm:$0xff]  ;;  %v935_v53 = vld [vmem:[%s14823_s2 + $0x88] sm:$0xff] }
 0x1ec   :  { %6340 = vmatpush1.bf16.msra.mxu0 %v12441_v6  ;;  %1064 = vperm.xlu0 %11957, %v934_v52   ;;  %v12446_v52 = vld [vmem:[#allocation6 + $0x4d8] ss:$68 sps:$4 sm:$0xff]  }
 0x1ed   :  { %6341 = vmatprep.subr.bf16.mxu0 %v14829_v0  ;;  %1069 = vperm.xlu1 %11958, %v935_v53  }
 0x1f0   :  { %6342 = vmatpush1.bf16.msra.mxu0 %v12454_v17  ;;  %1074 = vperm.xlu0 %11957, %v936_v62   ;;  %v12424_v17 = vld [vmem:[#allocation6 + $0xbd4] ss:$68 sps:$4 sm:$0xff]  }
 0x1f1   :  { %6343 = vmatprep.subr.bf16.mxu0 %v14829_v0  ;;  %v949_v62 = vld [vmem:[%s14823_s2 + $0xf8] sm:$0xff] }
 0x1f2   :  { %5312 = vmatmul.mubr.bf16.gmra.mrb[60].mxu1 %v12329_v57  ;;  %6115 = vmatmul.mubr.bf16.gmra.mrb[28].mxu0 %v12330_v58  ;;  %v12408_v57 = vld [vmem:[#allocation6 + $0xa38] ss:$68 sps:$4 sm:$0xff]   ;;  %v12409_v58 = vld [vmem:[#allocation6 + $0xeec] ss:$68 sps:$4 sm:$0xff]  }
 0x1f3   :  { %5319 = vmatprep.mubr.bf16.mxu1 %v12331_v59  ;;  %6122 = vmatprep.mubr.bf16.mxu0 %v12333_v60  ;;  %v12411_v60 = vld [vmem:[#allocation6 + $0xac4] ss:$68 sps:$4 sm:$0xff]  }
 0x1f4   :  { %6344 = vmatpush1.bf16.msra.mxu0 %v12467_v26 }
 0x1f5   :  { %6345 = vmatprep.subr.bf16.mxu0 %v14829_v0 }
 0x1f8   :  { %6346 = vmatpush1.bf16.msra.mxu0 %v12480_v35  ;;  %v12437_v35 = vld [vmem:[#allocation6 + $0x454] ss:$68 sps:$4 sm:$0xff]  }
 0x1f9   :  { %6604 = vmatprep.subr.bf16.mxu0 %v14829_v0 }
 0x1fa   :  { %5320 = vmatmul.mubr.bf16.gmra.mrb[64].mxu1 %v12335_v63  ;;  %6123 = vmatmul.mubr.bf16.gmra.mrb[32].mxu0 %v12336_v1  ;;  %v937_v63 = vld [vmem:[%s14823_s2 + $0x98] sm:$0xff] }
 0x1fb   :  { %5327 = vmatprep.mubr.bf16.mxu1 %v12338_v2  ;;  %6130 = vmatprep.mubr.bf16.mxu0 %v12340_v3  ;;  %v12413_v2 = vld [vmem:[#allocation6 + $0xee8] ss:$68 sps:$4 sm:$0xff]  }
 0x1fc   :  { %1079 = vperm.xlu1 %11958, %v937_v63  }
 0x202   :  { %5328 = vmatmul.mubr.bf16.gmra.mrb[68].mxu1 %v12342_v7  ;;  %6131 = vmatmul.mubr.bf16.gmra.mrb[36].mxu0 %v12343_v8  ;;  %v12418_v7 = vld [vmem:[#allocation6 + $0xb4c] ss:$68 sps:$4 sm:$0xff]  }
 0x203   :  { %5335 = vmatprep.mubr.bf16.mxu1 %v12344_v9  ;;  %6138 = vmatprep.mubr.bf16.mxu0 %v12346_v10  ;;  %v938_v9 = vld [vmem:[%s14823_s2 + $0xa0] sm:$0xff]  ;;  %v939_v10 = vld [vmem:[%s14823_s2 + $0xa8] sm:$0xff] }
 0x204   :  { %1084 = vperm.xlu0 %11957, %v938_v9   ;;  %1089 = vperm.xlu1 %11958, %v939_v10   ;;  %v950_v10 = vld [vmem:[%s14823_s2 + $0x100] sm:$0xff] }
 0x20a   :  { %5336 = vmatmul.mubr.bf16.gmra.mrb[72].mxu1 %v12348_v13  ;;  %6139 = vmatmul.mubr.bf16.gmra.mrb[40].mxu0 %v12349_v14  ;;  %v12421_v14 = vld [vmem:[#allocation6 + $0xb48] ss:$68 sps:$4 sm:$0xff]  }
 0x20b   :  { %5343 = vmatprep.mubr.bf16.mxu1 %v12351_v15  ;;  %6146 = vmatprep.mubr.bf16.mxu0 %v12353_v16  ;;  %v12422_v15 = vld [vmem:[#allocation6 + $0xffc] ss:$68 sps:$4 sm:$0xff]  }
 0x212   :  { %5344 = vmatmul.mubr.bf16.gmra.mrb[76].mxu1 %v12355_v18  ;;  %6147 = vmatmul.mubr.bf16.gmra.mrb[44].mxu0 %v12356_v19  ;;  %v940_v19 = vld [vmem:[%s14823_s2 + $0xb0] sm:$0xff] }
 0x213   :  { %5351 = vmatprep.mubr.bf16.mxu1 %v12357_v20  ;;  %6154 = vmatprep.mubr.bf16.mxu0 %v12359_v21  ;;  %v941_v20 = vld [vmem:[%s14823_s2 + $0xb8] sm:$0xff] }
 0x214   :  { %1094 = vperm.xlu0 %11957, %v940_v19   ;;  %1099 = vperm.xlu1 %11958, %v941_v20   ;;  %v953_v19 = vld [vmem:[%s14823_s2 + $0x118] sm:$0xff]  ;;  %v12465_v20 = vld [vmem:[#allocation6 + $0x670] ss:$68 sps:$4 sm:$0xff]  }
 0x21a   :  { %5352 = vmatmul.mubr.bf16.gmra.mrb[80].mxu1 %v12361_v22  ;;  %6155 = vmatmul.mubr.bf16.gmra.mrb[48].mxu0 %v12362_v23  ;;  %v12426_v22 = vld [vmem:[#allocation6 + $0xff8] ss:$68 sps:$4 sm:$0xff]  }
 0x21b   :  { %5359 = vmatprep.mubr.bf16.mxu1 %v12364_v24  ;;  %6162 = vmatprep.mubr.bf16.mxu0 %v12366_v25  ;;  %v12427_v24 = vld [vmem:[#allocation6 + $0xbd0] ss:$68 sps:$4 sm:$0xff]   ;;  %v12429_v25 = vld [vmem:[#allocation6 + $0x1084] ss:$68 sps:$4 sm:$0xff]  }
 0x222   :  { %5360 = vmatmul.mubr.bf16.gmra.mrb[84].mxu1 %v12368_v27  ;;  %6163 = vmatmul.mubr.bf16.gmra.mrb[52].mxu0 %v12369_v28  ;;  %v12431_v27 = vld [vmem:[#allocation6 + $0xc5c] ss:$68 sps:$4 sm:$0xff]  }
 0x223   :  { %5367 = vmatprep.mubr.bf16.mxu1 %v12370_v29  ;;  %6170 = vmatprep.mubr.bf16.mxu0 %v12372_v30  ;;  %v942_v29 = vld [vmem:[%s14823_s2 + $0xc0] sm:$0xff]  ;;  %v943_v30 = vld [vmem:[%s14823_s2 + $0xc8] sm:$0xff] }
 0x224   :  { %1104 = vperm.xlu0 %11957, %v942_v29   ;;  %1109 = vperm.xlu1 %11958, %v943_v30   ;;  %v12473_v29 = vld [vmem:[#allocation6 + $0xf88] ss:$68 sps:$4 sm:$0xff]  }
 0x225   :  { %v12474_v30 = vld [vmem:[#allocation6 + $0x784] ss:$68 sps:$4 sm:$0xff]  }
 0x22a   :  { %5368 = vmatmul.mubr.bf16.gmra.mrb[88].mxu1 %v12374_v31  ;;  %6171 = vmatmul.mubr.bf16.gmra.mrb[56].mxu0 %v12375_v32  ;;  %v12433_v32 = vld [vmem:[#allocation6 + $0x1080] ss:$68 sps:$4 sm:$0xff]  }
 0x22b   :  { %5375 = vmatprep.mubr.bf16.mxu1 %v12377_v33  ;;  %6178 = vmatprep.mubr.bf16.mxu0 %v12379_v34  ;;  %v12434_v34 = vld [vmem:[#allocation6 + $0xc58] ss:$68 sps:$4 sm:$0xff]  }
 0x232   :  { %5376 = vmatmul.mubr.bf16.gmra.mrb[92].mxu1 %v12381_v36  ;;  %6179 = vmatmul.mubr.bf16.gmra.mrb[60].mxu0 %v12382_v37  ;;  %v12438_v37 = vld [vmem:[#allocation6 + $0xce4] ss:$68 sps:$4 sm:$0xff]  }
 0x233   :  { %5383 = vmatprep.mubr.bf16.mxu1 %v12383_v38  ;;  %6186 = vmatprep.mubr.bf16.mxu0 %v12385_v39  ;;  %v944_v39 = vld [vmem:[%s14823_s2 + $0xd0] sm:$0xff] }
 0x234   :  { %1114 = vperm.xlu0 %11957, %v944_v39   ;;  %v12483_v39 = vld [vmem:[#allocation6 + $0x109c] ss:$68 sps:$4 sm:$0xff]  }
 0x23a   :  { %5384 = vmatmul.mubr.bf16.gmra.mrb[96].mxu1 %v12387_v40  ;;  %6187 = vmatmul.mubr.bf16.gmra.mrb[64].mxu0 %v12388_v41  ;;  %v945_v40 = vld [vmem:[%s14823_s2 + $0xd8] sm:$0xff] }
 0x23b   :  { %5391 = vmatprep.mubr.bf16.mxu1 %v12390_v42  ;;  %6194 = vmatprep.mubr.bf16.mxu0 %v12392_v43  ;;  %v12435_v42 = vld [vmem:[#allocation6 + $0x450] ss:$68 sps:$4 sm:$0xff]  }
 0x23c   :  { %1119 = vperm.xlu1 %11958, %v945_v40   ;;  %v958_v40 = vld [vmem:[%s14823_s2 + $0x140] sm:$0xff] }
 0x242   :  { %5392 = vmatmul.mubr.bf16.gmra.mrb[100].mxu1 %v12394_v44  ;;  %6195 = vmatmul.mubr.bf16.gmra.mrb[68].mxu0 %v12395_v45  ;;  %v12440_v44 = vld [vmem:[#allocation6 + $0xce0] ss:$68 sps:$4 sm:$0xff]  }
 0x243   :  { %5399 = vmatprep.mubr.bf16.mxu1 %v12396_v46  ;;  %6202 = vmatprep.mubr.bf16.mxu0 %v12398_v47  ;;  %v12442_v45 = vld [vmem:[#allocation6 + $0x4dc] ss:$68 sps:$4 sm:$0xff]   ;;  %v12444_v47 = vld [vmem:[#allocation6 + $0xd6c] ss:$68 sps:$4 sm:$0xff]  }
 0x24a   :  { %5400 = vmatmul.mubr.bf16.gmra.mrb[104].mxu1 %v12400_v48  ;;  %6203 = vmatmul.mubr.bf16.gmra.mrb[72].mxu0 %v12401_v49  ;;  %v946_v49 = vld [vmem:[%s14823_s2 + $0xe0] sm:$0xff] }
 0x24b   :  { %5407 = vmatprep.mubr.bf16.mxu1 %v12403_v50  ;;  %6210 = vmatprep.mubr.bf16.mxu0 %v12405_v51  ;;  %v947_v50 = vld [vmem:[%s14823_s2 + $0xe8] sm:$0xff] }
 0x24c   :  { %1124 = vperm.xlu0 %11957, %v946_v49   ;;  %1129 = vperm.xlu1 %11958, %v947_v50   ;;  %v961_v49 = vld [vmem:[%s14823_s2 + $0x158] sm:$0xff]  ;;  %v12492_v50 = vld [vmem:[#allocation6 + $0x890] ss:$68 sps:$4 sm:$0xff]  }
 0x24d   :  { %v13453_v54 = vpop.f32.mrb[0].mxu1 }
 0x24e   :  { %v5195_v56 = vpop.f32.mrb[1].mxu1 }
 0x24f   :  { %v13455_v59 = vpop.f32.mrb[2].mxu1  ;;  %v12448_v56 = vld [vmem:[#allocation6 + $0x564] ss:$68 sps:$4 sm:$0xff]  }
 0x250   :  { %v5198_v61 = vpop.f32.mrb[3].mxu1  ;;  %1139 = vperm.xlu1 %11958, %v949_v62   ;;  %v12498_v62 = vld [vmem:[#allocation6 + $0x918] ss:$68 sps:$4 sm:$0xff]  }
 0x251   :  { %v948_v61 = vld [vmem:[%s14823_s2 + $0xf0] sm:$0xff] }
 0x252   :  { %5408 = vmatmul.mubr.bf16.gmra.mrb[108].mxu1 %v12407_v55  ;;  %6211 = vmatmul.mubr.bf16.gmra.mrb[76].mxu0 %v12408_v57  ;;  %v12447_v55 = vld [vmem:[#allocation6 + $0xd68] ss:$68 sps:$4 sm:$0xff]  }
 0x253   :  { %5415 = vmatprep.mubr.bf16.mxu1 %v12409_v58  ;;  %6218 = vmatprep.mubr.bf16.mxu0 %v12411_v60  ;;  %v12450_v58 = vld [vmem:[#allocation6 + $0xdf4] ss:$68 sps:$4 sm:$0xff]  }
 0x254   :  { %1134 = vperm.xlu0 %11957, %v948_v61   ;;  %v12506_v61 = vld [vmem:[#allocation3 + $0x308] sm:$0xff]  }
 0x255   :  { %v13463_v1 = vpop.f32.mrb[4].mxu1 }
 0x256   :  { %v5203_v3 = vpop.f32.mrb[5].mxu1 }
 0x257   :  { %v13465_v6 = vpop.f32.mrb[6].mxu1 }
 0x258   :  { %v5206_v8 = vpop.f32.mrb[7].mxu1  ;;  %1144 = vperm.xlu0 %11957, %v950_v10   ;;  %v12532_v10 = vld [vmem:[#allocation3 + $0x318] sm:$0xff]  }
 0x259   :  { %v12457_v8 = vld [vmem:[#allocation6 + $0xe7c] ss:$68 sps:$4 sm:$0xff]  }
 0x25a   :  { %5416 = vmatmul.mubr.bf16.gmra.mrb[112].mxu1 %v12413_v2  ;;  %6219 = vmatmul.mubr.bf16.gmra.mrb[80].mxu0 %v12414_v4  ;;  %v12452_v2 = vld [vmem:[#allocation6 + $0x560] ss:$68 sps:$4 sm:$0xff]   ;;  %v12453_v4 = vld [vmem:[#allocation6 + $0xdf0] ss:$68 sps:$4 sm:$0xff]  }
 0x25b   :  { %5423 = vmatprep.mubr.bf16.mxu1 %v12416_v5  ;;  %6226 = vmatprep.mubr.bf16.mxu0 %v12418_v7  ;;  %v12455_v5 = vld [vmem:[#allocation6 + $0x5ec] ss:$68 sps:$4 sm:$0xff]  }
 0x25d   :  { %v13473_v11 = vpop.f32.mrb[8].mxu1 }
 0x25e   :  { %v5211_v13 = vpop.f32.mrb[9].mxu1 }
 0x25f   :  { %v13475_v16 = vpop.f32.mrb[10].mxu1  ;;  %v12459_v13 = vld [vmem:[#allocation6 + $0x5e8] ss:$68 sps:$4 sm:$0xff]  }
 0x260   :  { %v5214_v18 = vpop.f32.mrb[11].mxu1 }
 0x261   :  { %v952_v18 = vld [vmem:[%s14823_s2 + $0x110] sm:$0xff] }
 0x262   :  { %5424 = vmatmul.mubr.bf16.gmra.mrb[116].mxu1 %v12420_v12  ;;  %6227 = vmatmul.mubr.bf16.gmra.mrb[84].mxu0 %v12421_v14  ;;  %v951_v12 = vld [vmem:[%s14823_s2 + $0x108] sm:$0xff]  ;;  %v12460_v14 = vld [vmem:[#allocation6 + $0xe78] ss:$68 sps:$4 sm:$0xff]  }
 0x263   :  { %5431 = vmatprep.mubr.bf16.mxu1 %v12422_v15  ;;  %6234 = vmatprep.mubr.bf16.mxu0 %v12424_v17  ;;  %v12461_v15 = vld [vmem:[#allocation6 + $0x674] ss:$68 sps:$4 sm:$0xff]   ;;  %v12463_v17 = vld [vmem:[#allocation6 + $0xf04] ss:$68 sps:$4 sm:$0xff]  }
 0x264   :  { %1149 = vperm.xlu1 %11958, %v951_v12   ;;  %1154 = vperm.xlu0 %11957, %v952_v18   ;;  %v12504_v12 = vld [vmem:[#allocation6 + $0x9a0] ss:$68 sps:$4 sm:$0xff]   ;;  %v12558_v18 = vld [vmem:[#allocation3 + $0x328] sm:$0xff]  }
 0x265   :  { %v13483_v21 = vpop.f32.mrb[12].mxu1 }
 0x266   :  { %v5219_v23 = vpop.f32.mrb[13].mxu1 }
 0x267   :  { %v13485_v26 = vpop.f32.mrb[14].mxu1  ;;  %v12468_v23 = vld [vmem:[#allocation6 + $0x6fc] ss:$68 sps:$4 sm:$0xff]  }
 0x268   :  { %v5222_v28 = vpop.f32.mrb[15].mxu1  ;;  %1159 = vperm.xlu1 %11958, %v953_v19   ;;  %v966_v19 = vld [vmem:[%s14823_s2 + $0x180] sm:$0xff] }
 0x269   :  { %v12472_v28 = vld [vmem:[#allocation6 + $0x6f8] ss:$68 sps:$4 sm:$0xff]  }
 0x26a   :  { %5432 = vmatmul.mubr.bf16.gmra.mrb[120].mxu1 %v12426_v22  ;;  %6235 = vmatmul.mubr.bf16.gmra.mrb[88].mxu0 %v12427_v24  ;;  %v12466_v22 = vld [vmem:[#allocation6 + $0xf00] ss:$68 sps:$4 sm:$0xff]   ;;  %v12470_v24 = vld [vmem:[#allocation6 + $0xf8c] ss:$68 sps:$4 sm:$0xff]  }
 0x26b   :  { %5439 = vmatprep.mubr.bf16.mxu1 %v12429_v25  ;;  %6242 = vmatprep.mubr.bf16.mxu0 %v12431_v27  ;;  %v954_v25 = vld [vmem:[%s14823_s2 + $0x120] sm:$0xff]  ;;  %v955_v27 = vld [vmem:[%s14823_s2 + $0x128] sm:$0xff] }
 0x26c   :  { %1164 = vperm.xlu0 %11957, %v954_v25   ;;  %1169 = vperm.xlu1 %11958, %v955_v27   ;;  %v12515_v25 = vld [vmem:[#allocation6 + $0x24c] ss:$68 sps:$4 sm:$0xff]  }
 0x26d   :  { %v13493_v31 = vpop.f32.mrb[16].mxu1  ;;  %v12571_v27 = vld [vmem:[#allocation3 + $0x330] sm:$0xff]  }
 0x26e   :  { %v5227_v33 = vpop.f32.mrb[17].mxu1 }
 0x26f   :  { %v13495_v36 = vpop.f32.mrb[18].mxu1  ;;  %v956_v33 = vld [vmem:[%s14823_s2 + $0x130] sm:$0xff] }
 0x270   :  { %v5230_v38 = vpop.f32.mrb[19].mxu1  ;;  %1174 = vperm.xlu0 %11957, %v956_v33   ;;  %v12520_v33 = vld [vmem:[#allocation6 + $0xb3c] ss:$68 sps:$4 sm:$0xff]  }
 0x271   :  { %v12481_v38 = vld [vmem:[#allocation6 + $0x80c] ss:$68 sps:$4 sm:$0xff]  }
 0x272   :  { %5440 = vmatmul.mubr.bf16.gmra.mrb[124].mxu1 %v12433_v32  ;;  %6243 = vmatmul.mubr.bf16.gmra.mrb[92].mxu0 %v12434_v34  ;;  %v12476_v32 = vld [vmem:[#allocation6 + $0x1014] ss:$68 sps:$4 sm:$0xff]  }
 0x273   :  { %5544 = vmatprep.mubr.bf16.mxu1 %v12437_v35  ;;  %6250 = vmatprep.mubr.bf16.mxu0 %v12438_v37  ;;  %v957_v34 = vld [vmem:[%s14823_s2 + $0x138] sm:$0xff]  ;;  %v12478_v35 = vld [vmem:[#allocation6 + $0x780] ss:$68 sps:$4 sm:$0xff]   ;;  %v12479_v37 = vld [vmem:[#allocation6 + $0x1010] ss:$68 sps:$4 sm:$0xff]  }
 0x274   :  { %1179 = vperm.xlu1 %11958, %v957_v34   ;;  %1184 = vperm.xlu0 %11957, %v958_v40   ;;  %v969_v34 = vld [vmem:[%s14823_s2 + $0x198] sm:$0xff] }
 0x275   :  { %v13503_v41 = vpop.f32.mrb[20].mxu1  ;;  %v12524_v40 = vld [vmem:[#allocation6 + $0xb38] ss:$68 sps:$4 sm:$0xff]  }
 0x276   :  { %v5235_v43 = vpop.f32.mrb[21].mxu1 }
 0x277   :  { %v13505_v46 = vpop.f32.mrb[22].mxu1  ;;  %v12485_v43 = vld [vmem:[#allocation6 + $0x808] ss:$68 sps:$4 sm:$0xff]  }
 0x278   :  { %v5238_v48 = vpop.f32.mrb[23].mxu1 }
 0x279   :  { %v960_v48 = vld [vmem:[%s14823_s2 + $0x150] sm:$0xff] }
 0x27a   :  { %5545 = vmatmul.mubr.bf16.vlgmr.msra.gmra.mrb[32].mxu1 %v12435_v42  ;;  %6251 = vmatmul.mubr.bf16.gmra.mrb[96].mxu0 %v12440_v44  ;;  %v959_v42 = vld [vmem:[%s14823_s2 + $0x148] sm:$0xff]  ;;  %v12486_v44 = vld [vmem:[#allocation6 + $0x1098] ss:$68 sps:$4 sm:$0xff]  }
 0x27b   :  { %5552 = vmatprep.mubr.bf16.mxu1 %v12442_v45  ;;  %6258 = vmatprep.mubr.bf16.mxu0 %v12444_v47  ;;  %v12487_v45 = vld [vmem:[#allocation6 + $0x894] ss:$68 sps:$4 sm:$0xff]   ;;  %v12491_v47 = vld [vmem:[#allocation6 + $0x2c] ss:$68 sps:$4 sm:$0xff]  }
 0x27c   :  { %1189 = vperm.xlu1 %11958, %v959_v42   ;;  %1194 = vperm.xlu0 %11957, %v960_v48   ;;  %v12525_v42 = vld [vmem:[#allocation6 + $0x2d0] ss:$68 sps:$4 sm:$0xff]  }
 0x27d   :  { %v13513_v51 = vpop.f32.mrb[24].mxu1  ;;  %v972_v48 = vld [vmem:[%s14823_s2 + $0x1b0] sm:$0xff] }
 0x27e   :  { %v5243_v53 = vpop.f32.mrb[25].mxu1 }
 0x27f   :  { %v13515_v57 = vpop.f32.mrb[26].mxu1  ;;  %v12494_v53 = vld [vmem:[#allocation6 + $0x91c] ss:$68 sps:$4 sm:$0xff]  }
 0x280   :  { %v5246_v60 = vpop.f32.mrb[27].mxu1  ;;  %1199 = vperm.xlu1 %11958, %v961_v49   ;;  %v12530_v49 = vld [vmem:[#allocation6 + $0xbc0] ss:$68 sps:$4 sm:$0xff]  }
 0x281   :  { %v963_v60 = vld [vmem:[%s14823_s2 + $0x168] sm:$0xff] }
 0x282   :  { %5553 = vmatmul.mubr.bf16.gmra.mrb[36].mxu1 %v12446_v52  ;;  %6259 = vmatmul.mubr.bf16.gmra.mrb[100].mxu0 %v12447_v55  ;;  %v12489_v52 = vld [vmem:[#allocation6 + $0x28] ss:$68 sps:$4 sm:$0xff]   ;;  %v12493_v55 = vld [vmem:[#allocation3 + $0x300] sm:$0xff]  }
 0x283   :  { %5560 = vmatprep.mubr.bf16.mxu1 %v12448_v56  ;;  %6266 = vmatprep.mubr.bf16.mxu0 %v12450_v58  ;;  %v12496_v56 = vld [vmem:[#allocation6 + $0xb4] ss:$68 sps:$4 sm:$0xff]   ;;  %v962_v58 = vld [vmem:[%s14823_s2 + $0x160] sm:$0xff] }
 0x284   :  { %1204 = vperm.xlu0 %11957, %v962_v58   ;;  %1209 = vperm.xlu1 %11958, %v963_v60   ;;  %v12537_v58 = vld [vmem:[#allocation6 + $0xc48] ss:$68 sps:$4 sm:$0xff]   ;;  %v12538_v60 = vld [vmem:[#allocation6 + $0x3e0] ss:$68 sps:$4 sm:$0xff]  }
 0x285   :  { %v13523_v63 = vpop.f32.mrb[28].mxu1 }
 0x286   :  { %v5251_v3 = vpop.f32.mrb[29].mxu1 }
 0x287   :  { %v13525_v7 = vpop.f32.mrb[30].mxu1  ;;  %v12500_v3 = vld [vmem:[#allocation6 + $0x9a4] ss:$68 sps:$4 sm:$0xff]  }
 0x288   :  { %v5254_v9 = vpop.f32.mrb[31].mxu1 }
 0x289   :  { %v965_v9 = vld [vmem:[%s14823_s2 + $0x178] sm:$0xff] }
 0x28a   :  { %5561 = vmatmul.mubr.bf16.gmra.mrb[40].mxu1 %v12452_v2  ;;  %6267 = vmatmul.mubr.bf16.gmra.mrb[104].mxu0 %v12453_v4  ;;  %v12499_v2 = vld [vmem:[#allocation6 + $0xb0] ss:$68 sps:$4 sm:$0xff]   ;;  %v12502_v4 = vld [vmem:[#allocation6 + $0x13c] ss:$68 sps:$4 sm:$0xff]  }
 0x28b   :  { %5568 = vmatprep.mubr.bf16.mxu1 %v12455_v5  ;;  %6274 = vmatprep.mubr.bf16.mxu0 %v12457_v8  ;;  %v12519_v5 = vld [vmem:[#allocation3 + $0x310] sm:$0xff]  }
 0x28c   :  { %v964_v8 = vld [vmem:[%s14823_s2 + $0x170] sm:$0xff]  ;;  %1219 = vperm.xlu1 %11958, %v965_v9   ;;  %v12546_v9 = vld [vmem:[#allocation6 + $0xd5c] ss:$68 sps:$4 sm:$0xff]  }
 0x28d   :  { %1214 = vperm.xlu0 %11957, %v964_v8   ;;  %v12544_v8 = vld [vmem:[#allocation6 + $0x468] ss:$68 sps:$4 sm:$0xff]  }
 0x291   :  { %1224 = vperm.xlu0 %11957, %v966_v19   ;;  %v979_v19 = vld [vmem:[%s14823_s2 + $0x1e8] sm:$0xff] }
 0x292   :  { %5569 = vmatmul.mubr.bf16.gmra.mrb[44].mxu1 %v12459_v13  ;;  %6275 = vmatmul.mubr.bf16.gmra.mrb[108].mxu0 %v12460_v14  ;;  %v12505_v13 = vld [vmem:[#allocation6 + $0x138] ss:$68 sps:$4 sm:$0xff]   ;;  %v12507_v14 = vld [vmem:[#allocation6 + $0xa2c] ss:$68 sps:$4 sm:$0xff]  }
 0x293   :  { %5576 = vmatprep.mubr.bf16.mxu1 %v12461_v15  ;;  %6282 = vmatprep.mubr.bf16.mxu0 %v12463_v17  ;;  %v12509_v15 = vld [vmem:[#allocation6 + $0x1c4] ss:$68 sps:$4 sm:$0xff]  }
 0x294   :  { %v12545_v17 = vld [vmem:[#allocation3 + $0x320] sm:$0xff]  }
 0x29a   :  { %5577 = vmatmul.mubr.bf16.gmra.mrb[48].mxu1 %v12465_v20  ;;  %6283 = vmatmul.mubr.bf16.gmra.mrb[112].mxu0 %v12466_v22  ;;  %v12511_v20 = vld [vmem:[#allocation6 + $0xa28] ss:$68 sps:$4 sm:$0xff]   ;;  %v12512_v22 = vld [vmem:[#allocation6 + $0x1c0] ss:$68 sps:$4 sm:$0xff]  }
 0x29b   :  { %5584 = vmatprep.mubr.bf16.mxu1 %v12468_v23  ;;  %6290 = vmatprep.mubr.bf16.mxu0 %v12470_v24  ;;  %v12513_v23 = vld [vmem:[#allocation6 + $0xab4] ss:$68 sps:$4 sm:$0xff]   ;;  %v967_v24 = vld [vmem:[%s14823_s2 + $0x188] sm:$0xff] }
 0x29c   :  { %1229 = vperm.xlu1 %11958, %v967_v24   ;;  %v12557_v24 = vld [vmem:[#allocation6 + $0x578] ss:$68 sps:$4 sm:$0xff]  }
 0x2a0   :  { %1239 = vperm.xlu1 %11958, %v969_v34   ;;  %v12629_v34 = vld [vmem:[#allocation3 + $0x368] sm:$0xff]  }
 0x2a2   :  { %5585 = vmatmul.mubr.bf16.gmra.mrb[52].mxu1 %v12472_v28  ;;  %6291 = vmatmul.mubr.bf16.gmra.mrb[116].mxu0 %v12473_v29  ;;  %v12584_v28 = vld [vmem:[#allocation3 + $0x338] sm:$0xff]   ;;  %v968_v29 = vld [vmem:[%s14823_s2 + $0x190] sm:$0xff] }
 0x2a3   :  { %5592 = vmatprep.mubr.bf16.mxu1 %v12474_v30  ;;  %6298 = vmatprep.mubr.bf16.mxu0 %v12476_v32  ;;  %v12517_v30 = vld [vmem:[#allocation6 + $0xab0] ss:$68 sps:$4 sm:$0xff]   ;;  %v12518_v32 = vld [vmem:[#allocation6 + $0x248] ss:$68 sps:$4 sm:$0xff]  }
 0x2a4   :  { %1234 = vperm.xlu0 %11957, %v968_v29   ;;  %v12563_v29 = vld [vmem:[#allocation6 + $0xe68] ss:$68 sps:$4 sm:$0xff]  }
 0x2aa   :  { %5593 = vmatmul.mubr.bf16.gmra.mrb[56].mxu1 %v12478_v35  ;;  %6299 = vmatmul.mubr.bf16.gmra.mrb[120].mxu0 %v12479_v37  ;;  %v12522_v35 = vld [vmem:[#allocation6 + $0x2d4] ss:$68 sps:$4 sm:$0xff]   ;;  %v12594_v37 = vld [vmem:[#allocation3 + $0x340] sm:$0xff]  }
 0x2ab   :  { %5600 = vmatprep.mubr.bf16.mxu1 %v12481_v38  ;;  %6306 = vmatprep.mubr.bf16.mxu0 %v12483_v39  ;;  %v12601_v38 = vld [vmem:[#allocation3 + $0x348] sm:$0xff]   ;;  %v970_v39 = vld [vmem:[%s14823_s2 + $0x1a0] sm:$0xff] }
 0x2ac   :  { %1244 = vperm.xlu0 %11957, %v970_v39   ;;  %v12574_v39 = vld [vmem:[#allocation6 + $0x714] ss:$68 sps:$4 sm:$0xff]  }
 0x2b0   :  { %1254 = vperm.xlu0 %11957, %v972_v48   ;;  %v12583_v48 = vld [vmem:[#allocation6 + $0x798] ss:$68 sps:$4 sm:$0xff]  }
 0x2b2   :  { %5601 = vmatmul.mubr.bf16.gmra.mrb[60].mxu1 %v12485_v43  ;;  %6307 = vmatmul.mubr.bf16.gmra.mrb[124].mxu0 %v12486_v44  ;;  %v12526_v43 = vld [vmem:[#allocation6 + $0xbc4] ss:$68 sps:$4 sm:$0xff]  }
 0x2b3   :  { %5608 = vmatprep.mubr.bf16.mxu1 %v12487_v45  ;;  %6347 = vmatprep.mubr.bf16.mxu0 %v12491_v47  ;;  %v971_v44 = vld [vmem:[%s14823_s2 + $0x1a8] sm:$0xff]  ;;  %v12528_v45 = vld [vmem:[#allocation6 + $0x35c] ss:$68 sps:$4 sm:$0xff]   ;;  %v12608_v47 = vld [vmem:[#allocation3 + $0x350] sm:$0xff]  }
 0x2b4   :  { %1249 = vperm.xlu1 %11958, %v971_v44   ;;  %v12580_v44 = vld [vmem:[#allocation6 + $0x79c] ss:$68 sps:$4 sm:$0xff]  }
 0x2ba   :  { %5609 = vmatmul.mubr.bf16.gmra.mrb[64].mxu1 %v12492_v50  ;;  %6348 = vmatmul.mubr.bf16.vlgmr.msra.gmra.mrb[0].mxu0 %v12489_v52  ;;  %v12531_v50 = vld [vmem:[#allocation6 + $0x358] ss:$68 sps:$4 sm:$0xff]   ;;  %v12533_v52 = vld [vmem:[#allocation6 + $0xc4c] ss:$68 sps:$4 sm:$0xff]  }
 0x2bb   :  { %5616 = vmatprep.mubr.bf16.mxu1 %v12494_v53  ;;  %6605 = vmatpush1.bf16.msra.mxu0 %v12493_v55  ;;  %v973_v53 = vld [vmem:[%s14823_s2 + $0x1b8] sm:$0xff]  ;;  %v12535_v55 = vld [vmem:[#allocation6 + $0x3e4] ss:$68 sps:$4 sm:$0xff]  }
 0x2bc   :  { %6355 = vmatprep.mubr.bf16.mxu0 %v12496_v56  ;;  %6606 = vmatprep.subr.bf16.mxu0 %v14829_v0  ;;  %v974_v56 = vld [vmem:[%s14823_s2 + $0x1c0] sm:$0xff] }
 0x2bd   :  { %1259 = vperm.xlu1 %11958, %v973_v53   ;;  %1264 = vperm.xlu0 %11957, %v974_v56   ;;  %v12590_v53 = vld [vmem:[#allocation6 + $0x820] ss:$68 sps:$4 sm:$0xff]   ;;  %v12643_v56 = vld [vmem:[#allocation3 + $0x378] sm:$0xff]  }
 0x2bf   :  { %6607 = vmatpush1.bf16.msra.mxu0 %v12506_v61  ;;  %v12539_v61 = vld [vmem:[#allocation6 + $0xcd4] ss:$68 sps:$4 sm:$0xff]  }
 0x2c0   :  { %6608 = vmatprep.subr.bf16.mxu0 %v14829_v0 }
 0x2c2   :  { %5617 = vmatmul.mubr.bf16.gmra.mrb[68].mxu1 %v12498_v62  ;;  %6356 = vmatmul.mubr.bf16.gmra.mrb[4].mxu0 %v12499_v2  ;;  %v12615_v62 = vld [vmem:[#allocation3 + $0x358] sm:$0xff]   ;;  %v975_v2 = vld [vmem:[%s14823_s2 + $0x1c8] sm:$0xff] }
 0x2c3   :  { %5624 = vmatprep.mubr.bf16.mxu1 %v12500_v3  ;;  %6363 = vmatprep.mubr.bf16.mxu0 %v12502_v4  ;;  %v12541_v3 = vld [vmem:[#allocation6 + $0x46c] ss:$68 sps:$4 sm:$0xff]  }
 0x2c4   :  { %6609 = vmatpush1.bf16.msra.mxu0 %v12519_v5  ;;  %1269 = vperm.xlu1 %11958, %v975_v2   ;;  %v976_v4 = vld [vmem:[%s14823_s2 + $0x1d0] sm:$0xff]  ;;  %v12600_v2 = vld [vmem:[#allocation6 + $0x9b8] ss:$68 sps:$4 sm:$0xff]  }
 0x2c5   :  { %6610 = vmatprep.subr.bf16.mxu0 %v14829_v0  ;;  %v12543_v5 = vld [vmem:[#allocation6 + $0xcd0] ss:$68 sps:$4 sm:$0xff]   ;;  %1274 = vperm.xlu0 %11957, %v976_v4  }
 0x2c8   :  { %6611 = vmatpush1.bf16.msra.mxu0 %v12532_v10  ;;  %v977_v10 = vld [vmem:[%s14823_s2 + $0x1d8] sm:$0xff] }
 0x2c9   :  { %6612 = vmatprep.subr.bf16.mxu0 %v14829_v0  ;;  %1279 = vperm.xlu1 %11958, %v977_v10  }
 0x2ca   :  { %5625 = vmatmul.mubr.bf16.gmra.mrb[72].mxu1 %v12504_v12  ;;  %6364 = vmatmul.mubr.bf16.gmra.mrb[8].mxu0 %v12505_v13  ;;  %v12548_v12 = vld [vmem:[#allocation6 + $0x4f4] ss:$68 sps:$4 sm:$0xff]   ;;  %v978_v13 = vld [vmem:[%s14823_s2 + $0x1e0] sm:$0xff] }
 0x2cb   :  { %5632 = vmatprep.mubr.bf16.mxu1 %v12507_v14  ;;  %6371 = vmatprep.mubr.bf16.mxu0 %v12509_v15  ;;  %v12550_v14 = vld [vmem:[#allocation6 + $0xd58] ss:$68 sps:$4 sm:$0xff]   ;;  %v12551_v15 = vld [vmem:[#allocation6 + $0x4f0] ss:$68 sps:$4 sm:$0xff]  }
 0x2cc   :  { %6613 = vmatpush1.bf16.msra.mxu0 %v12545_v17  ;;  %1284 = vperm.xlu0 %11957, %v978_v13   ;;  %v12552_v17 = vld [vmem:[#allocation6 + $0xde4] ss:$68 sps:$4 sm:$0xff]  }
 0x2cd   :  { %6614 = vmatprep.subr.bf16.mxu0 %v14829_v0  ;;  %1289 = vperm.xlu1 %11958, %v979_v19   ;;  %v12609_v19 = vld [vmem:[#allocation6 + $0xb54] ss:$68 sps:$4 sm:$0xff]  }
 0x2d0   :  { %6615 = vmatpush1.bf16.msra.mxu0 %v12558_v18  ;;  %v12622_v18 = vld [vmem:[#allocation3 + $0x360] sm:$0xff]  }
 0x2d1   :  { %6616 = vmatprep.subr.bf16.mxu0 %v14829_v0 }
 0x2d2   :  { %5633 = vmatmul.mubr.bf16.gmra.mrb[76].mxu1 %v12511_v20  ;;  %6372 = vmatmul.mubr.bf16.gmra.mrb[12].mxu0 %v12512_v22  ;;  %v12554_v20 = vld [vmem:[#allocation6 + $0x57c] ss:$68 sps:$4 sm:$0xff]   ;;  %v980_v22 = vld [vmem:[%s14823_s2 + $0x1f0] sm:$0xff] }
 0x2d3   :  { %5640 = vmatprep.mubr.bf16.mxu1 %v12513_v23  ;;  %6379 = vmatprep.mubr.bf16.mxu0 %v12515_v25  ;;  %v12556_v23 = vld [vmem:[#allocation6 + $0xde0] ss:$68 sps:$4 sm:$0xff]   ;;  %v12559_v25 = vld [vmem:[#allocation6 + $0xe6c] ss:$68 sps:$4 sm:$0xff]  }
 0x2d4   :  { %6617 = vmatpush1.bf16.msra.mxu0 %v12571_v27  ;;  %1294 = vperm.xlu0 %11957, %v980_v22   ;;  %v981_v27 = vld [vmem:[%s14823_s2 + $0x1f8] sm:$0xff] }
 0x2d5   :  { %6618 = vmatprep.subr.bf16.mxu0 %v14829_v0  ;;  %1299 = vperm.xlu1 %11958, %v981_v27   ;;  %v12612_v27 = vld [vmem:[#allocation6 + $0xbdc] ss:$68 sps:$4 sm:$0xff]  }
 0x2d8   :  { %6619 = vmatpush1.bf16.msra.mxu0 %v12584_v28  ;;  %v12561_v28 = vld [vmem:[#allocation6 + $0x604] ss:$68 sps:$4 sm:$0xff]  }
 0x2d9   :  { %6620 = vmatprep.subr.bf16.mxu0 %v14829_v0 }
 0x2da   :  { %5641 = vmatmul.mubr.bf16.gmra.mrb[80].mxu1 %v12517_v30  ;;  %6380 = vmatmul.mubr.bf16.gmra.mrb[16].mxu0 %v12518_v32  ;;  %v12564_v30 = vld [vmem:[#allocation6 + $0x600] ss:$68 sps:$4 sm:$0xff]   ;;  %v12565_v32 = vld [vmem:[#allocation6 + $0xef4] ss:$68 sps:$4 sm:$0xff]  }
 0x2db   :  { %5648 = vmatprep.mubr.bf16.mxu1 %v12520_v33  ;;  %6387 = vmatprep.mubr.bf16.mxu0 %v12522_v35  ;;  %v12567_v33 = vld [vmem:[#allocation6 + $0x68c] ss:$68 sps:$4 sm:$0xff]  }
 0x2dc   :  { %6621 = vmatpush1.bf16.msra.mxu0 %v12594_v37  ;;  %v12569_v35 = vld [vmem:[#allocation6 + $0xef0] ss:$68 sps:$4 sm:$0xff]   ;;  %v12570_v37 = vld [vmem:[#allocation6 + $0x688] ss:$68 sps:$4 sm:$0xff]  }
 0x2dd   :  { %6622 = vmatprep.subr.bf16.mxu0 %v14829_v0 }
 0x2e0   :  { %6623 = vmatpush1.bf16.msra.mxu0 %v12601_v38  ;;  %v12572_v38 = vld [vmem:[#allocation6 + $0xf7c] ss:$68 sps:$4 sm:$0xff]  }
 0x2e1   :  { %6624 = vmatprep.subr.bf16.mxu0 %v14829_v0 }
 0x2e2   :  { %5649 = vmatmul.mubr.bf16.gmra.mrb[84].mxu1 %v12524_v40  ;;  %6388 = vmatmul.mubr.bf16.gmra.mrb[20].mxu0 %v12525_v42  ;;  %v12576_v40 = vld [vmem:[#allocation6 + $0xf78] ss:$68 sps:$4 sm:$0xff]   ;;  %v12577_v42 = vld [vmem:[#allocation6 + $0x710] ss:$68 sps:$4 sm:$0xff]  }
 0x2e3   :  { %5656 = vmatprep.mubr.bf16.mxu1 %v12526_v43  ;;  %6395 = vmatprep.mubr.bf16.mxu0 %v12528_v45  ;;  %v12578_v43 = vld [vmem:[#allocation6 + $0x1004] ss:$68 sps:$4 sm:$0xff]   ;;  %v12636_v45 = vld [vmem:[#allocation3 + $0x370] sm:$0xff]  }
 0x2e4   :  { %6625 = vmatpush1.bf16.msra.mxu0 %v12608_v47  ;;  %v12582_v47 = vld [vmem:[#allocation6 + $0x1000] ss:$68 sps:$4 sm:$0xff]  }
 0x2e5   :  { %6626 = vmatprep.subr.bf16.mxu0 %v14829_v0 }
 0x2e8   :  { %6627 = vmatpush1.bf16.msra.mxu0 %v12615_v62  ;;  %v12598_v62 = vld [vmem:[#allocation6 + $0x9bc] ss:$68 sps:$4 sm:$0xff]  }
 0x2e9   :  { %6628 = vmatprep.subr.bf16.mxu0 %v14829_v0 }
 0x2ea   :  { %5657 = vmatmul.mubr.bf16.gmra.mrb[88].mxu1 %v12530_v49  ;;  %6396 = vmatmul.mubr.bf16.gmra.mrb[24].mxu0 %v12531_v50  ;;  %v12585_v49 = vld [vmem:[#allocation6 + $0x108c] ss:$68 sps:$4 sm:$0xff]   ;;  %v12587_v50 = vld [vmem:[#allocation6 + $0x824] ss:$68 sps:$4 sm:$0xff]  }
 0x2eb   :  { %5664 = vmatprep.mubr.bf16.mxu1 %v12533_v52  ;;  %6403 = vmatprep.mubr.bf16.mxu0 %v12535_v55  ;;  %v12589_v52 = vld [vmem:[#allocation6 + $0x1088] ss:$68 sps:$4 sm:$0xff]  }
 0x2ec   :  { %6629 = vmatpush1.bf16.msra.mxu0 %v12622_v18  ;;  %v12591_v55 = vld [vmem:[#allocation6 + $0x8ac] ss:$68 sps:$4 sm:$0xff]  }
 0x2ed   :  { %6630 = vmatprep.subr.bf16.mxu0 %v14829_v0 }
 0x2f0   :  { %6631 = vmatpush1.bf16.msra.mxu0 %v12629_v34  ;;  %v12616_v34 = vld [vmem:[#allocation6 + $0xc64] ss:$68 sps:$4 sm:$0xff]  }
 0x2f1   :  { %6632 = vmatprep.subr.bf16.mxu0 %v14829_v0 }
 0x2f2   :  { %5665 = vmatmul.mubr.bf16.gmra.mrb[92].mxu1 %v12537_v58  ;;  %6404 = vmatmul.mubr.bf16.gmra.mrb[28].mxu0 %v12538_v60  ;;  %v12593_v58 = vld [vmem:[#allocation6 + $0x8a8] ss:$68 sps:$4 sm:$0xff]   ;;  %v12595_v60 = vld [vmem:[#allocation6 + $0x934] ss:$68 sps:$4 sm:$0xff]  }
 0x2f3   :  { %5672 = vmatprep.mubr.bf16.mxu1 %v12539_v61  ;;  %6411 = vmatprep.mubr.bf16.mxu0 %v12541_v3  ;;  %v12597_v61 = vld [vmem:[#allocation6 + $0x930] ss:$68 sps:$4 sm:$0xff]   ;;  %v12602_v3 = vld [vmem:[#allocation6 + $0xa44] ss:$68 sps:$4 sm:$0xff]  }
 0x2f4   :  { %6633 = vmatpush1.bf16.msra.mxu0 %v12636_v45 }
 0x2f5   :  { %6634 = vmatprep.subr.bf16.mxu0 %v14829_v0 }
 0x2f8   :  { %6635 = vmatpush1.bf16.msra.mxu0 %v12643_v56 }
 0x2f9   :  { %6893 = vmatprep.subr.bf16.mxu0 %v14829_v0 }
 0x2fa   :  { %5673 = vmatmul.mubr.bf16.gmra.mrb[96].mxu1 %v12543_v5  ;;  %6412 = vmatmul.mubr.bf16.gmra.mrb[32].mxu0 %v12544_v8 }
 0x2fb   :  { %5680 = vmatprep.mubr.bf16.mxu1 %v12546_v9  ;;  %6419 = vmatprep.mubr.bf16.mxu0 %v12548_v12  ;;  %v12604_v9 = vld [vmem:[#allocation6 + $0xa40] ss:$68 sps:$4 sm:$0xff]   ;;  %v12605_v12 = vld [vmem:[#allocation6 + $0xacc] ss:$68 sps:$4 sm:$0xff]  }
 0x302   :  { %5681 = vmatmul.mubr.bf16.gmra.mrb[100].mxu1 %v12550_v14  ;;  %6420 = vmatmul.mubr.bf16.gmra.mrb[36].mxu0 %v12551_v15 }
 0x303   :  { %5688 = vmatprep.mubr.bf16.mxu1 %v12552_v17  ;;  %6427 = vmatprep.mubr.bf16.mxu0 %v12554_v20  ;;  %v12607_v17 = vld [vmem:[#allocation6 + $0xac8] ss:$68 sps:$4 sm:$0xff]  }
 0x30a   :  { %5689 = vmatmul.mubr.bf16.gmra.mrb[104].mxu1 %v12556_v23  ;;  %6428 = vmatmul.mubr.bf16.gmra.mrb[40].mxu0 %v12557_v24  ;;  %v12611_v24 = vld [vmem:[#allocation6 + $0xb50] ss:$68 sps:$4 sm:$0xff]  }
 0x30b   :  { %5696 = vmatprep.mubr.bf16.mxu1 %v12559_v25  ;;  %6435 = vmatprep.mubr.bf16.mxu0 %v12561_v28 }
 0x312   :  { %5697 = vmatmul.mubr.bf16.gmra.mrb[108].mxu1 %v12563_v29  ;;  %6436 = vmatmul.mubr.bf16.gmra.mrb[44].mxu0 %v12564_v30 }
 0x313   :  { %5704 = vmatprep.mubr.bf16.mxu1 %v12565_v32  ;;  %6443 = vmatprep.mubr.bf16.mxu0 %v12567_v33  ;;  %v12614_v32 = vld [vmem:[#allocation6 + $0xbd8] ss:$68 sps:$4 sm:$0xff]  }
 0x31a   :  { %5705 = vmatmul.mubr.bf16.gmra.mrb[112].mxu1 %v12569_v35  ;;  %6444 = vmatmul.mubr.bf16.gmra.mrb[48].mxu0 %v12570_v37 }
 0x31b   :  { %5712 = vmatprep.mubr.bf16.mxu1 %v12572_v38  ;;  %6451 = vmatprep.mubr.bf16.mxu0 %v12574_v39  ;;  %v12618_v39 = vld [vmem:[#allocation6 + $0xc60] ss:$68 sps:$4 sm:$0xff]  }
 0x322   :  { %5713 = vmatmul.mubr.bf16.gmra.mrb[116].mxu1 %v12576_v40  ;;  %6452 = vmatmul.mubr.bf16.gmra.mrb[52].mxu0 %v12577_v42  ;;  %v12619_v42 = vld [vmem:[#allocation6 + $0xcec] ss:$68 sps:$4 sm:$0xff]  }
 0x323   :  { %5720 = vmatprep.mubr.bf16.mxu1 %v12578_v43  ;;  %6459 = vmatprep.mubr.bf16.mxu0 %v12580_v44 }
 0x32a   :  { %5721 = vmatmul.mubr.bf16.gmra.mrb[120].mxu1 %v12582_v47  ;;  %6460 = vmatmul.mubr.bf16.gmra.mrb[56].mxu0 %v12583_v48  ;;  %v12621_v47 = vld [vmem:[#allocation6 + $0xce8] ss:$68 sps:$4 sm:$0xff]  }
 0x32b   :  { %5728 = vmatprep.mubr.bf16.mxu1 %v12585_v49  ;;  %6467 = vmatprep.mubr.bf16.mxu0 %v12587_v50  ;;  %v12623_v49 = vld [vmem:[#allocation6 + $0xd74] ss:$68 sps:$4 sm:$0xff]  }
 0x332   :  { %5729 = vmatmul.mubr.bf16.gmra.mrb[124].mxu1 %v12589_v52  ;;  %6468 = vmatmul.mubr.bf16.gmra.mrb[60].mxu0 %v12590_v53 }
 0x333   :  { %6475 = vmatprep.mubr.bf16.mxu0 %v12591_v55  ;;  %v12625_v55 = vld [vmem:[#allocation6 + $0xd70] ss:$68 sps:$4 sm:$0xff]  }
 0x33a   :  { %6476 = vmatmul.mubr.bf16.gmra.mrb[64].mxu0 %v12593_v58  ;;  %v12626_v58 = vld [vmem:[#allocation6 + $0xdfc] ss:$68 sps:$4 sm:$0xff]  }
 0x33b   :  { %6483 = vmatprep.mubr.bf16.mxu0 %v12595_v60 }
 0x342   :  { %6484 = vmatmul.mubr.bf16.gmra.mrb[68].mxu0 %v12597_v61 }
 0x343   :  { %6491 = vmatprep.mubr.bf16.mxu0 %v12598_v62 }
 0x34a   :  { %6492 = vmatmul.mubr.bf16.gmra.mrb[72].mxu0 %v12600_v2  ;;  %v12628_v2 = vld [vmem:[#allocation6 + $0xdf8] ss:$68 sps:$4 sm:$0xff]  }
 0x34b   :  { %6499 = vmatprep.mubr.bf16.mxu0 %v12602_v3 }
 0x34d   :  { %v13639_v4 = vpop.f32.mrb[32].mxu1 }
 0x34e   :  { %14831 = vst [vmem:[#allocation13_spill] sm:$0xff] %v13639_v4  ;;  %v5548_v5 = vpop.f32.mrb[33].mxu1 }
 0x34f   :  { %v13641_v8 = vpop.f32.mrb[34].mxu1  ;;  %v12630_v5 = vld [vmem:[#allocation6 + $0xe84] ss:$68 sps:$4 sm:$0xff]  }
 0x350   :  { %14832 = vst [vmem:[#allocation14_spill] sm:$0xff] %v13641_v8  ;;  %v5551_v10 = vpop.f32.mrb[35].mxu1  ;;  %v12852_v8 = vld [vmem:[#allocation6 + $0xb64] ss:$68 sps:$4 sm:$0xff]  }
 0x352   :  { %6500 = vmatmul.mubr.bf16.gmra.mrb[76].mxu0 %v12604_v9  ;;  %v7695_v9 = vld [vmem:[%s14825_s4] sm:$0xff] }
 0x353   :  { %6507 = vmatprep.mubr.bf16.mxu0 %v12605_v12  ;;  %7761 = vperm.xlu0 %11957, %v7695_v9   ;;  %v7697_v12 = vld [vmem:[%s14825_s4 + $0x10] sm:$0xff]  ;;  %v7706_v9 = vld [vmem:[%s14825_s4 + $0x58] sm:$0xff] }
 0x355   :  { %v13643_v13 = vpop.f32.mrb[36].mxu1 }
 0x356   :  { %14833 = vst [vmem:[#allocation15_spill] sm:$0xff] %v13643_v13  ;;  %v5556_v14 = vpop.f32.mrb[37].mxu1 }
 0x357   :  { %v13645_v15 = vpop.f32.mrb[38].mxu1  ;;  %7771 = vperm.xlu0 %11957, %v7697_v12  }
 0x358   :  { %14834 = vst [vmem:[#allocation16_spill] sm:$0xff] %v13645_v15  ;;  %v5559_v18 = vpop.f32.mrb[39].mxu1  ;;  %v12844_v15 = vld [vmem:[#allocation6 + $0xa54] ss:$68 sps:$4 sm:$0xff]  }
 0x359   :  { %v12632_v18 = vld [vmem:[#allocation6 + $0xe80] ss:$68 sps:$4 sm:$0xff]  }
 0x35a   :  { %6508 = vmatmul.mubr.bf16.gmra.mrb[80].mxu0 %v12607_v17 }
 0x35b   :  { %6515 = vmatprep.mubr.bf16.mxu0 %v12609_v19 }
 0x35d   :  { %v13647_v20 = vpop.f32.mrb[40].mxu1 }
 0x35e   :  { %14835 = vst [vmem:[#allocation17_spill] sm:$0xff] %v13647_v20  ;;  %v5564_v22 = vpop.f32.mrb[41].mxu1 }
 0x35f   :  { %v13649_v23 = vpop.f32.mrb[42].mxu1  ;;  %v12633_v22 = vld [vmem:[#allocation6 + $0xf0c] ss:$68 sps:$4 sm:$0xff]  }
 0x360   :  { %14836 = vst [vmem:[#allocation18_spill] sm:$0xff] %v13649_v23  ;;  %v5567_v25 = vpop.f32.mrb[43].mxu1 }
 0x361   :  { %v7699_v25 = vld [vmem:[%s14825_s4 + $0x20] sm:$0xff] }
 0x362   :  { %6516 = vmatmul.mubr.bf16.gmra.mrb[84].mxu0 %v12611_v24  ;;  %v7696_v24 = vld [vmem:[%s14825_s4 + $0x8] sm:$0xff]  ;;  %7781 = vperm.xlu0 %11957, %v7699_v25  }
 0x363   :  { %6523 = vmatprep.mubr.bf16.mxu0 %v12612_v27  ;;  %7766 = vperm.xlu1 %11958, %v7696_v24   ;;  %v12644_v24 = vld [vmem:[#allocation6 + $0x10a4] ss:$68 sps:$4 sm:$0xff]  }
 0x364   :  { %v7708_v25 = vld [vmem:[%s14825_s4 + $0x68] sm:$0xff] }
 0x365   :  { %v13651_v28 = vpop.f32.mrb[44].mxu1 }
 0x366   :  { %14837 = vst [vmem:[#allocation19_spill] sm:$0xff] %v13651_v28  ;;  %v5572_v29 = vpop.f32.mrb[45].mxu1  ;;  %v12891_v28 = vld [vmem:[#allocation6 + $0x10b8] ss:$68 sps:$4 sm:$0xff]  }
 0x367   :  { %v13653_v30 = vpop.f32.mrb[46].mxu1  ;;  %v7698_v29 = vld [vmem:[%s14825_s4 + $0x18] sm:$0xff] }
 0x368   :  { %14838 = vst [vmem:[#allocation20_spill] sm:$0xff] %v13653_v30  ;;  %v5575_v33 = vpop.f32.mrb[47].mxu1  ;;  %7776 = vperm.xlu1 %11958, %v7698_v29   ;;  %v7711_v29 = vld [vmem:[%s14825_s4 + $0x80] sm:$0xff] }
 0x369   :  { %v7701_v33 = vld [vmem:[%s14825_s4 + $0x30] sm:$0xff] }
 0x36a   :  { %6524 = vmatmul.mubr.bf16.gmra.mrb[88].mxu0 %v12614_v32  ;;  %7791 = vperm.xlu0 %11957, %v7701_v33   ;;  %v7710_v33 = vld [vmem:[%s14825_s4 + $0x78] sm:$0xff] }
 0x36b   :  { %6531 = vmatprep.mubr.bf16.mxu0 %v12616_v34 }
 0x36d   :  { %v13655_v35 = vpop.f32.mrb[48].mxu1 }
 0x36e   :  { %14839 = vst [vmem:[#allocation21_spill] sm:$0xff] %v13655_v35  ;;  %v5580_v37 = vpop.f32.mrb[49].mxu1  ;;  %v12883_v35 = vld [vmem:[#allocation6 + $0xfa8] ss:$68 sps:$4 sm:$0xff]  }
 0x36f   :  { %v13657_v38 = vpop.f32.mrb[50].mxu1  ;;  %v12635_v37 = vld [vmem:[#allocation6 + $0xf08] ss:$68 sps:$4 sm:$0xff]  }
 0x370   :  { %14840 = vst [vmem:[#allocation22_spill] sm:$0xff] %v13657_v38  ;;  %v5583_v40 = vpop.f32.mrb[51].mxu1  ;;  %v12675_v38 = vld [vmem:[#allocation6 + $0x474] ss:$68 sps:$4 sm:$0xff]  }
 0x371   :  { %v12637_v40 = vld [vmem:[#allocation6 + $0xf94] ss:$68 sps:$4 sm:$0xff]  }
 0x372   :  { %6532 = vmatmul.mubr.bf16.gmra.mrb[92].mxu0 %v12618_v39 }
 0x373   :  { %6539 = vmatprep.mubr.bf16.mxu0 %v12619_v42  ;;  %v7700_v42 = vld [vmem:[%s14825_s4 + $0x28] sm:$0xff] }
 0x374   :  { %7786 = vperm.xlu1 %11958, %v7700_v42   ;;  %v12646_v42 = vld [vmem:[#allocation6 + $0x10a0] ss:$68 sps:$4 sm:$0xff]  }
 0x375   :  { %v13659_v43 = vpop.f32.mrb[52].mxu1 }
 0x376   :  { %14841 = vst [vmem:[#allocation23_spill] sm:$0xff] %v13659_v43  ;;  %v5588_v44 = vpop.f32.mrb[53].mxu1  ;;  %v12674_v43 = vld [vmem:[#allocation6 + $0x3e8] ss:$68 sps:$4 sm:$0xff]  }
 0x377   :  { %v13661_v45 = vpop.f32.mrb[54].mxu1  ;;  %v7703_v44 = vld [vmem:[%s14825_s4 + $0x40] sm:$0xff] }
 0x378   :  { %14842 = vst [vmem:[#allocation24_spill] sm:$0xff] %v13661_v45  ;;  %v5591_v48 = vpop.f32.mrb[55].mxu1  ;;  %7801 = vperm.xlu0 %11957, %v7703_v44  }
 0x379   :  { %v7702_v48 = vld [vmem:[%s14825_s4 + $0x38] sm:$0xff] }
 0x37a   :  { %6540 = vmatmul.mubr.bf16.gmra.mrb[96].mxu0 %v12621_v47  ;;  %7796 = vperm.xlu1 %11958, %v7702_v48   ;;  %v12649_v48 = vld [vmem:[#allocation6 + $0x34] ss:$68 sps:$4 sm:$0xff]  }
 0x37b   :  { %6547 = vmatprep.mubr.bf16.mxu0 %v12623_v49 }
 0x37d   :  { %v13663_v50 = vpop.f32.mrb[56].mxu1 }
 0x37e   :  { %14843 = vst [vmem:[#allocation25_spill] sm:$0xff] %v13663_v50  ;;  %v5596_v52 = vpop.f32.mrb[57].mxu1 }
 0x37f   :  { %v13665_v53 = vpop.f32.mrb[58].mxu1  ;;  %v7705_v52 = vld [vmem:[%s14825_s4 + $0x50] sm:$0xff] }
 0x380   :  { %14844 = vst [vmem:[#allocation26_spill] sm:$0xff] %v13665_v53  ;;  %v5599_v56 = vpop.f32.mrb[59].mxu1  ;;  %7811 = vperm.xlu0 %11957, %v7705_v52   ;;  %v7715_v52 = vld [vmem:[%s14825_s4 + $0xa0] sm:$0xff] }
 0x381   :  { %v12639_v56 = vld [vmem:[#allocation6 + $0xf90] ss:$68 sps:$4 sm:$0xff]  }
 0x382   :  { %6548 = vmatmul.mubr.bf16.gmra.mrb[100].mxu0 %v12625_v55 }
 0x383   :  { %6555 = vmatprep.mubr.bf16.mxu0 %v12626_v58 }
 0x385   :  { %v13667_v60 = vpop.f32.mrb[60].mxu1 }
 0x386   :  { %14845 = vst [vmem:[#allocation27_spill] sm:$0xff] %v13667_v60  ;;  %v5604_v61 = vpop.f32.mrb[61].mxu1  ;;  %v12672_v60 = vld [vmem:[#allocation6 + $0x3ec] ss:$68 sps:$4 sm:$0xff]  }
 0x387   :  { %v13669_v62 = vpop.f32.mrb[62].mxu1  ;;  %v12640_v61 = vld [vmem:[#allocation6 + $0x101c] ss:$68 sps:$4 sm:$0xff]  }
 0x388   :  { %14846 = vst [vmem:[#allocation28_spill] sm:$0xff] %v13669_v62  ;;  %v5607_v3 = vpop.f32.mrb[63].mxu1  ;;  %v12670_v62 = vld [vmem:[#allocation6 + $0x360] ss:$68 sps:$4 sm:$0xff]  }
 0x389   :  { %v7707_v3 = vld [vmem:[%s14825_s4 + $0x60] sm:$0xff] }
 0x38a   :  { %6556 = vmatmul.mubr.bf16.gmra.mrb[104].mxu0 %v12628_v2  ;;  %v7704_v2 = vld [vmem:[%s14825_s4 + $0x48] sm:$0xff]  ;;  %7821 = vperm.xlu0 %11957, %v7707_v3   ;;  %v7717_v3 = vld [vmem:[%s14825_s4 + $0xb0] sm:$0xff] }
 0x38b   :  { %6563 = vmatprep.mubr.bf16.mxu0 %v12630_v5  ;;  %7806 = vperm.xlu1 %11958, %v7704_v2  }
 0x38d   :  { %v13674_v10 = vpop.f32.mrb[64].mxu1 }
 0x38e   :  { %14847 = vst [vmem:[#allocation29_spill] sm:$0xff] %v13674_v10  ;;  %v5612_v14 = vpop.f32.mrb[65].mxu1  ;;  %v7737_v10 = vld [vmem:[%s14825_s4 + $0x150] sm:$0xff] }
 0x38f   :  { %v13679_v17 = vpop.f32.mrb[66].mxu1  ;;  %v7709_v14 = vld [vmem:[%s14825_s4 + $0x70] sm:$0xff]  ;;  %7816 = vperm.xlu1 %11958, %v7706_v9  }
 0x390   :  { %14848 = vst [vmem:[#allocation30_spill] sm:$0xff] %v13679_v17  ;;  %v5615_v19 = vpop.f32.mrb[67].mxu1  ;;  %7831 = vperm.xlu0 %11957, %v7709_v14   ;;  %v12668_v17 = vld [vmem:[#allocation6 + $0x364] ss:$68 sps:$4 sm:$0xff]  }
 0x391   :  { %v12642_v19 = vld [vmem:[#allocation6 + $0x1018] ss:$68 sps:$4 sm:$0xff]  }
 0x392   :  { %6564 = vmatmul.mubr.bf16.gmra.mrb[108].mxu0 %v12632_v18 }
 0x393   :  { %6571 = vmatprep.mubr.bf16.mxu0 %v12633_v22  ;;  %7826 = vperm.xlu1 %11958, %v7708_v25   ;;  %v12706_v25 = vld [vmem:[#allocation3 + $0x400] sm:$0xff]  }
 0x394   :  { %7841 = vperm.xlu0 %11957, %v7711_v29   ;;  %v7716_v29 = vld [vmem:[%s14825_s4 + $0xa8] sm:$0xff]  ;;  %10746 = vmatprep.subr.bf16.mxu1 %v12706_v25 }
 0x395   :  { %v13687_v27 = vpop.f32.mrb[68].mxu1  ;;  %10747 = vmatpush3.bf16.msra.mxu1 %v12706_v25  ;;  %v7720_v25 = vld [vmem:[%s14825_s4 + $0xc8] sm:$0xff] }
 0x396   :  { %14849 = vst [vmem:[#allocation31_spill] sm:$0xff] %v13687_v27  ;;  %v5620_v32 = vpop.f32.mrb[69].mxu1  ;;  %v12667_v27 = vld [vmem:[#allocation6 + $0x2d8] ss:$68 sps:$4 sm:$0xff]  }
 0x397   :  { %v13695_v34 = vpop.f32.mrb[70].mxu1  ;;  %7836 = vperm.xlu1 %11958, %v7710_v33   ;;  %v13768_v33 = vpop.permute.xlu1 %994 }
 0x398   :  { %14850 = vst [vmem:[#allocation32_spill] sm:$0xff] %v13695_v34  ;;  %v5623_v39 = vpop.f32.mrb[71].mxu1 }
 0x399   :  { %v7713_v39 = vld [vmem:[%s14825_s4 + $0x90] sm:$0xff] }
 0x39a   :  { %6572 = vmatmul.mubr.bf16.gmra.mrb[112].mxu0 %v12635_v37  ;;  %7851 = vperm.xlu0 %11957, %v7713_v39   ;;  %v7719_v39 = vld [vmem:[%s14825_s4 + $0xc0] sm:$0xff] }
 0x39b   :  { %6579 = vmatprep.mubr.bf16.mxu0 %v12637_v40 }
 0x39d   :  { %v13703_v47 = vpop.f32.mrb[72].mxu1 }
 0x39e   :  { %14851 = vst [vmem:[#allocation33_spill] sm:$0xff] %v13703_v47  ;;  %v5628_v49 = vpop.f32.mrb[73].mxu1  ;;  %7861 = vperm.xlu0 %11957, %v7715_v52   ;;  %v12653_v52 = vld [vmem:[#allocation6 + $0xb8] ss:$68 sps:$4 sm:$0xff]   ;;  %v12707_v47 = vld [vmem:[#allocation3 + $0x3c0] sm:$0xff]  }
 0x39f   :  { %v13711_v55 = vpop.f32.mrb[74].mxu1  ;;  %v7712_v49 = vld [vmem:[%s14825_s4 + $0x88] sm:$0xff] }
 0x3a0   :  { %14852 = vst [vmem:[#allocation34_spill] sm:$0xff] %v13711_v55  ;;  %v5631_v58 = vpop.f32.mrb[75].mxu1  ;;  %7846 = vperm.xlu1 %11958, %v7712_v49  }
 0x3a2   :  { %6580 = vmatmul.mubr.bf16.gmra.mrb[116].mxu0 %v12639_v56  ;;  %v13751_v56 = vpop.permute.xlu0 %984  ;;  %7871 = vperm.xlu0 %11957, %v7717_v3   ;;  %v12654_v3 = vld [vmem:[#allocation6 + $0x144] ss:$68 sps:$4 sm:$0xff]  }
 0x3a3   :  { %6587 = vmatprep.mubr.bf16.mxu0 %v12640_v61  ;;  %v7714_v61 = vld [vmem:[%s14825_s4 + $0x98] sm:$0xff] }
 0x3a4   :  { %7856 = vperm.xlu1 %11958, %v7714_v61   ;;  %v7718_v61 = vld [vmem:[%s14825_s4 + $0xb8] sm:$0xff] }
 0x3a5   :  { %v13719_v5 = vpop.f32.mrb[76].mxu1 }
 0x3a6   :  { %14853 = vst [vmem:[#allocation35_spill] sm:$0xff] %v13719_v5  ;;  %v5636_v12 = vpop.f32.mrb[77].mxu1  ;;  %7881 = vperm.xlu0 %11957, %v7719_v39  }
 0x3a7   :  { %v13727_v18 = vpop.f32.mrb[78].mxu1  ;;  %v12647_v12 = vld [vmem:[#allocation6 + $0x30] ss:$68 sps:$4 sm:$0xff]  }
 0x3a8   :  { %14854 = vst [vmem:[#allocation36_spill] sm:$0xff] %v13727_v18  ;;  %v5639_v22 = vpop.f32.mrb[79].mxu1  ;;  %7866 = vperm.xlu1 %11958, %v7716_v29   ;;  %v12671_v29 = vld [vmem:[#allocation3 + $0x398] sm:$0xff]  }
 0x3a9   :  { %v12651_v22 = vld [vmem:[#allocation6 + $0xbc] ss:$68 sps:$4 sm:$0xff]  }
 0x3aa   :  { %6588 = vmatmul.mubr.bf16.gmra.mrb[120].mxu0 %v12642_v19  ;;  %v12650_v19 = vld [vmem:[#allocation3 + $0x380] sm:$0xff]  }
 0x3ab   :  { %6595 = vmatprep.mubr.bf16.mxu0 %v12644_v24  ;;  %v13763_v24 = vpop.permute.xlu0 %989 }
 0x3ac   :  { %7876 = vperm.xlu1 %11958, %v7718_v61  }
 0x3ad   :  { %v13735_v32 = vpop.f32.mrb[80].mxu1 }
 0x3ae   :  { %14855 = vst [vmem:[#allocation37_spill] sm:$0xff] %v13735_v32  ;;  %v5644_v37 = vpop.f32.mrb[81].mxu1  ;;  %v7729_v32 = vld [vmem:[%s14825_s4 + $0x110] sm:$0xff] }
 0x3af   :  { %v13743_v40 = vpop.f32.mrb[82].mxu1  ;;  %v12657_v37 = vld [vmem:[#allocation3 + $0x388] sm:$0xff]  }
 0x3b0   :  { %14856 = vst [vmem:[#allocation38_spill] sm:$0xff] %v13743_v40  ;;  %v5647_v44 = vpop.f32.mrb[83].mxu1  ;;  %7886 = vperm.xlu1 %11958, %v7720_v25   ;;  %v12661_v40 = vld [vmem:[#allocation6 + $0x254] ss:$68 sps:$4 sm:$0xff]  }
 0x3b2   :  { %6596 = vmatmul.mubr.bf16.gmra.mrb[124].mxu0 %v12646_v42 }
 0x3b3   :  { %6636 = vmatprep.mubr.bf16.mxu0 %v12649_v48  ;;  %v13776_v48 = vpop.permute.xlu0 %1004 }
 0x3b5   :  { %v13753_v58 = vpop.f32.mrb[84].mxu1 }
 0x3b6   :  { %14857 = vst [vmem:[#allocation39_spill] sm:$0xff] %v13753_v58  ;;  %v5652_v2 = vpop.f32.mrb[85].mxu1  ;;  %v12660_v58 = vld [vmem:[#allocation6 + $0x1c8] ss:$68 sps:$4 sm:$0xff]  }
 0x3b7   :  { %v13761_v9 = vpop.f32.mrb[86].mxu1 }
 0x3b8   :  { %14858 = vst [vmem:[#allocation40_spill] sm:$0xff] %v13761_v9  ;;  %v5655_v14 = vpop.f32.mrb[87].mxu1 }
 0x3b9   :  { %v7721_v14 = vld [vmem:[%s14825_s4 + $0xd0] sm:$0xff] }
 0x3ba   :  { %6637 = vmatmul.mubr.bf16.vlgmr.msra.gmra.mrb[0].mxu0 %v12647_v12  ;;  %v12664_v12 = vld [vmem:[#allocation3 + $0x390] sm:$0xff]   ;;  %7891 = vperm.xlu0 %11957, %v7721_v14   ;;  %v12656_v14 = vld [vmem:[#allocation6 + $0x140] ss:$68 sps:$4 sm:$0xff]  }
 0x3bb   :  { %6894 = vmatpush1.bf16.msra.mxu0 %v12650_v19  ;;  %6644 = vmatprep.mubr.bf16.mxu0 %v12651_v22  ;;  %v13787_v19 = vpop.permute.xlu1 %999  ;;  %v13789_v22 = vpop.permute.xlu0 %1014 }
 0x3bc   :  { %6895 = vmatprep.subr.bf16.mxu0 %v14829_v0 }
 0x3bd   :  { %v13773_v42 = vpop.f32.mrb[88].mxu1 }
 0x3be   :  { %14859 = vst [vmem:[#allocation41_spill] sm:$0xff] %v13773_v42  ;;  %v5660_v44 = vpop.f32.mrb[89].mxu1 }
 0x3bf   :  { %v13778_v49 = vpop.f32.mrb[90].mxu1  ;;  %6896 = vmatpush1.bf16.msra.mxu0 %v12657_v37  ;;  %v7723_v37 = vld [vmem:[%s14825_s4 + $0xe0] sm:$0xff]  ;;  %v13800_v44 = vpop.permute.xlu1 %1009 }
 0x3c0   :  { %14860 = vst [vmem:[#allocation42_spill] sm:$0xff] %v13778_v49  ;;  %v5663_v2 = vpop.f32.mrb[91].mxu1  ;;  %6897 = vmatprep.subr.bf16.mxu0 %v14829_v0  ;;  %7901 = vperm.xlu0 %11957, %v7723_v37   ;;  %v12658_v49 = vld [vmem:[#allocation6 + $0x1cc] ss:$68 sps:$4 sm:$0xff]  }
 0x3c1   :  { %v7724_v37 = vld [vmem:[%s14825_s4 + $0xe8] sm:$0xff] }
 0x3c2   :  { %6645 = vmatmul.mubr.bf16.gmra.mrb[4].mxu0 %v12653_v52  ;;  %v13802_v52 = vpop.permute.xlu0 %1024 }
 0x3c3   :  { %6652 = vmatprep.mubr.bf16.mxu0 %v12654_v3  ;;  %6898 = vmatpush1.bf16.msra.mxu0 %v12664_v12  ;;  %v7722_v3 = vld [vmem:[%s14825_s4 + $0xd8] sm:$0xff]  ;;  %v13813_v25 = vpop.permute.xlu1 %1019 }
 0x3c4   :  { %6899 = vmatprep.subr.bf16.mxu0 %v14829_v0  ;;  %v7725_v0 = vld [vmem:[%s14825_s4 + $0xf0] sm:$0xff]  ;;  %7896 = vperm.xlu1 %11958, %v7722_v3  }
 0x3c5   :  { %v13797_v39 = vpop.f32.mrb[92].mxu1  ;;  %7911 = vperm.xlu0 %11957, %v7725_v0  }
 0x3c6   :  { %14861 = vst [vmem:[#allocation43_spill] sm:$0xff] %v13797_v39  ;;  %v5668_v61 = vpop.f32.mrb[93].mxu1  ;;  %v12678_v39 = vld [vmem:[#allocation3 + $0x3a0] sm:$0xff]  }
 0x3c7   :  { %v13804_v2 = vpop.f32.mrb[94].mxu1  ;;  %6900 = vmatpush1.bf16.msra.mxu0 %v12671_v29  ;;  %v14863_v61 = vmov 0   ;;  %v12685_v29 = vld [vmem:[#allocation3 + $0x3a8] sm:$0xff]   ;;  %v13826_v3 = vpop.permute.xlu1 %1029 }
 0x3c8   :  { %14862 = vst [vmem:[#allocation44_spill] sm:$0xff] %v13804_v2  ;;  %v5671_v12 = vpop.f32.mrb[95].mxu1  ;;  %6901 = vmatprep.subr.bf16.mxu0 %v14863_v61  ;;  %v13815_v2 = vpop.permute.xlu0 %1034  ;;  %7906 = vperm.xlu1 %11958, %v7724_v37  }
 0x3c9   :  { %v7727_v12 = vld [vmem:[%s14825_s4 + $0x100] sm:$0xff] }
 0x3ca   :  { %6653 = vmatmul.mubr.bf16.gmra.mrb[8].mxu0 %v12656_v14  ;;  %7921 = vperm.xlu0 %11957, %v7727_v12   ;;  %v12718_v12 = vld [vmem:[#allocation3 + $0x408] sm:$0xff]  }
 0x3cb   :  { %6660 = vmatprep.mubr.bf16.mxu0 %v12658_v49  ;;  %6902 = vmatpush1.bf16.msra.mxu0 %v12678_v39  ;;  %v7726_v49 = vld [vmem:[%s14825_s4 + $0xf8] sm:$0xff] }
 0x3cc   :  { %6903 = vmatprep.subr.bf16.mxu0 %v14863_v61  ;;  %v13828_v0 = vpop.permute.xlu0 %1044  ;;  %7916 = vperm.xlu1 %11958, %v7726_v49  }
 0x3cd   :  { %v13823_v42 = vpop.f32.mrb[96].mxu1  ;;  %10748 = vmatprep.subr.bf16.mxu1 %v12718_v12 }
 0x3ce   :  { %14864 = vst [vmem:[#allocation45_spill] sm:$0xff] %v13823_v42  ;;  %v5676_v9 = vpop.f32.mrb[97].mxu1  ;;  %v12692_v42 = vld [vmem:[#allocation3 + $0x3b0] sm:$0xff]   ;;  %7931 = vperm.xlu0 %11957, %v7729_v32   ;;  %10749 = vmatpush3.bf16.msra.mxu1 %v12718_v12 }
 0x3cf   :  { %v13830_v14 = vpop.f32.mrb[98].mxu1  ;;  %6904 = vmatpush1.bf16.msra.mxu0 %v12685_v29  ;;  %v13839_v9 = vpop.permute.xlu1 %1039  ;;  %v12699_v29 = vld [vmem:[#allocation3 + $0x3b8] sm:$0xff]  }
 0x3d0   :  { %14865 = vst [vmem:[#allocation46_spill] sm:$0xff] %v13830_v14  ;;  %v5679_v39 = vpop.f32.mrb[99].mxu1  ;;  %6905 = vmatprep.subr.bf16.mxu0 %v14863_v61  ;;  %v13841_v37 = vpop.permute.xlu0 %1054  ;;  %v7731_v14 = vld [vmem:[%s14825_s4 + $0x120] sm:$0xff] }
 0x3d1   :  { %v7728_v39 = vld [vmem:[%s14825_s4 + $0x108] sm:$0xff] }
 0x3d2   :  { %6661 = vmatmul.mubr.bf16.gmra.mrb[12].mxu0 %v12660_v58  ;;  %7926 = vperm.xlu1 %11958, %v7728_v39  }
 0x3d3   :  { %6668 = vmatprep.mubr.bf16.mxu0 %v12661_v40  ;;  %6906 = vmatpush1.bf16.msra.mxu0 %v12692_v42  ;;  %v13852_v49 = vpop.permute.xlu1 %1049  ;;  %v12663_v40 = vld [vmem:[#allocation6 + $0x250] ss:$68 sps:$4 sm:$0xff]   ;;  %v7730_v42 = vld [vmem:[%s14825_s4 + $0x118] sm:$0xff] }
 0x3d4   :  { %6907 = vmatprep.subr.bf16.mxu0 %v14863_v61  ;;  %v13854_v58 = vpop.permute.xlu0 %1064  ;;  %7941 = vperm.xlu0 %11957, %v7731_v14   ;;  %v12714_v14 = vld [vmem:[#allocation3 + $0x3c8] sm:$0xff]  }
 0x3d5   :  { %v13849_v18 = vpop.f32.mrb[100].mxu1 }
 0x3d6   :  { %14866 = vst [vmem:[#allocation47_spill] sm:$0xff] %v13849_v18  ;;  %v5684_v32 = vpop.f32.mrb[101].mxu1  ;;  %v12665_v18 = vld [vmem:[#allocation6 + $0x2dc] ss:$68 sps:$4 sm:$0xff]   ;;  %7936 = vperm.xlu1 %11958, %v7730_v42  }
 0x3d7   :  { %v13856_v5 = vpop.f32.mrb[102].mxu1  ;;  %6908 = vmatpush1.bf16.msra.mxu0 %v12699_v29  ;;  %v7733_v32 = vld [vmem:[%s14825_s4 + $0x130] sm:$0xff]  ;;  %v13865_v12 = vpop.permute.xlu1 %1059  ;;  %v7735_v29 = vld [vmem:[%s14825_s4 + $0x140] sm:$0xff] }
 0x3d8   :  { %14867 = vst [vmem:[#allocation48_spill] sm:$0xff] %v13856_v5  ;;  %v5687_v55 = vpop.f32.mrb[103].mxu1  ;;  %6909 = vmatprep.subr.bf16.mxu0 %v14863_v61  ;;  %v13867_v39 = vpop.permute.xlu0 %1074  ;;  %7951 = vperm.xlu0 %11957, %v7733_v32  }
 0x3d9   :  { %14868 = vst [vmem:[#allocation49_spill] sm:$0xff] %v13867_v39  ;;  %v7732_v55 = vld [vmem:[%s14825_s4 + $0x128] sm:$0xff]  ;;  %v12849_v39 = vld [vmem:[#allocation6 + $0xad8] ss:$68 sps:$4 sm:$0xff]  }
 0x3da   :  { %6669 = vmatmul.mubr.bf16.gmra.mrb[16].mxu0 %v12663_v40  ;;  %7946 = vperm.xlu1 %11958, %v7732_v55  }
 0x3db   :  { %6676 = vmatprep.mubr.bf16.mxu0 %v12665_v18  ;;  %6910 = vmatpush1.bf16.msra.mxu0 %v12707_v47  ;;  %v13878_v42 = vpop.permute.xlu1 %1069  ;;  %v7734_v47 = vld [vmem:[%s14825_s4 + $0x138] sm:$0xff] }
 0x3dc   :  { %6911 = vmatprep.subr.bf16.mxu0 %v14863_v61  ;;  %14870 = vst [vmem:[#allocation51_spill] sm:$0xff] %v13878_v42  ;;  %v13880_v40 = vpop.permute.xlu0 %1084  ;;  %7961 = vperm.xlu0 %11957, %v7735_v29   ;;  %v7736_v29 = vld [vmem:[%s14825_s4 + $0x148] sm:$0xff] }
 0x3dd   :  { %v13875_v5 = vpop.f32.mrb[104].mxu1  ;;  %14871 = vst [vmem:[#allocation52_spill] sm:$0xff] %v13880_v40  ;;  %v12841_v40 = vld [vmem:[#allocation6 + $0x9c8] ss:$68 sps:$4 sm:$0xff]  }
 0x3de   :  { %14869 = vst [vmem:[#allocation50_spill] sm:$0xff] %v13875_v5  ;;  %v5692_v34 = vpop.f32.mrb[105].mxu1  ;;  %v12722_v5 = vld [vmem:[#allocation3 + $0x3d0] sm:$0xff]   ;;  %7956 = vperm.xlu1 %11958, %v7734_v47  }
 0x3df   :  { %v13882_v32 = vpop.f32.mrb[106].mxu1  ;;  %6912 = vmatpush1.bf16.msra.mxu0 %v12714_v14  ;;  %v13891_v34 = vpop.permute.xlu1 %1079  ;;  %v7739_v14 = vld [vmem:[%s14825_s4 + $0x160] sm:$0xff] }
 0x3e0   :  { %14872 = vst [vmem:[#allocation53_spill] sm:$0xff] %v13882_v32  ;;  %v5695_v18 = vpop.f32.mrb[107].mxu1  ;;  %6913 = vmatprep.subr.bf16.mxu0 %v14863_v61  ;;  %14873 = vst [vmem:[#allocation54_spill] sm:$0xff] %v13891_v34  ;;  %v13893_v55 = vpop.permute.xlu0 %1094  ;;  %7971 = vperm.xlu0 %11957, %v7737_v10  }
 0x3e1   :  { %14874 = vst [vmem:[#allocation55_spill] sm:$0xff] %v13893_v55 }
 0x3e2   :  { %6677 = vmatmul.mubr.bf16.gmra.mrb[20].mxu0 %v12667_v27  ;;  %7966 = vperm.xlu1 %11958, %v7736_v29  }
 0x3e3   :  { %6684 = vmatprep.mubr.bf16.mxu0 %v12668_v17  ;;  %6914 = vmatpush1.bf16.msra.mxu0 %v12722_v5  ;;  %v13904_v32 = vpop.permute.xlu1 %1089  ;;  %v7738_v17 = vld [vmem:[%s14825_s4 + $0x158] sm:$0xff] }
 0x3e4   :  { %6915 = vmatprep.subr.bf16.mxu0 %v14863_v61  ;;  %14876 = vst [vmem:[#allocation57_spill] sm:$0xff] %v13904_v32  ;;  %v13906_v27 = vpop.permute.xlu0 %1104  ;;  %7981 = vperm.xlu0 %11957, %v7739_v14   ;;  %v7740_v14 = vld [vmem:[%s14825_s4 + $0x168] sm:$0xff] }
 0x3e5   :  { %v13901_v18 = vpop.f32.mrb[108].mxu1  ;;  %14877 = vst [vmem:[#allocation58_spill] sm:$0xff] %v13906_v27 }
 0x3e6   :  { %14875 = vst [vmem:[#allocation56_spill] sm:$0xff] %v13901_v18  ;;  %v5700_v47 = vpop.f32.mrb[109].mxu1  ;;  %v7741_v18 = vld [vmem:[%s14825_s4 + $0x170] sm:$0xff]  ;;  %7976 = vperm.xlu1 %11958, %v7738_v17  }
 0x3e7   :  { %v13908_v10 = vpop.f32.mrb[110].mxu1  ;;  %v13916_v53 = vpop.permute.xlu1 %1099  ;;  %v12729_v47 = vld [vmem:[#allocation3 + $0x410] sm:$0xff]  }
 0x3e8   :  { %14878 = vst [vmem:[#allocation59_spill] sm:$0xff] %v13908_v10  ;;  %v5703_v5 = vpop.f32.mrb[111].mxu1  ;;  %14879 = vst [vmem:[#allocation60_spill] sm:$0xff] %v13916_v53  ;;  %v13918_v29 = vpop.permute.xlu0 %1114  ;;  %7991 = vperm.xlu0 %11957, %v7741_v18   ;;  %v12730_v10 = vld [vmem:[#allocation3 + $0x3d8] sm:$0xff]   ;;  %10750 = vmatprep.subr.bf16.mxu1 %v12729_v47  ;;  %v12890_v53 = vld [vmem:[#allocation6 + $0x1030] ss:$68 sps:$4 sm:$0xff]  }
 0x3e9   :  { %14880 = vst [vmem:[#allocation61_spill] sm:$0xff] %v13918_v29  ;;  %v7743_v5 = vld [vmem:[%s14825_s4 + $0x180] sm:$0xff]  ;;  %10751 = vmatpush3.bf16.msra.mxu1 %v12729_v47  ;;  %6916 = vmatpush1.bf16.msra.mxu0 %v12730_v10  ;;  %v7744_v10 = vld [vmem:[%s14825_s4 + $0x188] sm:$0xff] }
 0x3ea   :  { %6685 = vmatmul.mubr.bf16.gmra.mrb[24].mxu0 %v12670_v62  ;;  %7986 = vperm.xlu1 %11958, %v7740_v14  }
 0x3eb   :  { %6692 = vmatprep.mubr.bf16.mxu0 %v12672_v60  ;;  %v13928_v45 = vpop.permute.xlu1 %1109  ;;  %v7742_v60 = vld [vmem:[%s14825_s4 + $0x178] sm:$0xff]  ;;  %6917 = vmatprep.subr.bf16.mxu0 %v14863_v61 }
 0x3ec   :  { %14882 = vst [vmem:[#allocation63_spill] sm:$0xff] %v13928_v45  ;;  %v13930_v62 = vpop.permute.xlu0 %1124  ;;  %8001 = vperm.xlu0 %11957, %v7743_v5   ;;  %v12882_v45 = vld [vmem:[#allocation6 + $0xf20] ss:$68 sps:$4 sm:$0xff]  }
 0x3ed   :  { %v13926_v50 = vpop.f32.mrb[112].mxu1  ;;  %14883 = vst [vmem:[#allocation64_spill] sm:$0xff] %v13930_v62  ;;  %v12679_v62 = vld [vmem:[#allocation6 + $0x4fc] ss:$68 sps:$4 sm:$0xff]  }
 0x3ee   :  { %14881 = vst [vmem:[#allocation62_spill] sm:$0xff] %v13926_v50  ;;  %v5708_v17 = vpop.f32.mrb[113].mxu1  ;;  %v7745_v50 = vld [vmem:[%s14825_s4 + $0x190] sm:$0xff]  ;;  %7996 = vperm.xlu1 %11958, %v7742_v60  }
 0x3ef   :  { %v13932_v18 = vpop.f32.mrb[114].mxu1  ;;  %v13941_v47 = vpop.permute.xlu1 %1119 }
 0x3f0   :  { %14884 = vst [vmem:[#allocation65_spill] sm:$0xff] %v13932_v18  ;;  %v5711_v29 = vpop.f32.mrb[115].mxu1  ;;  %14885 = vst [vmem:[#allocation66_spill] sm:$0xff] %v13941_v47  ;;  %v13943_v14 = vpop.permute.xlu0 %1134  ;;  %8011 = vperm.xlu0 %11957, %v7745_v50  }
 0x3f1   :  { %14886 = vst [vmem:[#allocation67_spill] sm:$0xff] %v13943_v14  ;;  %v7747_v29 = vld [vmem:[%s14825_s4 + $0x1a0] sm:$0xff] }
 0x3f2   :  { %6693 = vmatmul.mubr.bf16.gmra.mrb[28].mxu0 %v12674_v43  ;;  %8006 = vperm.xlu1 %11958, %v7744_v10   ;;  %v12677_v43 = vld [vmem:[#allocation6 + $0x470] ss:$68 sps:$4 sm:$0xff]   ;;  %v7748_v10 = vld [vmem:[%s14825_s4 + $0x1a8] sm:$0xff] }
 0x3f3   :  { %6700 = vmatprep.mubr.bf16.mxu0 %v12675_v38  ;;  %v13953_v17 = vpop.permute.xlu1 %1129  ;;  %v7746_v38 = vld [vmem:[%s14825_s4 + $0x198] sm:$0xff] }
 0x3f4   :  { %14888 = vst [vmem:[#allocation69_spill] sm:$0xff] %v13953_v17  ;;  %v13955_v60 = vpop.permute.xlu0 %1144  ;;  %8021 = vperm.xlu0 %11957, %v7747_v29   ;;  %v12737_v29 = vld [vmem:[#allocation3 + $0x3e0] sm:$0xff]  }
 0x3f5   :  { %v13951_v5 = vpop.f32.mrb[116].mxu1  ;;  %14889 = vst [vmem:[#allocation70_spill] sm:$0xff] %v13955_v60  ;;  %6918 = vmatpush1.bf16.msra.mxu0 %v12737_v29  ;;  %v12682_v17 = vld [vmem:[#allocation6 + $0x584] ss:$68 sps:$4 sm:$0xff]   ;;  %v7753_v29 = vld [vmem:[%s14825_s4 + $0x1d0] sm:$0xff] }
 0x3f6   :  { %14887 = vst [vmem:[#allocation68_spill] sm:$0xff] %v13951_v5  ;;  %v5716_v18 = vpop.f32.mrb[117].mxu1  ;;  %v7749_v5 = vld [vmem:[%s14825_s4 + $0x1b0] sm:$0xff]  ;;  %8016 = vperm.xlu1 %11958, %v7746_v38   ;;  %6919 = vmatprep.subr.bf16.mxu0 %v14863_v61 }
 0x3f7   :  { %v13957_v14 = vpop.f32.mrb[118].mxu1  ;;  %v13965_v47 = vpop.permute.xlu1 %1139 }
 0x3f8   :  { %14890 = vst [vmem:[#allocation71_spill] sm:$0xff] %v13957_v14  ;;  %v5719_v50 = vpop.f32.mrb[119].mxu1  ;;  %14891 = vst [vmem:[#allocation72_spill] sm:$0xff] %v13965_v47  ;;  %v13967_v18 = vpop.permute.xlu0 %1154  ;;  %8031 = vperm.xlu0 %11957, %v7749_v5  }
 0x3f9   :  { %14892 = vst [vmem:[#allocation73_spill] sm:$0xff] %v13967_v18  ;;  %v7751_v50 = vld [vmem:[%s14825_s4 + $0x1c0] sm:$0xff]  ;;  %v12681_v18 = vld [vmem:[#allocation6 + $0x4f8] ss:$68 sps:$4 sm:$0xff]  }
 0x3fa   :  { %6701 = vmatmul.mubr.bf16.gmra.mrb[32].mxu0 %v12677_v43  ;;  %8026 = vperm.xlu1 %11958, %v7748_v10  }
 0x3fb   :  { %6708 = vmatprep.mubr.bf16.mxu0 %v12679_v62  ;;  %v13977_v60 = vpop.permute.xlu1 %1149  ;;  %v7750_v62 = vld [vmem:[%s14825_s4 + $0x1b8] sm:$0xff] }
 0x3fc   :  { %14894 = vst [vmem:[#allocation75_spill] sm:$0xff] %v13977_v60  ;;  %v13980_v5 = vpop.permute.xlu0 %1164  ;;  %8041 = vperm.xlu0 %11957, %v7751_v50   ;;  %v7752_v50 = vld [vmem:[%s14825_s4 + $0x1c8] sm:$0xff] }
 0x3fd   :  { %v13975_v14 = vpop.f32.mrb[120].mxu1  ;;  %14895 = vst [vmem:[#allocation76_spill] sm:$0xff] %v13980_v5  ;;  %v12686_v60 = vld [vmem:[#allocation6 + $0x60c] ss:$68 sps:$4 sm:$0xff]  }
 0x3fe   :  { %14893 = vst [vmem:[#allocation74_spill] sm:$0xff] %v13975_v14  ;;  %v5724_v38 = vpop.f32.mrb[121].mxu1  ;;  %8036 = vperm.xlu1 %11958, %v7750_v62  }
 0x3ff   :  { %v13982_v43 = vpop.f32.mrb[122].mxu1  ;;  %v13990_v38 = vpop.permute.xlu1 %1159 }
 0x400   :  { %14896 = vst [vmem:[#allocation77_spill] sm:$0xff] %v13982_v43  ;;  %v5727_v47 = vpop.f32.mrb[123].mxu1  ;;  %14897 = vst [vmem:[#allocation78_spill] sm:$0xff] %v13990_v38  ;;  %v13992_v10 = vpop.permute.xlu0 %1174  ;;  %8051 = vperm.xlu0 %11957, %v7753_v29   ;;  %v12741_v43 = vld [vmem:[#allocation3 + $0x418] sm:$0xff]  }
 0x401   :  { %14898 = vst [vmem:[#allocation79_spill] sm:$0xff] %v13992_v10  ;;  %v7755_v47 = vld [vmem:[%s14825_s4 + $0x1e0] sm:$0xff]  ;;  %10752 = vmatprep.subr.bf16.mxu1 %v12741_v43 }
 0x402   :  { %6709 = vmatmul.mubr.bf16.gmra.mrb[36].mxu0 %v12681_v18  ;;  %10753 = vmatpush3.bf16.msra.mxu1 %v12741_v43  ;;  %v12684_v10 = vld [vmem:[#allocation6 + $0x580] ss:$68 sps:$4 sm:$0xff]  }
 0x403   :  { %6716 = vmatprep.mubr.bf16.mxu0 %v12682_v17  ;;  %v14002_v5 = vpop.permute.xlu1 %1169  ;;  %8046 = vperm.xlu1 %11958, %v7752_v50   ;;  %v7754_v17 = vld [vmem:[%s14825_s4 + $0x1d8] sm:$0xff]  ;;  %v7756_v50 = vld [vmem:[%s14825_s4 + $0x1e8] sm:$0xff] }
 0x404   :  { %14900 = vst [vmem:[#allocation81_spill] sm:$0xff] %v14002_v5  ;;  %v14004_v18 = vpop.permute.xlu0 %1184  ;;  %8061 = vperm.xlu0 %11957, %v7755_v47   ;;  %v12745_v47 = vld [vmem:[#allocation3 + $0x3e8] sm:$0xff]  }
 0x405   :  { %v14000_v14 = vpop.f32.mrb[124].mxu1  ;;  %14901 = vst [vmem:[#allocation82_spill] sm:$0xff] %v14004_v18  ;;  %6920 = vmatpush1.bf16.msra.mxu0 %v12745_v47 }
 0x406   :  { %14899 = vst [vmem:[#allocation80_spill] sm:$0xff] %v14000_v14  ;;  %v5732_v62 = vpop.f32.mrb[125].mxu1  ;;  %v7757_v14 = vld [vmem:[%s14825_s4 + $0x1f0] sm:$0xff]  ;;  %6921 = vmatprep.subr.bf16.mxu0 %v14863_v61 }
 0x407   :  { %v14006_v29 = vpop.f32.mrb[126].mxu1  ;;  %v14014_v5 = vpop.permute.xlu1 %1179  ;;  %8056 = vperm.xlu1 %11958, %v7754_v17  }
 0x408   :  { %14902 = vst [vmem:[#allocation83_spill] sm:$0xff] %v14006_v29  ;;  %v5735_v38 = vpop.f32.mrb[127].mxu1  ;;  %14903 = vst [vmem:[#allocation84_spill] sm:$0xff] %v14014_v5  ;;  %v14016_v43 = vpop.permute.xlu0 %1194  ;;  %8071 = vperm.xlu0 %11957, %v7757_v14   ;;  %v7758_v14 = vld [vmem:[%s14825_s4 + $0x1f8] sm:$0xff] }
 0x409   :  { %14904 = vst [vmem:[#allocation85_spill] sm:$0xff] %v14016_v43  ;;  %v9361_v38 = vld [vmem:[%s14826_s5] sm:$0xff]  ;;  %v12689_v29 = vld [vmem:[#allocation6 + $0x694] ss:$68 sps:$4 sm:$0xff]  }
 0x40a   :  { %6717 = vmatmul.mubr.bf16.gmra.mrb[40].mxu0 %v12684_v10  ;;  %v12688_v10 = vld [vmem:[#allocation6 + $0x608] ss:$68 sps:$4 sm:$0xff]  }
 0x40b   :  { %6724 = vmatprep.mubr.bf16.mxu0 %v12686_v60  ;;  %v14024_v62 = vpop.permute.xlu1 %1189  ;;  %8066 = vperm.xlu1 %11958, %v7756_v50   ;;  %v9363_v60 = vld [vmem:[%s14826_s5 + $0x10] sm:$0xff]  ;;  %v9362_v50 = vld [vmem:[%s14826_s5 + $0x8] sm:$0xff] }
 0x40c   :  { %14905 = vst [vmem:[#allocation86_spill] sm:$0xff] %v14024_v62  ;;  %v14027_v17 = vpop.permute.xlu0 %1204  ;;  %9427 = vperm.xlu0 %11957, %v9361_v38   ;;  %v9365_v38 = vld [vmem:[%s14826_s5 + $0x20] sm:$0xff] }
 0x40d   :  { %14906 = vst [vmem:[#allocation87_spill] sm:$0xff] %v14027_v17 }
 0x40f   :  { %v14035_v43 = vpop.permute.xlu1 %1199  ;;  %8076 = vperm.xlu1 %11958, %v7758_v14   ;;  %v12693_v14 = vld [vmem:[#allocation6 + $0x71c] ss:$68 sps:$4 sm:$0xff]  }
 0x410   :  { %14907 = vst [vmem:[#allocation88_spill] sm:$0xff] %v14035_v43  ;;  %v14037_v47 = vpop.permute.xlu0 %1214  ;;  %9437 = vperm.xlu0 %11957, %v9363_v60   ;;  %v12691_v43 = vld [vmem:[#allocation6 + $0x690] ss:$68 sps:$4 sm:$0xff]  }
 0x411   :  { %14908 = vst [vmem:[#allocation89_spill] sm:$0xff] %v14037_v47 }
 0x412   :  { %6725 = vmatmul.mubr.bf16.gmra.mrb[44].mxu0 %v12688_v10  ;;  %v9364_v10 = vld [vmem:[%s14826_s5 + $0x18] sm:$0xff] }
 0x413   :  { %6732 = vmatprep.mubr.bf16.mxu0 %v12689_v29  ;;  %v14045_v17 = vpop.permute.xlu1 %1209  ;;  %9432 = vperm.xlu1 %11958, %v9362_v50   ;;  %v9367_v29 = vld [vmem:[%s14826_s5 + $0x30] sm:$0xff]  ;;  %v12752_v50 = vld [vmem:[#allocation3 + $0x420] sm:$0xff]  }
 0x414   :  { %14909 = vst [vmem:[#allocation90_spill] sm:$0xff] %v14045_v17  ;;  %v14047_v62 = vpop.permute.xlu0 %1224  ;;  %9447 = vperm.xlu0 %11957, %v9365_v38   ;;  %v9366_v38 = vld [vmem:[%s14826_s5 + $0x28] sm:$0xff]  ;;  %v12753_v17 = vld [vmem:[#allocation3 + $0x3f0] sm:$0xff]   ;;  %10754 = vmatprep.subr.bf16.mxu1 %v12752_v50 }
 0x415   :  { %14910 = vst [vmem:[#allocation91_spill] sm:$0xff] %v14047_v62  ;;  %v9369_v62 = vld [vmem:[%s14826_s5 + $0x40] sm:$0xff]  ;;  %10755 = vmatpush3.bf16.msra.mxu1 %v12752_v50  ;;  %6922 = vmatpush1.bf16.msra.mxu0 %v12753_v17 }
 0x416   :  { %6923 = vmatprep.subr.bf16.mxu0 %v14863_v61  ;;  %v9373_v17 = vld [vmem:[%s14826_s5 + $0x60] sm:$0xff] }
 0x417   :  { %v14055_v60 = vpop.permute.xlu1 %1219  ;;  %9442 = vperm.xlu1 %11958, %v9364_v10  }
 0x418   :  { %14911 = vst [vmem:[#allocation92_spill] sm:$0xff] %v14055_v60  ;;  %v14057_v47 = vpop.permute.xlu0 %1234  ;;  %9457 = vperm.xlu0 %11957, %v9367_v29   ;;  %v9368_v29 = vld [vmem:[%s14826_s5 + $0x38] sm:$0xff] }
 0x419   :  { %14912 = vst [vmem:[#allocation93_spill] sm:$0xff] %v14057_v47  ;;  %v9371_v47 = vld [vmem:[%s14826_s5 + $0x50] sm:$0xff] }
 0x41a   :  { %6733 = vmatmul.mubr.bf16.gmra.mrb[48].mxu0 %v12691_v43  ;;  %v12695_v43 = vld [vmem:[#allocation6 + $0x718] ss:$68 sps:$4 sm:$0xff]  }
 0x41b   :  { %6740 = vmatprep.mubr.bf16.mxu0 %v12693_v14  ;;  %v14065_v18 = vpop.permute.xlu1 %1229  ;;  %9452 = vperm.xlu1 %11958, %v9366_v38   ;;  %v12696_v14 = vld [vmem:[#allocation6 + $0x7a4] ss:$68 sps:$4 sm:$0xff]  }
 0x41c   :  { %14913 = vst [vmem:[#allocation94_spill] sm:$0xff] %v14065_v18  ;;  %v14067_v10 = vpop.permute.xlu0 %1244  ;;  %9467 = vperm.xlu0 %11957, %v9369_v62   ;;  %v9370_v62 = vld [vmem:[%s14826_s5 + $0x48] sm:$0xff]  ;;  %v12762_v18 = vld [vmem:[#allocation3 + $0x430] sm:$0xff]  }
 0x41d   :  { %14914 = vst [vmem:[#allocation95_spill] sm:$0xff] %v14067_v10 }
 0x41f   :  { %v14076_v60 = vpop.permute.xlu1 %1239  ;;  %9462 = vperm.xlu1 %11958, %v9368_v29   ;;  %v9375_v29 = vld [vmem:[%s14826_s5 + $0x70] sm:$0xff] }
 0x420   :  { %14915 = vst [vmem:[#allocation96_spill] sm:$0xff] %v14076_v60  ;;  %v14078_v50 = vpop.permute.xlu0 %1254  ;;  %9477 = vperm.xlu0 %11957, %v9371_v47   ;;  %v12698_v60 = vld [vmem:[#allocation6 + $0x7a0] ss:$68 sps:$4 sm:$0xff]   ;;  %v9372_v47 = vld [vmem:[%s14826_s5 + $0x58] sm:$0xff] }
 0x421   :  { %14916 = vst [vmem:[#allocation97_spill] sm:$0xff] %v14078_v50 }
 0x422   :  { %6741 = vmatmul.mubr.bf16.gmra.mrb[52].mxu0 %v12695_v43  ;;  %v12700_v43 = vld [vmem:[#allocation6 + $0x82c] ss:$68 sps:$4 sm:$0xff]  }
 0x423   :  { %6748 = vmatprep.mubr.bf16.mxu0 %v12696_v14  ;;  %v14086_v38 = vpop.permute.xlu1 %1249  ;;  %9472 = vperm.xlu1 %11958, %v9370_v62   ;;  %v12760_v62 = vld [vmem:[#allocation3 + $0x428] sm:$0xff]  }
 0x424   :  { %14917 = vst [vmem:[#allocation98_spill] sm:$0xff] %v14086_v38  ;;  %v14088_v10 = vpop.permute.xlu0 %1264  ;;  %9487 = vperm.xlu0 %11957, %v9373_v17   ;;  %v9374_v17 = vld [vmem:[%s14826_s5 + $0x68] sm:$0xff]  ;;  %v12761_v38 = vld [vmem:[#allocation3 + $0x3f8] sm:$0xff]   ;;  %10756 = vmatprep.subr.bf16.mxu1 %v12760_v62 }
 0x425   :  { %14918 = vst [vmem:[#allocation99_spill] sm:$0xff] %v14088_v10  ;;  %v9377_v10 = vld [vmem:[%s14826_s5 + $0x80] sm:$0xff]  ;;  %10757 = vmatpush3.bf16.msra.mxu1 %v12760_v62  ;;  %6924 = vmatpush1.bf16.msra.mxu0 %v12761_v38  ;;  %v9378_v38 = vld [vmem:[%s14826_s5 + $0x88] sm:$0xff] }
 0x426   :  { %10758 = vmatprep.subr.bf16.mxu1 %v12762_v18 }
 0x427   :  { %v14096_v14 = vpop.permute.xlu1 %1259  ;;  %9482 = vperm.xlu1 %11958, %v9372_v47  }
 0x428   :  { %14919 = vst [vmem:[#allocation100_spill] sm:$0xff] %v14096_v14  ;;  %v14098_v50 = vpop.permute.xlu0 %1274  ;;  %9497 = vperm.xlu0 %11957, %v9375_v29   ;;  %v12703_v29 = vld [vmem:[#allocation6 + $0x8b4] ss:$68 sps:$4 sm:$0xff]  }
 0x429   :  { %14920 = vst [vmem:[#allocation101_spill] sm:$0xff] %v14098_v50  ;;  %v9379_v50 = vld [vmem:[%s14826_s5 + $0x90] sm:$0xff]  ;;  %10759 = vmatpush3.bf16.msra.mxu1 %v12762_v18 }
 0x42a   :  { %6749 = vmatmul.mubr.bf16.gmra.mrb[56].mxu0 %v12698_v60  ;;  %v12702_v60 = vld [vmem:[#allocation6 + $0x828] ss:$68 sps:$4 sm:$0xff]   ;;  %v12705_v18 = vld [vmem:[#allocation6 + $0x8b0] ss:$68 sps:$4 sm:$0xff]  }
 0x42b   :  { %6756 = vmatprep.mubr.bf16.mxu0 %v12700_v43  ;;  %v14106_v5 = vpop.permute.xlu1 %1269  ;;  %9492 = vperm.xlu1 %11958, %v9374_v17   ;;  %v9376_v43 = vld [vmem:[%s14826_s5 + $0x78] sm:$0xff]  ;;  %v9381_v17 = vld [vmem:[%s14826_s5 + $0xa0] sm:$0xff] }
 0x42c   :  { %14921 = vst [vmem:[#allocation102_spill] sm:$0xff] %v14106_v5  ;;  %v14108_v47 = vpop.permute.xlu0 %1284  ;;  %9507 = vperm.xlu0 %11957, %v9377_v10   ;;  %v12766_v10 = vld [vmem:[#allocation3 + $0x438] sm:$0xff]   ;;  %v12768_v5 = vld [vmem:[#allocation6 + $0xc8] ss:$68 sps:$4 sm:$0xff]  }
 0x42d   :  { %14922 = vst [vmem:[#allocation103_spill] sm:$0xff] %v14108_v47  ;;  %v12767_v47 = vld [vmem:[#allocation6 + $0x40] ss:$68 sps:$4 sm:$0xff]   ;;  %10760 = vmatprep.subr.bf16.mxu1 %v12766_v10 }
 0x42e   :  { %10761 = vmatpush3.bf16.msra.mxu1 %v12766_v10  ;;  %10762 = vmatprep.mubr.bf16.mxu1 %v12767_v47  ;;  %v9382_v47 = vld [vmem:[%s14826_s5 + $0xa8] sm:$0xff]  ;;  %v9385_v10 = vld [vmem:[%s14826_s5 + $0xc0] sm:$0xff] }
 0x42f   :  { %v14116_v14 = vpop.permute.xlu1 %1279  ;;  %9502 = vperm.xlu1 %11958, %v9376_v43   ;;  %v12708_v43 = vld [vmem:[#allocation6 + $0x93c] ss:$68 sps:$4 sm:$0xff]   ;;  %8719 = vmatprep.subr.bf16.mxu1 %v14863_v61 }
 0x430   :  { %14923 = vst [vmem:[#allocation104_spill] sm:$0xff] %v14116_v14  ;;  %v14118_v62 = vpop.permute.xlu0 %1294  ;;  %9517 = vperm.xlu0 %11957, %v9379_v50   ;;  %v9380_v50 = vld [vmem:[%s14826_s5 + $0x98] sm:$0xff] }
 0x431   :  { %14924 = vst [vmem:[#allocation105_spill] sm:$0xff] %v14118_v62  ;;  %10763 = vmatmul.mubr.bf16.vlgmr.msra.gmra.mrb[128].mxu1 %v12768_v5  ;;  %v12710_v5 = vld [vmem:[#allocation6 + $0x938] ss:$68 sps:$4 sm:$0xff]  }
 0x432   :  { %6757 = vmatmul.mubr.bf16.gmra.mrb[60].mxu0 %v12702_v60 }
 0x433   :  { %6764 = vmatprep.mubr.bf16.mxu0 %v12703_v29  ;;  %v14126_v14 = vpop.permute.xlu1 %1289  ;;  %9512 = vperm.xlu1 %11958, %v9378_v38   ;;  %v9383_v29 = vld [vmem:[%s14826_s5 + $0xb0] sm:$0xff] }
 0x434   :  { %14925 = vst [vmem:[#allocation106_spill] sm:$0xff] %v14126_v14  ;;  %v14128_v60 = vpop.permute.xlu0 %7761  ;;  %9527 = vperm.xlu0 %11957, %v9381_v17   ;;  %v12824_v14 = vld [vmem:[#allocation6 + $0x838] ss:$68 sps:$4 sm:$0xff]  }
 0x435   :  { %14926 = vst [vmem:[#allocation107_spill] sm:$0xff] %v14128_v60  ;;  %v12776_v60 = vld [vmem:[#allocation6 + $0x1d8] ss:$68 sps:$4 sm:$0xff]  }
 0x437   :  { %v14137_v62 = vpop.permute.xlu1 %1299  ;;  %9522 = vperm.xlu1 %11958, %v9380_v50   ;;  %v12711_v50 = vld [vmem:[#allocation6 + $0x9c4] ss:$68 sps:$4 sm:$0xff]  }
 0x438   :  { %14927 = vst [vmem:[#allocation108_spill] sm:$0xff] %v14137_v62  ;;  %9537 = vperm.xlu0 %11957, %v9383_v29   ;;  %v14145_v38 = vpop.permute.xlu0 %7771 }
 0x439   :  { %14928 = vst [vmem:[#allocation109_spill] sm:$0xff] %v14145_v38  ;;  %v12775_v38 = vld [vmem:[#allocation6 + $0x150] ss:$68 sps:$4 sm:$0xff]  }
 0x43a   :  { %6765 = vmatmul.mubr.bf16.gmra.mrb[64].mxu0 %v12705_v18  ;;  %v9384_v18 = vld [vmem:[%s14826_s5 + $0xb8] sm:$0xff]  ;;  %10766 = vmatprep.mubr.bf16.mxu1 %v12775_v38  ;;  %v9393_v38 = vld [vmem:[%s14826_s5 + $0x100] sm:$0xff] }
 0x43b   :  { %6772 = vmatprep.mubr.bf16.mxu0 %v12708_v43  ;;  %v14147_v17 = vpop.permute.xlu1 %7766  ;;  %9532 = vperm.xlu1 %11958, %v9382_v47   ;;  %v9387_v43 = vld [vmem:[%s14826_s5 + $0xd0] sm:$0xff]  ;;  %v9386_v47 = vld [vmem:[%s14826_s5 + $0xc8] sm:$0xff] }
 0x43c   :  { %14929 = vst [vmem:[#allocation110_spill] sm:$0xff] %v14147_v17  ;;  %9547 = vperm.xlu0 %11957, %v9385_v10   ;;  %v14155_v29 = vpop.permute.xlu0 %7781  ;;  %v9389_v17 = vld [vmem:[%s14826_s5 + $0xe0] sm:$0xff]  ;;  %10767 = vmatmul.mubr.bf16.gmra.mrb[132].mxu1 %v12776_v60  ;;  %v9390_v60 = vld [vmem:[%s14826_s5 + $0xe8] sm:$0xff] }
 0x43d   :  { %14930 = vst [vmem:[#allocation111_spill] sm:$0xff] %v14155_v29 }
 0x43f   :  { %9542 = vperm.xlu1 %11958, %v9384_v18   ;;  %v14160_v10 = vpop.permute.xlu1 %7776  ;;  %v9388_v18 = vld [vmem:[%s14826_s5 + $0xd8] sm:$0xff] }
 0x440   :  { %9557 = vperm.xlu0 %11957, %v9387_v43   ;;  %14931 = vst [vmem:[#allocation112_spill] sm:$0xff] %v14160_v10  ;;  %v12715_v43 = vld [vmem:[#allocation6 + $0xa4c] ss:$68 sps:$4 sm:$0xff]   ;;  %v14171_v29 = vpop.permute.xlu0 %7791 }
 0x441   :  { %14932 = vst [vmem:[#allocation113_spill] sm:$0xff] %v14171_v29  ;;  %v12784_v29 = vld [vmem:[#allocation6 + $0x2e8] ss:$68 sps:$4 sm:$0xff]  }
 0x442   :  { %6773 = vmatmul.mubr.bf16.gmra.mrb[68].mxu0 %v12710_v5  ;;  %v12713_v5 = vld [vmem:[#allocation6 + $0x9c0] ss:$68 sps:$4 sm:$0xff]  }
 0x443   :  { %6780 = vmatprep.mubr.bf16.mxu0 %v12711_v50  ;;  %9552 = vperm.xlu1 %11958, %v9386_v47   ;;  %v9391_v50 = vld [vmem:[%s14826_s5 + $0xf0] sm:$0xff]  ;;  %v14173_v10 = vpop.permute.xlu1 %7786 }
 0x444   :  { %9567 = vperm.xlu0 %11957, %v9389_v17   ;;  %14933 = vst [vmem:[#allocation114_spill] sm:$0xff] %v14173_v10  ;;  %v12717_v17 = vld [vmem:[#allocation6 + $0xa48] ss:$68 sps:$4 sm:$0xff]   ;;  %v14181_v47 = vpop.permute.xlu0 %7801 }
 0x445   :  { %14934 = vst [vmem:[#allocation115_spill] sm:$0xff] %v14181_v47  ;;  %v12783_v47 = vld [vmem:[#allocation6 + $0x260] ss:$68 sps:$4 sm:$0xff]  }
 0x446   :  { %10770 = vmatprep.mubr.bf16.mxu1 %v12783_v47 }
 0x447   :  { %9562 = vperm.xlu1 %11958, %v9388_v18   ;;  %v9392_v18 = vld [vmem:[%s14826_s5 + $0xf8] sm:$0xff]  ;;  %10771 = vmatmul.mubr.bf16.gmra.mrb[136].mxu1 %v12784_v29  ;;  %v9398_v29 = vld [vmem:[%s14826_s5 + $0x128] sm:$0xff] }
 0x448   :  { %9577 = vperm.xlu0 %11957, %v9391_v50   ;;  %v14186_v50 = vpop.permute.xlu1 %7796  ;;  %v14197_v10 = vpop.permute.xlu0 %7811 }
 0x449   :  { %14935 = vst [vmem:[#allocation116_spill] sm:$0xff] %v14186_v50  ;;  %14936 = vst [vmem:[#allocation117_spill] sm:$0xff] %v14197_v10  ;;  %v12792_v10 = vld [vmem:[#allocation6 + $0x3f8] ss:$68 sps:$4 sm:$0xff]  }
 0x44a   :  { %6781 = vmatmul.mubr.bf16.gmra.mrb[72].mxu0 %v12713_v5  ;;  %v12719_v5 = vld [vmem:[#allocation6 + $0xad4] ss:$68 sps:$4 sm:$0xff]  }
 0x44b   :  { %6788 = vmatprep.mubr.bf16.mxu0 %v12715_v43  ;;  %9572 = vperm.xlu1 %11958, %v9390_v60   ;;  %v9395_v43 = vld [vmem:[%s14826_s5 + $0x110] sm:$0xff]  ;;  %v9394_v60 = vld [vmem:[%s14826_s5 + $0x108] sm:$0xff] }
 0x44c   :  { %9587 = vperm.xlu0 %11957, %v9393_v38   ;;  %v9397_v38 = vld [vmem:[%s14826_s5 + $0x120] sm:$0xff]  ;;  %v14199_v50 = vpop.permute.xlu1 %7806  ;;  %v14207_v62 = vpop.permute.xlu0 %7821 }
 0x44d   :  { %14937 = vst [vmem:[#allocation118_spill] sm:$0xff] %v14199_v50  ;;  %14938 = vst [vmem:[#allocation119_spill] sm:$0xff] %v14207_v62 }
 0x44f   :  { %9582 = vperm.xlu1 %11958, %v9392_v18   ;;  %v9396_v18 = vld [vmem:[%s14826_s5 + $0x118] sm:$0xff] }
 0x450   :  { %9597 = vperm.xlu0 %11957, %v9395_v43   ;;  %v12723_v43 = vld [vmem:[#allocation6 + $0xb5c] ss:$68 sps:$4 sm:$0xff]   ;;  %v14212_v47 = vpop.permute.xlu1 %7816  ;;  %v14223_v62 = vpop.permute.xlu0 %7831 }
 0x451   :  { %14939 = vst [vmem:[#allocation120_spill] sm:$0xff] %v14212_v47  ;;  %14940 = vst [vmem:[#allocation121_spill] sm:$0xff] %v14223_v62  ;;  %v9405_v47 = vld [vmem:[%s14826_s5 + $0x160] sm:$0xff] }
 0x452   :  { %6789 = vmatmul.mubr.bf16.gmra.mrb[76].mxu0 %v12717_v17  ;;  %v12721_v17 = vld [vmem:[#allocation6 + $0xad0] ss:$68 sps:$4 sm:$0xff]   ;;  %v12728_v62 = vld [vmem:[#allocation6 + $0xbe0] ss:$68 sps:$4 sm:$0xff]  }
 0x453   :  { %6796 = vmatprep.mubr.bf16.mxu0 %v12719_v5  ;;  %9592 = vperm.xlu1 %11958, %v9394_v60   ;;  %v9399_v5 = vld [vmem:[%s14826_s5 + $0x130] sm:$0xff]  ;;  %v9401_v60 = vld [vmem:[%s14826_s5 + $0x140] sm:$0xff] }
 0x454   :  { %9607 = vperm.xlu0 %11957, %v9397_v38   ;;  %v12725_v38 = vld [vmem:[#allocation6 + $0xb58] ss:$68 sps:$4 sm:$0xff]   ;;  %v14233_v50 = vpop.permute.xlu0 %7841 }
 0x455   :  { %14942 = vst [vmem:[#allocation123_spill] sm:$0xff] %v14233_v50  ;;  %v12733_v50 = vld [vmem:[#allocation6 + $0xc68] ss:$68 sps:$4 sm:$0xff]  }
 0x457   :  { %9602 = vperm.xlu1 %11958, %v9396_v18   ;;  %v12726_v18 = vld [vmem:[#allocation6 + $0xbe4] ss:$68 sps:$4 sm:$0xff]  }
 0x458   :  { %9617 = vperm.xlu0 %11957, %v9399_v5   ;;  %v9403_v5 = vld [vmem:[%s14826_s5 + $0x150] sm:$0xff] }
 0x45a   :  { %6797 = vmatmul.mubr.bf16.gmra.mrb[80].mxu0 %v12721_v17  ;;  %v9400_v17 = vld [vmem:[%s14826_s5 + $0x138] sm:$0xff] }
 0x45b   :  { %6804 = vmatprep.mubr.bf16.mxu0 %v12723_v43  ;;  %9612 = vperm.xlu1 %11958, %v9398_v29   ;;  %v14225_v43 = vpop.permute.xlu1 %7826  ;;  %v9402_v29 = vld [vmem:[%s14826_s5 + $0x148] sm:$0xff] }
 0x45c   :  { %9627 = vperm.xlu0 %11957, %v9401_v60   ;;  %14941 = vst [vmem:[#allocation122_spill] sm:$0xff] %v14225_v43  ;;  %v12791_v60 = vld [vmem:[#allocation6 + $0x370] ss:$68 sps:$4 sm:$0xff]  }
 0x45d   :  { %10774 = vmatprep.mubr.bf16.mxu1 %v12791_v60 }
 0x45e   :  { %10775 = vmatmul.mubr.bf16.gmra.mrb[140].mxu1 %v12792_v10  ;;  %v9406_v10 = vld [vmem:[%s14826_s5 + $0x168] sm:$0xff] }
 0x45f   :  { %9622 = vperm.xlu1 %11958, %v9400_v17   ;;  %v12731_v17 = vld [vmem:[#allocation6 + $0xc6c] ss:$68 sps:$4 sm:$0xff]  }
 0x460   :  { %9637 = vperm.xlu0 %11957, %v9403_v5   ;;  %v14238_v5 = vpop.permute.xlu1 %7836 }
 0x461   :  { %14943 = vst [vmem:[#allocation124_spill] sm:$0xff] %v14238_v5  ;;  %v12800_v5 = vld [vmem:[#allocation6 + $0x508] ss:$68 sps:$4 sm:$0xff]  }
 0x462   :  { %6805 = vmatmul.mubr.bf16.gmra.mrb[84].mxu0 %v12725_v38  ;;  %v9404_v38 = vld [vmem:[%s14826_s5 + $0x158] sm:$0xff] }
 0x463   :  { %6812 = vmatprep.mubr.bf16.mxu0 %v12726_v18  ;;  %9632 = vperm.xlu1 %11958, %v9402_v29   ;;  %v9407_v18 = vld [vmem:[%s14826_s5 + $0x170] sm:$0xff]  ;;  %v14249_v29 = vpop.permute.xlu0 %7851 }
 0x464   :  { %9647 = vperm.xlu0 %11957, %v9405_v47   ;;  %v9409_v47 = vld [vmem:[%s14826_s5 + $0x180] sm:$0xff]  ;;  %14944 = vst [vmem:[#allocation125_spill] sm:$0xff] %v14249_v29  ;;  %v14251_v60 = vpop.permute.xlu1 %7846 }
 0x465   :  { %14945 = vst [vmem:[#allocation126_spill] sm:$0xff] %v14251_v60  ;;  %v12799_v29 = vld [vmem:[#allocation6 + $0x480] ss:$68 sps:$4 sm:$0xff]  }
 0x466   :  { %v9413_v60 = vld [vmem:[%s14826_s5 + $0x1a0] sm:$0xff]  ;;  %10778 = vmatprep.mubr.bf16.mxu1 %v12799_v29 }
 0x467   :  { %9642 = vperm.xlu1 %11958, %v9404_v38   ;;  %v12734_v38 = vld [vmem:[#allocation6 + $0xcf4] ss:$68 sps:$4 sm:$0xff]   ;;  %10779 = vmatmul.mubr.bf16.gmra.mrb[144].mxu1 %v12800_v5  ;;  %v9414_v5 = vld [vmem:[%s14826_s5 + $0x1a8] sm:$0xff]  ;;  %v9417_v29 = vld [vmem:[%s14826_s5 + $0x1c0] sm:$0xff] }
 0x468   :  { %9657 = vperm.xlu0 %11957, %v9407_v18   ;;  %v14259_v18 = vpop.permute.xlu0 %7861 }
 0x469   :  { %14946 = vst [vmem:[#allocation127_spill] sm:$0xff] %v14259_v18 }
 0x46a   :  { %6813 = vmatmul.mubr.bf16.gmra.mrb[88].mxu0 %v12728_v62  ;;  %v9408_v62 = vld [vmem:[%s14826_s5 + $0x178] sm:$0xff] }
 0x46b   :  { %6820 = vmatprep.mubr.bf16.mxu0 %v12731_v17  ;;  %9652 = vperm.xlu1 %11958, %v9406_v10   ;;  %v9411_v17 = vld [vmem:[%s14826_s5 + $0x190] sm:$0xff]  ;;  %v9410_v10 = vld [vmem:[%s14826_s5 + $0x188] sm:$0xff] }
 0x46c   :  { %9667 = vperm.xlu0 %11957, %v9409_v47   ;;  %v14264_v47 = vpop.permute.xlu1 %7856  ;;  %v14275_v18 = vpop.permute.xlu0 %7871 }
 0x46d   :  { %14947 = vst [vmem:[#allocation128_spill] sm:$0xff] %v14264_v47  ;;  %14948 = vst [vmem:[#allocation129_spill] sm:$0xff] %v14275_v18  ;;  %v12808_v18 = vld [vmem:[#allocation6 + $0x618] ss:$68 sps:$4 sm:$0xff]  }
 0x46f   :  { %9662 = vperm.xlu1 %11958, %v9408_v62   ;;  %v9412_v62 = vld [vmem:[%s14826_s5 + $0x198] sm:$0xff] }
 0x470   :  { %9677 = vperm.xlu0 %11957, %v9411_v17   ;;  %v12738_v17 = vld [vmem:[#allocation6 + $0xd7c] ss:$68 sps:$4 sm:$0xff]   ;;  %v14277_v47 = vpop.permute.xlu1 %7866 }
 0x471   :  { %14949 = vst [vmem:[#allocation130_spill] sm:$0xff] %v14277_v47 }
 0x472   :  { %6821 = vmatmul.mubr.bf16.gmra.mrb[92].mxu0 %v12733_v50  ;;  %v12736_v50 = vld [vmem:[#allocation6 + $0xcf0] ss:$68 sps:$4 sm:$0xff]  }
 0x473   :  { %6828 = vmatprep.mubr.bf16.mxu0 %v12734_v38  ;;  %9672 = vperm.xlu1 %11958, %v9410_v10   ;;  %v9415_v38 = vld [vmem:[%s14826_s5 + $0x1b0] sm:$0xff]  ;;  %v14285_v10 = vpop.permute.xlu0 %7881 }
 0x474   :  { %9687 = vperm.xlu0 %11957, %v9413_v60   ;;  %v12740_v60 = vld [vmem:[#allocation6 + $0xd78] ss:$68 sps:$4 sm:$0xff]   ;;  %14950 = vst [vmem:[#allocation131_spill] sm:$0xff] %v14285_v10  ;;  %v12807_v10 = vld [vmem:[#allocation6 + $0x590] ss:$68 sps:$4 sm:$0xff]  }
 0x475   :  { %10782 = vmatprep.mubr.bf16.mxu1 %v12807_v10 }
 0x476   :  { %10783 = vmatmul.mubr.bf16.gmra.mrb[148].mxu1 %v12808_v18  ;;  %v9422_v18 = vld [vmem:[%s14826_s5 + $0x1e8] sm:$0xff] }
 0x477   :  { %9682 = vperm.xlu1 %11958, %v9412_v62   ;;  %v9416_v62 = vld [vmem:[%s14826_s5 + $0x1b8] sm:$0xff]  ;;  %v14301_v47 = vpop.permute.xlu0 %7891 }
 0x478   :  { %9697 = vperm.xlu0 %11957, %v9415_v38   ;;  %v14290_v38 = vpop.permute.xlu1 %7876  ;;  %14952 = vst [vmem:[#allocation133_spill] sm:$0xff] %v14301_v47  ;;  %v12749_v47 = vld [vmem:[#allocation6 + $0xf14] ss:$68 sps:$4 sm:$0xff]  }
 0x479   :  { %14951 = vst [vmem:[#allocation132_spill] sm:$0xff] %v14290_v38 }
 0x47a   :  { %6829 = vmatmul.mubr.bf16.gmra.mrb[96].mxu0 %v12736_v50  ;;  %v12742_v50 = vld [vmem:[#allocation6 + $0xe04] ss:$68 sps:$4 sm:$0xff]  }
 0x47b   :  { %6836 = vmatprep.mubr.bf16.mxu0 %v12738_v17  ;;  %9692 = vperm.xlu1 %11958, %v9414_v5   ;;  %v9419_v17 = vld [vmem:[%s14826_s5 + $0x1d0] sm:$0xff]  ;;  %v9418_v5 = vld [vmem:[%s14826_s5 + $0x1c8] sm:$0xff]  ;;  %v14311_v43 = vpop.permute.xlu0 %7901 }
 0x47c   :  { %9707 = vperm.xlu0 %11957, %v9417_v29   ;;  %v9421_v29 = vld [vmem:[%s14826_s5 + $0x1e0] sm:$0xff]  ;;  %v14303_v38 = vpop.permute.xlu1 %7886  ;;  %14954 = vst [vmem:[#allocation135_spill] sm:$0xff] %v14311_v43 }
 0x47d   :  { %14953 = vst [vmem:[#allocation134_spill] sm:$0xff] %v14303_v38  ;;  %v12757_v43 = vld [vmem:[#allocation6 + $0x1024] ss:$68 sps:$4 sm:$0xff]  }
 0x47f   :  { %9702 = vperm.xlu1 %11958, %v9416_v62   ;;  %v9420_v62 = vld [vmem:[%s14826_s5 + $0x1d8] sm:$0xff] }
 0x480   :  { %9717 = vperm.xlu0 %11957, %v9419_v17   ;;  %v12746_v17 = vld [vmem:[#allocation6 + $0xe8c] ss:$68 sps:$4 sm:$0xff]   ;;  %v14316_v10 = vpop.permute.xlu1 %7896 }
 0x481   :  { %14955 = vst [vmem:[#allocation136_spill] sm:$0xff] %v14316_v10  ;;  %v12823_v10 = vld [vmem:[#allocation6 + $0x7b0] ss:$68 sps:$4 sm:$0xff]  }
 0x482   :  { %6837 = vmatmul.mubr.bf16.gmra.mrb[100].mxu0 %v12740_v60  ;;  %v12744_v60 = vld [vmem:[#allocation6 + $0xe00] ss:$68 sps:$4 sm:$0xff]  }
 0x483   :  { %6844 = vmatprep.mubr.bf16.mxu0 %v12742_v50  ;;  %9712 = vperm.xlu1 %11958, %v9418_v5   ;;  %v9423_v50 = vld [vmem:[%s14826_s5 + $0x1f0] sm:$0xff]  ;;  %v12748_v5 = vld [vmem:[#allocation6 + $0xe88] ss:$68 sps:$4 sm:$0xff]  }
 0x484   :  { %9727 = vperm.xlu0 %11957, %v9421_v29   ;;  %v9424_v29 = vld [vmem:[%s14826_s5 + $0x1f8] sm:$0xff]  ;;  %v14321_v38 = vpop.permute.xlu1 %7906 }
 0x485   :  { %14956 = vst [vmem:[#allocation137_spill] sm:$0xff] %v14321_v38  ;;  %v12759_v38 = vld [vmem:[#allocation6 + $0x1020] ss:$68 sps:$4 sm:$0xff]  }
 0x487   :  { %9722 = vperm.xlu1 %11958, %v9420_v62   ;;  %v12816_v62 = vld [vmem:[#allocation6 + $0x728] ss:$68 sps:$4 sm:$0xff]  }
 0x488   :  { %9737 = vperm.xlu0 %11957, %v9423_v50   ;;  %v12751_v50 = vld [vmem:[#allocation6 + $0xf10] ss:$68 sps:$4 sm:$0xff]  }
 0x48a   :  { %6845 = vmatmul.mubr.bf16.gmra.mrb[104].mxu0 %v12744_v60  ;;  %v12815_v60 = vld [vmem:[#allocation6 + $0x6a0] ss:$68 sps:$4 sm:$0xff]  }
 0x48b   :  { %6852 = vmatprep.mubr.bf16.mxu0 %v12746_v17  ;;  %9732 = vperm.xlu1 %11958, %v9422_v18   ;;  %v12754_v17 = vld [vmem:[#allocation6 + $0xf9c] ss:$68 sps:$4 sm:$0xff]  }
 0x48c   :  { %10786 = vmatprep.mubr.bf16.mxu1 %v12815_v60  ;;  %v12756_v18 = vld [vmem:[#allocation6 + $0xf98] ss:$68 sps:$4 sm:$0xff]   ;;  %v12831_v60 = vld [vmem:[#allocation6 + $0x8c0] ss:$68 sps:$4 sm:$0xff]  }
 0x48d   :  { %10787 = vmatmul.mubr.bf16.gmra.mrb[152].mxu1 %v12816_v62  ;;  %v12832_v62 = vld [vmem:[#allocation6 + $0x948] ss:$68 sps:$4 sm:$0xff]  }
 0x48e   :  { %10790 = vmatprep.mubr.bf16.mxu1 %v12823_v10  ;;  %v12780_v10 = vld [vmem:[#allocation6 + $0x1d4] ss:$68 sps:$4 sm:$0xff]  }
 0x48f   :  { %9742 = vperm.xlu1 %11958, %v9424_v29   ;;  %v12763_v29 = vld [vmem:[#allocation6 + $0x10ac] ss:$68 sps:$4 sm:$0xff]  }
 0x492   :  { %6853 = vmatmul.mubr.bf16.gmra.mrb[108].mxu0 %v12748_v5  ;;  %v12765_v5 = vld [vmem:[#allocation6 + $0x10a8] ss:$68 sps:$4 sm:$0xff]  }
 0x493   :  { %6860 = vmatprep.mubr.bf16.mxu0 %v12749_v47  ;;  %v12771_v47 = vld [vmem:[#allocation6 + $0x3c] ss:$68 sps:$4 sm:$0xff]  }
 0x495   :  { %10791 = vmatmul.mubr.bf16.gmra.mrb[156].mxu1 %v12824_v14  ;;  %v12779_v14 = vld [vmem:[#allocation6 + $0x148] ss:$68 sps:$4 sm:$0xff]  }
 0x496   :  { %10794 = vmatprep.mubr.bf16.mxu1 %v12831_v60  ;;  %v12787_v60 = vld [vmem:[#allocation6 + $0x258] ss:$68 sps:$4 sm:$0xff]  }
 0x49a   :  { %6861 = vmatmul.mubr.bf16.gmra.mrb[112].mxu0 %v12751_v50  ;;  %v12769_v50 = vld [vmem:[#allocation6 + $0x38] ss:$68 sps:$4 sm:$0xff]  }
 0x49b   :  { %6868 = vmatprep.mubr.bf16.mxu0 %v12754_v17  ;;  %v12772_v17 = vld [vmem:[#allocation6 + $0xc4] ss:$68 sps:$4 sm:$0xff]  }
 0x49d   :  { %10795 = vmatmul.mubr.bf16.gmra.mrb[160].mxu1 %v12832_v62  ;;  %v12788_v62 = vld [vmem:[#allocation6 + $0x2e4] ss:$68 sps:$4 sm:$0xff]  }
 0x4a2   :  { %6869 = vmatmul.mubr.bf16.gmra.mrb[116].mxu0 %v12756_v18  ;;  %v12774_v18 = vld [vmem:[#allocation6 + $0xc0] ss:$68 sps:$4 sm:$0xff]  }
 0x4a3   :  { %6876 = vmatprep.mubr.bf16.mxu0 %v12757_v43  ;;  %v12777_v43 = vld [vmem:[#allocation6 + $0x14c] ss:$68 sps:$4 sm:$0xff]  }
 0x4aa   :  { %6877 = vmatmul.mubr.bf16.gmra.mrb[120].mxu0 %v12759_v38  ;;  %v12842_v38 = vld [vmem:[#allocation6 + $0x9d0] ss:$68 sps:$4 sm:$0xff]  }
 0x4ab   :  { %6884 = vmatprep.mubr.bf16.mxu0 %v12763_v29  ;;  %v12843_v29 = vld [vmem:[#allocation6 + $0xa58] ss:$68 sps:$4 sm:$0xff]   ;;  %10798 = vmatprep.mubr.bf16.mxu1 %v12842_v38 }
 0x4ac   :  { %10799 = vmatmul.mubr.bf16.gmra.mrb[164].mxu1 %v12843_v29  ;;  %v12796_v38 = vld [vmem:[#allocation6 + $0x3f4] ss:$68 sps:$4 sm:$0xff]  }
 0x4ad   :  { %v12859_v29 = vld [vmem:[#allocation6 + $0xc78] ss:$68 sps:$4 sm:$0xff]  }
 0x4b2   :  { %6885 = vmatmul.mubr.bf16.gmra.mrb[124].mxu0 %v12765_v5  ;;  %v12782_v5 = vld [vmem:[#allocation6 + $0x1d0] ss:$68 sps:$4 sm:$0xff]  }
 0x4b3   :  { %6925 = vmatprep.mubr.bf16.mxu0 %v12771_v47  ;;  %v12785_v47 = vld [vmem:[#allocation6 + $0x25c] ss:$68 sps:$4 sm:$0xff]  }
 0x4ba   :  { %6926 = vmatmul.mubr.bf16.vlgmr.msra.gmra.mrb[0].mxu0 %v12769_v50  ;;  %v12850_v50 = vld [vmem:[#allocation6 + $0xae0] ss:$68 sps:$4 sm:$0xff]  }
 0x4bb   :  { %6933 = vmatprep.mubr.bf16.mxu0 %v12772_v17  ;;  %v12851_v17 = vld [vmem:[#allocation6 + $0xb68] ss:$68 sps:$4 sm:$0xff]   ;;  %10802 = vmatprep.mubr.bf16.mxu1 %v12850_v50 }
 0x4bc   :  { %10803 = vmatmul.mubr.bf16.gmra.mrb[168].mxu1 %v12851_v17  ;;  %v12804_v50 = vld [vmem:[#allocation6 + $0x504] ss:$68 sps:$4 sm:$0xff]  }
 0x4bd   :  { %v12867_v17 = vld [vmem:[#allocation6 + $0xd88] ss:$68 sps:$4 sm:$0xff]  }
 0x4c2   :  { %6934 = vmatmul.mubr.bf16.gmra.mrb[4].mxu0 %v12774_v18  ;;  %v12790_v18 = vld [vmem:[#allocation6 + $0x2e0] ss:$68 sps:$4 sm:$0xff]  }
 0x4c3   :  { %6941 = vmatprep.mubr.bf16.mxu0 %v12777_v43  ;;  %v12793_v43 = vld [vmem:[#allocation6 + $0x36c] ss:$68 sps:$4 sm:$0xff]  }
 0x4ca   :  { %6942 = vmatmul.mubr.bf16.gmra.mrb[8].mxu0 %v12779_v14  ;;  %v12795_v14 = vld [vmem:[#allocation6 + $0x368] ss:$68 sps:$4 sm:$0xff]  }
 0x4cb   :  { %6949 = vmatprep.mubr.bf16.mxu0 %v12780_v10  ;;  %v12858_v10 = vld [vmem:[#allocation6 + $0xbf0] ss:$68 sps:$4 sm:$0xff]  }
 0x4cc   :  { %10806 = vmatprep.mubr.bf16.mxu1 %v12858_v10  ;;  %v12812_v10 = vld [vmem:[#allocation6 + $0x614] ss:$68 sps:$4 sm:$0xff]  }
 0x4cd   :  { %10807 = vmatmul.mubr.bf16.gmra.mrb[172].mxu1 %v12859_v29  ;;  %v12875_v29 = vld [vmem:[#allocation6 + $0xe98] ss:$68 sps:$4 sm:$0xff]  }
 0x4d2   :  { %6950 = vmatmul.mubr.bf16.gmra.mrb[12].mxu0 %v12782_v5  ;;  %v12798_v5 = vld [vmem:[#allocation6 + $0x3f0] ss:$68 sps:$4 sm:$0xff]  }
 0x4d3   :  { %6957 = vmatprep.mubr.bf16.mxu0 %v12785_v47  ;;  %v12801_v47 = vld [vmem:[#allocation6 + $0x47c] ss:$68 sps:$4 sm:$0xff]  }
 0x4da   :  { %6958 = vmatmul.mubr.bf16.gmra.mrb[16].mxu0 %v12787_v60  ;;  %v12803_v60 = vld [vmem:[#allocation6 + $0x478] ss:$68 sps:$4 sm:$0xff]  }
 0x4db   :  { %6965 = vmatprep.mubr.bf16.mxu0 %v12788_v62  ;;  %v12866_v62 = vld [vmem:[#allocation6 + $0xd00] ss:$68 sps:$4 sm:$0xff]  }
 0x4dc   :  { %10810 = vmatprep.mubr.bf16.mxu1 %v12866_v62  ;;  %v12817_v62 = vld [vmem:[#allocation6 + $0x69c] ss:$68 sps:$4 sm:$0xff]  }
 0x4dd   :  { %10811 = vmatmul.mubr.bf16.gmra.mrb[176].mxu1 %v12867_v17 }
 0x4e2   :  { %6966 = vmatmul.mubr.bf16.gmra.mrb[20].mxu0 %v12790_v18  ;;  %v12806_v18 = vld [vmem:[#allocation6 + $0x500] ss:$68 sps:$4 sm:$0xff]  }
 0x4e3   :  { %6973 = vmatprep.mubr.bf16.mxu0 %v12793_v43  ;;  %v12809_v43 = vld [vmem:[#allocation6 + $0x58c] ss:$68 sps:$4 sm:$0xff]  }
 0x4ea   :  { %6974 = vmatmul.mubr.bf16.gmra.mrb[24].mxu0 %v12795_v14  ;;  %v12811_v14 = vld [vmem:[#allocation6 + $0x588] ss:$68 sps:$4 sm:$0xff]  }
 0x4eb   :  { %6981 = vmatprep.mubr.bf16.mxu0 %v12796_v38  ;;  %v12874_v38 = vld [vmem:[#allocation6 + $0xe10] ss:$68 sps:$4 sm:$0xff]  }
 0x4ec   :  { %10814 = vmatprep.mubr.bf16.mxu1 %v12874_v38  ;;  %v12825_v38 = vld [vmem:[#allocation6 + $0x7ac] ss:$68 sps:$4 sm:$0xff]  }
 0x4ed   :  { %10815 = vmatmul.mubr.bf16.gmra.mrb[180].mxu1 %v12875_v29 }
 0x4ee   :  { %10818 = vmatprep.mubr.bf16.mxu1 %v12882_v45 }
 0x4f2   :  { %6982 = vmatmul.mubr.bf16.gmra.mrb[28].mxu0 %v12798_v5 }
 0x4f3   :  { %6989 = vmatprep.mubr.bf16.mxu0 %v12801_v47 }
 0x4f5   :  { %10819 = vmatmul.mubr.bf16.gmra.mrb[184].mxu1 %v12883_v35  ;;  %v12830_v35 = vld [vmem:[#allocation6 + $0x830] ss:$68 sps:$4 sm:$0xff]  }
 0x4f6   :  { %10822 = vmatprep.mubr.bf16.mxu1 %v12890_v53 }
 0x4fa   :  { %6990 = vmatmul.mubr.bf16.gmra.mrb[32].mxu0 %v12803_v60  ;;  %v12814_v60 = vld [vmem:[#allocation6 + $0x610] ss:$68 sps:$4 sm:$0xff]  }
 0x4fb   :  { %6997 = vmatprep.mubr.bf16.mxu0 %v12804_v50 }
 0x4fd   :  { %10823 = vmatmul.mubr.bf16.gmra.mrb[188].mxu1 %v12891_v28  ;;  %v12839_v28 = vld [vmem:[#allocation6 + $0x9cc] ss:$68 sps:$4 sm:$0xff]  }
 0x502   :  { %6998 = vmatmul.mubr.bf16.gmra.mrb[36].mxu0 %v12806_v18  ;;  %v12819_v18 = vld [vmem:[#allocation6 + $0x698] ss:$68 sps:$4 sm:$0xff]  }
 0x503   :  { %7005 = vmatprep.mubr.bf16.mxu0 %v12809_v43  ;;  %v12820_v43 = vld [vmem:[#allocation6 + $0x724] ss:$68 sps:$4 sm:$0xff]  }
 0x504   :  { %v14323_v5 = vpop.f32.mrb[128].mxu1 }
 0x505   :  { %v14325_v47 = vpop.f32.mrb[129].mxu1 }
 0x506   :  { %v14327_v50 = vpop.f32.mrb[130].mxu1 }
 0x507   :  { %v14329_v17 = vpop.f32.mrb[131].mxu1 }
 0x50a   :  { %7006 = vmatmul.mubr.bf16.gmra.mrb[40].mxu0 %v12811_v14  ;;  %v12822_v14 = vld [vmem:[#allocation6 + $0x720] ss:$68 sps:$4 sm:$0xff]  }
 0x50b   :  { %7013 = vmatprep.mubr.bf16.mxu0 %v12812_v10 }
 0x50f   :  { %v14331_v10 = vpop.f32.mrb[132].mxu1 }
 0x510   :  { %v14333_v29 = vpop.f32.mrb[133].mxu1 }
 0x511   :  { %v14335_v27 = vpop.f32.mrb[134].mxu1 }
 0x512   :  { %7014 = vmatmul.mubr.bf16.gmra.mrb[44].mxu0 %v12814_v60  ;;  %v14337_v30 = vpop.f32.mrb[135].mxu1  ;;  %v12827_v60 = vld [vmem:[#allocation6 + $0x7a8] ss:$68 sps:$4 sm:$0xff]  }
 0x513   :  { %7021 = vmatprep.mubr.bf16.mxu0 %v12817_v62  ;;  %v12828_v62 = vld [vmem:[#allocation6 + $0x834] ss:$68 sps:$4 sm:$0xff]  }
 0x51a   :  { %7022 = vmatmul.mubr.bf16.gmra.mrb[48].mxu0 %v12819_v18  ;;  %v14339_v45 = vpop.f32.mrb[136].mxu1  ;;  %v12833_v18 = vld [vmem:[#allocation6 + $0x8bc] ss:$68 sps:$4 sm:$0xff]  }
 0x51b   :  { %7029 = vmatprep.mubr.bf16.mxu0 %v12820_v43  ;;  %v14341_v43 = vpop.f32.mrb[137].mxu1 }
 0x51c   :  { %v14343_v55 = vpop.f32.mrb[138].mxu1 }
 0x51d   :  { %v14345_v23 = vpop.f32.mrb[139].mxu1 }
 0x522   :  { %7030 = vmatmul.mubr.bf16.gmra.mrb[52].mxu0 %v12822_v14  ;;  %v12835_v14 = vld [vmem:[#allocation6 + $0x8b8] ss:$68 sps:$4 sm:$0xff]  }
 0x523   :  { %7037 = vmatprep.mubr.bf16.mxu0 %v12825_v38  ;;  %v12836_v38 = vld [vmem:[#allocation6 + $0x944] ss:$68 sps:$4 sm:$0xff]  }
 0x52a   :  { %7038 = vmatmul.mubr.bf16.gmra.mrb[56].mxu0 %v12827_v60  ;;  %v12838_v60 = vld [vmem:[#allocation6 + $0x940] ss:$68 sps:$4 sm:$0xff]  }
 0x52b   :  { %7045 = vmatprep.mubr.bf16.mxu0 %v12828_v62 }
 0x531   :  { %v14347_v53 = vpop.f32.mrb[140].mxu1 }
 0x532   :  { %7046 = vmatmul.mubr.bf16.gmra.mrb[60].mxu0 %v12830_v35  ;;  %v14349_v62 = vpop.f32.mrb[141].mxu1  ;;  %v12846_v35 = vld [vmem:[#allocation6 + $0xa50] ss:$68 sps:$4 sm:$0xff]  }
 0x533   :  { %7053 = vmatprep.mubr.bf16.mxu0 %v12833_v18  ;;  %v14351_v32 = vpop.f32.mrb[142].mxu1 }
 0x534   :  { %v14353_v20 = vpop.f32.mrb[143].mxu1 }
 0x53a   :  { %7054 = vmatmul.mubr.bf16.gmra.mrb[64].mxu0 %v12835_v14  ;;  %v14355_v18 = vpop.f32.mrb[144].mxu1  ;;  %v12847_v14 = vld [vmem:[#allocation6 + $0xadc] ss:$68 sps:$4 sm:$0xff]  }
 0x53b   :  { %7061 = vmatprep.mubr.bf16.mxu0 %v12836_v38  ;;  %14957 = vst [vmem:[#allocation138_spill] sm:$0xff] %v14355_v18  ;;  %v14357_v38 = vpop.f32.mrb[145].mxu1 }
 0x53c   :  { %14958 = vst [vmem:[#allocation139_spill] sm:$0xff] %v14357_v38  ;;  %v14359_v34 = vpop.f32.mrb[146].mxu1 }
 0x53d   :  { %14959 = vst [vmem:[#allocation140_spill] sm:$0xff] %v14359_v34  ;;  %v14361_v13 = vpop.f32.mrb[147].mxu1  ;;  %v12857_v34 = vld [vmem:[#allocation6 + $0xbe8] ss:$68 sps:$4 sm:$0xff]  }
 0x53e   :  { %14960 = vst [vmem:[#allocation141_spill] sm:$0xff] %v14361_v13  ;;  %v12860_v13 = vld [vmem:[#allocation6 + $0xc74] ss:$68 sps:$4 sm:$0xff]  }
 0x542   :  { %7062 = vmatmul.mubr.bf16.gmra.mrb[68].mxu0 %v12838_v60  ;;  %v12854_v60 = vld [vmem:[#allocation6 + $0xb60] ss:$68 sps:$4 sm:$0xff]  }
 0x543   :  { %7069 = vmatprep.mubr.bf16.mxu0 %v12839_v28 }
 0x549   :  { %v14363_v28 = vpop.f32.mrb[148].mxu1 }
 0x54a   :  { %7070 = vmatmul.mubr.bf16.gmra.mrb[72].mxu0 %v12841_v40  ;;  %14961 = vst [vmem:[#allocation142_spill] sm:$0xff] %v14363_v28  ;;  %v14365_v40 = vpop.f32.mrb[149].mxu1 }
 0x54b   :  { %7077 = vmatprep.mubr.bf16.mxu0 %v12844_v15  ;;  %v12855_v15 = vld [vmem:[#allocation6 + $0xbec] ss:$68 sps:$4 sm:$0xff]   ;;  %14962 = vst [vmem:[#allocation143_spill] sm:$0xff] %v14365_v40  ;;  %v14367_v18 = vpop.f32.mrb[150].mxu1 }
 0x54c   :  { %14963 = vst [vmem:[#allocation144_spill] sm:$0xff] %v14367_v18  ;;  %v14369_v42 = vpop.f32.mrb[151].mxu1  ;;  %v12865_v18 = vld [vmem:[#allocation6 + $0xcf8] ss:$68 sps:$4 sm:$0xff]  }
 0x54d   :  { %14964 = vst [vmem:[#allocation145_spill] sm:$0xff] %v14369_v42  ;;  %v12868_v42 = vld [vmem:[#allocation6 + $0xd84] ss:$68 sps:$4 sm:$0xff]  }
 0x552   :  { %7078 = vmatmul.mubr.bf16.gmra.mrb[76].mxu0 %v12846_v35  ;;  %v12862_v35 = vld [vmem:[#allocation6 + $0xc70] ss:$68 sps:$4 sm:$0xff]  }
 0x553   :  { %7085 = vmatprep.mubr.bf16.mxu0 %v12847_v14 }
 0x55a   :  { %7086 = vmatmul.mubr.bf16.gmra.mrb[80].mxu0 %v12849_v39 }
 0x55b   :  { %7093 = vmatprep.mubr.bf16.mxu0 %v12852_v8  ;;  %v12863_v8 = vld [vmem:[#allocation6 + $0xcfc] ss:$68 sps:$4 sm:$0xff]  }
 0x560   :  { %v14371_v14 = vpop.f32.mrb[152].mxu1 }
 0x561   :  { %14965 = vst [vmem:[#allocation146_spill] sm:$0xff] %v14371_v14  ;;  %v14373_v39 = vpop.f32.mrb[153].mxu1 }
 0x562   :  { %7094 = vmatmul.mubr.bf16.gmra.mrb[84].mxu0 %v12854_v60  ;;  %14966 = vst [vmem:[#allocation147_spill] sm:$0xff] %v14373_v39  ;;  %v14375_v28 = vpop.f32.mrb[154].mxu1  ;;  %v12870_v60 = vld [vmem:[#allocation6 + $0xd80] ss:$68 sps:$4 sm:$0xff]  }
 0x563   :  { %7101 = vmatprep.mubr.bf16.mxu0 %v12855_v15  ;;  %14967 = vst [vmem:[#allocation148_spill] sm:$0xff] %v14375_v28  ;;  %v14377_v38 = vpop.f32.mrb[155].mxu1  ;;  %v12873_v28 = vld [vmem:[#allocation6 + $0xe08] ss:$68 sps:$4 sm:$0xff]  }
 0x564   :  { %14968 = vst [vmem:[#allocation149_spill] sm:$0xff] %v14377_v38  ;;  %v12876_v38 = vld [vmem:[#allocation6 + $0xe94] ss:$68 sps:$4 sm:$0xff]  }
 0x568   :  { %v14379_v15 = vpop.f32.mrb[156].mxu1 }
 0x569   :  { %14969 = vst [vmem:[#allocation150_spill] sm:$0xff] %v14379_v15 }
 0x56a   :  { %7102 = vmatmul.mubr.bf16.gmra.mrb[88].mxu0 %v12857_v34  ;;  %v14381_v34 = vpop.f32.mrb[157].mxu1 }
 0x56b   :  { %7109 = vmatprep.mubr.bf16.mxu0 %v12860_v13  ;;  %v12871_v13 = vld [vmem:[#allocation6 + $0xe0c] ss:$68 sps:$4 sm:$0xff]   ;;  %14970 = vst [vmem:[#allocation151_spill] sm:$0xff] %v14381_v34  ;;  %v14383_v14 = vpop.f32.mrb[158].mxu1 }
 0x56c   :  { %14971 = vst [vmem:[#allocation152_spill] sm:$0xff] %v14383_v14  ;;  %v14385_v40 = vpop.f32.mrb[159].mxu1  ;;  %v12878_v34 = vld [vmem:[#allocation6 + $0xe90] ss:$68 sps:$4 sm:$0xff]  }
 0x56d   :  { %14972 = vst [vmem:[#allocation153_spill] sm:$0xff] %v14385_v40  ;;  %v12879_v40 = vld [vmem:[#allocation6 + $0xf1c] ss:$68 sps:$4 sm:$0xff]  }
 0x570   :  { %v14391_v39 = vpop.f32.mrb[160].mxu1 }
 0x571   :  { %14973 = vst [vmem:[#allocation154_spill] sm:$0xff] %v14391_v39  ;;  %v12884_v39 = vld [vmem:[#allocation6 + $0xfa4] ss:$68 sps:$4 sm:$0xff]  }
 0x572   :  { %7110 = vmatmul.mubr.bf16.gmra.mrb[92].mxu0 %v12862_v35  ;;  %v10860_v35 = vadd.f32 %v13455_v59, %v13763_v24 }
 0x573   :  { %7117 = vmatprep.mubr.bf16.mxu0 %v12863_v8 }
 0x57a   :  { %7118 = vmatmul.mubr.bf16.gmra.mrb[96].mxu0 %v12865_v18  ;;  %v10858_v18 = vadd.f32 %v13453_v54, %v13751_v56  ;;  %v12897_v54 = vld [vmem:[#allocation8 + $0x4] ss:$16 sps:$4 sm:$0xff]  }
 0x57b   :  { %7125 = vmatprep.mubr.bf16.mxu0 %v12868_v42  ;;  %8751 = vmatprep.mubr.bf16.mxu1 %v12897_v54 }
 0x582   :  { %7126 = vmatmul.mubr.bf16.gmra.mrb[100].mxu0 %v12870_v60  ;;  %v14393_v60 = vpop.f32.mrb[161].mxu1 }
 0x583   :  { %7133 = vmatprep.mubr.bf16.mxu0 %v12871_v13  ;;  %v14396_v4 = vpop.f32.mrb[162].mxu1 }
 0x584   :  { %14974 = vst [vmem:[#allocation155_spill] sm:$0xff] %v14396_v4  ;;  %v14398_v56 = vpop.f32.mrb[163].mxu1 }
 0x58a   :  { %7134 = vmatmul.mubr.bf16.gmra.mrb[104].mxu0 %v12873_v28 }
 0x58b   :  { %7141 = vmatprep.mubr.bf16.mxu0 %v12876_v38 }
 0x58d   :  { %v6927_v42 = vpop.f32.mrb[0].mxu0 }
 0x58e   :  { %v10859_v8 = vadd.f32 %v10858_v18, %v6927_v42  ;;  %v6929_v15 = vpop.f32.mrb[1].mxu0  ;;  %v10862_v18 = vadd.f32 %v13463_v1, %v13768_v33  ;;  %v10866_v1 = vadd.f32 %v13473_v11, %v13776_v48 }
 0x58f   :  { %v6930_v14 = vpop.f32.mrb[2].mxu0 }
 0x590   :  { %v7217_v13 = vadd.f32 %v10859_v8, %v14325_v47  ;;  %v10861_v28 = vadd.f32 %v10860_v35, %v6930_v14  ;;  %v6932_v38 = vpop.f32.mrb[3].mxu0  ;;  %v10864_v47 = vadd.f32 %v13465_v6, %v13787_v19 }
 0x591   :  { %v12881_v38 = vld [vmem:[#allocation6 + $0xf18] ss:$68 sps:$4 sm:$0xff]  }
 0x592   :  { %v7220_v59 = vadd.f32 %v10861_v28, %v14329_v17  ;;  %7142 = vmatmul.mubr.bf16.gmra.mrb[108].mxu0 %v12878_v34  ;;  %v7471_v24 = vmax.f32 %v7217_v13, 0.0  ;;  %v10868_v13 = vadd.f32 %v13475_v16, %v13800_v44 }
 0x593   :  { %7149 = vmatprep.mubr.bf16.mxu0 %v12879_v40 }
 0x594   :  { %v7472_v15 = vmax.f32 %v7220_v59, 0.0  ;;  %v12886_v59 = vld [vmem:[#allocation6 + $0xfa0] ss:$68 sps:$4 sm:$0xff]  }
 0x595   :  { %v6935_v42 = vpop.f32.mrb[4].mxu0 }
 0x596   :  { %v7535_v14 = vpack.c.bf16 %v7472_v15, %v7471_v24  ;;  %v10863_v35 = vadd.f32 %v10862_v18, %v6935_v42  ;;  %v6937_v8 = vpop.f32.mrb[5].mxu0  ;;  %v14412_v24 = vpop.f32.mrb[164].mxu1  ;;  %v12887_v18 = vld [vmem:[#allocation6 + $0x102c] ss:$68 sps:$4 sm:$0xff]  }
 0x597   :  { %v6938_v4 = vpop.f32.mrb[6].mxu0 }
 0x598   :  { %v7225_v17 = vadd.f32 %v10863_v35, %v14323_v5  ;;  %v10865_v34 = vadd.f32 %v10864_v47, %v6938_v4  ;;  %v6940_v28 = vpop.f32.mrb[7].mxu0  ;;  %8720 = vmatpush1.bf16.msra.mxu1 %v7535_v14  ;;  %v10870_v47 = vadd.f32 %v13483_v21, %v13789_v22 }
 0x599   :  { %8721 = vmatprep.subr.bf16.mxu1 %v14863_v61  ;;  %v12889_v28 = vld [vmem:[#allocation6 + $0x1028] ss:$68 sps:$4 sm:$0xff]  }
 0x59a   :  { %v7228_v40 = vadd.f32 %v10865_v34, %v14327_v50  ;;  %7150 = vmatmul.mubr.bf16.gmra.mrb[112].mxu0 %v12881_v38  ;;  %v7473_v6 = vmax.f32 %v7225_v17, 0.0  ;;  %v14414_v50 = vpop.f32.mrb[165].mxu1 }
 0x59b   :  { %7157 = vmatprep.mubr.bf16.mxu0 %v12884_v39  ;;  %v14417_v48 = vpop.f32.mrb[166].mxu1 }
 0x59c   :  { %v7474_v33 = vmax.f32 %v7228_v40, 0.0  ;;  %v14420_v16 = vpop.f32.mrb[167].mxu1 }
 0x59d   :  { %v6943_v19 = vpop.f32.mrb[8].mxu0 }
 0x59e   :  { %v7536_v54 = vpack.c.bf16 %v7474_v33, %v7473_v6  ;;  %v10867_v5 = vadd.f32 %v10866_v1, %v6943_v19  ;;  %v6945_v4 = vpop.f32.mrb[9].mxu0  ;;  %v12892_v1 = vld [vmem:[#allocation6 + $0x10b4] ss:$68 sps:$4 sm:$0xff]  }
 0x59f   :  { %v6946_v15 = vpop.f32.mrb[10].mxu0  ;;  %v12894_v4 = vld [vmem:[#allocation6 + $0x10b0] ss:$68 sps:$4 sm:$0xff]  }
 0x5a0   :  { %v7233_v39 = vadd.f32 %v10867_v5, %v14333_v29  ;;  %v10869_v42 = vadd.f32 %v10868_v13, %v6946_v15  ;;  %v6948_v11 = vpop.f32.mrb[11].mxu0  ;;  %8722 = vmatpush1.bf16.msra.mxu1 %v7536_v54  ;;  %v10872_v29 = vadd.f32 %v13485_v26, %v13813_v25  ;;  %v10874_v26 = vadd.f32 %v13493_v31, %v13802_v52 }
 0x5a1   :  { %8723 = vmatprep.subr.bf16.mxu1 %v14863_v61  ;;  %v10876_v13 = vadd.f32 %v13495_v36, %v13826_v3  ;;  %v10878_v3 = vadd.f32 %v13503_v41, %v13815_v2  ;;  %v10882_v41 = vadd.f32 %v13513_v51, %v13828_v0 }
 0x5a2   :  { %v7236_v44 = vadd.f32 %v10869_v42, %v14337_v30  ;;  %7158 = vmatmul.mubr.bf16.gmra.mrb[116].mxu0 %v12886_v59  ;;  %v7475_v14 = vmax.f32 %v7233_v39, 0.0  ;;  %v14434_v59 = vpop.f32.mrb[168].mxu1 }
 0x5a3   :  { %7165 = vmatprep.mubr.bf16.mxu0 %v12887_v18  ;;  %v14436_v18 = vpop.f32.mrb[169].mxu1 }
 0x5a4   :  { %v7476_v35 = vmax.f32 %v7236_v44, 0.0  ;;  %v14439_v31 = vpop.f32.mrb[170].mxu1 }
 0x5a5   :  { %v6951_v8 = vpop.f32.mrb[12].mxu0  ;;  %v14442_v52 = vpop.f32.mrb[171].mxu1 }
 0x5a6   :  { %v7537_v38 = vpack.c.bf16 %v7476_v35, %v7475_v14  ;;  %v10871_v17 = vadd.f32 %v10870_v47, %v6951_v8  ;;  %v6953_v34 = vpop.f32.mrb[13].mxu0 }
 0x5a7   :  { %v6954_v40 = vpop.f32.mrb[14].mxu0 }
 0x5a8   :  { %v7241_v6 = vadd.f32 %v10871_v17, %v14331_v10  ;;  %v10873_v30 = vadd.f32 %v10872_v29, %v6954_v40  ;;  %v6956_v33 = vpop.f32.mrb[15].mxu0  ;;  %8724 = vmatpush1.bf16.msra.mxu1 %v7537_v38 }
 0x5a9   :  { %8725 = vmatprep.subr.bf16.mxu1 %v14863_v61 }
 0x5aa   :  { %v7244_v21 = vadd.f32 %v10873_v30, %v14335_v27  ;;  %7166 = vmatmul.mubr.bf16.gmra.mrb[120].mxu0 %v12889_v28  ;;  %v7477_v22 = vmax.f32 %v7241_v6, 0.0 }
 0x5ab   :  { %7173 = vmatprep.mubr.bf16.mxu0 %v12892_v1 }
 0x5ac   :  { %v7478_v25 = vmax.f32 %v7244_v21, 0.0 }
 0x5ad   :  { %v6959_v19 = vpop.f32.mrb[16].mxu0 }
 0x5ae   :  { %v7538_v54 = vpack.c.bf16 %v7478_v25, %v7477_v22  ;;  %v10875_v10 = vadd.f32 %v10874_v26, %v6959_v19  ;;  %v6961_v5 = vpop.f32.mrb[17].mxu0 }
 0x5af   :  { %v6962_v15 = vpop.f32.mrb[18].mxu0 }
 0x5b0   :  { %v7249_v27 = vadd.f32 %v10875_v10, %v14341_v43  ;;  %v10877_v39 = vadd.f32 %v10876_v13, %v6962_v15  ;;  %v6964_v42 = vpop.f32.mrb[19].mxu0  ;;  %8726 = vmatpush1.bf16.msra.mxu1 %v7538_v54  ;;  %v10880_v43 = vadd.f32 %v13505_v46, %v13839_v9  ;;  %v10884_v46 = vadd.f32 %v13515_v57, %v13852_v49 }
 0x5b1   :  { %8727 = vmatprep.subr.bf16.mxu1 %v14863_v61  ;;  %v10886_v49 = vadd.f32 %v13523_v63, %v13841_v37 }
 0x5b2   :  { %v7252_v36 = vadd.f32 %v10877_v39, %v14345_v23  ;;  %7174 = vmatmul.mubr.bf16.gmra.mrb[124].mxu0 %v12894_v4  ;;  %v7479_v11 = vmax.f32 %v7249_v27, 0.0  ;;  %v14975_v39 = vld [vmem:[#allocation13_spill] sm:$0xff] }
 0x5b3   :  { %v10890_v42 = vadd.f32 %v14975_v39, %v13854_v58  ;;  %v14989_v39 = vld [vmem:[#allocation18_spill] sm:$0xff] }
 0x5b4   :  { %v7480_v44 = vmax.f32 %v7252_v36, 0.0 }
 0x5b5   :  { %v6967_v47 = vpop.f32.mrb[20].mxu0 }
 0x5b6   :  { %v7539_v14 = vpack.c.bf16 %v7480_v44, %v7479_v11  ;;  %v10879_v35 = vadd.f32 %v10878_v3, %v6967_v47  ;;  %v6969_v8 = vpop.f32.mrb[21].mxu0  ;;  %v14976_v11 = vld [vmem:[#allocation51_spill] sm:$0xff]  ;;  %v14977_v44 = vld [vmem:[#allocation14_spill] sm:$0xff] }
 0x5b7   :  { %v6970_v29 = vpop.f32.mrb[22].mxu0  ;;  %v10892_v47 = vadd.f32 %v14977_v44, %v14976_v11 }
 0x5b8   :  { %v7257_v38 = vadd.f32 %v10879_v35, %v14339_v45  ;;  %v10881_v17 = vadd.f32 %v10880_v43, %v6970_v29  ;;  %v6972_v34 = vpop.f32.mrb[23].mxu0  ;;  %8728 = vmatpush1.bf16.msra.mxu1 %v7539_v14  ;;  %v14456_v45 = vpop.f32.mrb[172].mxu1  ;;  %v14978_v35 = vld [vmem:[#allocation139_spill] sm:$0xff] }
 0x5b9   :  { %8729 = vmatprep.subr.bf16.mxu1 %v14863_v61  ;;  %v14458_v33 = vpop.f32.mrb[173].mxu1 }
 0x5ba   :  { %v7260_v23 = vadd.f32 %v10881_v17, %v14343_v55  ;;  %v7481_v2 = vmax.f32 %v7257_v38, 0.0  ;;  %v14461_v51 = vpop.f32.mrb[174].mxu1  ;;  %v14979_v17 = vld [vmem:[#allocation141_spill] sm:$0xff] }
 0x5bb   :  { %v14464_v0 = vpop.f32.mrb[175].mxu1 }
 0x5bc   :  { %v7482_v28 = vmax.f32 %v7260_v23, 0.0 }
 0x5bd   :  { %v6975_v40 = vpop.f32.mrb[24].mxu0 }
 0x5be   :  { %v7540_v9 = vpack.c.bf16 %v7482_v28, %v7481_v2  ;;  %v10883_v1 = vadd.f32 %v10882_v41, %v6975_v40  ;;  %v6977_v6 = vpop.f32.mrb[25].mxu0  ;;  %v14980_v2 = vld [vmem:[#allocation49_spill] sm:$0xff]  ;;  %v14981_v28 = vld [vmem:[#allocation15_spill] sm:$0xff] }
 0x5bf   :  { %v6978_v30 = vpop.f32.mrb[26].mxu0  ;;  %v10894_v40 = vadd.f32 %v14981_v28, %v14980_v2 }
 0x5c0   :  { %v7265_v21 = vadd.f32 %v10883_v1, %v14349_v62  ;;  %v10885_v55 = vadd.f32 %v10884_v46, %v6978_v30  ;;  %v6980_v26 = vpop.f32.mrb[27].mxu0  ;;  %8730 = vmatpush1.bf16.msra.mxu1 %v7540_v9  ;;  %v10888_v62 = vadd.f32 %v13525_v7, %v13865_v12  ;;  %v14982_v30 = vld [vmem:[#allocation54_spill] sm:$0xff] }
 0x5c1   :  { %8731 = vmatprep.subr.bf16.mxu1 %v14863_v61 }
 0x5c2   :  { %v7268_v57 = vadd.f32 %v10885_v55, %v14353_v20  ;;  %v7483_v22 = vmax.f32 %v7265_v21, 0.0  ;;  %v14983_v21 = vld [vmem:[#allocation16_spill] sm:$0xff] }
 0x5c3   :  { %v10896_v55 = vadd.f32 %v14983_v21, %v14982_v30  ;;  %v14996_v21 = vld [vmem:[#allocation142_spill] sm:$0xff] }
 0x5c4   :  { %v7484_v25 = vmax.f32 %v7268_v57, 0.0  ;;  %v14984_v57 = vld [vmem:[#allocation138_spill] sm:$0xff] }
 0x5c5   :  { %v6983_v19 = vpop.f32.mrb[28].mxu0 }
 0x5c6   :  { %v7541_v13 = vpack.c.bf16 %v7484_v25, %v7483_v22  ;;  %v10887_v54 = vadd.f32 %v10886_v49, %v6983_v19  ;;  %v6985_v10 = vpop.f32.mrb[29].mxu0  ;;  %v14985_v19 = vld [vmem:[#allocation140_spill] sm:$0xff] }
 0x5c7   :  { %v6986_v5 = vpop.f32.mrb[30].mxu0  ;;  %v14986_v10 = vld [vmem:[#allocation52_spill] sm:$0xff] }
 0x5c8   :  { %v7273_v4 = vadd.f32 %v10887_v54, %v14347_v53  ;;  %v10889_v15 = vadd.f32 %v10888_v62, %v6986_v5  ;;  %v6988_v27 = vpop.f32.mrb[31].mxu0  ;;  %8732 = vmatpush1.bf16.msra.mxu1 %v7541_v13  ;;  %v14478_v53 = vpop.f32.mrb[176].mxu1  ;;  %v14987_v5 = vld [vmem:[#allocation17_spill] sm:$0xff] }
 0x5c9   :  { %8733 = vmatprep.subr.bf16.mxu1 %v14863_v61  ;;  %v14480_v14 = vpop.f32.mrb[177].mxu1 }
 0x5ca   :  { %v7276_v20 = vadd.f32 %v10889_v15, %v14351_v32  ;;  %v7485_v63 = vmax.f32 %v7273_v4, 0.0  ;;  %v14483_v38 = vpop.f32.mrb[178].mxu1  ;;  %v10898_v4 = vadd.f32 %v14987_v5, %v14986_v10 }
 0x5cb   :  { %v14486_v58 = vpop.f32.mrb[179].mxu1 }
 0x5cc   :  { %v7486_v37 = vmax.f32 %v7276_v20, 0.0 }
 0x5cd   :  { %v6991_v36 = vpop.f32.mrb[32].mxu0 }
 0x5ce   :  { %v7542_v7 = vpack.c.bf16 %v7486_v37, %v7485_v63  ;;  %v10891_v12 = vadd.f32 %v10890_v42, %v6991_v36  ;;  %v6993_v3 = vpop.f32.mrb[33].mxu0  ;;  %v14988_v37 = vld [vmem:[#allocation57_spill] sm:$0xff]  ;;  %v14500_v36 = vpop.f32.mrb[180].mxu1 }
 0x5cf   :  { %v6994_v43 = vpop.f32.mrb[34].mxu0  ;;  %v10900_v42 = vadd.f32 %v14989_v39, %v14988_v37  ;;  %v14990_v3 = vld [vmem:[#allocation143_spill] sm:$0xff] }
 0x5d0   :  { %v7281_v8 = vadd.f32 %v10891_v12, %v14978_v35  ;;  %v10893_v32 = vadd.f32 %v10892_v47, %v6994_v43  ;;  %v6996_v29 = vpop.f32.mrb[35].mxu0  ;;  %8734 = vmatpush1.bf16.msra.mxu1 %v7542_v7  ;;  %v14502_v12 = vpop.f32.mrb[181].mxu1 }
 0x5d1   :  { %8735 = vmatprep.subr.bf16.mxu1 %v14863_v61  ;;  %v14505_v43 = vpop.f32.mrb[182].mxu1 }
 0x5d2   :  { %v7284_v34 = vadd.f32 %v10893_v32, %v14979_v17  ;;  %v7487_v23 = vmax.f32 %v7281_v8, 0.0  ;;  %v14508_v35 = vpop.f32.mrb[183].mxu1  ;;  %v14991_v8 = vld [vmem:[#allocation145_spill] sm:$0xff] }
 0x5d3   :  { %v14522_v37 = vpop.f32.mrb[184].mxu1 }
 0x5d4   :  { %v7488_v41 = vmax.f32 %v7284_v34, 0.0  ;;  %v14992_v34 = vld [vmem:[#allocation55_spill] sm:$0xff] }
 0x5d5   :  { %v6999_v46 = vpop.f32.mrb[36].mxu0 }
 0x5d6   :  { %v7543_v9 = vpack.c.bf16 %v7488_v41, %v7487_v23  ;;  %v10895_v1 = vadd.f32 %v10894_v40, %v6999_v46  ;;  %v7001_v6 = vpop.f32.mrb[37].mxu0  ;;  %v14993_v23 = vld [vmem:[#allocation19_spill] sm:$0xff] }
 0x5d7   :  { %v7002_v26 = vpop.f32.mrb[38].mxu0  ;;  %v10902_v41 = vadd.f32 %v14993_v23, %v14992_v34  ;;  %v15004_v23 = vld [vmem:[#allocation61_spill] sm:$0xff] }
 0x5d8   :  { %v7289_v49 = vadd.f32 %v10895_v1, %v14984_v57  ;;  %v10897_v22 = vadd.f32 %v10896_v55, %v7002_v26  ;;  %v7004_v25 = vpop.f32.mrb[39].mxu0  ;;  %8736 = vmatpush1.bf16.msra.mxu1 %v7543_v9  ;;  %v14994_v9 = vld [vmem:[#allocation60_spill] sm:$0xff] }
 0x5d9   :  { %8737 = vmatprep.subr.bf16.mxu1 %v14863_v61  ;;  %v14995_v1 = vld [vmem:[#allocation20_spill] sm:$0xff] }
 0x5da   :  { %v7292_v62 = vadd.f32 %v10897_v22, %v14985_v19  ;;  %v7489_v13 = vmax.f32 %v7289_v49, 0.0  ;;  %v10904_v6 = vadd.f32 %v14995_v1, %v14994_v9  ;;  %v14997_v49 = vld [vmem:[#allocation144_spill] sm:$0xff]  ;;  %v15006_v1 = vld [vmem:[#allocation66_spill] sm:$0xff] }
 0x5dc   :  { %v7490_v54 = vmax.f32 %v7292_v62, 0.0  ;;  %v14998_v62 = vld [vmem:[#allocation58_spill] sm:$0xff] }
 0x5dd   :  { %v7007_v15 = vpop.f32.mrb[40].mxu0 }
 0x5de   :  { %v7544_v27 = vpack.c.bf16 %v7490_v54, %v7489_v13  ;;  %v10899_v20 = vadd.f32 %v10898_v4, %v7007_v15  ;;  %v7009_v63 = vpop.f32.mrb[41].mxu0  ;;  %v14999_v13 = vld [vmem:[#allocation21_spill] sm:$0xff] }
 0x5df   :  { %v7010_v7 = vpop.f32.mrb[42].mxu0  ;;  %v10906_v54 = vadd.f32 %v14999_v13, %v14998_v62  ;;  %v15010_v13 = vld [vmem:[#allocation64_spill] sm:$0xff] }
 0x5e0   :  { %v7297_v11 = vadd.f32 %v10899_v20, %v14990_v3  ;;  %v10901_v44 = vadd.f32 %v10900_v42, %v7010_v7  ;;  %v7012_v47 = vpop.f32.mrb[43].mxu0  ;;  %8738 = vmatpush1.bf16.msra.mxu1 %v7544_v27  ;;  %v15000_v27 = vld [vmem:[#allocation63_spill] sm:$0xff]  ;;  %v15001_v20 = vld [vmem:[#allocation22_spill] sm:$0xff]  ;;  %v14524_v42 = vpop.f32.mrb[185].mxu1 }
 0x5e1   :  { %8739 = vmatprep.subr.bf16.mxu1 %v14863_v61  ;;  %v10908_v63 = vadd.f32 %v15001_v20, %v15000_v27  ;;  %v15002_v7 = vld [vmem:[#allocation147_spill] sm:$0xff]  ;;  %v14527_v47 = vpop.f32.mrb[186].mxu1  ;;  %v15012_v20 = vld [vmem:[#allocation69_spill] sm:$0xff] }
 0x5e2   :  { %v7300_v32 = vadd.f32 %v10901_v44, %v14991_v8  ;;  %v7491_v29 = vmax.f32 %v7297_v11, 0.0  ;;  %v14530_v8 = vpop.f32.mrb[187].mxu1 }
 0x5e4   :  { %v7492_v17 = vmax.f32 %v7300_v32, 0.0  ;;  %v15003_v32 = vld [vmem:[#allocation149_spill] sm:$0xff] }
 0x5e5   :  { %v7015_v2 = vpop.f32.mrb[44].mxu0 }
 0x5e6   :  { %v7545_v28 = vpack.c.bf16 %v7492_v17, %v7491_v29  ;;  %v10903_v40 = vadd.f32 %v10902_v41, %v7015_v2  ;;  %v7017_v46 = vpop.f32.mrb[45].mxu0  ;;  %v15005_v41 = vld [vmem:[#allocation23_spill] sm:$0xff] }
 0x5e7   :  { %v7018_v30 = vpop.f32.mrb[46].mxu0  ;;  %v10910_v2 = vadd.f32 %v15005_v41, %v15004_v23  ;;  %v15015_v41 = vld [vmem:[#allocation153_spill] sm:$0xff] }
 0x5e8   :  { %v7305_v55 = vadd.f32 %v10903_v40, %v14996_v21  ;;  %v10905_v26 = vadd.f32 %v10904_v6, %v7018_v30  ;;  %v7020_v57 = vpop.f32.mrb[47].mxu0  ;;  %8740 = vmatpush1.bf16.msra.mxu1 %v7545_v28  ;;  %v15007_v6 = vld [vmem:[#allocation24_spill] sm:$0xff] }
 0x5e9   :  { %8741 = vmatprep.subr.bf16.mxu1 %v14863_v61  ;;  %v10912_v30 = vadd.f32 %v15007_v6, %v15006_v1 }
 0x5ea   :  { %v7308_v22 = vadd.f32 %v10905_v26, %v14997_v49  ;;  %v7493_v25 = vmax.f32 %v7305_v55, 0.0  ;;  %v15008_v55 = vld [vmem:[#allocation146_spill] sm:$0xff] }
 0x5ec   :  { %v7494_v19 = vmax.f32 %v7308_v22, 0.0  ;;  %v15009_v22 = vld [vmem:[#allocation148_spill] sm:$0xff] }
 0x5ed   :  { %v7023_v10 = vpop.f32.mrb[48].mxu0 }
 0x5ee   :  { %v7546_v5 = vpack.c.bf16 %v7494_v19, %v7493_v25  ;;  %v10907_v4 = vadd.f32 %v10906_v54, %v7023_v10  ;;  %v7025_v15 = vpop.f32.mrb[49].mxu0  ;;  %v15011_v54 = vld [vmem:[#allocation25_spill] sm:$0xff] }
 0x5ef   :  { %v7026_v39 = vpop.f32.mrb[50].mxu0  ;;  %v10914_v10 = vadd.f32 %v15011_v54, %v15010_v13  ;;  %v15021_v54 = vld [vmem:[#allocation152_spill] sm:$0xff] }
 0x5f0   :  { %v7313_v3 = vadd.f32 %v10907_v4, %v15002_v7  ;;  %v10909_v11 = vadd.f32 %v10908_v63, %v7026_v39  ;;  %v7028_v44 = vpop.f32.mrb[51].mxu0  ;;  %8742 = vmatpush1.bf16.msra.mxu1 %v7546_v5  ;;  %v15013_v63 = vld [vmem:[#allocation26_spill] sm:$0xff]  ;;  %v14544_v7 = vpop.f32.mrb[188].mxu1 }
 0x5f1   :  { %8743 = vmatprep.subr.bf16.mxu1 %v14863_v61  ;;  %v10916_v39 = vadd.f32 %v15013_v63, %v15012_v20  ;;  %v15014_v44 = vld [vmem:[#allocation151_spill] sm:$0xff] }
 0x5f2   :  { %v7316_v29 = vadd.f32 %v10909_v11, %v15003_v32  ;;  %v7495_v17 = vmax.f32 %v7313_v3, 0.0  ;;  %v14546_v11 = vpop.f32.mrb[189].mxu1 }
 0x5f4   :  { %v7496_v34 = vmax.f32 %v7316_v29, 0.0 }
 0x5f5   :  { %v7031_v28 = vpop.f32.mrb[52].mxu0 }
 0x5f6   :  { %v7547_v40 = vpack.c.bf16 %v7496_v34, %v7495_v17  ;;  %v10911_v46 = vadd.f32 %v10910_v2, %v7031_v28  ;;  %v7033_v9 = vpop.f32.mrb[53].mxu0  ;;  %v14549_v34 = vpop.f32.mrb[190].mxu1 }
 0x5f7   :  { %v7034_v21 = vpop.f32.mrb[54].mxu0  ;;  %v14552_v23 = vpop.f32.mrb[191].mxu1  ;;  %v15017_v9 = vld [vmem:[#allocation27_spill] sm:$0xff] }
 0x5f8   :  { %v7321_v26 = vadd.f32 %v10911_v46, %v15008_v55  ;;  %v10913_v57 = vadd.f32 %v10912_v30, %v7034_v21  ;;  %v7036_v49 = vpop.f32.mrb[55].mxu0  ;;  %8744 = vmatpush1.bf16.msra.mxu1 %v7547_v40  ;;  %v15016_v46 = vld [vmem:[#allocation67_spill] sm:$0xff] }
 0x5f9   :  { %8745 = vmatprep.subr.bf16.mxu1 %v14863_v61  ;;  %v10918_v1 = vadd.f32 %v15017_v9, %v15016_v46  ;;  %v12898_v9 = vld [vmem:[#allocation8 + $0x24] ss:$16 sps:$4 sm:$0xff]  }
 0x5fa   :  { %v7324_v25 = vadd.f32 %v10913_v57, %v15009_v22  ;;  %v7497_v19 = vmax.f32 %v7321_v26, 0.0  ;;  %v15018_v26 = vld [vmem:[#allocation72_spill] sm:$0xff] }
 0x5fb   :  { %v15019_v57 = vld [vmem:[#allocation28_spill] sm:$0xff] }
 0x5fc   :  { %v7498_v62 = vmax.f32 %v7324_v25, 0.0  ;;  %v10920_v49 = vadd.f32 %v15019_v57, %v15018_v26  ;;  %v15020_v25 = vld [vmem:[#allocation150_spill] sm:$0xff] }
 0x5fd   :  { %v7039_v5 = vpop.f32.mrb[56].mxu0 }
 0x5fe   :  { %v7548_v4 = vpack.c.bf16 %v7498_v62, %v7497_v19  ;;  %v10915_v15 = vadd.f32 %v10914_v10, %v7039_v5  ;;  %v7041_v27 = vpop.f32.mrb[57].mxu0  ;;  %v15022_v5 = vld [vmem:[#allocation70_spill] sm:$0xff] }
 0x5ff   :  { %v7042_v3 = vpop.f32.mrb[58].mxu0 }
 0x600   :  { %v7329_v32 = vadd.f32 %v10915_v15, %v15014_v44  ;;  %v10917_v29 = vadd.f32 %v10916_v39, %v7042_v3  ;;  %v7044_v17 = vpop.f32.mrb[59].mxu0  ;;  %8746 = vmatpush1.bf16.msra.mxu1 %v7548_v4  ;;  %v15023_v4 = vld [vmem:[#allocation29_spill] sm:$0xff]  ;;  %v15024_v39 = vld [vmem:[#allocation75_spill] sm:$0xff]  ;;  %v15025_v3 = vld [vmem:[#allocation30_spill] sm:$0xff] }
 0x601   :  { %8747 = vmatprep.subr.bf16.mxu1 %v14863_v61  ;;  %v10922_v15 = vadd.f32 %v15023_v4, %v15022_v5  ;;  %v10924_v44 = vadd.f32 %v15025_v3, %v15024_v39  ;;  %v15033_v39 = vld [vmem:[#allocation33_spill] sm:$0xff] }
 0x602   :  { %v7332_v2 = vadd.f32 %v10917_v29, %v15015_v41  ;;  %v7499_v28 = vmax.f32 %v7329_v32, 0.0 }
 0x604   :  { %v7500_v40 = vmax.f32 %v7332_v2, 0.0  ;;  %v12895_v2 = vld [vmem:[#allocation8] ss:$16 sps:$4 sm:$0xff]  }
 0x605   :  { %v7047_v6 = vpop.f32.mrb[60].mxu0 }
 0x606   :  { %v7549_v30 = vpack.c.bf16 %v7500_v40, %v7499_v28  ;;  %v10919_v21 = vadd.f32 %v10918_v1, %v7047_v6  ;;  %v7049_v55 = vpop.f32.mrb[61].mxu0  ;;  %v15026_v6 = vld [vmem:[#allocation73_spill] sm:$0xff] }
 0x607   :  { %v7050_v22 = vpop.f32.mrb[62].mxu0 }
 0x608   :  { %v7337_v19 = vadd.f32 %v10919_v21, %v15020_v25  ;;  %v10921_v62 = vadd.f32 %v10920_v49, %v7050_v22  ;;  %v7052_v13 = vpop.f32.mrb[63].mxu0  ;;  %8748 = vmatpush1.bf16.msra.mxu1 %v7549_v30  ;;  %v15027_v30 = vld [vmem:[#allocation31_spill] sm:$0xff]  ;;  %v15028_v49 = vld [vmem:[#allocation78_spill] sm:$0xff]  ;;  %v15029_v22 = vld [vmem:[#allocation32_spill] sm:$0xff] }
 0x609   :  { %8749 = vmatprep.subr.bf16.mxu1 %v14863_v61  ;;  %v10926_v21 = vadd.f32 %v15027_v30, %v15026_v6  ;;  %v10928_v25 = vadd.f32 %v15029_v22, %v15028_v49  ;;  %v15037_v49 = vld [vmem:[#allocation35_spill] sm:$0xff] }
 0x60a   :  { %v7340_v10 = vadd.f32 %v10921_v62, %v15021_v54  ;;  %v7501_v27 = vmax.f32 %v7337_v19, 0.0  ;;  %v12900_v54 = vld [vmem:[#allocation8 + $0x20] ss:$16 sps:$4 sm:$0xff]  }
 0x60c   :  { %v7502_v20 = vmax.f32 %v7340_v10, 0.0  ;;  %v15030_v10 = vld [vmem:[#allocation154_spill] sm:$0xff] }
 0x60d   :  { %v7055_v63 = vpop.f32.mrb[64].mxu0 }
 0x60e   :  { %v7550_v32 = vpack.c.bf16 %v7502_v20, %v7501_v27  ;;  %v10923_v29 = vadd.f32 %v10922_v15, %v7055_v63  ;;  %v7057_v17 = vpop.f32.mrb[65].mxu0  ;;  %v12901_v15 = vld [vmem:[#allocation8 + $0x44] ss:$16 sps:$4 sm:$0xff]   ;;  %v15032_v63 = vld [vmem:[#allocation76_spill] sm:$0xff] }
 0x60f   :  { %v7058_v41 = vpop.f32.mrb[66].mxu0  ;;  %v15031_v27 = vld [vmem:[#allocation155_spill] sm:$0xff]  ;;  %v10930_v3 = vadd.f32 %v15033_v39, %v15032_v63  ;;  %v15034_v17 = vld [vmem:[#allocation81_spill] sm:$0xff]  ;;  %v15040_v39 = vld [vmem:[#allocation82_spill] sm:$0xff] }
 0x610   :  { %v7345_v28 = vadd.f32 %v10923_v29, %v14393_v60  ;;  %v10925_v40 = vadd.f32 %v10924_v44, %v7058_v41  ;;  %v7060_v46 = vpop.f32.mrb[67].mxu0  ;;  %8750 = vmatpush1.bf16.msra.mxu1 %v7550_v32  ;;  %v15035_v41 = vld [vmem:[#allocation34_spill] sm:$0xff] }
 0x611   :  { %9008 = vmatprep.subr.bf16.mxu1 %v14863_v61 }
 0x612   :  { %v7348_v1 = vadd.f32 %v10925_v40, %v14398_v56  ;;  %v7503_v55 = vmax.f32 %v7345_v28, 0.0 }
 0x613   :  { %8752 = vmatmul.mubr.bf16.vlgmr.msra.gmra.mrb[192].mxu1 %v12895_v2  ;;  %v10932_v2 = vadd.f32 %v15035_v41, %v15034_v17  ;;  %v15042_v41 = vld [vmem:[#allocation86_spill] sm:$0xff] }
 0x614   :  { %v7504_v26 = vmax.f32 %v7348_v1, 0.0  ;;  %8759 = vmatprep.mubr.bf16.mxu1 %v12898_v9  ;;  %v12903_v1 = vld [vmem:[#allocation8 + $0x40] ss:$16 sps:$4 sm:$0xff]  }
 0x615   :  { %v7063_v57 = vpop.f32.mrb[68].mxu0 }
 0x616   :  { %v7551_v60 = vpack.c.bf16 %v7504_v26, %v7503_v55  ;;  %v10927_v19 = vadd.f32 %v10926_v21, %v7063_v57  ;;  %v7065_v62 = vpop.f32.mrb[69].mxu0  ;;  %v12904_v55 = vld [vmem:[#allocation8 + $0x64] ss:$16 sps:$4 sm:$0xff]  }
 0x617   :  { %v7066_v13 = vpop.f32.mrb[70].mxu0  ;;  %v15036_v57 = vld [vmem:[#allocation79_spill] sm:$0xff]  ;;  %v15038_v62 = vld [vmem:[#allocation84_spill] sm:$0xff] }
 0x618   :  { %v7353_v5 = vadd.f32 %v10927_v19, %v15030_v10  ;;  %v10929_v4 = vadd.f32 %v10928_v25, %v7066_v13  ;;  %v7068_v56 = vpop.f32.mrb[71].mxu0  ;;  %9009 = vmatpush1.bf16.msra.mxu1 %v7551_v60  ;;  %v10934_v22 = vadd.f32 %v15037_v49, %v15036_v57  ;;  %v15039_v13 = vld [vmem:[#allocation36_spill] sm:$0xff]  ;;  %v15045_v57 = vld [vmem:[#allocation39_spill] sm:$0xff] }
 0x619   :  { %9010 = vmatprep.subr.bf16.mxu1 %v14863_v61  ;;  %v12906_v56 = vld [vmem:[#allocation8 + $0x60] ss:$16 sps:$4 sm:$0xff]  }
 0x61a   :  { %v7356_v20 = vadd.f32 %v10929_v4, %v15031_v27  ;;  %v7505_v44 = vmax.f32 %v7353_v5, 0.0 }
 0x61b   :  { %8760 = vmatmul.mubr.bf16.gmra.mrb[196].mxu1 %v12900_v54  ;;  %v10936_v54 = vadd.f32 %v15039_v13, %v15038_v62  ;;  %v15047_v62 = vld [vmem:[#allocation40_spill] sm:$0xff] }
 0x61c   :  { %v7506_v32 = vmax.f32 %v7356_v20, 0.0  ;;  %8767 = vmatprep.mubr.bf16.mxu1 %v12901_v15  ;;  %v12907_v20 = vld [vmem:[#allocation8 + $0x84] ss:$16 sps:$4 sm:$0xff]  }
 0x61d   :  { %v7071_v29 = vpop.f32.mrb[72].mxu0 }
 0x61e   :  { %v7552_v28 = vpack.c.bf16 %v7506_v32, %v7505_v44  ;;  %v10931_v40 = vadd.f32 %v10930_v3, %v7071_v29  ;;  %v7073_v46 = vpop.f32.mrb[73].mxu0  ;;  %v15041_v3 = vld [vmem:[#allocation37_spill] sm:$0xff] }
 0x61f   :  { %v7074_v9 = vpop.f32.mrb[74].mxu0  ;;  %v10938_v44 = vadd.f32 %v15041_v3, %v15040_v39 }
 0x620   :  { %v10933_v6 = vadd.f32 %v10932_v2, %v7074_v9  ;;  %v7361_v30 = vadd.f32 %v10931_v40, %v14414_v50  ;;  %v7076_v21 = vpop.f32.mrb[75].mxu0  ;;  %9011 = vmatpush1.bf16.msra.mxu1 %v7552_v28  ;;  %v15043_v2 = vld [vmem:[#allocation38_spill] sm:$0xff] }
 0x621   :  { %9012 = vmatprep.subr.bf16.mxu1 %v14863_v61  ;;  %v10940_v28 = vadd.f32 %v15043_v2, %v15042_v41  ;;  %v12910_v21 = vld [vmem:[#allocation8 + $0xa4] ss:$16 sps:$4 sm:$0xff]  }
 0x622   :  { %v7364_v26 = vadd.f32 %v10933_v6, %v14420_v16  ;;  %v7507_v25 = vmax.f32 %v7361_v30, 0.0 }
 0x623   :  { %8768 = vmatmul.mubr.bf16.gmra.mrb[200].mxu1 %v12903_v1  ;;  %v12909_v1 = vld [vmem:[#allocation8 + $0x80] ss:$16 sps:$4 sm:$0xff]  }
 0x624   :  { %v7508_v60 = vmax.f32 %v7364_v26, 0.0  ;;  %8775 = vmatprep.mubr.bf16.mxu1 %v12904_v55  ;;  %v15044_v26 = vld [vmem:[#allocation85_spill] sm:$0xff] }
 0x625   :  { %v7079_v19 = vpop.f32.mrb[76].mxu0  ;;  %v10942_v49 = vadd.f32 %v15045_v57, %v15044_v26  ;;  %v15054_v57 = vld [vmem:[#allocation92_spill] sm:$0xff] }
 0x626   :  { %v7553_v10 = vpack.c.bf16 %v7508_v60, %v7507_v25  ;;  %v10935_v50 = vadd.f32 %v10934_v22, %v7079_v19  ;;  %v7081_v5 = vpop.f32.mrb[77].mxu0  ;;  %v15046_v19 = vld [vmem:[#allocation88_spill] sm:$0xff] }
 0x627   :  { %v7082_v4 = vpop.f32.mrb[78].mxu0  ;;  %v10944_v13 = vadd.f32 %v15047_v62, %v15046_v19  ;;  %v12912_v5 = vld [vmem:[#allocation8 + $0xa0] ss:$16 sps:$4 sm:$0xff]  }
 0x628   :  { %v7369_v15 = vadd.f32 %v10935_v50, %v14412_v24  ;;  %v10937_v27 = vadd.f32 %v10936_v54, %v7082_v4  ;;  %v7084_v16 = vpop.f32.mrb[79].mxu0  ;;  %9013 = vmatpush1.bf16.msra.mxu1 %v7553_v10  ;;  %v12918_v62 = vld [vmem:[#allocation8 + $0xe0] ss:$16 sps:$4 sm:$0xff]  }
 0x629   :  { %9014 = vmatprep.subr.bf16.mxu1 %v14863_v61  ;;  %v15048_v16 = vld [vmem:[#allocation87_spill] sm:$0xff] }
 0x62a   :  { %v7372_v63 = vadd.f32 %v10937_v27, %v14417_v48  ;;  %v7509_v32 = vmax.f32 %v7369_v15, 0.0  ;;  %v12913_v15 = vld [vmem:[#allocation8 + $0xc4] ss:$16 sps:$4 sm:$0xff]  }
 0x62b   :  { %8776 = vmatmul.mubr.bf16.gmra.mrb[204].mxu1 %v12906_v56 }
 0x62c   :  { %v7510_v29 = vmax.f32 %v7372_v63, 0.0  ;;  %8783 = vmatprep.mubr.bf16.mxu1 %v12907_v20  ;;  %v15049_v20 = vld [vmem:[#allocation41_spill] sm:$0xff] }
 0x62d   :  { %v7087_v17 = vpop.f32.mrb[80].mxu0  ;;  %v10946_v63 = vadd.f32 %v15049_v20, %v15048_v16  ;;  %v15059_v16 = vld [vmem:[#allocation46_spill] sm:$0xff] }
 0x62e   :  { %v7554_v24 = vpack.c.bf16 %v7510_v29, %v7509_v32  ;;  %v10939_v40 = vadd.f32 %v10938_v44, %v7087_v17  ;;  %v7089_v46 = vpop.f32.mrb[81].mxu0  ;;  %v15050_v32 = vld [vmem:[#allocation90_spill] sm:$0xff] }
 0x62f   :  { %v7090_v9 = vpop.f32.mrb[82].mxu0  ;;  %v15051_v29 = vld [vmem:[#allocation42_spill] sm:$0xff] }
 0x630   :  { %v10941_v6 = vadd.f32 %v10940_v28, %v7090_v9  ;;  %v7377_v30 = vadd.f32 %v10939_v40, %v14436_v18  ;;  %v7092_v48 = vpop.f32.mrb[83].mxu0  ;;  %9015 = vmatpush1.bf16.msra.mxu1 %v7554_v24  ;;  %v10948_v17 = vadd.f32 %v15051_v29, %v15050_v32  ;;  %v12915_v24 = vld [vmem:[#allocation8 + $0xc0] ss:$16 sps:$4 sm:$0xff]   ;;  %v12916_v9 = vld [vmem:[#allocation8 + $0xe4] ss:$16 sps:$4 sm:$0xff]  }
 0x631   :  { %9016 = vmatprep.subr.bf16.mxu1 %v14863_v61 }
 0x632   :  { %v7380_v55 = vadd.f32 %v10941_v6, %v14442_v52  ;;  %v7511_v22 = vmax.f32 %v7377_v30, 0.0  ;;  %v15052_v6 = vld [vmem:[#allocation89_spill] sm:$0xff]  ;;  %v15053_v30 = vld [vmem:[#allocation43_spill] sm:$0xff] }
 0x633   :  { %8784 = vmatmul.mubr.bf16.gmra.mrb[208].mxu1 %v12909_v1  ;;  %v10950_v48 = vadd.f32 %v15053_v30, %v15052_v6 }
 0x634   :  { %v7512_v25 = vmax.f32 %v7380_v55, 0.0  ;;  %8791 = vmatprep.mubr.bf16.mxu1 %v12910_v21 }
 0x635   :  { %v7095_v60 = vpop.f32.mrb[84].mxu0 }
 0x636   :  { %v7555_v54 = vpack.c.bf16 %v7512_v25, %v7511_v22  ;;  %v10943_v18 = vadd.f32 %v10942_v49, %v7095_v60  ;;  %v7097_v10 = vpop.f32.mrb[85].mxu0  ;;  %v15055_v49 = vld [vmem:[#allocation44_spill] sm:$0xff] }
 0x637   :  { %v7098_v50 = vpop.f32.mrb[86].mxu0  ;;  %v10952_v22 = vadd.f32 %v15055_v49, %v15054_v57  ;;  %v12925_v57 = vld [vmem:[#allocation8 + $0x144] ss:$16 sps:$4 sm:$0xff]  }
 0x638   :  { %v7385_v4 = vadd.f32 %v10943_v18, %v14434_v59  ;;  %v10945_v56 = vadd.f32 %v10944_v13, %v7098_v50  ;;  %v7100_v52 = vpop.f32.mrb[87].mxu0  ;;  %9017 = vmatpush1.bf16.msra.mxu1 %v7555_v54  ;;  %v12919_v18 = vld [vmem:[#allocation8 + $0x104] ss:$16 sps:$4 sm:$0xff]  }
 0x639   :  { %9018 = vmatprep.subr.bf16.mxu1 %v14863_v61  ;;  %v15056_v50 = vld [vmem:[#allocation91_spill] sm:$0xff] }
 0x63a   :  { %v7388_v27 = vadd.f32 %v10945_v56, %v14439_v31  ;;  %v7513_v39 = vmax.f32 %v7385_v4, 0.0 }
 0x63b   :  { %8792 = vmatmul.mubr.bf16.gmra.mrb[212].mxu1 %v12912_v5  ;;  %v15057_v5 = vld [vmem:[#allocation45_spill] sm:$0xff] }
 0x63c   :  { %v7514_v3 = vmax.f32 %v7388_v27, 0.0  ;;  %8799 = vmatprep.mubr.bf16.mxu1 %v12913_v15  ;;  %v10954_v4 = vadd.f32 %v15057_v5, %v15056_v50  ;;  %v15058_v27 = vld [vmem:[#allocation94_spill] sm:$0xff] }
 0x63d   :  { %v7103_v44 = vpop.f32.mrb[88].mxu0  ;;  %v10956_v20 = vadd.f32 %v15059_v16, %v15058_v27  ;;  %v12927_v5 = vld [vmem:[#allocation8 + $0x140] ss:$16 sps:$4 sm:$0xff]  }
 0x63e   :  { %v7556_v59 = vpack.c.bf16 %v7514_v3, %v7513_v39  ;;  %v10947_v41 = vadd.f32 %v10946_v63, %v7103_v44  ;;  %v7105_v2 = vpop.f32.mrb[89].mxu0  ;;  %v12921_v44 = vld [vmem:[#allocation8 + $0x100] ss:$16 sps:$4 sm:$0xff]  }
 0x63f   :  { %v7106_v28 = vpop.f32.mrb[90].mxu0  ;;  %v15061_v2 = vld [vmem:[#allocation47_spill] sm:$0xff]  ;;  %v15068_v27 = vld [vmem:[#allocation97_spill] sm:$0xff]  ;;  %v15069_v16 = vld [vmem:[#allocation56_spill] sm:$0xff] }
 0x640   :  { %v10949_v40 = vadd.f32 %v10948_v17, %v7106_v28  ;;  %v7393_v46 = vadd.f32 %v10947_v41, %v14458_v33  ;;  %v7108_v31 = vpop.f32.mrb[91].mxu0  ;;  %9019 = vmatpush1.bf16.msra.mxu1 %v7556_v59  ;;  %v12922_v17 = vld [vmem:[#allocation8 + $0x124] ss:$16 sps:$4 sm:$0xff]  }
 0x641   :  { %9020 = vmatprep.subr.bf16.mxu1 %v14863_v61  ;;  %v15060_v41 = vld [vmem:[#allocation93_spill] sm:$0xff]  ;;  %v15062_v31 = vld [vmem:[#allocation96_spill] sm:$0xff] }
 0x642   :  { %v7396_v1 = vadd.f32 %v10949_v40, %v14464_v0  ;;  %v7515_v21 = vmax.f32 %v7393_v46, 0.0  ;;  %v10958_v28 = vadd.f32 %v15061_v2, %v15060_v41 }
 0x643   :  { %8800 = vmatmul.mubr.bf16.gmra.mrb[216].mxu1 %v12915_v24 }
 0x644   :  { %v7516_v55 = vmax.f32 %v7396_v1, 0.0  ;;  %8807 = vmatprep.mubr.bf16.mxu1 %v12916_v9  ;;  %v15063_v9 = vld [vmem:[#allocation48_spill] sm:$0xff] }
 0x645   :  { %v7111_v26 = vpop.f32.mrb[92].mxu0  ;;  %v10960_v1 = vadd.f32 %v15063_v9, %v15062_v31 }
 0x646   :  { %v7557_v25 = vpack.c.bf16 %v7516_v55, %v7515_v21  ;;  %v10951_v33 = vadd.f32 %v10950_v48, %v7111_v26  ;;  %v7113_v60 = vpop.f32.mrb[93].mxu0  ;;  %v12924_v21 = vld [vmem:[#allocation8 + $0x120] ss:$16 sps:$4 sm:$0xff]  }
 0x647   :  { %v7114_v19 = vpop.f32.mrb[94].mxu0 }
 0x648   :  { %v7401_v13 = vadd.f32 %v10951_v33, %v14456_v45  ;;  %v10953_v54 = vadd.f32 %v10952_v22, %v7114_v19  ;;  %v7116_v0 = vpop.f32.mrb[95].mxu0  ;;  %9021 = vmatpush1.bf16.msra.mxu1 %v7557_v25  ;;  %v15064_v22 = vld [vmem:[#allocation95_spill] sm:$0xff]  ;;  %v15065_v25 = vld [vmem:[#allocation50_spill] sm:$0xff] }
 0x649   :  { %9022 = vmatprep.subr.bf16.mxu1 %v14863_v61  ;;  %v10962_v33 = vadd.f32 %v15065_v25, %v15064_v22  ;;  %v12934_v22 = vld [vmem:[#allocation8 + $0x1a4] ss:$16 sps:$4 sm:$0xff]  }
 0x64a   :  { %v7404_v10 = vadd.f32 %v10953_v54, %v14461_v51  ;;  %v7517_v56 = vmax.f32 %v7401_v13, 0.0  ;;  %v15066_v13 = vld [vmem:[#allocation98_spill] sm:$0xff]  ;;  %v15067_v54 = vld [vmem:[#allocation53_spill] sm:$0xff] }
 0x64b   :  { %8808 = vmatmul.mubr.bf16.gmra.mrb[220].mxu1 %v12918_v62  ;;  %v10964_v0 = vadd.f32 %v15067_v54, %v15066_v13 }
 0x64c   :  { %v7518_v52 = vmax.f32 %v7404_v10, 0.0  ;;  %8815 = vmatprep.mubr.bf16.mxu1 %v12919_v18 }
 0x64d   :  { %v7119_v15 = vpop.f32.mrb[96].mxu0 }
 0x64e   :  { %v7558_v45 = vpack.c.bf16 %v7518_v52, %v7517_v56  ;;  %v10955_v63 = vadd.f32 %v10954_v4, %v7119_v15  ;;  %v7121_v39 = vpop.f32.mrb[97].mxu0  ;;  %v12928_v52 = vld [vmem:[#allocation8 + $0x164] ss:$16 sps:$4 sm:$0xff]  }
 0x64f   :  { %v7122_v3 = vpop.f32.mrb[98].mxu0 }
 0x650   :  { %v10957_v32 = vadd.f32 %v10956_v20, %v7122_v3  ;;  %v7409_v29 = vadd.f32 %v10955_v63, %v14480_v14  ;;  %v7124_v51 = vpop.f32.mrb[99].mxu0  ;;  %9023 = vmatpush1.bf16.msra.mxu1 %v7558_v45  ;;  %v10966_v20 = vadd.f32 %v15069_v16, %v15068_v27  ;;  %v15070_v3 = vld [vmem:[#allocation100_spill] sm:$0xff]  ;;  %v15080_v27 = vld [vmem:[#allocation103_spill] sm:$0xff]  ;;  %v15081_v16 = vld [vmem:[#allocation74_spill] sm:$0xff] }
 0x651   :  { %9024 = vmatprep.subr.bf16.mxu1 %v14863_v61 }
 0x652   :  { %v7412_v59 = vadd.f32 %v10957_v32, %v14486_v58  ;;  %v7519_v24 = vmax.f32 %v7409_v29, 0.0 }
 0x653   :  { %8816 = vmatmul.mubr.bf16.gmra.mrb[224].mxu1 %v12921_v44  ;;  %v15071_v44 = vld [vmem:[#allocation59_spill] sm:$0xff] }
 0x654   :  { %v7520_v40 = vmax.f32 %v7412_v59, 0.0  ;;  %8823 = vmatprep.mubr.bf16.mxu1 %v12922_v17  ;;  %v10968_v32 = vadd.f32 %v15071_v44, %v15070_v3  ;;  %v12930_v59 = vld [vmem:[#allocation8 + $0x160] ss:$16 sps:$4 sm:$0xff]  }
 0x655   :  { %v7127_v46 = vpop.f32.mrb[100].mxu0  ;;  %v15082_v3 = vld [vmem:[#allocation106_spill] sm:$0xff]  ;;  %v15083_v44 = vld [vmem:[#allocation77_spill] sm:$0xff] }
 0x656   :  { %v7559_v6 = vpack.c.bf16 %v7520_v40, %v7519_v24  ;;  %v10959_v14 = vadd.f32 %v10958_v28, %v7127_v46  ;;  %v7129_v30 = vpop.f32.mrb[101].mxu0  ;;  %v12931_v28 = vld [vmem:[#allocation8 + $0x184] ss:$16 sps:$4 sm:$0xff]   ;;  %v15073_v46 = vld [vmem:[#allocation62_spill] sm:$0xff] }
 0x657   :  { %v7130_v48 = vpop.f32.mrb[102].mxu0  ;;  %v15072_v40 = vld [vmem:[#allocation99_spill] sm:$0xff]  ;;  %v15075_v30 = vld [vmem:[#allocation65_spill] sm:$0xff] }
 0x658   :  { %v7417_v55 = vadd.f32 %v10959_v14, %v14478_v53  ;;  %v10961_v26 = vadd.f32 %v10960_v1, %v7130_v48  ;;  %v7132_v58 = vpop.f32.mrb[103].mxu0  ;;  %9025 = vmatpush1.bf16.msra.mxu1 %v7559_v6  ;;  %v10970_v31 = vadd.f32 %v15073_v46, %v15072_v40  ;;  %v15074_v14 = vld [vmem:[#allocation102_spill] sm:$0xff] }
 0x659   :  { %9026 = vmatprep.subr.bf16.mxu1 %v14863_v61  ;;  %v10972_v48 = vadd.f32 %v15075_v30, %v15074_v14  ;;  %v12933_v58 = vld [vmem:[#allocation8 + $0x180] ss:$16 sps:$4 sm:$0xff]  }
 0x65a   :  { %v7420_v49 = vadd.f32 %v10961_v26, %v14483_v38  ;;  %v7521_v60 = vmax.f32 %v7417_v55, 0.0 }
 0x65b   :  { %8824 = vmatmul.mubr.bf16.gmra.mrb[228].mxu1 %v12924_v21 }
 0x65c   :  { %v7522_v19 = vmax.f32 %v7420_v49, 0.0  ;;  %8831 = vmatprep.mubr.bf16.mxu1 %v12925_v57 }
 0x65d   :  { %v7135_v62 = vpop.f32.mrb[104].mxu0 }
 0x65e   :  { %v7560_v53 = vpack.c.bf16 %v7522_v19, %v7521_v60  ;;  %v10963_v18 = vadd.f32 %v10962_v33, %v7135_v62  ;;  %v7137_v10 = vpop.f32.mrb[105].mxu0  ;;  %v15076_v33 = vld [vmem:[#allocation101_spill] sm:$0xff]  ;;  %v15077_v60 = vld [vmem:[#allocation68_spill] sm:$0xff] }
 0x65f   :  { %v7138_v50 = vpop.f32.mrb[106].mxu0  ;;  %v10974_v19 = vadd.f32 %v15077_v60, %v15076_v33  ;;  %v12948_v33 = vld [vmem:[#allocation8 + $0x224] ss:$16 sps:$4 sm:$0xff]   ;;  %v12946_v60 = vld [vmem:[#allocation8 + $0x220] ss:$16 sps:$4 sm:$0xff]  }
 0x660   :  { %v10965_v4 = vadd.f32 %v10964_v0, %v7138_v50  ;;  %v7425_v56 = vadd.f32 %v10963_v18, %v14502_v12  ;;  %v7140_v38 = vpop.f32.mrb[107].mxu0  ;;  %9027 = vmatpush1.bf16.msra.mxu1 %v7560_v53  ;;  %v15078_v0 = vld [vmem:[#allocation104_spill] sm:$0xff]  ;;  %v15079_v53 = vld [vmem:[#allocation71_spill] sm:$0xff] }
 0x661   :  { %9028 = vmatprep.subr.bf16.mxu1 %v14863_v61  ;;  %v10976_v18 = vadd.f32 %v15079_v53, %v15078_v0  ;;  %v12958_v0 = vld [vmem:[#allocation8 + $0x2a0] ss:$16 sps:$4 sm:$0xff]   ;;  %v12963_v53 = vld [vmem:[#allocation8 + $0x2c4] ss:$16 sps:$4 sm:$0xff]  }
 0x662   :  { %v7428_v15 = vadd.f32 %v10965_v4, %v14508_v35  ;;  %v7523_v45 = vmax.f32 %v7425_v56, 0.0  ;;  %v12936_v4 = vld [vmem:[#allocation8 + $0x1a0] ss:$16 sps:$4 sm:$0xff]  }
 0x663   :  { %8832 = vmatmul.mubr.bf16.gmra.mrb[232].mxu1 %v12927_v5 }
 0x664   :  { %v7524_v63 = vmax.f32 %v7428_v15, 0.0  ;;  %8839 = vmatprep.mubr.bf16.mxu1 %v12928_v52  ;;  %v12937_v52 = vld [vmem:[#allocation8 + $0x1c4] ss:$16 sps:$4 sm:$0xff]  }
 0x665   :  { %v7143_v39 = vpop.f32.mrb[108].mxu0 }
 0x666   :  { %v7561_v29 = vpack.c.bf16 %v7524_v63, %v7523_v45  ;;  %v10967_v12 = vadd.f32 %v10966_v20, %v7143_v39  ;;  %v7145_v51 = vpop.f32.mrb[109].mxu0  ;;  %v10978_v20 = vadd.f32 %v15081_v16, %v15080_v27  ;;  %v12981_v27 = vld [vmem:[#allocation8 + $0x384] ss:$16 sps:$4 sm:$0xff]   ;;  %v12979_v16 = vld [vmem:[#allocation8 + $0x380] ss:$16 sps:$4 sm:$0xff]  }
 0x667   :  { %v7146_v17 = vpop.f32.mrb[110].mxu0 }
 0x668   :  { %v7433_v41 = vadd.f32 %v10967_v12, %v14500_v36  ;;  %v10969_v2 = vadd.f32 %v10968_v32, %v7146_v17  ;;  %v7148_v35 = vpop.f32.mrb[111].mxu0  ;;  %9029 = vmatpush1.bf16.msra.mxu1 %v7561_v29  ;;  %v10980_v32 = vadd.f32 %v15083_v44, %v15082_v3  ;;  %v12939_v17 = vld [vmem:[#allocation8 + $0x1c0] ss:$16 sps:$4 sm:$0xff]   ;;  %v12990_v3 = vld [vmem:[#allocation8 + $0x3e4] ss:$16 sps:$4 sm:$0xff]  }
 0x669   :  { %9030 = vmatprep.subr.bf16.mxu1 %v14863_v61  ;;  %v12988_v44 = vld [vmem:[#allocation8 + $0x3e0] ss:$16 sps:$4 sm:$0xff]  }
 0x66a   :  { %v7436_v24 = vadd.f32 %v10969_v2, %v14505_v43  ;;  %v7525_v9 = vmax.f32 %v7433_v41, 0.0  ;;  %v12940_v2 = vld [vmem:[#allocation8 + $0x1e4] ss:$16 sps:$4 sm:$0xff]  }
 0x66b   :  { %8840 = vmatmul.mubr.bf16.gmra.mrb[236].mxu1 %v12930_v59 }
 0x66c   :  { %v7526_v1 = vmax.f32 %v7436_v24, 0.0  ;;  %8847 = vmatprep.mubr.bf16.mxu1 %v12931_v28  ;;  %v15084_v28 = vld [vmem:[#allocation105_spill] sm:$0xff]  ;;  %v15085_v24 = vld [vmem:[#allocation80_spill] sm:$0xff] }
 0x66d   :  { %v7151_v6 = vpop.f32.mrb[112].mxu0  ;;  %v10982_v40 = vadd.f32 %v15085_v24, %v15084_v28  ;;  %v13008_v28 = vld [vmem:[#allocation8 + $0xa8] ss:$16 sps:$4 sm:$0xff]   ;;  %v13009_v24 = vld [vmem:[#allocation8 + $0xcc] ss:$16 sps:$4 sm:$0xff]  }
 0x66e   :  { %v7562_v36 = vpack.c.bf16 %v7526_v1, %v7525_v9  ;;  %v10971_v21 = vadd.f32 %v10970_v31, %v7151_v6  ;;  %v7153_v55 = vpop.f32.mrb[113].mxu0  ;;  %v15086_v1 = vld [vmem:[#allocation108_spill] sm:$0xff]  ;;  %v15087_v6 = vld [vmem:[#allocation83_spill] sm:$0xff] }
 0x66f   :  { %v7154_v26 = vpop.f32.mrb[114].mxu0  ;;  %v10984_v14 = vadd.f32 %v15087_v6, %v15086_v1  ;;  %v13017_v1 = vld [vmem:[#allocation8 + $0x108] ss:$16 sps:$4 sm:$0xff]   ;;  %v13018_v6 = vld [vmem:[#allocation8 + $0x12c] ss:$16 sps:$4 sm:$0xff]  }
 0x670   :  { %v10973_v57 = vadd.f32 %v10972_v48, %v7154_v26  ;;  %v7441_v49 = vadd.f32 %v10971_v21, %v14524_v42  ;;  %v7156_v43 = vpop.f32.mrb[115].mxu0  ;;  %9031 = vmatpush1.bf16.msra.mxu1 %v7562_v36  ;;  %v12942_v21 = vld [vmem:[#allocation8 + $0x1e0] ss:$16 sps:$4 sm:$0xff]  }
 0x671   :  { %9032 = vmatprep.subr.bf16.mxu1 %v14863_v61 }
 0x672   :  { %v7444_v25 = vadd.f32 %v10973_v57, %v14530_v8  ;;  %v7527_v62 = vmax.f32 %v7441_v49, 0.0 }
 0x673   :  { %8848 = vmatmul.mubr.bf16.gmra.mrb[240].mxu1 %v12933_v58  ;;  %v12945_v58 = vld [vmem:[#allocation8 + $0x204] ss:$16 sps:$4 sm:$0xff]  }
 0x674   :  { %v7528_v13 = vmax.f32 %v7444_v25, 0.0  ;;  %8855 = vmatprep.mubr.bf16.mxu1 %v12934_v22  ;;  %v12943_v25 = vld [vmem:[#allocation8 + $0x200] ss:$16 sps:$4 sm:$0xff]  }
 0x675   :  { %v7159_v54 = vpop.f32.mrb[116].mxu0 }
 0x676   :  { %v7563_v10 = vpack.c.bf16 %v7528_v13, %v7527_v62  ;;  %v10975_v42 = vadd.f32 %v10974_v19, %v7159_v54  ;;  %v7161_v50 = vpop.f32.mrb[117].mxu0  ;;  %v12949_v19 = vld [vmem:[#allocation8 + $0x240] ss:$16 sps:$4 sm:$0xff]   ;;  %v12954_v62 = vld [vmem:[#allocation8 + $0x264] ss:$16 sps:$4 sm:$0xff]  }
 0x677   :  { %v7162_v5 = vpop.f32.mrb[118].mxu0  ;;  %v12955_v13 = vld [vmem:[#allocation8 + $0x280] ss:$16 sps:$4 sm:$0xff]   ;;  %v12960_v54 = vld [vmem:[#allocation8 + $0x2a4] ss:$16 sps:$4 sm:$0xff]  }
 0x678   :  { %v7449_v56 = vadd.f32 %v10975_v42, %v14522_v37  ;;  %v10977_v38 = vadd.f32 %v10976_v18, %v7162_v5  ;;  %v7164_v8 = vpop.f32.mrb[119].mxu0  ;;  %9033 = vmatpush1.bf16.msra.mxu1 %v7563_v10  ;;  %v12961_v18 = vld [vmem:[#allocation8 + $0x2c0] ss:$16 sps:$4 sm:$0xff]   ;;  %v12966_v10 = vld [vmem:[#allocation8 + $0x2e4] ss:$16 sps:$4 sm:$0xff]  }
 0x679   :  { %9034 = vmatprep.subr.bf16.mxu1 %v14863_v61  ;;  %v12964_v42 = vld [vmem:[#allocation8 + $0x2e0] ss:$16 sps:$4 sm:$0xff]   ;;  %v12969_v50 = vld [vmem:[#allocation8 + $0x304] ss:$16 sps:$4 sm:$0xff]  }
 0x67a   :  { %v7452_v15 = vadd.f32 %v10977_v38, %v14527_v47  ;;  %v7529_v45 = vmax.f32 %v7449_v56, 0.0  ;;  %v12967_v5 = vld [vmem:[#allocation8 + $0x300] ss:$16 sps:$4 sm:$0xff]   ;;  %v12975_v38 = vld [vmem:[#allocation8 + $0x344] ss:$16 sps:$4 sm:$0xff]  }
 0x67b   :  { %8856 = vmatmul.mubr.bf16.gmra.mrb[244].mxu1 %v12936_v4  ;;  %v12972_v4 = vld [vmem:[#allocation8 + $0x324] ss:$16 sps:$4 sm:$0xff]   ;;  %v12970_v56 = vld [vmem:[#allocation8 + $0x320] ss:$16 sps:$4 sm:$0xff]  }
 0x67c   :  { %v7530_v63 = vmax.f32 %v7452_v15, 0.0  ;;  %8863 = vmatprep.mubr.bf16.mxu1 %v12937_v52  ;;  %v12973_v8 = vld [vmem:[#allocation8 + $0x340] ss:$16 sps:$4 sm:$0xff]   ;;  %v12978_v52 = vld [vmem:[#allocation8 + $0x364] ss:$16 sps:$4 sm:$0xff]  }
 0x67d   :  { %v7167_v39 = vpop.f32.mrb[120].mxu0  ;;  %v12976_v15 = vld [vmem:[#allocation8 + $0x360] ss:$16 sps:$4 sm:$0xff]  }
 0x67e   :  { %v7564_v37 = vpack.c.bf16 %v7530_v63, %v7529_v45  ;;  %v10979_v29 = vadd.f32 %v10978_v20, %v7167_v39  ;;  %v7169_v12 = vpop.f32.mrb[121].mxu0  ;;  %v12984_v20 = vld [vmem:[#allocation8 + $0x3a4] ss:$16 sps:$4 sm:$0xff]   ;;  %v12982_v45 = vld [vmem:[#allocation8 + $0x3a0] ss:$16 sps:$4 sm:$0xff]  }
 0x67f   :  { %v7170_v51 = vpop.f32.mrb[122].mxu0  ;;  %v12987_v63 = vld [vmem:[#allocation8 + $0x3c4] ss:$16 sps:$4 sm:$0xff]   ;;  %v12985_v39 = vld [vmem:[#allocation8 + $0x3c0] ss:$16 sps:$4 sm:$0xff]  }
 0x680   :  { %v10981_v59 = vadd.f32 %v10980_v32, %v7170_v51  ;;  %v7457_v41 = vadd.f32 %v10979_v29, %v14546_v11  ;;  %v7172_v47 = vpop.f32.mrb[123].mxu0  ;;  %9035 = vmatpush1.bf16.msra.mxu1 %v7564_v37  ;;  %v12993_v32 = vld [vmem:[#allocation8 + $0xc] ss:$16 sps:$4 sm:$0xff]   ;;  %v12991_v37 = vld [vmem:[#allocation8 + $0x8] ss:$16 sps:$4 sm:$0xff]  }
 0x681   :  { %9036 = vmatprep.subr.bf16.mxu1 %v14863_v61  ;;  %v12994_v29 = vld [vmem:[#allocation8 + $0x2c] ss:$16 sps:$4 sm:$0xff]   ;;  %v12996_v12 = vld [vmem:[#allocation8 + $0x28] ss:$16 sps:$4 sm:$0xff]  }
 0x682   :  { %v7460_v35 = vadd.f32 %v10981_v59, %v14552_v23  ;;  %v7531_v46 = vmax.f32 %v7457_v41, 0.0  ;;  %v12997_v51 = vld [vmem:[#allocation8 + $0x4c] ss:$16 sps:$4 sm:$0xff]   ;;  %v13002_v41 = vld [vmem:[#allocation8 + $0x68] ss:$16 sps:$4 sm:$0xff]  }
 0x683   :  { %8864 = vmatmul.mubr.bf16.gmra.mrb[248].mxu1 %v12939_v17  ;;  %v12999_v17 = vld [vmem:[#allocation8 + $0x48] ss:$16 sps:$4 sm:$0xff]   ;;  %v13000_v59 = vld [vmem:[#allocation8 + $0x6c] ss:$16 sps:$4 sm:$0xff]  }
 0x684   :  { %v7532_v31 = vmax.f32 %v7460_v35, 0.0  ;;  %8871 = vmatprep.mubr.bf16.mxu1 %v12940_v2  ;;  %v13003_v47 = vld [vmem:[#allocation8 + $0x8c] ss:$16 sps:$4 sm:$0xff]   ;;  %v13005_v2 = vld [vmem:[#allocation8 + $0x88] ss:$16 sps:$4 sm:$0xff]  }
 0x685   :  { %v7175_v9 = vpop.f32.mrb[124].mxu0  ;;  %v13006_v35 = vld [vmem:[#allocation8 + $0xac] ss:$16 sps:$4 sm:$0xff]  }
 0x686   :  { %v7565_v30 = vpack.c.bf16 %v7532_v31, %v7531_v46  ;;  %v10983_v11 = vadd.f32 %v10982_v40, %v7175_v9  ;;  %v7177_v48 = vpop.f32.mrb[125].mxu0  ;;  %v13011_v40 = vld [vmem:[#allocation8 + $0xc8] ss:$16 sps:$4 sm:$0xff]   ;;  %v13012_v46 = vld [vmem:[#allocation8 + $0xec] ss:$16 sps:$4 sm:$0xff]  }
 0x687   :  { %v7178_v36 = vpop.f32.mrb[126].mxu0  ;;  %v13014_v31 = vld [vmem:[#allocation8 + $0xe8] ss:$16 sps:$4 sm:$0xff]   ;;  %v13015_v9 = vld [vmem:[#allocation8 + $0x10c] ss:$16 sps:$4 sm:$0xff]  }
 0x688   :  { %v7465_v55 = vadd.f32 %v10983_v11, %v14544_v7  ;;  %v10985_v26 = vadd.f32 %v10984_v14, %v7178_v36  ;;  %v7180_v23 = vpop.f32.mrb[127].mxu0  ;;  %9037 = vmatpush1.bf16.msra.mxu1 %v7565_v30  ;;  %v12951_v7 = vld [vmem:[#allocation8 + $0x244] ss:$16 sps:$4 sm:$0xff]   ;;  %v13020_v14 = vld [vmem:[#allocation8 + $0x128] ss:$16 sps:$4 sm:$0xff]  }
 0x689   :  { %9038 = vmatprep.subr.bf16.mxu1 %v14863_v61  ;;  %v12952_v61 = vld [vmem:[#allocation8 + $0x260] ss:$16 sps:$4 sm:$0xff]   ;;  %v13021_v30 = vld [vmem:[#allocation8 + $0x14c] ss:$16 sps:$4 sm:$0xff]   ;;  %v13023_v11 = vld [vmem:[#allocation8 + $0x148] ss:$16 sps:$4 sm:$0xff]  }
 0x68a   :  { %v7468_v57 = vadd.f32 %v10985_v26, %v14549_v34  ;;  %v7533_v49 = vmax.f32 %v7465_v55, 0.0  ;;  %v12957_v34 = vld [vmem:[#allocation8 + $0x284] ss:$16 sps:$4 sm:$0xff]   ;;  %v13024_v48 = vld [vmem:[#allocation8 + $0x16c] ss:$16 sps:$4 sm:$0xff]  }
 0x68b   :  { %8872 = vmatmul.mubr.bf16.gmra.mrb[252].mxu1 %v12942_v21  ;;  %v13026_v36 = vld [vmem:[#allocation8 + $0x168] ss:$16 sps:$4 sm:$0xff]   ;;  %v13027_v21 = vld [vmem:[#allocation8 + $0x18c] ss:$16 sps:$4 sm:$0xff]  }
 0x68c   :  { %v7534_v43 = vmax.f32 %v7468_v57, 0.0  ;;  %8879 = vmatprep.mubr.bf16.mxu1 %v12945_v58  ;;  %v13029_v55 = vld [vmem:[#allocation8 + $0x188] ss:$16 sps:$4 sm:$0xff]   ;;  %v13030_v26 = vld [vmem:[#allocation8 + $0x1ac] ss:$16 sps:$4 sm:$0xff]  }
 0x68d   :  { %v13032_v23 = vld [vmem:[#allocation8 + $0x1a8] ss:$16 sps:$4 sm:$0xff]   ;;  %v13033_v58 = vld [vmem:[#allocation8 + $0x1cc] ss:$16 sps:$4 sm:$0xff]  }
 0x68e   :  { %v7566_v22 = vpack.c.bf16 %v7534_v43, %v7533_v49  ;;  %v13035_v57 = vld [vmem:[#allocation8 + $0x1c8] ss:$16 sps:$4 sm:$0xff]   ;;  %v13036_v49 = vld [vmem:[#allocation8 + $0x1ec] ss:$16 sps:$4 sm:$0xff]   ;;  %v14674_v43 = vpop.permute.xlu0 %7911 }
 0x690   :  { %9039 = vmatpush1.bf16.msra.mxu1 %v7566_v22  ;;  %v14676_v22 = vpop.permute.xlu1 %7916 }
 0x693   :  { %8880 = vmatmul.mubr.bf16.gmra.mrb[0].mxu1 %v12943_v25  ;;  %v13038_v25 = vld [vmem:[#allocation8 + $0x1e8] ss:$16 sps:$4 sm:$0xff]  }
 0x694   :  { %8887 = vmatprep.mubr.bf16.mxu1 %v12948_v33  ;;  %v13041_v33 = vld [vmem:[#allocation8 + $0x20c] ss:$16 sps:$4 sm:$0xff]  }
 0x69b   :  { %8888 = vmatmul.mubr.bf16.gmra.mrb[4].mxu1 %v12946_v60  ;;  %v14678_v60 = vpop.permute.xlu0 %7921 }
 0x69c   :  { %8895 = vmatprep.mubr.bf16.mxu1 %v12951_v7  ;;  %v14680_v7 = vpop.permute.xlu1 %7926 }
 0x6a3   :  { %8896 = vmatmul.mubr.bf16.gmra.mrb[8].mxu1 %v12949_v19  ;;  %v13039_v19 = vld [vmem:[#allocation8 + $0x208] ss:$16 sps:$4 sm:$0xff]  }
 0x6a4   :  { %8903 = vmatprep.mubr.bf16.mxu1 %v12954_v62  ;;  %v13044_v62 = vld [vmem:[#allocation8 + $0x22c] ss:$16 sps:$4 sm:$0xff]  }
 0x6ab   :  { %8904 = vmatmul.mubr.bf16.gmra.mrb[12].mxu1 %v12952_v61  ;;  %v14682_v61 = vpop.permute.xlu0 %7931 }
 0x6ac   :  { %8911 = vmatprep.mubr.bf16.mxu1 %v12957_v34  ;;  %v14684_v34 = vpop.permute.xlu1 %7936 }
 0x6b3   :  { %8912 = vmatmul.mubr.bf16.gmra.mrb[16].mxu1 %v12955_v13  ;;  %v14686_v13 = vpop.permute.xlu0 %7941 }
 0x6b4   :  { %8919 = vmatprep.mubr.bf16.mxu1 %v12960_v54  ;;  %v13042_v54 = vld [vmem:[#allocation8 + $0x228] ss:$16 sps:$4 sm:$0xff]  }
 0x6bb   :  { %8920 = vmatmul.mubr.bf16.gmra.mrb[20].mxu1 %v12958_v0  ;;  %v14688_v0 = vpop.permute.xlu1 %7946 }
 0x6bc   :  { %8927 = vmatprep.mubr.bf16.mxu1 %v12963_v53  ;;  %v13047_v53 = vld [vmem:[#allocation8 + $0x24c] ss:$16 sps:$4 sm:$0xff]  }
 0x6c3   :  { %8928 = vmatmul.mubr.bf16.gmra.mrb[24].mxu1 %v12961_v18  ;;  %v14690_v18 = vpop.permute.xlu0 %7951 }
 0x6c4   :  { %8935 = vmatprep.mubr.bf16.mxu1 %v12966_v10  ;;  %v14692_v10 = vpop.permute.xlu1 %7956 }
 0x6cb   :  { %8936 = vmatmul.mubr.bf16.gmra.mrb[28].mxu1 %v12964_v42  ;;  %v13045_v42 = vld [vmem:[#allocation8 + $0x248] ss:$16 sps:$4 sm:$0xff]  }
 0x6cc   :  { %8943 = vmatprep.mubr.bf16.mxu1 %v12969_v50  ;;  %v13050_v50 = vld [vmem:[#allocation8 + $0x26c] ss:$16 sps:$4 sm:$0xff]  }
 0x6d3   :  { %8944 = vmatmul.mubr.bf16.gmra.mrb[32].mxu1 %v12967_v5  ;;  %v14694_v5 = vpop.permute.xlu0 %7961 }
 0x6d4   :  { %8951 = vmatprep.mubr.bf16.mxu1 %v12972_v4  ;;  %v14696_v4 = vpop.permute.xlu1 %7966 }
 0x6db   :  { %8952 = vmatmul.mubr.bf16.gmra.mrb[36].mxu1 %v12970_v56  ;;  %v13048_v56 = vld [vmem:[#allocation8 + $0x268] ss:$16 sps:$4 sm:$0xff]  }
 0x6dc   :  { %8959 = vmatprep.mubr.bf16.mxu1 %v12975_v38  ;;  %v13053_v38 = vld [vmem:[#allocation8 + $0x28c] ss:$16 sps:$4 sm:$0xff]  }
 0x6e3   :  { %8960 = vmatmul.mubr.bf16.gmra.mrb[40].mxu1 %v12973_v8  ;;  %v14698_v8 = vpop.permute.xlu0 %7971 }
 0x6e4   :  { %8967 = vmatprep.mubr.bf16.mxu1 %v12978_v52  ;;  %v14700_v52 = vpop.permute.xlu1 %7976 }
 0x6eb   :  { %8968 = vmatmul.mubr.bf16.gmra.mrb[44].mxu1 %v12976_v15  ;;  %v14702_v15 = vpop.permute.xlu0 %7981 }
 0x6ec   :  { %8975 = vmatprep.mubr.bf16.mxu1 %v12981_v27  ;;  %v13051_v27 = vld [vmem:[#allocation8 + $0x288] ss:$16 sps:$4 sm:$0xff]  }
 0x6f3   :  { %8976 = vmatmul.mubr.bf16.gmra.mrb[48].mxu1 %v12979_v16  ;;  %v14704_v16 = vpop.permute.xlu1 %7986 }
 0x6f4   :  { %8983 = vmatprep.mubr.bf16.mxu1 %v12984_v20  ;;  %v13056_v20 = vld [vmem:[#allocation8 + $0x2ac] ss:$16 sps:$4 sm:$0xff]  }
 0x6fb   :  { %8984 = vmatmul.mubr.bf16.gmra.mrb[52].mxu1 %v12982_v45  ;;  %v14706_v45 = vpop.permute.xlu0 %7991 }
 0x6fc   :  { %8991 = vmatprep.mubr.bf16.mxu1 %v12987_v63  ;;  %v14708_v63 = vpop.permute.xlu1 %7996 }
 0x703   :  { %8992 = vmatmul.mubr.bf16.gmra.mrb[56].mxu1 %v12985_v39  ;;  %v13054_v39 = vld [vmem:[#allocation8 + $0x2a8] ss:$16 sps:$4 sm:$0xff]  }
 0x704   :  { %8999 = vmatprep.mubr.bf16.mxu1 %v12990_v3  ;;  %v13059_v3 = vld [vmem:[#allocation8 + $0x2cc] ss:$16 sps:$4 sm:$0xff]  }
 0x70b   :  { %9000 = vmatmul.mubr.bf16.gmra.mrb[60].mxu1 %v12988_v44  ;;  %v14710_v44 = vpop.permute.xlu0 %8001 }
 0x70c   :  { %9040 = vmatprep.mubr.bf16.mxu1 %v12993_v32  ;;  %v14712_v32 = vpop.permute.xlu1 %8006 }
 0x713   :  { %9041 = vmatmul.mubr.bf16.vlgmr.msra.gmra.mrb[192].mxu1 %v12991_v37  ;;  %v13057_v37 = vld [vmem:[#allocation8 + $0x2c8] ss:$16 sps:$4 sm:$0xff]  }
 0x714   :  { %9048 = vmatprep.mubr.bf16.mxu1 %v12994_v29  ;;  %v13062_v29 = vld [vmem:[#allocation8 + $0x2ec] ss:$16 sps:$4 sm:$0xff]  }
 0x71b   :  { %9049 = vmatmul.mubr.bf16.gmra.mrb[196].mxu1 %v12996_v12  ;;  %v14714_v12 = vpop.permute.xlu0 %8011 }
 0x71c   :  { %9056 = vmatprep.mubr.bf16.mxu1 %v12997_v51  ;;  %v14716_v51 = vpop.permute.xlu1 %8016 }
 0x723   :  { %9057 = vmatmul.mubr.bf16.gmra.mrb[200].mxu1 %v12999_v17  ;;  %v14718_v17 = vpop.permute.xlu0 %8021 }
 0x724   :  { %9064 = vmatprep.mubr.bf16.mxu1 %v13000_v59  ;;  %v13060_v59 = vld [vmem:[#allocation8 + $0x2e8] ss:$16 sps:$4 sm:$0xff]  }
 0x72b   :  { %9065 = vmatmul.mubr.bf16.gmra.mrb[204].mxu1 %v13002_v41  ;;  %v14720_v41 = vpop.permute.xlu1 %8026 }
 0x72c   :  { %9072 = vmatprep.mubr.bf16.mxu1 %v13003_v47  ;;  %v13065_v47 = vld [vmem:[#allocation8 + $0x30c] ss:$16 sps:$4 sm:$0xff]  }
 0x733   :  { %9073 = vmatmul.mubr.bf16.gmra.mrb[208].mxu1 %v13005_v2  ;;  %v14722_v2 = vpop.permute.xlu0 %8031 }
 0x734   :  { %9080 = vmatprep.mubr.bf16.mxu1 %v13006_v35  ;;  %v14724_v35 = vpop.permute.xlu1 %8036 }
 0x73b   :  { %9081 = vmatmul.mubr.bf16.gmra.mrb[212].mxu1 %v13008_v28  ;;  %v13063_v28 = vld [vmem:[#allocation8 + $0x308] ss:$16 sps:$4 sm:$0xff]  }
 0x73c   :  { %9088 = vmatprep.mubr.bf16.mxu1 %v13009_v24  ;;  %v13068_v24 = vld [vmem:[#allocation8 + $0x32c] ss:$16 sps:$4 sm:$0xff]  }
 0x743   :  { %9089 = vmatmul.mubr.bf16.gmra.mrb[216].mxu1 %v13011_v40  ;;  %v14726_v40 = vpop.permute.xlu0 %8041 }
 0x744   :  { %9096 = vmatprep.mubr.bf16.mxu1 %v13012_v46  ;;  %v14728_v46 = vpop.permute.xlu1 %8046 }
 0x74b   :  { %9097 = vmatmul.mubr.bf16.gmra.mrb[220].mxu1 %v13014_v31  ;;  %v13066_v31 = vld [vmem:[#allocation8 + $0x328] ss:$16 sps:$4 sm:$0xff]  }
 0x74c   :  { %9104 = vmatprep.mubr.bf16.mxu1 %v13015_v9  ;;  %v13071_v9 = vld [vmem:[#allocation8 + $0x34c] ss:$16 sps:$4 sm:$0xff]  }
 0x753   :  { %9105 = vmatmul.mubr.bf16.gmra.mrb[224].mxu1 %v13017_v1  ;;  %v14730_v1 = vpop.permute.xlu0 %8051 }
 0x754   :  { %9112 = vmatprep.mubr.bf16.mxu1 %v13018_v6  ;;  %v14732_v6 = vpop.permute.xlu1 %8056 }
 0x75b   :  { %9113 = vmatmul.mubr.bf16.gmra.mrb[228].mxu1 %v13020_v14  ;;  %v14734_v14 = vpop.permute.xlu0 %8061 }
 0x75c   :  { %9120 = vmatprep.mubr.bf16.mxu1 %v13021_v30  ;;  %v13069_v30 = vld [vmem:[#allocation8 + $0x348] ss:$16 sps:$4 sm:$0xff]  }
 0x763   :  { %9121 = vmatmul.mubr.bf16.gmra.mrb[232].mxu1 %v13023_v11  ;;  %v14736_v11 = vpop.permute.xlu1 %8066 }
 0x764   :  { %9128 = vmatprep.mubr.bf16.mxu1 %v13024_v48  ;;  %v13074_v48 = vld [vmem:[#allocation8 + $0x36c] ss:$16 sps:$4 sm:$0xff]  }
 0x76b   :  { %9129 = vmatmul.mubr.bf16.gmra.mrb[236].mxu1 %v13026_v36  ;;  %v14738_v36 = vpop.permute.xlu0 %8071 }
 0x76c   :  { %9136 = vmatprep.mubr.bf16.mxu1 %v13027_v21  ;;  %v14740_v21 = vpop.permute.xlu1 %8076 }
 0x773   :  { %9137 = vmatmul.mubr.bf16.gmra.mrb[240].mxu1 %v13029_v55 }
 0x774   :  { %9144 = vmatprep.mubr.bf16.mxu1 %v13030_v26  ;;  %v15088_v26 = vld [vmem:[#allocation107_spill] sm:$0xff] }
 0x77b   :  { %9145 = vmatmul.mubr.bf16.gmra.mrb[244].mxu1 %v13032_v23 }
 0x77c   :  { %9152 = vmatprep.mubr.bf16.mxu1 %v13033_v58 }
 0x783   :  { %9153 = vmatmul.mubr.bf16.gmra.mrb[248].mxu1 %v13035_v57  ;;  %v13072_v57 = vld [vmem:[#allocation8 + $0x368] ss:$16 sps:$4 sm:$0xff]  }
 0x784   :  { %9160 = vmatprep.mubr.bf16.mxu1 %v13036_v49 }
 0x78b   :  { %9161 = vmatmul.mubr.bf16.gmra.mrb[252].mxu1 %v13038_v25  ;;  %v13077_v25 = vld [vmem:[#allocation8 + $0x38c] ss:$16 sps:$4 sm:$0xff]  }
 0x78c   :  { %9168 = vmatprep.mubr.bf16.mxu1 %v13041_v33 }
 0x793   :  { %9169 = vmatmul.mubr.bf16.gmra.mrb[0].mxu1 %v13039_v19  ;;  %v15089_v19 = vld [vmem:[#allocation110_spill] sm:$0xff] }
 0x794   :  { %9176 = vmatprep.mubr.bf16.mxu1 %v13044_v62 }
 0x79b   :  { %9177 = vmatmul.mubr.bf16.gmra.mrb[4].mxu1 %v13042_v54 }
 0x79c   :  { %9184 = vmatprep.mubr.bf16.mxu1 %v13047_v53 }
 0x7a3   :  { %9185 = vmatmul.mubr.bf16.gmra.mrb[8].mxu1 %v13045_v42  ;;  %v9428_v42 = vpop.permute.xlu0 %9427 }
 0x7a4   :  { %9192 = vmatprep.mubr.bf16.mxu1 %v13050_v50  ;;  %v9433_v50 = vpop.permute.xlu1 %9432 }
 0x7ab   :  { %9193 = vmatmul.mubr.bf16.gmra.mrb[12].mxu1 %v13048_v56 }
 0x7ac   :  { %9200 = vmatprep.mubr.bf16.mxu1 %v13053_v38 }
 0x7b3   :  { %9201 = vmatmul.mubr.bf16.gmra.mrb[16].mxu1 %v13051_v27 }
 0x7b4   :  { %9208 = vmatprep.mubr.bf16.mxu1 %v13056_v20 }
 0x7bb   :  { %9209 = vmatmul.mubr.bf16.gmra.mrb[20].mxu1 %v13054_v39  ;;  %v15090_v39 = vld [vmem:[#allocation109_spill] sm:$0xff] }
 0x7bc   :  { %9216 = vmatprep.mubr.bf16.mxu1 %v13059_v3 }
 0x7c3   :  { %9217 = vmatmul.mubr.bf16.gmra.mrb[24].mxu1 %v13057_v37 }
 0x7c4   :  { %9224 = vmatprep.mubr.bf16.mxu1 %v13062_v29  ;;  %v13075_v29 = vld [vmem:[#allocation8 + $0x388] ss:$16 sps:$4 sm:$0xff]  }
 0x7cb   :  { %9225 = vmatmul.mubr.bf16.gmra.mrb[28].mxu1 %v13060_v59 }
 0x7cc   :  { %9232 = vmatprep.mubr.bf16.mxu1 %v13065_v47  ;;  %v13080_v47 = vld [vmem:[#allocation8 + $0x3ac] ss:$16 sps:$4 sm:$0xff]  }
 0x7d3   :  { %9233 = vmatmul.mubr.bf16.gmra.mrb[32].mxu1 %v13063_v28 }
 0x7d4   :  { %9240 = vmatprep.mubr.bf16.mxu1 %v13068_v24  ;;  %v15091_v24 = vld [vmem:[#allocation112_spill] sm:$0xff] }
 0x7db   :  { %9241 = vmatmul.mubr.bf16.gmra.mrb[36].mxu1 %v13066_v31 }
 0x7dc   :  { %9248 = vmatprep.mubr.bf16.mxu1 %v13071_v9 }
 0x7e3   :  { %9249 = vmatmul.mubr.bf16.gmra.mrb[40].mxu1 %v13069_v30  ;;  %v9438_v30 = vpop.permute.xlu0 %9437 }
 0x7e4   :  { %9256 = vmatprep.mubr.bf16.mxu1 %v13074_v48 }
 0x7e6   :  { %v9042_v55 = vpop.f32.mrb[192].mxu1 }
 0x7e7   :  { %v10986_v23 = vadd.f32 %v9042_v55, %v15088_v26  ;;  %v9044_v58 = vpop.f32.mrb[193].mxu1  ;;  %v9443_v26 = vpop.permute.xlu1 %9442 }
 0x7e8   :  { %v9045_v49 = vpop.f32.mrb[194].mxu1 }
 0x7e9   :  { %v9297_v33 = vmax.f32 %v10986_v23, 0.0  ;;  %v10987_v62 = vadd.f32 %v9045_v49, %v15089_v19  ;;  %v9047_v54 = vpop.f32.mrb[195].mxu1 }
 0x7eb   :  { %v9298_v53 = vmax.f32 %v10987_v62, 0.0  ;;  %9257 = vmatmul.mubr.bf16.gmra.mrb[44].mxu1 %v13072_v57  ;;  %v9745_v56 = vmul.f32 %v9428_v42, %v9297_v33  ;;  %v13078_v62 = vld [vmem:[#allocation8 + $0x3a8] ss:$16 sps:$4 sm:$0xff]  }
 0x7ec   :  { %9264 = vmatprep.mubr.bf16.mxu1 %v13077_v25  ;;  %v15092_v25 = vld [vmem:[#allocation111_spill] sm:$0xff] }
 0x7ed   :  { %v9746_v38 = vmul.f32 %v9433_v50, %v9298_v53  ;;  %v13083_v53 = vld [vmem:[#allocation8 + $0x3cc] ss:$16 sps:$4 sm:$0xff]  }
 0x7ee   :  { %v9050_v27 = vpop.f32.mrb[196].mxu1  ;;  %v15093_v50 = vld [vmem:[#allocation114_spill] sm:$0xff] }
 0x7ef   :  { %v9809_v20 = vadd.f32 %v9746_v38, %v9745_v56  ;;  %v10988_v3 = vadd.f32 %v9050_v27, %v15090_v39  ;;  %v9052_v37 = vpop.f32.mrb[197].mxu1  ;;  %v9448_v27 = vpop.permute.xlu0 %9447 }
 0x7f0   :  { %v9053_v59 = vpop.f32.mrb[198].mxu1  ;;  %v9453_v37 = vpop.permute.xlu1 %9452 }
 0x7f1   :  { %v9299_v28 = vmax.f32 %v10988_v3, 0.0  ;;  %v10989_v31 = vadd.f32 %v9053_v59, %v15091_v24  ;;  %v9055_v9 = vpop.f32.mrb[199].mxu1 }
 0x7f2   :  { %v13081_v9 = vld [vmem:[#allocation8 + $0x3c8] ss:$16 sps:$4 sm:$0xff]  }
 0x7f3   :  { %v9747_v48 = vmul.f32 %v9438_v30, %v9299_v28  ;;  %v9300_v55 = vmax.f32 %v10989_v31, 0.0  ;;  %9265 = vmatmul.mubr.bf16.gmra.mrb[48].mxu1 %v13075_v29  ;;  %v15094_v28 = vld [vmem:[#allocation113_spill] sm:$0xff] }
 0x7f4   :  { %9272 = vmatprep.mubr.bf16.mxu1 %v13080_v47 }
 0x7f5   :  { %v9810_v23 = vadd.f32 %v9809_v20, %v9747_v48  ;;  %v9748_v58 = vmul.f32 %v9443_v26, %v9300_v55  ;;  %v13086_v48 = vld [vmem:[#allocation8 + $0x3ec] ss:$16 sps:$4 sm:$0xff]  }
 0x7f6   :  { %v9058_v57 = vpop.f32.mrb[200].mxu1  ;;  %v15095_v26 = vld [vmem:[#allocation116_spill] sm:$0xff] }
 0x7f7   :  { %v9811_v49 = vadd.f32 %v9810_v23, %v9748_v58  ;;  %v10990_v33 = vadd.f32 %v9058_v57, %v15092_v25  ;;  %v9060_v19 = vpop.f32.mrb[201].mxu1  ;;  %v9458_v57 = vpop.permute.xlu0 %9457 }
 0x7f8   :  { %v9061_v54 = vpop.f32.mrb[202].mxu1  ;;  %v9463_v19 = vpop.permute.xlu1 %9462 }
 0x7f9   :  { %v9301_v42 = vmax.f32 %v10990_v33, 0.0  ;;  %v10991_v56 = vadd.f32 %v9061_v54, %v15093_v50  ;;  %v9063_v38 = vpop.f32.mrb[203].mxu1 }
 0x7fa   :  { %v13084_v38 = vld [vmem:[#allocation8 + $0x3e8] ss:$16 sps:$4 sm:$0xff]  }
 0x7fb   :  { %v9749_v39 = vmul.f32 %v9448_v27, %v9301_v42  ;;  %v9302_v3 = vmax.f32 %v10991_v56, 0.0  ;;  %9273 = vmatmul.mubr.bf16.gmra.mrb[52].mxu1 %v13078_v62  ;;  %v15096_v42 = vld [vmem:[#allocation115_spill] sm:$0xff] }
 0x7fc   :  { %9280 = vmatprep.mubr.bf16.mxu1 %v13083_v53 }
 0x7fd   :  { %v9812_v20 = vadd.f32 %v9811_v49, %v9749_v39  ;;  %v9750_v29 = vmul.f32 %v9453_v37, %v9302_v3  ;;  %v15097_v3 = vld [vmem:[#allocation118_spill] sm:$0xff] }
 0x7fe   :  { %v9066_v59 = vpop.f32.mrb[204].mxu1 }
 0x7ff   :  { %v9813_v47 = vadd.f32 %v9812_v20, %v9750_v29  ;;  %v10992_v24 = vadd.f32 %v9066_v59, %v15094_v28  ;;  %v9068_v31 = vpop.f32.mrb[205].mxu1  ;;  %v9468_v29 = vpop.permute.xlu0 %9467 }
 0x800   :  { %v9069_v30 = vpop.f32.mrb[206].mxu1 }
 0x801   :  { %v9303_v55 = vmax.f32 %v10992_v24, 0.0  ;;  %v10993_v23 = vadd.f32 %v9069_v30, %v15095_v26  ;;  %v9071_v58 = vpop.f32.mrb[207].mxu1  ;;  %v9473_v24 = vpop.permute.xlu1 %9472 }
 0x803   :  { %v9751_v25 = vmul.f32 %v9458_v57, %v9303_v55  ;;  %v9304_v33 = vmax.f32 %v10993_v23, 0.0  ;;  %9281 = vmatmul.mubr.bf16.gmra.mrb[56].mxu1 %v13081_v9  ;;  %v15099_v57 = vld [vmem:[#allocation120_spill] sm:$0xff] }
 0x804   :  { %9288 = vmatprep.mubr.bf16.mxu1 %v13086_v48  ;;  %v15098_v48 = vld [vmem:[#allocation117_spill] sm:$0xff] }
 0x805   :  { %v9814_v49 = vadd.f32 %v9813_v47, %v9751_v25  ;;  %v9752_v62 = vmul.f32 %v9463_v19, %v9304_v33  ;;  %v9478_v19 = vpop.permute.xlu0 %9477 }
 0x806   :  { %v9074_v54 = vpop.f32.mrb[208].mxu1 }
 0x807   :  { %v9815_v53 = vadd.f32 %v9814_v49, %v9752_v62  ;;  %v10994_v50 = vadd.f32 %v9074_v54, %v15096_v42  ;;  %v9076_v56 = vpop.f32.mrb[209].mxu1  ;;  %v9483_v54 = vpop.permute.xlu1 %9482 }
 0x808   :  { %v9077_v27 = vpop.f32.mrb[210].mxu1 }
 0x809   :  { %v9305_v39 = vmax.f32 %v10994_v50, 0.0  ;;  %v10995_v37 = vadd.f32 %v9077_v27, %v15097_v3  ;;  %v9079_v20 = vpop.f32.mrb[211].mxu1 }
 0x80a   :  { %v15101_v20 = vld [vmem:[#allocation122_spill] sm:$0xff] }
 0x80b   :  { %v9753_v59 = vmul.f32 %v9468_v29, %v9305_v39  ;;  %v9306_v28 = vmax.f32 %v10995_v37, 0.0  ;;  %9289 = vmatmul.mubr.bf16.gmra.mrb[60].mxu1 %v13084_v38 }
 0x80d   :  { %v9816_v31 = vadd.f32 %v9815_v53, %v9753_v59  ;;  %v9754_v9 = vmul.f32 %v9473_v24, %v9306_v28  ;;  %v15100_v53 = vld [vmem:[#allocation119_spill] sm:$0xff]  ;;  %v9488_v28 = vpop.permute.xlu0 %9487 }
 0x80e   :  { %v9082_v47 = vpop.f32.mrb[212].mxu1 }
 0x80f   :  { %v9817_v30 = vadd.f32 %v9816_v31, %v9754_v9  ;;  %v10996_v55 = vadd.f32 %v9082_v47, %v15098_v48  ;;  %v9084_v26 = vpop.f32.mrb[213].mxu1  ;;  %v9493_v9 = vpop.permute.xlu1 %9492 }
 0x810   :  { %v9085_v23 = vpop.f32.mrb[214].mxu1 }
 0x811   :  { %v9307_v58 = vmax.f32 %v10996_v55, 0.0  ;;  %v10997_v25 = vadd.f32 %v9085_v23, %v15099_v57  ;;  %v9087_v33 = vpop.f32.mrb[215].mxu1 }
 0x812   :  { %v15103_v33 = vld [vmem:[#allocation124_spill] sm:$0xff] }
 0x813   :  { %v9755_v49 = vmul.f32 %v9478_v19, %v9307_v58  ;;  %v9308_v62 = vmax.f32 %v10997_v25, 0.0 }
 0x815   :  { %v9818_v42 = vadd.f32 %v9817_v30, %v9755_v49  ;;  %v9756_v50 = vmul.f32 %v9483_v54, %v9308_v62  ;;  %v15102_v30 = vld [vmem:[#allocation121_spill] sm:$0xff]  ;;  %v9498_v62 = vpop.permute.xlu0 %9497 }
 0x816   :  { %v9090_v56 = vpop.f32.mrb[216].mxu1 }
 0x817   :  { %v9819_v38 = vadd.f32 %v9818_v42, %v9756_v50  ;;  %v10998_v27 = vadd.f32 %v9090_v56, %v15100_v53  ;;  %v9092_v39 = vpop.f32.mrb[217].mxu1  ;;  %v9503_v50 = vpop.permute.xlu1 %9502 }
 0x818   :  { %v9093_v3 = vpop.f32.mrb[218].mxu1 }
 0x819   :  { %v9309_v37 = vmax.f32 %v10998_v27, 0.0  ;;  %v10999_v29 = vadd.f32 %v9093_v3, %v15101_v20  ;;  %v9095_v59 = vpop.f32.mrb[219].mxu1 }
 0x81a   :  { %v15105_v59 = vld [vmem:[#allocation126_spill] sm:$0xff] }
 0x81b   :  { %v9757_v24 = vmul.f32 %v9488_v28, %v9309_v37  ;;  %v9310_v31 = vmax.f32 %v10999_v29, 0.0 }
 0x81d   :  { %v9820_v47 = vadd.f32 %v9819_v38, %v9757_v24  ;;  %v9758_v48 = vmul.f32 %v9493_v9, %v9310_v31  ;;  %v15104_v38 = vld [vmem:[#allocation123_spill] sm:$0xff]  ;;  %v9508_v31 = vpop.permute.xlu0 %9507 }
 0x81e   :  { %v9098_v55 = vpop.f32.mrb[220].mxu1 }
 0x81f   :  { %v9821_v26 = vadd.f32 %v9820_v47, %v9758_v48  ;;  %v11000_v23 = vadd.f32 %v9098_v55, %v15102_v30  ;;  %v9100_v58 = vpop.f32.mrb[221].mxu1  ;;  %v9513_v48 = vpop.permute.xlu1 %9512 }
 0x820   :  { %v9101_v57 = vpop.f32.mrb[222].mxu1 }
 0x821   :  { %v9311_v25 = vmax.f32 %v11000_v23, 0.0  ;;  %v11001_v19 = vadd.f32 %v9101_v57, %v15103_v33  ;;  %v9103_v49 = vpop.f32.mrb[223].mxu1 }
 0x822   :  { %v15107_v49 = vld [vmem:[#allocation128_spill] sm:$0xff] }
 0x823   :  { %v9759_v54 = vmul.f32 %v9498_v62, %v9311_v25  ;;  %v9312_v42 = vmax.f32 %v11001_v19, 0.0 }
 0x825   :  { %v9822_v56 = vadd.f32 %v9821_v26, %v9759_v54  ;;  %v9760_v53 = vmul.f32 %v9503_v50, %v9312_v42  ;;  %v15106_v26 = vld [vmem:[#allocation125_spill] sm:$0xff]  ;;  %v9518_v42 = vpop.permute.xlu0 %9517 }
 0x826   :  { %v9106_v27 = vpop.f32.mrb[224].mxu1 }
 0x827   :  { %v9823_v39 = vadd.f32 %v9822_v56, %v9760_v53  ;;  %v11002_v3 = vadd.f32 %v9106_v27, %v15104_v38  ;;  %v9108_v37 = vpop.f32.mrb[225].mxu1  ;;  %v9523_v53 = vpop.permute.xlu1 %9522 }
 0x828   :  { %v9109_v20 = vpop.f32.mrb[226].mxu1 }
 0x829   :  { %v9313_v29 = vmax.f32 %v11002_v3, 0.0  ;;  %v11003_v28 = vadd.f32 %v9109_v20, %v15105_v59  ;;  %v9111_v24 = vpop.f32.mrb[227].mxu1 }
 0x82a   :  { %v15109_v24 = vld [vmem:[#allocation130_spill] sm:$0xff] }
 0x82b   :  { %v9761_v9 = vmul.f32 %v9508_v31, %v9313_v29  ;;  %v9314_v47 = vmax.f32 %v11003_v28, 0.0 }
 0x82d   :  { %v9824_v55 = vadd.f32 %v9823_v39, %v9761_v9  ;;  %v9762_v30 = vmul.f32 %v9513_v48, %v9314_v47  ;;  %v15108_v39 = vld [vmem:[#allocation127_spill] sm:$0xff]  ;;  %v9528_v47 = vpop.permute.xlu0 %9527 }
 0x82e   :  { %v9114_v23 = vpop.f32.mrb[228].mxu1 }
 0x82f   :  { %v9825_v58 = vadd.f32 %v9824_v55, %v9762_v30  ;;  %v11004_v57 = vadd.f32 %v9114_v23, %v15106_v26  ;;  %v9116_v25 = vpop.f32.mrb[229].mxu1  ;;  %v9533_v30 = vpop.permute.xlu1 %9532 }
 0x830   :  { %v9117_v33 = vpop.f32.mrb[230].mxu1 }
 0x831   :  { %v9315_v19 = vmax.f32 %v11004_v57, 0.0  ;;  %v11005_v62 = vadd.f32 %v9117_v33, %v15107_v49  ;;  %v9119_v54 = vpop.f32.mrb[231].mxu1 }
 0x832   :  { %v15111_v54 = vld [vmem:[#allocation132_spill] sm:$0xff] }
 0x833   :  { %v9763_v50 = vmul.f32 %v9518_v42, %v9315_v19  ;;  %v9316_v56 = vmax.f32 %v11005_v62, 0.0 }
 0x835   :  { %v9826_v27 = vadd.f32 %v9825_v58, %v9763_v50  ;;  %v9764_v38 = vmul.f32 %v9523_v53, %v9316_v56  ;;  %v15110_v58 = vld [vmem:[#allocation129_spill] sm:$0xff]  ;;  %v9538_v56 = vpop.permute.xlu0 %9537 }
 0x836   :  { %v9122_v3 = vpop.f32.mrb[232].mxu1 }
 0x837   :  { %v9827_v37 = vadd.f32 %v9826_v27, %v9764_v38  ;;  %v11006_v20 = vadd.f32 %v9122_v3, %v15108_v39  ;;  %v9124_v29 = vpop.f32.mrb[233].mxu1  ;;  %v9543_v38 = vpop.permute.xlu1 %9542 }
 0x838   :  { %v9125_v59 = vpop.f32.mrb[234].mxu1 }
 0x839   :  { %v9317_v28 = vmax.f32 %v11006_v20, 0.0  ;;  %v11007_v31 = vadd.f32 %v9125_v59, %v15109_v24  ;;  %v9127_v9 = vpop.f32.mrb[235].mxu1 }
 0x83a   :  { %v15113_v9 = vld [vmem:[#allocation134_spill] sm:$0xff] }
 0x83b   :  { %v9765_v48 = vmul.f32 %v9528_v47, %v9317_v28  ;;  %v9318_v55 = vmax.f32 %v11007_v31, 0.0 }
 0x83d   :  { %v9828_v23 = vadd.f32 %v9827_v37, %v9765_v48  ;;  %v9766_v26 = vmul.f32 %v9533_v30, %v9318_v55  ;;  %v15112_v37 = vld [vmem:[#allocation131_spill] sm:$0xff]  ;;  %v9548_v55 = vpop.permute.xlu0 %9547 }
 0x83e   :  { %v9130_v57 = vpop.f32.mrb[236].mxu1 }
 0x83f   :  { %v9829_v25 = vadd.f32 %v9828_v23, %v9766_v26  ;;  %v11008_v33 = vadd.f32 %v9130_v57, %v15110_v58  ;;  %v9132_v19 = vpop.f32.mrb[237].mxu1  ;;  %v9553_v26 = vpop.permute.xlu1 %9552 }
 0x840   :  { %v9133_v49 = vpop.f32.mrb[238].mxu1 }
 0x841   :  { %v9319_v62 = vmax.f32 %v11008_v33, 0.0  ;;  %v11009_v42 = vadd.f32 %v9133_v49, %v15111_v54  ;;  %v9135_v50 = vpop.f32.mrb[239].mxu1 }
 0x842   :  { %v15115_v50 = vld [vmem:[#allocation136_spill] sm:$0xff] }
 0x843   :  { %v9767_v53 = vmul.f32 %v9538_v56, %v9319_v62  ;;  %v9320_v27 = vmax.f32 %v11009_v42, 0.0 }
 0x845   :  { %v9830_v3 = vadd.f32 %v9829_v25, %v9767_v53  ;;  %v9768_v39 = vmul.f32 %v9543_v38, %v9320_v27  ;;  %v15114_v25 = vld [vmem:[#allocation133_spill] sm:$0xff]  ;;  %v9558_v27 = vpop.permute.xlu0 %9557 }
 0x846   :  { %v9138_v20 = vpop.f32.mrb[240].mxu1 }
 0x847   :  { %v9831_v29 = vadd.f32 %v9830_v3, %v9768_v39  ;;  %v11010_v59 = vadd.f32 %v9138_v20, %v15112_v37  ;;  %v9140_v28 = vpop.f32.mrb[241].mxu1  ;;  %v9563_v39 = vpop.permute.xlu1 %9562 }
 0x848   :  { %v9141_v24 = vpop.f32.mrb[242].mxu1 }
 0x849   :  { %v9321_v31 = vmax.f32 %v11010_v59, 0.0  ;;  %v11011_v47 = vadd.f32 %v9141_v24, %v15113_v9  ;;  %v9143_v48 = vpop.f32.mrb[243].mxu1 }
 0x84a   :  { %v15117_v48 = vld [vmem:[#allocation137_spill] sm:$0xff] }
 0x84b   :  { %v9769_v30 = vmul.f32 %v9548_v55, %v9321_v31  ;;  %v9322_v23 = vmax.f32 %v11011_v47, 0.0 }
 0x84d   :  { %v9832_v57 = vadd.f32 %v9831_v29, %v9769_v30  ;;  %v9770_v58 = vmul.f32 %v9553_v26, %v9322_v23  ;;  %v15116_v29 = vld [vmem:[#allocation135_spill] sm:$0xff]  ;;  %v9568_v23 = vpop.permute.xlu0 %9567 }
 0x84e   :  { %v9146_v33 = vpop.f32.mrb[244].mxu1 }
 0x84f   :  { %v9833_v19 = vadd.f32 %v9832_v57, %v9770_v58  ;;  %v11012_v49 = vadd.f32 %v9146_v33, %v15114_v25  ;;  %v9148_v62 = vpop.f32.mrb[245].mxu1  ;;  %v9573_v58 = vpop.permute.xlu1 %9572 }
 0x850   :  { %v9149_v54 = vpop.f32.mrb[246].mxu1 }
 0x851   :  { %v9323_v42 = vmax.f32 %v11012_v49, 0.0  ;;  %v11013_v56 = vadd.f32 %v9149_v54, %v15115_v50  ;;  %v9151_v53 = vpop.f32.mrb[247].mxu1 }
 0x853   :  { %v9771_v38 = vmul.f32 %v9558_v27, %v9323_v42  ;;  %v9324_v3 = vmax.f32 %v11013_v56, 0.0  ;;  %v9578_v27 = vpop.permute.xlu0 %9577 }
 0x855   :  { %v9834_v20 = vadd.f32 %v9833_v19, %v9771_v38  ;;  %v9772_v37 = vmul.f32 %v9563_v39, %v9324_v3  ;;  %v9583_v39 = vpop.permute.xlu1 %9582 }
 0x856   :  { %v9154_v59 = vpop.f32.mrb[248].mxu1 }
 0x857   :  { %v9835_v28 = vadd.f32 %v9834_v20, %v9772_v37  ;;  %v11014_v24 = vadd.f32 %v9154_v59, %v15116_v29  ;;  %v9156_v31 = vpop.f32.mrb[249].mxu1 }
 0x858   :  { %v9157_v9 = vpop.f32.mrb[250].mxu1 }
 0x859   :  { %v9325_v47 = vmax.f32 %v11014_v24, 0.0  ;;  %v11015_v55 = vadd.f32 %v9157_v9, %v15117_v48  ;;  %v9159_v30 = vpop.f32.mrb[251].mxu1  ;;  %v9588_v48 = vpop.permute.xlu0 %9587 }
 0x85a   :  { %v9593_v30 = vpop.permute.xlu1 %9592 }
 0x85b   :  { %v9773_v26 = vmul.f32 %v9568_v23, %v9325_v47  ;;  %v9326_v57 = vmax.f32 %v11015_v55, 0.0 }
 0x85d   :  { %v9836_v33 = vadd.f32 %v9835_v28, %v9773_v26  ;;  %v9774_v25 = vmul.f32 %v9573_v58, %v9326_v57 }
 0x85e   :  { %v9162_v49 = vpop.f32.mrb[252].mxu1 }
 0x85f   :  { %v9837_v62 = vadd.f32 %v9836_v33, %v9774_v25  ;;  %v11016_v19 = vadd.f32 %v9162_v49, %v14674_v43  ;;  %v9164_v54 = vpop.f32.mrb[253].mxu1 }
 0x860   :  { %v9165_v42 = vpop.f32.mrb[254].mxu1  ;;  %v9598_v54 = vpop.permute.xlu0 %9597 }
 0x861   :  { %v9327_v50 = vmax.f32 %v11016_v19, 0.0  ;;  %v11017_v56 = vadd.f32 %v9165_v42, %v14676_v22  ;;  %v9167_v53 = vpop.f32.mrb[255].mxu1 }
 0x863   :  { %v9775_v38 = vmul.f32 %v9578_v27, %v9327_v50  ;;  %v9328_v3 = vmax.f32 %v11017_v56, 0.0  ;;  %v9603_v50 = vpop.permute.xlu1 %9602 }
 0x865   :  { %v9838_v20 = vadd.f32 %v9837_v62, %v9775_v38  ;;  %v9776_v37 = vmul.f32 %v9583_v39, %v9328_v3 }
 0x866   :  { %v9170_v59 = vpop.f32.mrb[0].mxu1 }
 0x867   :  { %v9839_v29 = vadd.f32 %v9838_v20, %v9776_v37  ;;  %v11018_v28 = vadd.f32 %v9170_v59, %v14678_v60  ;;  %v9172_v24 = vpop.f32.mrb[1].mxu1 }
 0x868   :  { %v9173_v31 = vpop.f32.mrb[2].mxu1  ;;  %v9613_v24 = vpop.permute.xlu1 %9612 }
 0x869   :  { %v9329_v9 = vmax.f32 %v11018_v28, 0.0  ;;  %v11019_v43 = vadd.f32 %v9173_v31, %v14680_v7  ;;  %v9175_v47 = vpop.f32.mrb[3].mxu1 }
 0x86b   :  { %v9777_v55 = vmul.f32 %v9588_v48, %v9329_v9  ;;  %v9330_v22 = vmax.f32 %v11019_v43, 0.0 }
 0x86d   :  { %v9840_v23 = vadd.f32 %v9839_v29, %v9777_v55  ;;  %v9778_v26 = vmul.f32 %v9593_v30, %v9330_v22  ;;  %v9608_v29 = vpop.permute.xlu0 %9607 }
 0x86e   :  { %v9178_v57 = vpop.f32.mrb[4].mxu1 }
 0x86f   :  { %v9841_v58 = vadd.f32 %v9840_v23, %v9778_v26  ;;  %v11020_v33 = vadd.f32 %v9178_v57, %v14682_v61  ;;  %v9180_v25 = vpop.f32.mrb[5].mxu1 }
 0x870   :  { %v9181_v49 = vpop.f32.mrb[6].mxu1 }
 0x871   :  { %v9331_v62 = vmax.f32 %v11020_v33, 0.0  ;;  %v11021_v60 = vadd.f32 %v9181_v49, %v14684_v34  ;;  %v9183_v19 = vpop.f32.mrb[7].mxu1  ;;  %v9618_v26 = vpop.permute.xlu0 %9617 }
 0x873   :  { %v9779_v42 = vmul.f32 %v9598_v54, %v9331_v62  ;;  %v9332_v7 = vmax.f32 %v11021_v60, 0.0 }
 0x875   :  { %v9842_v56 = vadd.f32 %v9841_v58, %v9779_v42  ;;  %v9780_v53 = vmul.f32 %v9603_v50, %v9332_v7  ;;  %v9623_v58 = vpop.permute.xlu1 %9622  ;;  %v9628_v50 = vpop.permute.xlu0 %9627 }
 0x876   :  { %v9186_v27 = vpop.f32.mrb[8].mxu1 }
 0x877   :  { %v9843_v38 = vadd.f32 %v9842_v56, %v9780_v53  ;;  %v11022_v3 = vadd.f32 %v9186_v27, %v14686_v13  ;;  %v9188_v39 = vpop.f32.mrb[9].mxu1 }
 0x878   :  { %v9189_v20 = vpop.f32.mrb[10].mxu1 }
 0x879   :  { %v9333_v37 = vmax.f32 %v11022_v3, 0.0  ;;  %v11023_v61 = vadd.f32 %v9189_v20, %v14688_v0  ;;  %v9191_v59 = vpop.f32.mrb[11].mxu1  ;;  %v9633_v53 = vpop.permute.xlu1 %9632 }
 0x87b   :  { %v9781_v28 = vmul.f32 %v9608_v29, %v9333_v37  ;;  %v9334_v34 = vmax.f32 %v11023_v61, 0.0 }
 0x87d   :  { %v9844_v31 = vadd.f32 %v9843_v38, %v9781_v28  ;;  %v9782_v9 = vmul.f32 %v9613_v24, %v9334_v34  ;;  %v9638_v28 = vpop.permute.xlu0 %9637  ;;  %v9643_v24 = vpop.permute.xlu1 %9642 }
 0x87e   :  { %v9194_v43 = vpop.f32.mrb[12].mxu1 }
 0x87f   :  { %v9845_v47 = vadd.f32 %v9844_v31, %v9782_v9  ;;  %v11024_v48 = vadd.f32 %v9194_v43, %v14690_v18  ;;  %v9196_v55 = vpop.f32.mrb[13].mxu1 }
 0x880   :  { %v9197_v22 = vpop.f32.mrb[14].mxu1 }
 0x881   :  { %v9335_v30 = vmax.f32 %v11024_v48, 0.0  ;;  %v11025_v13 = vadd.f32 %v9197_v22, %v14692_v10  ;;  %v9199_v23 = vpop.f32.mrb[15].mxu1 }
 0x882   :  { %v9648_v23 = vpop.permute.xlu0 %9647 }
 0x883   :  { %v9783_v57 = vmul.f32 %v9618_v26, %v9335_v30  ;;  %v9336_v0 = vmax.f32 %v11025_v13, 0.0 }
 0x885   :  { %v9846_v33 = vadd.f32 %v9845_v47, %v9783_v57  ;;  %v9784_v25 = vmul.f32 %v9623_v58, %v9336_v0  ;;  %v9653_v57 = vpop.permute.xlu1 %9652 }
 0x886   :  { %v9202_v49 = vpop.f32.mrb[16].mxu1 }
 0x887   :  { %v9847_v62 = vadd.f32 %v9846_v33, %v9784_v25  ;;  %v11026_v60 = vadd.f32 %v9202_v49, %v14694_v5  ;;  %v9204_v19 = vpop.f32.mrb[17].mxu1 }
 0x888   :  { %v9205_v54 = vpop.f32.mrb[18].mxu1 }
 0x889   :  { %v9337_v42 = vmax.f32 %v11026_v60, 0.0  ;;  %v11027_v18 = vadd.f32 %v9205_v54, %v14696_v4  ;;  %v9207_v7 = vpop.f32.mrb[19].mxu1 }
 0x88a   :  { %v9663_v7 = vpop.permute.xlu1 %9662 }
 0x88b   :  { %v9785_v56 = vmul.f32 %v9628_v50, %v9337_v42  ;;  %v9338_v10 = vmax.f32 %v11027_v18, 0.0  ;;  %v9658_v42 = vpop.permute.xlu0 %9657 }
 0x88d   :  { %v9848_v27 = vadd.f32 %v9847_v62, %v9785_v56  ;;  %v9786_v38 = vmul.f32 %v9633_v53, %v9338_v10 }
 0x88e   :  { %v9210_v3 = vpop.f32.mrb[20].mxu1 }
 0x88f   :  { %v9849_v39 = vadd.f32 %v9848_v27, %v9786_v38  ;;  %v11028_v20 = vadd.f32 %v9210_v3, %v14698_v8  ;;  %v9212_v37 = vpop.f32.mrb[21].mxu1 }
 0x890   :  { %v9213_v61 = vpop.f32.mrb[22].mxu1  ;;  %v9668_v37 = vpop.permute.xlu0 %9667 }
 0x891   :  { %v9339_v59 = vmax.f32 %v11028_v20, 0.0  ;;  %v11029_v5 = vadd.f32 %v9213_v61, %v14700_v52  ;;  %v9215_v29 = vpop.f32.mrb[23].mxu1 }
 0x893   :  { %v9787_v34 = vmul.f32 %v9638_v28, %v9339_v59  ;;  %v9340_v4 = vmax.f32 %v11029_v5, 0.0  ;;  %v9673_v59 = vpop.permute.xlu1 %9672 }
 0x895   :  { %v9850_v31 = vadd.f32 %v9849_v39, %v9787_v34  ;;  %v9788_v9 = vmul.f32 %v9643_v24, %v9340_v4 }
 0x896   :  { %v9218_v43 = vpop.f32.mrb[24].mxu1 }
 0x897   :  { %v9851_v47 = vadd.f32 %v9850_v31, %v9788_v9  ;;  %v11030_v48 = vadd.f32 %v9218_v43, %v14702_v15  ;;  %v9220_v55 = vpop.f32.mrb[25].mxu1 }
 0x898   :  { %v9221_v22 = vpop.f32.mrb[26].mxu1  ;;  %v9683_v55 = vpop.permute.xlu1 %9682 }
 0x899   :  { %v9341_v30 = vmax.f32 %v11030_v48, 0.0  ;;  %v11031_v8 = vadd.f32 %v9221_v22, %v14704_v16  ;;  %v9223_v13 = vpop.f32.mrb[27].mxu1 }
 0x89b   :  { %v9789_v26 = vmul.f32 %v9648_v23, %v9341_v30  ;;  %v9342_v52 = vmax.f32 %v11031_v8, 0.0 }
 0x89d   :  { %v9852_v0 = vadd.f32 %v9851_v47, %v9789_v26  ;;  %v9790_v58 = vmul.f32 %v9653_v57, %v9342_v52  ;;  %v9678_v47 = vpop.permute.xlu0 %9677 }
 0x89e   :  { %v9226_v33 = vpop.f32.mrb[28].mxu1 }
 0x89f   :  { %v9853_v25 = vadd.f32 %v9852_v0, %v9790_v58  ;;  %v11032_v49 = vadd.f32 %v9226_v33, %v14706_v45  ;;  %v9228_v62 = vpop.f32.mrb[29].mxu1 }
 0x8a0   :  { %v9229_v60 = vpop.f32.mrb[30].mxu1 }
 0x8a1   :  { %v9343_v19 = vmax.f32 %v11032_v49, 0.0  ;;  %v11033_v15 = vadd.f32 %v9229_v60, %v14708_v63  ;;  %v9231_v54 = vpop.f32.mrb[31].mxu1  ;;  %v9688_v58 = vpop.permute.xlu0 %9687 }
 0x8a3   :  { %v9791_v18 = vmul.f32 %v9658_v42, %v9343_v19  ;;  %v9344_v16 = vmax.f32 %v11033_v15, 0.0 }
 0x8a5   :  { %v9854_v50 = vadd.f32 %v9853_v25, %v9791_v18  ;;  %v9792_v56 = vmul.f32 %v9663_v7, %v9344_v16  ;;  %v9693_v25 = vpop.permute.xlu1 %9692  ;;  %v9698_v7 = vpop.permute.xlu0 %9697 }
 0x8a6   :  { %v9234_v10 = vpop.f32.mrb[32].mxu1 }
 0x8a7   :  { %v9855_v53 = vadd.f32 %v9854_v50, %v9792_v56  ;;  %v11034_v27 = vadd.f32 %v9234_v10, %v14710_v44  ;;  %v9236_v38 = vpop.f32.mrb[33].mxu1 }
 0x8a8   :  { %v9237_v3 = vpop.f32.mrb[34].mxu1 }
 0x8a9   :  { %v9345_v39 = vmax.f32 %v11034_v27, 0.0  ;;  %v11035_v45 = vadd.f32 %v9237_v3, %v14712_v32  ;;  %v9239_v20 = vpop.f32.mrb[35].mxu1  ;;  %v9703_v56 = vpop.permute.xlu1 %9702 }
 0x8ab   :  { %v9793_v61 = vmul.f32 %v9668_v37, %v9345_v39  ;;  %v9346_v63 = vmax.f32 %v11035_v45, 0.0 }
 0x8ad   :  { %v9856_v5 = vadd.f32 %v9855_v53, %v9793_v61  ;;  %v9794_v29 = vmul.f32 %v9673_v59, %v9346_v63  ;;  %v9708_v61 = vpop.permute.xlu0 %9707  ;;  %v9713_v59 = vpop.permute.xlu1 %9712 }
 0x8ae   :  { %v9242_v28 = vpop.f32.mrb[36].mxu1 }
 0x8af   :  { %v9857_v34 = vadd.f32 %v9856_v5, %v9794_v29  ;;  %v11036_v4 = vadd.f32 %v9242_v28, %v14714_v12  ;;  %v9244_v24 = vpop.f32.mrb[37].mxu1 }
 0x8b0   :  { %v9245_v31 = vpop.f32.mrb[38].mxu1 }
 0x8b1   :  { %v9347_v9 = vmax.f32 %v11036_v4, 0.0  ;;  %v11037_v44 = vadd.f32 %v9245_v31, %v14716_v51  ;;  %v9247_v43 = vpop.f32.mrb[39].mxu1 }
 0x8b2   :  { %v9718_v43 = vpop.permute.xlu0 %9717 }
 0x8b3   :  { %v9795_v48 = vmul.f32 %v9678_v47, %v9347_v9  ;;  %v9348_v32 = vmax.f32 %v11037_v44, 0.0 }
 0x8b5   :  { %v9858_v22 = vadd.f32 %v9857_v34, %v9795_v48  ;;  %v9796_v30 = vmul.f32 %v9683_v55, %v9348_v32  ;;  %v9723_v48 = vpop.permute.xlu1 %9722 }
 0x8b6   :  { %v9250_v8 = vpop.f32.mrb[40].mxu1 }
 0x8b7   :  { %v9859_v13 = vadd.f32 %v9858_v22, %v9796_v30  ;;  %v11038_v23 = vadd.f32 %v9250_v8, %v14718_v17  ;;  %v9252_v26 = vpop.f32.mrb[41].mxu1 }
 0x8b8   :  { %v9253_v52 = vpop.f32.mrb[42].mxu1 }
 0x8b9   :  { %v9349_v57 = vmax.f32 %v11038_v23, 0.0  ;;  %v11039_v12 = vadd.f32 %v9253_v52, %v14720_v41  ;;  %v9255_v0 = vpop.f32.mrb[43].mxu1 }
 0x8ba   :  { %v9733_v0 = vpop.permute.xlu1 %9732 }
 0x8bb   :  { %v9797_v33 = vmul.f32 %v9688_v58, %v9349_v57  ;;  %v9350_v51 = vmax.f32 %v11039_v12, 0.0  ;;  %v9728_v57 = vpop.permute.xlu0 %9727 }
 0x8bd   :  { %v9860_v49 = vadd.f32 %v9859_v13, %v9797_v33  ;;  %v9798_v62 = vmul.f32 %v9693_v25, %v9350_v51 }
 0x8be   :  { %v9258_v60 = vpop.f32.mrb[44].mxu1 }
 0x8bf   :  { %v9861_v19 = vadd.f32 %v9860_v49, %v9798_v62  ;;  %v11040_v15 = vadd.f32 %v9258_v60, %v14722_v2  ;;  %v9260_v54 = vpop.f32.mrb[45].mxu1 }
 0x8c0   :  { %v9261_v42 = vpop.f32.mrb[46].mxu1  ;;  %v9738_v54 = vpop.permute.xlu0 %9737 }
 0x8c1   :  { %v9351_v18 = vmax.f32 %v11040_v15, 0.0  ;;  %v11041_v17 = vadd.f32 %v9261_v42, %v14724_v35  ;;  %v9263_v16 = vpop.f32.mrb[47].mxu1 }
 0x8c3   :  { %v9799_v50 = vmul.f32 %v9698_v7, %v9351_v18  ;;  %v9352_v41 = vmax.f32 %v11041_v17, 0.0  ;;  %v9743_v18 = vpop.permute.xlu1 %9742 }
 0x8c5   :  { %v9862_v10 = vadd.f32 %v9861_v19, %v9799_v50  ;;  %v9800_v53 = vmul.f32 %v9703_v56, %v9352_v41 }
 0x8c6   :  { %v9266_v27 = vpop.f32.mrb[48].mxu1 }
 0x8c7   :  { %v9863_v38 = vadd.f32 %v9862_v10, %v9800_v53  ;;  %v11042_v3 = vadd.f32 %v9266_v27, %v14726_v40  ;;  %v9268_v39 = vpop.f32.mrb[49].mxu1 }
 0x8c8   :  { %v9269_v45 = vpop.f32.mrb[50].mxu1 }
 0x8c9   :  { %v9353_v20 = vmax.f32 %v11042_v3, 0.0  ;;  %v11043_v2 = vadd.f32 %v9269_v45, %v14728_v46  ;;  %v9271_v37 = vpop.f32.mrb[51].mxu1 }
 0x8cb   :  { %v9801_v63 = vmul.f32 %v9708_v61, %v9353_v20  ;;  %v9354_v35 = vmax.f32 %v11043_v2, 0.0 }
 0x8cd   :  { %v9864_v5 = vadd.f32 %v9863_v38, %v9801_v63  ;;  %v9802_v29 = vmul.f32 %v9713_v59, %v9354_v35 }
 0x8ce   :  { %v9274_v28 = vpop.f32.mrb[52].mxu1 }
 0x8cf   :  { %v9865_v34 = vadd.f32 %v9864_v5, %v9802_v29  ;;  %v11044_v4 = vadd.f32 %v9274_v28, %v14730_v1  ;;  %v9276_v24 = vpop.f32.mrb[53].mxu1 }
 0x8d0   :  { %v9277_v31 = vpop.f32.mrb[54].mxu1 }
 0x8d1   :  { %v9355_v9 = vmax.f32 %v11044_v4, 0.0  ;;  %v11045_v40 = vadd.f32 %v9277_v31, %v14732_v6  ;;  %v9279_v44 = vpop.f32.mrb[55].mxu1 }
 0x8d3   :  { %v9803_v47 = vmul.f32 %v9718_v43, %v9355_v9  ;;  %v9356_v46 = vmax.f32 %v11045_v40, 0.0 }
 0x8d5   :  { %v9866_v32 = vadd.f32 %v9865_v34, %v9803_v47  ;;  %v9804_v55 = vmul.f32 %v9723_v48, %v9356_v46 }
 0x8d6   :  { %v9282_v22 = vpop.f32.mrb[56].mxu1 }
 0x8d7   :  { %v9867_v30 = vadd.f32 %v9866_v32, %v9804_v55  ;;  %v11046_v8 = vadd.f32 %v9282_v22, %v14734_v14  ;;  %v9284_v13 = vpop.f32.mrb[57].mxu1 }
 0x8d8   :  { %v9285_v23 = vpop.f32.mrb[58].mxu1 }
 0x8d9   :  { %v9357_v26 = vmax.f32 %v11046_v8, 0.0  ;;  %v11047_v1 = vadd.f32 %v9285_v23, %v14736_v11  ;;  %v9287_v52 = vpop.f32.mrb[59].mxu1 }
 0x8db   :  { %v9805_v12 = vmul.f32 %v9728_v57, %v9357_v26  ;;  %v9358_v6 = vmax.f32 %v11047_v1, 0.0 }
 0x8dd   :  { %v9868_v58 = vadd.f32 %v9867_v30, %v9805_v12  ;;  %v9806_v33 = vmul.f32 %v9733_v0, %v9358_v6 }
 0x8de   :  { %v9290_v51 = vpop.f32.mrb[60].mxu1 }
 0x8df   :  { %v9869_v25 = vadd.f32 %v9868_v58, %v9806_v33  ;;  %v11048_v49 = vadd.f32 %v9290_v51, %v14738_v36  ;;  %v9292_v62 = vpop.f32.mrb[61].mxu1  ;;  %v9879_v36 = vstv %s14827_s6 }
 0x8e0   :  { %v9293_v60 = vpop.f32.mrb[62].mxu1 }
 0x8e1   :  { %v9359_v19 = vmax.f32 %v11048_v49, 0.0  ;;  %v11049_v14 = vadd.f32 %v9293_v60, %v14740_v21  ;;  %v9295_v15 = vpop.f32.mrb[63].mxu1 }
 0x8e3   :  { %v9807_v42 = vmul.f32 %v9738_v54, %v9359_v19  ;;  %v9360_v11 = vmax.f32 %v11049_v14, 0.0 }
 0x8e5   :  { %v9870_v17 = vadd.f32 %v9869_v25, %v9807_v42  ;;  %v9808_v16 = vmul.f32 %v9743_v18, %v9360_v11 }
 0x8e7   :  { %v9871_v7 = vadd.f32 %v9870_v17, %v9808_v16 }
 0x8e9   :  { %v9872_v50 = vrot.slane %v9871_v7, 4 }
 0x8eb   :  { %v9873_v41 = vadd.f32 %v9872_v50, %v9871_v7 }
 0x8ed   :  { %v9874_v56 = vrot.slane %v9873_v41, 2 }
 0x8ef   :  { %v9875_v10 = vadd.f32 %v9874_v56, %v9873_v41 }
 0x8f1   :  { %v9876_v53 = vrot.slane %v9875_v10, 1 }
 0x8f3   :  { %v9877_v21 = vadd.f32 %v9876_v53, %v9875_v10 }
 0x8f5   :  { %v9880_v27 = vadd.f32 %v9879_v36, %v9877_v21 }
 0x8f7   :  { %9881 = vst [vmem:[#allocation9] sm:$0x1] %v9880_v27 }
 0x8f8   :  { %13180 = shalt.err (!%p13177_p0)
}
 0x8f9   :  { %s13181_s28 = scalar_lea.hbm %s14828_s7, 16 }
 0x8fa   :  { %p13182_p1 = scmp.ne.s32.totalorder %s14828_s7, %s13181_s28  ;;  %p13185_p2 = scmp.lt.u32.totalorder %s13181_s28, %s14828_s7 }
 0x8fc   :  { %p13187_p3 = pnand %p13185_p2, %p13182_p1 }
 0x8fe   :  { %13190 = shalt.err (!%p13187_p3)
}
 0x8ff   :  { %9891 = dma.vmem_to_hbm [thread:$0]  %s9889_s24, 16, %s14828_s7, [#allocation5]  }
 0x900   :  { %13195 = dma.done.wait [#allocation5], 16  }
 0x901   :  { %13196 = vsyncadd [#allocation5], 4294967280 }
 0x902   :  { %9895 = vsyncpa [#allocation4], 1 }
 0x903   :  { %9896 = vsyncpa [#allocation7], 1 }
 0x904   :  { %9897 = vsyncpa [#allocation5], 1 }

</bundles_post_ra>
